<compile_context>
chip_gen: v5e
topology: v5e:2x2
jax: 0.10.0
libtpu: 0.0.40
codegen_flags: <defaults>
</compile_context>

<pallas_src>
import numpy as np
import jax
import jax.numpy as jnp
from jax.experimental import pallas as pl
from jax.experimental.pallas import tpu as pltpu


_NUM_LAYERS = 10          # 5 encoder + 5 decoder Linear layers
_TINY = (4, 5)            # layers touching emb_dim: stored & computed in f32
_MANUAL = (7, 8, 9)       # big decoder weights: manual DMA overlapped with encoder
# ReLU after every layer except the encoder bottleneck (4) and final decoder (9).
_RELU = tuple(i not in (4, 9) for i in range(_NUM_LAYERS))


# ----------------------------------------------------------------------------
# Fused kernel
# ----------------------------------------------------------------------------
def _autoencoder_kernel(*refs):
    # refs = (x, w0..w9, vec_slab, out, enc, manual_buf0..2, dma_sem)
    x_ref = refs[0]
    w_refs = refs[1:1 + _NUM_LAYERS]
    vec_ref = refs[1 + _NUM_LAYERS]
    out_ref = refs[2 + _NUM_LAYERS]
    enc_ref = refs[3 + _NUM_LAYERS]
    n_manual = len(_MANUAL)
    manual_bufs = refs[4 + _NUM_LAYERS: 4 + _NUM_LAYERS + n_manual]
    dma_sem = refs[4 + _NUM_LAYERS + n_manual]

    # Kick off HBM->VMEM copies of the big decoder weights; they complete while
    # the encoder runs (all auto-DMA'd inputs are already resident in VMEM).
    copies = {}
    for s, li in enumerate(_MANUAL):
        cp = pltpu.make_async_copy(w_refs[li], manual_bufs[s], dma_sem.at[s])
        cp.start()
        copies[li] = (cp, manual_bufs[s])

    h = x_ref[...].astype(jnp.float32)

    for i in range(_NUM_LAYERS):
        if i in copies:
            cp, w_src = copies[i]
            cp.wait()                               # only blocks if DMA not done yet
        else:
            w_src = w_refs[i]

        n = w_src.shape[1]
        bias = vec_ref[i:i + 1, :n]                 # (1, n) f32, static slab slice

        if i in _TINY:
            # Tiny emb_dim layer: f32 weights, f32 matmul (negligible work).
            y = jnp.dot(h, w_src[...], preferred_element_type=jnp.float32) + bias
        else:
            # int8 storage -> bf16 operand; f32 accumulate; per-channel scale after.
            scale = vec_ref[_NUM_LAYERS + i:_NUM_LAYERS + i + 1, :n]   # (1, n) f32
            w_bf16 = w_src[...].astype(jnp.float32).astype(jnp.bfloat16)
            y = jnp.dot(h.astype(jnp.bfloat16), w_bf16,
                        preferred_element_type=jnp.float32)
            y = y * scale + bias

        if _RELU[i]:
            y = jnp.maximum(y, 0.0)
        h = y

        if i == 4:                                  # encoder bottleneck output
            enc_ref[...] = h.astype(enc_ref.dtype)

    out_ref[...] = h.astype(out_ref.dtype)


# ----------------------------------------------------------------------------
# Wrapper
# ----------------------------------------------------------------------------
def autoencoder_fc_forward(packed, x):
    """packed: dict from pack_params(); x: (B, dim_code) f32 -> (out, out_enc)."""
    weights = packed["weights"]        # 10 arrays: int8 (big) / f32 (tiny), (in, out)
    vec_slab = packed["vec_slab"]      # (2*10, VEC_W) f32: rows 0-9 biases, 10-19 scales
    B, dim_code = x.shape
    emb_dim = weights[4].shape[1]

    vmem = pl.BlockSpec(memory_space=pltpu.MemorySpace.VMEM)
    anym = pl.BlockSpec(memory_space=pl.ANY)
    in_specs = [vmem]                                             # x
    in_specs += [anym if i in _MANUAL else vmem for i in range(_NUM_LAYERS)]
    in_specs += [vmem]                                            # vec slab

    scratch_shapes = [pltpu.VMEM(tuple(weights[i].shape), weights[i].dtype)
                      for i in _MANUAL]
    scratch_shapes.append(pltpu.SemaphoreType.DMA((len(_MANUAL),)))

    flops = int(2 * B * sum(int(w.shape[0]) * int(w.shape[1]) for w in weights))
    bytes_accessed = int(
        x.size * x.dtype.itemsize
        + sum(int(w.size) * w.dtype.itemsize for w in weights)
        + vec_slab.size * vec_slab.dtype.itemsize
        + B * dim_code * 4 + B * emb_dim * 4)

    out, out_enc = pl.pallas_call(
        _autoencoder_kernel,
        out_shape=(
            jax.ShapeDtypeStruct((B, dim_code), jnp.float32),
            jax.ShapeDtypeStruct((B, emb_dim), jnp.float32),
        ),
        in_specs=in_specs,
        out_specs=(vmem, vmem),
        scratch_shapes=scratch_shapes,
        cost_estimate=pl.CostEstimate(flops=flops, transcendentals=0,
                                      bytes_accessed=bytes_accessed),
    )(x, *weights, vec_slab)
    return out, out_enc


# ----------------------------------------------------------------------------
# Parameter initialization (PyTorch nn.Linear-style uniform, f32 master copy)
# ----------------------------------------------------------------------------
def init_params_f32(key, dim_code, emb_dim=2):
    dims = [(dim_code, 1024), (1024, 512), (512, 256), (256, 64), (64, emb_dim),
            (emb_dim, 64), (64, 256), (256, 512), (512, 1024), (1024, dim_code)]
    keys = jax.random.split(key, len(dims))
    params = []
    for k, (fi, fo) in zip(keys, dims):
        kw, kb = jax.random.split(k)
        bound = 1.0 / (fi ** 0.5)
        w = jax.random.uniform(kw, (fi, fo), jnp.float32, -bound, bound)
        b = jax.random.uniform(kb, (fo,), jnp.float32, -bound, bound)
        params.append((w, b))
    return params


def pack_params(params_f32):
    """One-time pack: int8 per-output-channel weights for the big layers, f32 for
    the tiny emb_dim layers, and ONE f32 slab holding every bias + dequant scale."""
    weights, biases, scales = [], [], []
    for i, (w, b) in enumerate(params_f32):
        if i in _TINY:
            weights.append(w)                                         # f32
            scales.append(jnp.ones((w.shape[1],), jnp.float32))       # unused
        else:
            absmax = jnp.max(jnp.abs(w), axis=0)
            scale = jnp.maximum(absmax, 1e-8) / 127.0
            q = jnp.clip(jnp.round(w / scale), -127.0, 127.0).astype(jnp.int8)
            weights.append(q)
            scales.append(scale)
        biases.append(b)

    max_n = max(w.shape[1] for w, _ in params_f32)
    vec_w = ((max_n + 127) // 128) * 128
    slab = np.zeros((2 * _NUM_LAYERS, vec_w), np.float32)
    for i in range(_NUM_LAYERS):
        slab[i, :biases[i].shape[0]] = np.asarray(biases[i])
        slab[_NUM_LAYERS + i, :scales[i].shape[0]] = np.asarray(scales[i])
    return {"weights": weights, "vec_slab": jnp.asarray(slab)}


# ----------------------------------------------------------------------------
# References: (a) identical quantized numerics, (b) true f32 module semantics
# ----------------------------------------------------------------------------
def reference_forward_quantized(packed, x):
    weights, slab = packed["weights"], packed["vec_slab"]
    h = x.astype(jnp.float32)
    out_enc = None
    for i in range(_NUM_LAYERS):
        w = weights[i]
        n = w.shape[1]
        b = slab[i, :n]
        if i in _TINY:
            y = jnp.dot(h, w, preferred_element_type=jnp.float32) + b
        else:
            s = slab[_NUM_LAYERS + i, :n]
            wq = w.astype(jnp.float32).astype(jnp.bfloat16)
            y = jnp.dot(h.astype(jnp.bfloat16), wq,
                        preferred_element_type=jnp.float32) * s + b
        if _RELU[i]:
            y = jnp.maximum(y, 0.0)
        if i == 4:
            out_enc = y
        h = y
    return h, out_enc


def reference_forward_f32(params_f32, x):
    h = x.astype(jnp.float32)
    out_enc = None
    for i, (w, b) in enumerate(params_f32):
        y = jnp.dot(h, w, preferred_element_type=jnp.float32) + b
        if _RELU[i]:
            y = jnp.maximum(y, 0.0)
        if i == 4:
            out_enc = y
        h = y
    return h, out_enc


if __name__ == "__main__":
    dim_code, emb_dim, batch = 128, 2, 8

    key = jax.random.PRNGKey(0)
    kp, kx = jax.random.split(key)
    params_f32 = init_params_f32(kp, dim_code, emb_dim)
    packed = pack_params(params_f32)
    x = jax.random.normal(kx, (batch, dim_code), jnp.float32)

    out, out_enc = autoencoder_fc_forward(packed, x)
    out = jax.block_until_ready(out)
    out_enc = jax.block_until_ready(out_enc)
    assert out.shape == (batch, dim_code) and out_enc.shape == (batch, emb_dim)

    # (a) Kernel vs. pure-JAX reference with IDENTICAL int8/bf16 numerics.
    qr_out, qr_enc = reference_forward_quantized(packed, x)
    assert jnp.allclose(out, qr_out, atol=1e-2, rtol=1e-2)
    assert jnp.allclose(out_enc, qr_enc, atol=1e-2, rtol=1e-2)

    # (b) Fidelity vs. the true f32 AutoencoderFC semantics (quantization error
    #     budget; expected max-abs error ~1e-3 for this init/scale).
    fr_out, fr_enc = reference_forward_f32(params_f32, x)
    assert float(jnp.max(jnp.abs(out - fr_out))) < 2e-2
    assert float(jnp.max(jnp.abs(out_enc - fr_enc))) < 2e-2

    print("KERNEL_OK")
</pallas_src>

<mosaic_0001>
module attributes {stable_mosaic.version = 11 : i64} {
  func.func @_autoencoder_kernel(%arg0: memref<8x128xf32, #tpu.memory_space<vmem>>, %arg1: memref<128x1024xi8, #tpu.memory_space<vmem>>, %arg2: memref<1024x512xi8, #tpu.memory_space<vmem>>, %arg3: memref<512x256xi8, #tpu.memory_space<vmem>>, %arg4: memref<256x64xi8, #tpu.memory_space<vmem>>, %arg5: memref<64x2xf32, #tpu.memory_space<vmem>>, %arg6: memref<2x64xf32, #tpu.memory_space<vmem>>, %arg7: memref<64x256xi8, #tpu.memory_space<vmem>>, %arg8: memref<256x512xi8, #tpu.memory_space<any>>, %arg9: memref<512x1024xi8, #tpu.memory_space<any>>, %arg10: memref<1024x128xi8, #tpu.memory_space<any>>, %arg11: memref<20x1024xf32, #tpu.memory_space<vmem>>, %arg12: memref<8x128xf32, #tpu.memory_space<vmem>>, %arg13: memref<8x2xf32, #tpu.memory_space<vmem>>, %arg14: memref<256x512xi8, #tpu.memory_space<vmem>>, %arg15: memref<512x1024xi8, #tpu.memory_space<vmem>>, %arg16: memref<1024x128xi8, #tpu.memory_space<vmem>>, %arg17: memref<3x!tpu.dma_semaphore, #tpu.memory_space<semaphore_mem>>) attributes {dimension_semantics = [], scalar_prefetch = 0 : i64, scratch_operands = 4 : i64, tpu.core_type = #tpu.core_type<tc>} {
    %c0_i32 = arith.constant 0 : i32
    %0 = tpu.memref_slice %arg17[%c0_i32] : memref<3x!tpu.dma_semaphore, #tpu.memory_space<semaphore_mem>> -> memref<1x!tpu.dma_semaphore, #tpu.memory_space<semaphore_mem>>
    %1 = tpu.memref_squeeze %0 : memref<1x!tpu.dma_semaphore, #tpu.memory_space<semaphore_mem>> -> memref<!tpu.dma_semaphore, #tpu.memory_space<semaphore_mem>>
    tpu.enqueue_dma source(%arg8 : memref<256x512xi8, #tpu.memory_space<any>>) target(%arg14 : memref<256x512xi8, #tpu.memory_space<vmem>>) target_semaphore(%1 : memref<!tpu.dma_semaphore, #tpu.memory_space<semaphore_mem>>)
    %c1_i32 = arith.constant 1 : i32
    %2 = tpu.memref_slice %arg17[%c1_i32] : memref<3x!tpu.dma_semaphore, #tpu.memory_space<semaphore_mem>> -> memref<1x!tpu.dma_semaphore, #tpu.memory_space<semaphore_mem>>
    %3 = tpu.memref_squeeze %2 : memref<1x!tpu.dma_semaphore, #tpu.memory_space<semaphore_mem>> -> memref<!tpu.dma_semaphore, #tpu.memory_space<semaphore_mem>>
    tpu.enqueue_dma source(%arg9 : memref<512x1024xi8, #tpu.memory_space<any>>) target(%arg15 : memref<512x1024xi8, #tpu.memory_space<vmem>>) target_semaphore(%3 : memref<!tpu.dma_semaphore, #tpu.memory_space<semaphore_mem>>)
    %c2_i32 = arith.constant 2 : i32
    %4 = tpu.memref_slice %arg17[%c2_i32] : memref<3x!tpu.dma_semaphore, #tpu.memory_space<semaphore_mem>> -> memref<1x!tpu.dma_semaphore, #tpu.memory_space<semaphore_mem>>
    %5 = tpu.memref_squeeze %4 : memref<1x!tpu.dma_semaphore, #tpu.memory_space<semaphore_mem>> -> memref<!tpu.dma_semaphore, #tpu.memory_space<semaphore_mem>>
    tpu.enqueue_dma source(%arg10 : memref<1024x128xi8, #tpu.memory_space<any>>) target(%arg16 : memref<1024x128xi8, #tpu.memory_space<vmem>>) target_semaphore(%5 : memref<!tpu.dma_semaphore, #tpu.memory_space<semaphore_mem>>)
    %c0 = arith.constant 0 : index
    %c0_0 = arith.constant 0 : index
    %6 = vector.load %arg0[%c0, %c0_0] : memref<8x128xf32, #tpu.memory_space<vmem>>, vector<8x128xf32>
    %c0_1 = arith.constant 0 : index
    %c0_2 = arith.constant 0 : index
    %7 = vector.load %arg11[%c0_1, %c0_2] : memref<20x1024xf32, #tpu.memory_space<vmem>>, vector<1x1024xf32>
    %c10 = arith.constant 10 : index
    %c0_3 = arith.constant 0 : index
    %8 = vector.load %arg11[%c10, %c0_3] : memref<20x1024xf32, #tpu.memory_space<vmem>>, vector<1x1024xf32>
    %c0_4 = arith.constant 0 : index
    %c0_5 = arith.constant 0 : index
    %9 = vector.load %arg1[%c0_4, %c0_5] : memref<128x1024xi8, #tpu.memory_space<vmem>>, vector<128x1024xi8>
    %10 = arith.sitofp %9 : vector<128x1024xi8> to vector<128x1024xf32>
    %11 = arith.truncf %10 : vector<128x1024xf32> to vector<128x1024xbf16>
    %12 = arith.truncf %6 : vector<8x128xf32> to vector<8x128xbf16>
    %cst = arith.constant dense<0.000000e+00> : vector<8x1024xf32>
    %13 = tpu.matmul %12, %11, %cst {dimension_numbers = #tpu.dot_dimension_numbers<[1], [0], [0], [1], [0, 0, 1, 1], [], []>} : vector<8x128xbf16>, vector<128x1024xbf16>, vector<8x1024xf32> -> vector<8x1024xf32>
    %14 = vector.broadcast %8 : vector<1x1024xf32> to vector<8x1024xf32>
    %15 = arith.mulf %13, %14 : vector<8x1024xf32>
    %16 = vector.broadcast %7 : vector<1x1024xf32> to vector<8x1024xf32>
    %17 = arith.addf %15, %16 : vector<8x1024xf32>
    %cst_6 = arith.constant 0.000000e+00 : f32
    %18 = vector.broadcast %cst_6 : f32 to vector<8x1024xf32>
    %19 = arith.maximumf %17, %18 : vector<8x1024xf32>
    %c1 = arith.constant 1 : index
    %c0_7 = arith.constant 0 : index
    %20 = vector.load %arg11[%c1, %c0_7] : memref<20x1024xf32, #tpu.memory_space<vmem>>, vector<1x512xf32>
    %c11 = arith.constant 11 : index
    %c0_8 = arith.constant 0 : index
    %21 = vector.load %arg11[%c11, %c0_8] : memref<20x1024xf32, #tpu.memory_space<vmem>>, vector<1x512xf32>
    %c0_9 = arith.constant 0 : index
    %c0_10 = arith.constant 0 : index
    %22 = vector.load %arg2[%c0_9, %c0_10] : memref<1024x512xi8, #tpu.memory_space<vmem>>, vector<1024x512xi8>
    %23 = arith.sitofp %22 : vector<1024x512xi8> to vector<1024x512xf32>
    %24 = arith.truncf %23 : vector<1024x512xf32> to vector<1024x512xbf16>
    %25 = arith.truncf %19 : vector<8x1024xf32> to vector<8x1024xbf16>
    %cst_11 = arith.constant dense<0.000000e+00> : vector<8x512xf32>
    %26 = tpu.matmul %25, %24, %cst_11 {dimension_numbers = #tpu.dot_dimension_numbers<[1], [0], [0], [1], [0, 0, 1, 1], [], []>} : vector<8x1024xbf16>, vector<1024x512xbf16>, vector<8x512xf32> -> vector<8x512xf32>
    %27 = vector.broadcast %21 : vector<1x512xf32> to vector<8x512xf32>
    %28 = arith.mulf %26, %27 : vector<8x512xf32>
    %29 = vector.broadcast %20 : vector<1x512xf32> to vector<8x512xf32>
    %30 = arith.addf %28, %29 : vector<8x512xf32>
    %cst_12 = arith.constant 0.000000e+00 : f32
    %31 = vector.broadcast %cst_12 : f32 to vector<8x512xf32>
    %32 = arith.maximumf %30, %31 : vector<8x512xf32>
    %c2 = arith.constant 2 : index
    %c0_13 = arith.constant 0 : index
    %33 = vector.load %arg11[%c2, %c0_13] : memref<20x1024xf32, #tpu.memory_space<vmem>>, vector<1x256xf32>
    %c12 = arith.constant 12 : index
    %c0_14 = arith.constant 0 : index
    %34 = vector.load %arg11[%c12, %c0_14] : memref<20x1024xf32, #tpu.memory_space<vmem>>, vector<1x256xf32>
    %c0_15 = arith.constant 0 : index
    %c0_16 = arith.constant 0 : index
    %35 = vector.load %arg3[%c0_15, %c0_16] : memref<512x256xi8, #tpu.memory_space<vmem>>, vector<512x256xi8>
    %36 = arith.sitofp %35 : vector<512x256xi8> to vector<512x256xf32>
    %37 = arith.truncf %36 : vector<512x256xf32> to vector<512x256xbf16>
    %38 = arith.truncf %32 : vector<8x512xf32> to vector<8x512xbf16>
    %cst_17 = arith.constant dense<0.000000e+00> : vector<8x256xf32>
    %39 = tpu.matmul %38, %37, %cst_17 {dimension_numbers = #tpu.dot_dimension_numbers<[1], [0], [0], [1], [0, 0, 1, 1], [], []>} : vector<8x512xbf16>, vector<512x256xbf16>, vector<8x256xf32> -> vector<8x256xf32>
    %40 = vector.broadcast %34 : vector<1x256xf32> to vector<8x256xf32>
    %41 = arith.mulf %39, %40 : vector<8x256xf32>
    %42 = vector.broadcast %33 : vector<1x256xf32> to vector<8x256xf32>
    %43 = arith.addf %41, %42 : vector<8x256xf32>
    %cst_18 = arith.constant 0.000000e+00 : f32
    %44 = vector.broadcast %cst_18 : f32 to vector<8x256xf32>
    %45 = arith.maximumf %43, %44 : vector<8x256xf32>
    %c3 = arith.constant 3 : index
    %c0_19 = arith.constant 0 : index
    %46 = vector.load %arg11[%c3, %c0_19] : memref<20x1024xf32, #tpu.memory_space<vmem>>, vector<1x64xf32>
    %c13 = arith.constant 13 : index
    %c0_20 = arith.constant 0 : index
    %47 = vector.load %arg11[%c13, %c0_20] : memref<20x1024xf32, #tpu.memory_space<vmem>>, vector<1x64xf32>
    %c0_21 = arith.constant 0 : index
    %c0_22 = arith.constant 0 : index
    %48 = vector.load %arg4[%c0_21, %c0_22] : memref<256x64xi8, #tpu.memory_space<vmem>>, vector<256x64xi8>
    %49 = arith.sitofp %48 : vector<256x64xi8> to vector<256x64xf32>
    %50 = arith.truncf %49 : vector<256x64xf32> to vector<256x64xbf16>
    %51 = arith.truncf %45 : vector<8x256xf32> to vector<8x256xbf16>
    %cst_23 = arith.constant dense<0.000000e+00> : vector<8x64xf32>
    %52 = tpu.matmul %51, %50, %cst_23 {dimension_numbers = #tpu.dot_dimension_numbers<[1], [0], [0], [1], [0, 0, 1, 1], [], []>} : vector<8x256xbf16>, vector<256x64xbf16>, vector<8x64xf32> -> vector<8x64xf32>
    %53 = vector.broadcast %47 : vector<1x64xf32> to vector<8x64xf32>
    %54 = arith.mulf %52, %53 : vector<8x64xf32>
    %55 = vector.broadcast %46 : vector<1x64xf32> to vector<8x64xf32>
    %56 = arith.addf %54, %55 : vector<8x64xf32>
    %cst_24 = arith.constant 0.000000e+00 : f32
    %57 = vector.broadcast %cst_24 : f32 to vector<8x64xf32>
    %58 = arith.maximumf %56, %57 : vector<8x64xf32>
    %c4 = arith.constant 4 : index
    %c0_25 = arith.constant 0 : index
    %59 = vector.load %arg11[%c4, %c0_25] : memref<20x1024xf32, #tpu.memory_space<vmem>>, vector<1x2xf32>
    %c0_26 = arith.constant 0 : index
    %c0_27 = arith.constant 0 : index
    %60 = vector.load %arg5[%c0_26, %c0_27] : memref<64x2xf32, #tpu.memory_space<vmem>>, vector<64x2xf32>
    %cst_28 = arith.constant dense<0.000000e+00> : vector<8x2xf32>
    %61 = tpu.matmul %58, %60, %cst_28 {dimension_numbers = #tpu.dot_dimension_numbers<[1], [0], [0], [1], [0, 0, 1, 1], [], []>} : vector<8x64xf32>, vector<64x2xf32>, vector<8x2xf32> -> vector<8x2xf32>
    %62 = vector.broadcast %59 : vector<1x2xf32> to vector<8x2xf32>
    %63 = arith.addf %61, %62 : vector<8x2xf32>
    %c0_29 = arith.constant 0 : index
    %c0_30 = arith.constant 0 : index
    %64 = vector.load %arg13[%c0_29, %c0_30] : memref<8x2xf32, #tpu.memory_space<vmem>>, vector<8x2xf32>
    tpu.vector_store %arg13[%c0_29, %c0_30], %63 {strides = array<i32>} : memref<8x2xf32, #tpu.memory_space<vmem>>, vector<8x2xf32>,
    %c5 = arith.constant 5 : index
    %c0_31 = arith.constant 0 : index
    %65 = vector.load %arg11[%c5, %c0_31] : memref<20x1024xf32, #tpu.memory_space<vmem>>, vector<1x64xf32>
    %c0_32 = arith.constant 0 : index
    %c0_33 = arith.constant 0 : index
    %66 = vector.load %arg6[%c0_32, %c0_33] : memref<2x64xf32, #tpu.memory_space<vmem>>, vector<2x64xf32>
    %cst_34 = arith.constant dense<0.000000e+00> : vector<8x64xf32>
    %67 = tpu.matmul %63, %66, %cst_34 {dimension_numbers = #tpu.dot_dimension_numbers<[1], [0], [0], [1], [0, 0, 1, 1], [], []>} : vector<8x2xf32>, vector<2x64xf32>, vector<8x64xf32> -> vector<8x64xf32>
    %68 = vector.broadcast %65 : vector<1x64xf32> to vector<8x64xf32>
    %69 = arith.addf %67, %68 : vector<8x64xf32>
    %cst_35 = arith.constant 0.000000e+00 : f32
    %70 = vector.broadcast %cst_35 : f32 to vector<8x64xf32>
    %71 = arith.maximumf %69, %70 : vector<8x64xf32>
    %c6 = arith.constant 6 : index
    %c0_36 = arith.constant 0 : index
    %72 = vector.load %arg11[%c6, %c0_36] : memref<20x1024xf32, #tpu.memory_space<vmem>>, vector<1x256xf32>
    %c16 = arith.constant 16 : index
    %c0_37 = arith.constant 0 : index
    %73 = vector.load %arg11[%c16, %c0_37] : memref<20x1024xf32, #tpu.memory_space<vmem>>, vector<1x256xf32>
    %c0_38 = arith.constant 0 : index
    %c0_39 = arith.constant 0 : index
    %74 = vector.load %arg7[%c0_38, %c0_39] : memref<64x256xi8, #tpu.memory_space<vmem>>, vector<64x256xi8>
    %75 = arith.sitofp %74 : vector<64x256xi8> to vector<64x256xf32>
    %76 = arith.truncf %75 : vector<64x256xf32> to vector<64x256xbf16>
    %77 = arith.truncf %71 : vector<8x64xf32> to vector<8x64xbf16>
    %cst_40 = arith.constant dense<0.000000e+00> : vector<8x256xf32>
    %78 = tpu.matmul %77, %76, %cst_40 {dimension_numbers = #tpu.dot_dimension_numbers<[1], [0], [0], [1], [0, 0, 1, 1], [], []>} : vector<8x64xbf16>, vector<64x256xbf16>, vector<8x256xf32> -> vector<8x256xf32>
    %79 = vector.broadcast %73 : vector<1x256xf32> to vector<8x256xf32>
    %80 = arith.mulf %78, %79 : vector<8x256xf32>
    %81 = vector.broadcast %72 : vector<1x256xf32> to vector<8x256xf32>
    %82 = arith.addf %80, %81 : vector<8x256xf32>
    %cst_41 = arith.constant 0.000000e+00 : f32
    %83 = vector.broadcast %cst_41 : f32 to vector<8x256xf32>
    %84 = arith.maximumf %82, %83 : vector<8x256xf32>
    %c0_i32_42 = arith.constant 0 : i32
    %85 = tpu.memref_slice %arg17[%c0_i32_42] : memref<3x!tpu.dma_semaphore, #tpu.memory_space<semaphore_mem>> -> memref<1x!tpu.dma_semaphore, #tpu.memory_space<semaphore_mem>>
    %86 = tpu.memref_squeeze %85 : memref<1x!tpu.dma_semaphore, #tpu.memory_space<semaphore_mem>> -> memref<!tpu.dma_semaphore, #tpu.memory_space<semaphore_mem>>
    tpu.wait_dma2 semaphore(%86 : memref<!tpu.dma_semaphore, #tpu.memory_space<semaphore_mem>>) src(%arg8 : memref<256x512xi8, #tpu.memory_space<any>>) dst(%arg14 : memref<256x512xi8, #tpu.memory_space<vmem>>)
    %c7 = arith.constant 7 : index
    %c0_43 = arith.constant 0 : index
    %87 = vector.load %arg11[%c7, %c0_43] : memref<20x1024xf32, #tpu.memory_space<vmem>>, vector<1x512xf32>
    %c17 = arith.constant 17 : index
    %c0_44 = arith.constant 0 : index
    %88 = vector.load %arg11[%c17, %c0_44] : memref<20x1024xf32, #tpu.memory_space<vmem>>, vector<1x512xf32>
    %c0_45 = arith.constant 0 : index
    %c0_46 = arith.constant 0 : index
    %89 = vector.load %arg14[%c0_45, %c0_46] : memref<256x512xi8, #tpu.memory_space<vmem>>, vector<256x512xi8>
    %90 = arith.sitofp %89 : vector<256x512xi8> to vector<256x512xf32>
    %91 = arith.truncf %90 : vector<256x512xf32> to vector<256x512xbf16>
    %92 = arith.truncf %84 : vector<8x256xf32> to vector<8x256xbf16>
    %cst_47 = arith.constant dense<0.000000e+00> : vector<8x512xf32>
    %93 = tpu.matmul %92, %91, %cst_47 {dimension_numbers = #tpu.dot_dimension_numbers<[1], [0], [0], [1], [0, 0, 1, 1], [], []>} : vector<8x256xbf16>, vector<256x512xbf16>, vector<8x512xf32> -> vector<8x512xf32>
    %94 = vector.broadcast %88 : vector<1x512xf32> to vector<8x512xf32>
    %95 = arith.mulf %93, %94 : vector<8x512xf32>
    %96 = vector.broadcast %87 : vector<1x512xf32> to vector<8x512xf32>
    %97 = arith.addf %95, %96 : vector<8x512xf32>
    %cst_48 = arith.constant 0.000000e+00 : f32
    %98 = vector.broadcast %cst_48 : f32 to vector<8x512xf32>
    %99 = arith.maximumf %97, %98 : vector<8x512xf32>
    %c1_i32_49 = arith.constant 1 : i32
    %100 = tpu.memref_slice %arg17[%c1_i32_49] : memref<3x!tpu.dma_semaphore, #tpu.memory_space<semaphore_mem>> -> memref<1x!tpu.dma_semaphore, #tpu.memory_space<semaphore_mem>>
    %101 = tpu.memref_squeeze %100 : memref<1x!tpu.dma_semaphore, #tpu.memory_space<semaphore_mem>> -> memref<!tpu.dma_semaphore, #tpu.memory_space<semaphore_mem>>
    tpu.wait_dma2 semaphore(%101 : memref<!tpu.dma_semaphore, #tpu.memory_space<semaphore_mem>>) src(%arg9 : memref<512x1024xi8, #tpu.memory_space<any>>) dst(%arg15 : memref<512x1024xi8, #tpu.memory_space<vmem>>)
    %c8 = arith.constant 8 : index
    %c0_50 = arith.constant 0 : index
    %102 = vector.load %arg11[%c8, %c0_50] : memref<20x1024xf32, #tpu.memory_space<vmem>>, vector<1x1024xf32>
    %c18 = arith.constant 18 : index
    %c0_51 = arith.constant 0 : index
    %103 = vector.load %arg11[%c18, %c0_51] : memref<20x1024xf32, #tpu.memory_space<vmem>>, vector<1x1024xf32>
    %c0_52 = arith.constant 0 : index
    %c0_53 = arith.constant 0 : index
    %104 = vector.load %arg15[%c0_52, %c0_53] : memref<512x1024xi8, #tpu.memory_space<vmem>>, vector<512x1024xi8>
    %105 = arith.sitofp %104 : vector<512x1024xi8> to vector<512x1024xf32>
    %106 = arith.truncf %105 : vector<512x1024xf32> to vector<512x1024xbf16>
    %107 = arith.truncf %99 : vector<8x512xf32> to vector<8x512xbf16>
    %cst_54 = arith.constant dense<0.000000e+00> : vector<8x1024xf32>
    %108 = tpu.matmul %107, %106, %cst_54 {dimension_numbers = #tpu.dot_dimension_numbers<[1], [0], [0], [1], [0, 0, 1, 1], [], []>} : vector<8x512xbf16>, vector<512x1024xbf16>, vector<8x1024xf32> -> vector<8x1024xf32>
    %109 = vector.broadcast %103 : vector<1x1024xf32> to vector<8x1024xf32>
    %110 = arith.mulf %108, %109 : vector<8x1024xf32>
    %111 = vector.broadcast %102 : vector<1x1024xf32> to vector<8x1024xf32>
    %112 = arith.addf %110, %111 : vector<8x1024xf32>
    %cst_55 = arith.constant 0.000000e+00 : f32
    %113 = vector.broadcast %cst_55 : f32 to vector<8x1024xf32>
    %114 = arith.maximumf %112, %113 : vector<8x1024xf32>
    %c2_i32_56 = arith.constant 2 : i32
    %115 = tpu.memref_slice %arg17[%c2_i32_56] : memref<3x!tpu.dma_semaphore, #tpu.memory_space<semaphore_mem>> -> memref<1x!tpu.dma_semaphore, #tpu.memory_space<semaphore_mem>>
    %116 = tpu.memref_squeeze %115 : memref<1x!tpu.dma_semaphore, #tpu.memory_space<semaphore_mem>> -> memref<!tpu.dma_semaphore, #tpu.memory_space<semaphore_mem>>
    tpu.wait_dma2 semaphore(%116 : memref<!tpu.dma_semaphore, #tpu.memory_space<semaphore_mem>>) src(%arg10 : memref<1024x128xi8, #tpu.memory_space<any>>) dst(%arg16 : memref<1024x128xi8, #tpu.memory_space<vmem>>)
    %c9 = arith.constant 9 : index
    %c0_57 = arith.constant 0 : index
    %117 = vector.load %arg11[%c9, %c0_57] : memref<20x1024xf32, #tpu.memory_space<vmem>>, vector<1x128xf32>
    %c19 = arith.constant 19 : index
    %c0_58 = arith.constant 0 : index
    %118 = vector.load %arg11[%c19, %c0_58] : memref<20x1024xf32, #tpu.memory_space<vmem>>, vector<1x128xf32>
    %c0_59 = arith.constant 0 : index
    %c0_60 = arith.constant 0 : index
    %119 = vector.load %arg16[%c0_59, %c0_60] : memref<1024x128xi8, #tpu.memory_space<vmem>>, vector<1024x128xi8>
    %120 = arith.sitofp %119 : vector<1024x128xi8> to vector<1024x128xf32>
    %121 = arith.truncf %120 : vector<1024x128xf32> to vector<1024x128xbf16>
    %122 = arith.truncf %114 : vector<8x1024xf32> to vector<8x1024xbf16>
    %cst_61 = arith.constant dense<0.000000e+00> : vector<8x128xf32>
    %123 = tpu.matmul %122, %121, %cst_61 {dimension_numbers = #tpu.dot_dimension_numbers<[1], [0], [0], [1], [0, 0, 1, 1], [], []>} : vector<8x1024xbf16>, vector<1024x128xbf16>, vector<8x128xf32> -> vector<8x128xf32>
    %124 = vector.broadcast %118 : vector<1x128xf32> to vector<8x128xf32>
    %125 = arith.mulf %123, %124 : vector<8x128xf32>
    %126 = vector.broadcast %117 : vector<1x128xf32> to vector<8x128xf32>
    %127 = arith.addf %125, %126 : vector<8x128xf32>
    %c0_62 = arith.constant 0 : index
    %c0_63 = arith.constant 0 : index
    %128 = vector.load %arg12[%c0_62, %c0_63] : memref<8x128xf32, #tpu.memory_space<vmem>>, vector<8x128xf32>
    tpu.vector_store %arg12[%c0_62, %c0_63], %127 {strides = array<i32>} : memref<8x128xf32, #tpu.memory_space<vmem>>, vector<8x128xf32>,
    return
  }
}

</mosaic_0001>

<bundles_post_ra>
// kernel: tpu_custom_call.1
= control target key start
LH: loop header
LB: loop body
LE: loop exit
PB: predicated region body
PF: predicated region fallthrough
CT: control target
= control target key end

     0   :  { %19 = vsyncpa [#allocation7], 0  ;;  %s7244_s0 = inlined_call_operand.vmem [shape: f32[8,128], index: 0, kind: input, shape index: {}]   ;;  %s7245_s1 = inlined_call_operand.hbm [shape: s8[128,1024], index: 1, kind: input, shape index: {}]   ;;  %s7246_s2 = inlined_call_operand.hbm [shape: s8[1024,512], index: 2, kind: input, shape index: {}]   ;;  %s7247_s3 = inlined_call_operand.hbm [shape: s8[512,256], index: 3, kind: input, shape index: {}]   ;;  %s7248_s4 = inlined_call_operand.vmem [shape: s8[256,64], index: 4, kind: input, shape index: {}]   ;;  %s7249_s5 = inlined_call_operand.vmem [shape: f32[64,2], index: 5, kind: input, shape index: {}]   ;;  %s7250_s6 = inlined_call_operand.vmem [shape: f32[2,64], index: 6, kind: input, shape index: {}]   ;;  %s7251_s7 = inlined_call_operand.vmem [shape: s8[64,256], index: 7, kind: input, shape index: {}]   ;;  %s7252_s8 = inlined_call_operand.hbm [shape: s8[256,512], index: 8, kind: input, shape index: {}]   ;;  %s7253_s9 = inlined_call_operand.hbm [shape: s8[512,1024], index: 9, kind: input, shape index: {}]   ;;  %s7254_s10 = inlined_call_operand.hbm [shape: s8[1024,128], index: 10, kind: input, shape index: {}]   ;;  %s7255_s11 = inlined_call_operand.hbm [shape: f32[20,1024], index: 11, kind: input, shape index: {}]   ;;  %s7256_s12 = inlined_call_operand.hbm [shape: f32[8,128], index: 12, kind: output, shape index: {0}]   ;;  %s7257_s13 = inlined_call_operand.vmem [shape: f32[8,2], index: 13, kind: output, shape index: {1}]  }
   0x1   :  { %20 = vsyncpa [#allocation10], 0 }
   0x2   :  { %21 = vsyncpa [#allocation13], 0  ;;  %s42_s27 = sshll.u32 %s7246_s2, 4  ;;  %s43_s27 = int_to_ptr.hbm [resolvable:$true] %s42_s27 }
   0x3   :  { %22 = vsyncpa [#allocation8], 0  ;;  %s6431_s28 = smov [#allocation9]   ;;  %s29_s15 = sshll.u32 %s7245_s1, 4  ;;  %s30_s15 = int_to_ptr.hbm [resolvable:$true] %s29_s15 }
   0x4   :  { %s44_s29 = sshll.u32 %s6431_s28, 4  ;;  %s6432_s16 = smov 512   ;;  %s45_s29 = int_to_ptr.vmem [resolvable:$true] %s44_s29 }
   0x5   :  { %s6433_s17 = smov 32   ;;  %s6434_s18 = smov [#allocation6]  }
   0x6   :  { %50 = dma.hbm_to_vmem [thread:$0]  %s43_s27, 16384, %s45_s29, [#allocation10], %s6432_s16, %s6432_s16, %s6433_s17  }
   0x7   :  { %s31_s19 = sshll.u32 %s6434_s18, 4  ;;  %s6435_s20 = smov 1024   ;;  %s32_s19 = int_to_ptr.vmem [resolvable:$true] %s31_s19 }
   0x8   :  { %s6436_s21 = smov 64   ;;  %s55_s23 = sshll.u32 %s7247_s3, 4  ;;  %s56_s23 = int_to_ptr.hbm [resolvable:$true] %s55_s23 }
   0x9   :  { %37 = dma.hbm_to_vmem [thread:$0]  %s30_s15, 4096, %s32_s19, [#allocation7], %s6435_s20, %s6435_s20, %s6436_s21  }
   0xa   :  { %s6437_s24 = smov [#allocation11]   ;;  %s76_s28 = sshll.u32 %s7255_s11, 4  ;;  %s77_s28 = int_to_ptr.hbm [resolvable:$true] %s76_s28 }
   0xb   :  { %s57_s25 = sshll.u32 %s6437_s24, 4  ;;  %s6438_s27 = smov 256   ;;  %s58_s25 = int_to_ptr.vmem [resolvable:$true] %s57_s25 }
   0xc   :  { %s6439_s29 = smov 16   ;;  %s6440_s30 = smov [#allocation12]  }
   0xd   :  { %63 = dma.hbm_to_vmem [thread:$0]  %s56_s23, 4096, %s58_s25, [#allocation10], %s6438_s27, %s6438_s27, %s6439_s29  }
   0xe   :  { %s78_s14 = sshll.u32 %s6440_s30, 4  ;;  %s79_s14 = int_to_ptr.vmem [resolvable:$true] %s78_s14 }
   0xf   :  { %84 = dma.hbm_to_vmem [thread:$0]  %s77_s28, 3072, %s79_s14, [#allocation13], %s6435_s20, %s6435_s20, %s6436_s21  }
  0x10   :  { %6417 = dma.done.wait [#allocation7], 4096  }
  0x11   :  { %6418 = vsyncadd [#allocation7], 4294963200 }
  0x12   :  { %6419 = dma.done.wait [#allocation10], 20480  }
  0x13   :  { %6420 = vsyncadd [#allocation10], 4294946816 }
  0x14   :  { %6421 = dma.done.wait [#allocation13], 3072  }
  0x15   :  { %6422 = vsyncadd [#allocation13], 4294964224  ;;  %v175_v0 = vld [vmem:[#allocation6 + $0xc0] sm:$0xff]  ;;  %v176_v1 = vld [vmem:[#allocation6 + $0xc8] sm:$0xff]  ;;  %vm3173_vm0 = vcmask 1041408   ;;  %vm3142_vm1 = vcmask 523264  }
  0x16   :  { %v177_v2 = vld [vmem:[#allocation6 + $0xd0] sm:$0xff]  ;;  %v295_v3 = vunpack.c.2.s8 %v175_v0  ;;  %v303_v4 = vunpack.c.3.s8 %v175_v0  ;;  %v296_v5 = vunpack.c.2.s8 %v176_v1  ;;  %v304_v6 = vunpack.c.3.s8 %v176_v1  ;;  %v178_v7 = vld [vmem:[#allocation6 + $0xd8] sm:$0xff]  ;;  %v167_v28 = vld [vmem:[#allocation6 + $0x80] sm:$0xff]  ;;  %s109_s30 = sshll.u32 %s7252_s8, 4  ;;  %s6441_s14 = smov [#allocation2]   ;;  %s110_s30 = int_to_ptr.hbm [resolvable:$true] %s109_s30 }
  0x17   :  { %v297_v8 = vunpack.c.2.s8 %v177_v2  ;;  %v305_v9 = vunpack.c.3.s8 %v177_v2  ;;  %v298_v10 = vunpack.c.2.s8 %v178_v7  ;;  %v306_v11 = vunpack.c.3.s8 %v178_v7  ;;  %v168_v37 = vld [vmem:[#allocation6 + $0x88] sm:$0xff]  ;;  %v169_v42 = vld [vmem:[#allocation6 + $0x90] sm:$0xff]  ;;  %v170_v47 = vld [vmem:[#allocation6 + $0x98] sm:$0xff]  ;;  %s111_s3 = sshll.u32 %s6441_s14, 4  ;;  %s123_s15 = sshll.u32 %s7253_s9, 4  ;;  %s112_s3 = int_to_ptr.vmem [resolvable:$true] %s111_s3  ;;  %s124_s15 = int_to_ptr.hbm [resolvable:$true] %s123_s15 }
  0x18   :  { %v423_v12 = vcvt.s32.f32 %v295_v3  ;;  %v431_v13 = vcvt.s32.f32 %v303_v4  ;;  %v424_v14 = vcvt.s32.f32 %v296_v5  ;;  %v432_v15 = vcvt.s32.f32 %v304_v6  ;;  %114 = dma.hbm_to_vmem [thread:$0]  %s110_s30, 4096, %s112_s3, [#allocation5] }
  0x19   :  { %v425_v16 = vcvt.s32.f32 %v297_v8  ;;  %v433_v17 = vcvt.s32.f32 %v305_v9  ;;  %v426_v18 = vcvt.s32.f32 %v298_v10  ;;  %v434_v19 = vcvt.s32.f32 %v306_v11  ;;  %v159_v8 = vld [vmem:[#allocation6 + $0x40] sm:$0xff]  ;;  %s6442_s16 = smov [#allocation3]   ;;  %s137_s20 = sshll.u32 %s7254_s10, 4  ;;  %s138_s20 = int_to_ptr.hbm [resolvable:$true] %s137_s20 }
  0x1a   :  { %v495_v20 = vpack.c.bf16 %v431_v13, %v423_v12  ;;  %v496_v21 = vpack.c.bf16 %v432_v15, %v424_v14  ;;  %v279_v22 = vunpack.c.0.s8 %v175_v0  ;;  %v287_v23 = vunpack.c.1.s8 %v175_v0  ;;  %s125_s17 = sshll.u32 %s6442_s16, 4  ;;  %s6443_s8 = smov [#allocation4]   ;;  %s126_s17 = int_to_ptr.vmem [resolvable:$true] %s125_s17 }
  0x1b   :  { %v497_v24 = vpack.c.bf16 %v433_v17, %v425_v16  ;;  %v498_v25 = vpack.c.bf16 %v434_v19, %v426_v18  ;;  %v280_v26 = vunpack.c.0.s8 %v176_v1  ;;  %v288_v27 = vunpack.c.1.s8 %v176_v1  ;;  %v160_v17 = vld [vmem:[#allocation6 + $0x48] sm:$0xff]  ;;  %128 = dma.hbm_to_vmem [thread:$0]  %s124_s15, 16384, %s126_s17, [#allocation5 + $0x1] }
  0x1c   :  { %504 = vmatpush.bf16.msra.mxu0 %v495_v20  ;;  %517 = vmatpush.bf16.msra.mxu1 %v496_v21  ;;  %v407_v29 = vcvt.s32.f32 %v279_v22  ;;  %v415_v30 = vcvt.s32.f32 %v287_v23  ;;  %v281_v31 = vunpack.c.0.s8 %v177_v2  ;;  %v289_v32 = vunpack.c.1.s8 %v177_v2  ;;  %v161_v22 = vld [vmem:[#allocation6 + $0x50] sm:$0xff]  ;;  %s139_s21 = sshll.u32 %s6443_s8, 4  ;;  %s140_s21 = int_to_ptr.vmem [resolvable:$true] %s139_s21 }
  0x1d   :  { %530 = vmatpush.bf16.msra.mxu2 %v497_v24  ;;  %543 = vmatpush.bf16.msra.mxu3 %v498_v25  ;;  %v408_v33 = vcvt.s32.f32 %v280_v26  ;;  %v416_v34 = vcvt.s32.f32 %v288_v27  ;;  %v282_v35 = vunpack.c.0.s8 %v178_v7  ;;  %v290_v36 = vunpack.c.1.s8 %v178_v7  ;;  %v162_v27 = vld [vmem:[#allocation6 + $0x58] sm:$0xff]  ;;  %142 = dma.hbm_to_vmem [thread:$0]  %s138_s20, 4096, %s140_s21, [#allocation5 + $0x2] }
  0x1e   :  { %v487_v38 = vpack.c.bf16 %v415_v30, %v407_v29  ;;  %v409_v39 = vcvt.s32.f32 %v281_v31  ;;  %v417_v40 = vcvt.s32.f32 %v289_v32  ;;  %v263_v41 = vunpack.c.2.s8 %v167_v28 }
  0x1f   :  { %v488_v43 = vpack.c.bf16 %v416_v34, %v408_v33  ;;  %v410_v44 = vcvt.s32.f32 %v282_v35  ;;  %v418_v45 = vcvt.s32.f32 %v290_v36  ;;  %v271_v46 = vunpack.c.3.s8 %v167_v28 }
  0x20   :  { %505 = vmatpush.bf16.msra.mxu0 %v487_v38  ;;  %v489_v48 = vpack.c.bf16 %v417_v40, %v409_v39  ;;  %v391_v49 = vcvt.s32.f32 %v263_v41  ;;  %v264_v50 = vunpack.c.2.s8 %v168_v37  ;;  %v272_v51 = vunpack.c.3.s8 %v168_v37 }
  0x21   :  { %518 = vmatpush.bf16.msra.mxu1 %v488_v43  ;;  %v490_v52 = vpack.c.bf16 %v418_v45, %v410_v44  ;;  %v399_v53 = vcvt.s32.f32 %v271_v46  ;;  %v265_v54 = vunpack.c.2.s8 %v169_v42  ;;  %v273_v55 = vunpack.c.3.s8 %v169_v42 }
  0x22   :  { %531 = vmatpush.bf16.msra.mxu2 %v489_v48  ;;  %v392_v56 = vcvt.s32.f32 %v264_v50  ;;  %v400_v57 = vcvt.s32.f32 %v272_v51  ;;  %v266_v58 = vunpack.c.2.s8 %v170_v47  ;;  %v274_v59 = vunpack.c.3.s8 %v170_v47 }
  0x23   :  { %544 = vmatpush.bf16.msra.mxu3 %v490_v52  ;;  %v479_v60 = vpack.c.bf16 %v399_v53, %v391_v49  ;;  %v393_v61 = vcvt.s32.f32 %v265_v54  ;;  %v401_v62 = vcvt.s32.f32 %v273_v55  ;;  %v247_v63 = vunpack.c.0.s8 %v167_v28  ;;  %v151_v52 = vld [vmem:[#allocation6] sm:$0xff] }
  0x24   :  { %v480_v0 = vpack.c.bf16 %v400_v57, %v392_v56  ;;  %v394_v1 = vcvt.s32.f32 %v266_v58  ;;  %v402_v2 = vcvt.s32.f32 %v274_v59  ;;  %v255_v3 = vunpack.c.1.s8 %v167_v28 }
  0x25   :  { %506 = vmatpush.bf16.msra.mxu0 %v479_v60  ;;  %v481_v4 = vpack.c.bf16 %v401_v62, %v393_v61  ;;  %v375_v5 = vcvt.s32.f32 %v247_v63  ;;  %v248_v6 = vunpack.c.0.s8 %v168_v37  ;;  %v256_v7 = vunpack.c.1.s8 %v168_v37  ;;  %v152_v61 = vld [vmem:[#allocation6 + $0x8] sm:$0xff] }
  0x26   :  { %519 = vmatpush.bf16.msra.mxu1 %v480_v0  ;;  %v482_v9 = vpack.c.bf16 %v402_v2, %v394_v1  ;;  %v383_v10 = vcvt.s32.f32 %v255_v3  ;;  %v249_v11 = vunpack.c.0.s8 %v169_v42  ;;  %v257_v12 = vunpack.c.1.s8 %v169_v42  ;;  %v153_v2 = vld [vmem:[#allocation6 + $0x10] sm:$0xff] }
  0x27   :  { %532 = vmatpush.bf16.msra.mxu2 %v481_v4  ;;  %v376_v13 = vcvt.s32.f32 %v248_v6  ;;  %v384_v14 = vcvt.s32.f32 %v256_v7  ;;  %v250_v15 = vunpack.c.0.s8 %v170_v47  ;;  %v258_v16 = vunpack.c.1.s8 %v170_v47  ;;  %v154_v7 = vld [vmem:[#allocation6 + $0x18] sm:$0xff] }
  0x28   :  { %545 = vmatpush.bf16.msra.mxu3 %v482_v9  ;;  %v471_v18 = vpack.c.bf16 %v383_v10, %v375_v5  ;;  %v377_v19 = vcvt.s32.f32 %v249_v11  ;;  %v385_v20 = vcvt.s32.f32 %v257_v12  ;;  %v231_v21 = vunpack.c.2.s8 %v159_v8 }
  0x29   :  { %v472_v23 = vpack.c.bf16 %v384_v14, %v376_v13  ;;  %v378_v24 = vcvt.s32.f32 %v250_v15  ;;  %v386_v25 = vcvt.s32.f32 %v258_v16  ;;  %v239_v26 = vunpack.c.3.s8 %v159_v8 }
  0x2a   :  { %507 = vmatpush.bf16.msra.mxu0 %v471_v18  ;;  %v473_v28 = vpack.c.bf16 %v385_v20, %v377_v19  ;;  %v359_v29 = vcvt.s32.f32 %v231_v21  ;;  %v232_v30 = vunpack.c.2.s8 %v160_v17  ;;  %v240_v31 = vunpack.c.3.s8 %v160_v17 }
  0x2b   :  { %520 = vmatpush.bf16.msra.mxu1 %v472_v23  ;;  %v474_v32 = vpack.c.bf16 %v386_v25, %v378_v24  ;;  %v367_v33 = vcvt.s32.f32 %v239_v26  ;;  %v233_v34 = vunpack.c.2.s8 %v161_v22  ;;  %v241_v35 = vunpack.c.3.s8 %v161_v22 }
  0x2c   :  { %533 = vmatpush.bf16.msra.mxu2 %v473_v28  ;;  %v360_v36 = vcvt.s32.f32 %v232_v30  ;;  %v368_v37 = vcvt.s32.f32 %v240_v31  ;;  %v234_v38 = vunpack.c.2.s8 %v162_v27  ;;  %v242_v39 = vunpack.c.3.s8 %v162_v27 }
  0x2d   :  { %546 = vmatpush.bf16.msra.mxu3 %v474_v32  ;;  %v463_v40 = vpack.c.bf16 %v367_v33, %v359_v29  ;;  %v361_v41 = vcvt.s32.f32 %v233_v34  ;;  %v369_v42 = vcvt.s32.f32 %v241_v35  ;;  %v215_v43 = vunpack.c.0.s8 %v159_v8  ;;  %v6527_v32 = vld [vmem:[#allocation6 + $0xe0] sm:$0xff] }
  0x2e   :  { %v464_v44 = vpack.c.bf16 %v368_v37, %v360_v36  ;;  %v362_v45 = vcvt.s32.f32 %v234_v38  ;;  %v370_v46 = vcvt.s32.f32 %v242_v39  ;;  %v223_v47 = vunpack.c.1.s8 %v159_v8 }
  0x2f   :  { %508 = vmatpush.bf16.msra.mxu0 %v463_v40  ;;  %v465_v48 = vpack.c.bf16 %v369_v42, %v361_v41  ;;  %v343_v49 = vcvt.s32.f32 %v215_v43  ;;  %v216_v50 = vunpack.c.0.s8 %v160_v17  ;;  %v224_v51 = vunpack.c.1.s8 %v160_v17  ;;  %v180_v41 = vld [vmem:[#allocation6 + $0xe8] sm:$0xff] }
  0x30   :  { %521 = vmatpush.bf16.msra.mxu1 %v464_v44  ;;  %v466_v53 = vpack.c.bf16 %v370_v46, %v362_v45  ;;  %v351_v54 = vcvt.s32.f32 %v223_v47  ;;  %v217_v55 = vunpack.c.0.s8 %v161_v22  ;;  %v225_v56 = vunpack.c.1.s8 %v161_v22  ;;  %v181_v46 = vld [vmem:[#allocation6 + $0xf0] sm:$0xff] }
  0x31   :  { %534 = vmatpush.bf16.msra.mxu2 %v465_v48  ;;  %v344_v57 = vcvt.s32.f32 %v216_v50  ;;  %v352_v58 = vcvt.s32.f32 %v224_v51  ;;  %v218_v59 = vunpack.c.0.s8 %v162_v27  ;;  %v226_v60 = vunpack.c.1.s8 %v162_v27  ;;  %v182_v51 = vld [vmem:[#allocation6 + $0xf8] sm:$0xff] }
  0x32   :  { %547 = vmatpush.bf16.msra.mxu3 %v466_v53  ;;  %v455_v62 = vpack.c.bf16 %v351_v54, %v343_v49  ;;  %v345_v63 = vcvt.s32.f32 %v217_v55  ;;  %v353_v0 = vcvt.s32.f32 %v225_v56  ;;  %v199_v1 = vunpack.c.2.s8 %v151_v52  ;;  %v143_v56 = vld [vmem:[%s7244_s0] sm:$0xff] }
  0x33   :  { %v456_v3 = vpack.c.bf16 %v352_v58, %v344_v57  ;;  %v346_v4 = vcvt.s32.f32 %v218_v59  ;;  %v354_v5 = vcvt.s32.f32 %v226_v60  ;;  %v207_v6 = vunpack.c.3.s8 %v151_v52 }
  0x34   :  { %509 = vmatpush.bf16.msra.mxu0 %v455_v62  ;;  %v457_v8 = vpack.c.bf16 %v353_v0, %v345_v63  ;;  %v327_v9 = vcvt.s32.f32 %v199_v1  ;;  %v200_v10 = vunpack.c.2.s8 %v152_v61  ;;  %v208_v11 = vunpack.c.3.s8 %v152_v61 }
  0x35   :  { %522 = vmatpush.bf16.msra.mxu1 %v456_v3  ;;  %v458_v12 = vpack.c.bf16 %v354_v5, %v346_v4  ;;  %v335_v13 = vcvt.s32.f32 %v207_v6  ;;  %v201_v14 = vunpack.c.2.s8 %v153_v2  ;;  %v209_v15 = vunpack.c.3.s8 %v153_v2 }
  0x36   :  { %535 = vmatpush.bf16.msra.mxu2 %v457_v8  ;;  %v328_v16 = vcvt.s32.f32 %v200_v10  ;;  %v336_v17 = vcvt.s32.f32 %v208_v11  ;;  %v202_v18 = vunpack.c.2.s8 %v154_v7  ;;  %v210_v19 = vunpack.c.3.s8 %v154_v7 }
  0x37   :  { %548 = vmatpush.bf16.msra.mxu3 %v458_v12  ;;  %v447_v20 = vpack.c.bf16 %v335_v13, %v327_v9  ;;  %v329_v21 = vcvt.s32.f32 %v201_v14  ;;  %v337_v22 = vcvt.s32.f32 %v209_v15  ;;  %v183_v23 = vunpack.c.0.s8 %v151_v52  ;;  %v171_v13 = vld [vmem:[#allocation6 + $0xa0] sm:$0xff] }
  0x38   :  { %v448_v24 = vpack.c.bf16 %v336_v17, %v328_v16  ;;  %v330_v25 = vcvt.s32.f32 %v202_v18  ;;  %v338_v26 = vcvt.s32.f32 %v210_v19  ;;  %v191_v27 = vunpack.c.1.s8 %v151_v52 }
  0x39   :  { %510 = vmatpush.bf16.msra.mxu0 %v447_v20  ;;  %v449_v28 = vpack.c.bf16 %v337_v22, %v329_v21  ;;  %v311_v29 = vcvt.s32.f32 %v183_v23  ;;  %v184_v30 = vunpack.c.0.s8 %v152_v61  ;;  %v192_v31 = vunpack.c.1.s8 %v152_v61  ;;  %v172_v22 = vld [vmem:[#allocation6 + $0xa8] sm:$0xff] }
  0x3a   :  { %523 = vmatpush.bf16.msra.mxu1 %v448_v24  ;;  %v450_v33 = vpack.c.bf16 %v338_v26, %v330_v25  ;;  %v319_v34 = vcvt.s32.f32 %v191_v27  ;;  %v185_v35 = vunpack.c.0.s8 %v153_v2  ;;  %v193_v36 = vunpack.c.1.s8 %v153_v2  ;;  %v173_v27 = vld [vmem:[#allocation6 + $0xb0] sm:$0xff] }
  0x3b   :  { %536 = vmatpush.bf16.msra.mxu2 %v449_v28  ;;  %v312_v37 = vcvt.s32.f32 %v184_v30  ;;  %v320_v38 = vcvt.s32.f32 %v192_v31  ;;  %v186_v39 = vunpack.c.0.s8 %v154_v7  ;;  %v194_v40 = vunpack.c.1.s8 %v154_v7 }
  0x3c   :  { %549 = vmatpush.bf16.msra.mxu3 %v450_v33  ;;  %v439_v42 = vpack.c.bf16 %v319_v34, %v311_v29  ;;  %v313_v43 = vcvt.s32.f32 %v185_v35  ;;  %v321_v44 = vcvt.s32.f32 %v193_v36  ;;  %v299_v45 = vunpack.c.2.s8 %v6527_v32 }
  0x3d   :  { %v440_v47 = vpack.c.bf16 %v320_v38, %v312_v37  ;;  %v314_v48 = vcvt.s32.f32 %v186_v39  ;;  %v322_v49 = vcvt.s32.f32 %v194_v40  ;;  %v307_v50 = vunpack.c.3.s8 %v6527_v32 }
  0x3e   :  { %511 = vmatpush.bf16.msra.mxu0 %v439_v42  ;;  %v441_v52 = vpack.c.bf16 %v321_v44, %v313_v43  ;;  %v427_v53 = vcvt.s32.f32 %v299_v45  ;;  %v300_v54 = vunpack.c.2.s8 %v180_v41  ;;  %v308_v55 = vunpack.c.3.s8 %v180_v41 }
  0x3f   :  { %524 = vmatpush.bf16.msra.mxu1 %v440_v47  ;;  %v442_v57 = vpack.c.bf16 %v322_v49, %v314_v48  ;;  %v435_v58 = vcvt.s32.f32 %v307_v50  ;;  %v301_v59 = vunpack.c.2.s8 %v181_v46  ;;  %v309_v60 = vunpack.c.3.s8 %v181_v46 }
  0x40   :  { %537 = vmatpush.bf16.msra.mxu2 %v441_v52  ;;  %v428_v61 = vcvt.s32.f32 %v300_v54  ;;  %v436_v62 = vcvt.s32.f32 %v308_v55  ;;  %v302_v63 = vunpack.c.2.s8 %v182_v51  ;;  %v310_v0 = vunpack.c.3.s8 %v182_v51 }
  0x41   :  { %550 = vmatpush.bf16.msra.mxu3 %v442_v57  ;;  %v499_v1 = vpack.c.bf16 %v435_v58, %v427_v53  ;;  %v429_v2 = vcvt.s32.f32 %v301_v59  ;;  %v437_v3 = vcvt.s32.f32 %v309_v60  ;;  %v6534_v4 = vpack.c.bf16 %v143_v56, %v143_v56  ;;  %v163_v57 = vld [vmem:[#allocation6 + $0x60] sm:$0xff] }
  0x42   :  { %v500_v5 = vpack.c.bf16 %v436_v62, %v428_v61  ;;  %v430_v6 = vcvt.s32.f32 %v302_v63  ;;  %v438_v7 = vcvt.s32.f32 %v310_v0  ;;  %v283_v8 = vunpack.c.0.s8 %v6527_v32 }
  0x43   :  { %556 = vmatpush.bf16.msrb.mxu0 %v499_v1  ;;  %v501_v9 = vpack.c.bf16 %v437_v3, %v429_v2  ;;  %525 = vmatmul.bf16.vlgmr.msra.gmra.mxu1 %v6534_v4  ;;  %v291_v10 = vunpack.c.1.s8 %v6527_v32  ;;  %v284_v11 = vunpack.c.0.s8 %v180_v41  ;;  %v292_v12 = vunpack.c.1.s8 %v180_v41  ;;  %v174_v32 = vld [vmem:[#allocation6 + $0xb8] sm:$0xff]  ;;  %v164_v2 = vld [vmem:[#allocation6 + $0x68] sm:$0xff] }
  0x44   :  { %569 = vmatpush.bf16.msrb.mxu1 %v500_v5  ;;  %v502_v14 = vpack.c.bf16 %v438_v7, %v430_v6  ;;  %512 = vmatmul.bf16.vlgmr.msra.gmra.mxu0 %v6534_v4  ;;  %v411_v15 = vcvt.s32.f32 %v283_v8  ;;  %v285_v16 = vunpack.c.0.s8 %v181_v46  ;;  %v293_v17 = vunpack.c.1.s8 %v181_v46  ;;  %v165_v8 = vld [vmem:[#allocation6 + $0x70] sm:$0xff] }
  0x45   :  { %582 = vmatpush.bf16.msrb.mxu2 %v501_v9  ;;  %551 = vmatmul.bf16.vlgmr.msra.gmra.mxu3 %v6534_v4  ;;  %v419_v18 = vcvt.s32.f32 %v291_v10  ;;  %v412_v19 = vcvt.s32.f32 %v284_v11  ;;  %v420_v20 = vcvt.s32.f32 %v292_v12  ;;  %v286_v21 = vunpack.c.0.s8 %v182_v51 }
  0x46   :  { %595 = vmatpush.bf16.msrb.mxu3 %v502_v14  ;;  %538 = vmatmul.bf16.vlgmr.msra.gmra.mxu2 %v6534_v4  ;;  %v413_v23 = vcvt.s32.f32 %v285_v16  ;;  %v421_v24 = vcvt.s32.f32 %v293_v17  ;;  %v294_v25 = vunpack.c.1.s8 %v182_v51  ;;  %v267_v26 = vunpack.c.2.s8 %v171_v13 }
  0x47   :  { %v491_v28 = vpack.c.bf16 %v419_v18, %v411_v15  ;;  %v492_v29 = vpack.c.bf16 %v420_v20, %v412_v19  ;;  %v414_v30 = vcvt.s32.f32 %v286_v21  ;;  %v275_v31 = vunpack.c.3.s8 %v171_v13 }
  0x48   :  { %v493_v33 = vpack.c.bf16 %v421_v24, %v413_v23  ;;  %v422_v34 = vcvt.s32.f32 %v294_v25  ;;  %v395_v35 = vcvt.s32.f32 %v267_v26  ;;  %v268_v36 = vunpack.c.2.s8 %v172_v22 }
  0x49   :  { %557 = vmatpush.bf16.msrb.mxu0 %v491_v28  ;;  %570 = vmatpush.bf16.msrb.mxu1 %v492_v29  ;;  %v403_v37 = vcvt.s32.f32 %v275_v31  ;;  %v276_v38 = vunpack.c.3.s8 %v172_v22  ;;  %v269_v39 = vunpack.c.2.s8 %v173_v27  ;;  %v277_v40 = vunpack.c.3.s8 %v173_v27 }
  0x4a   :  { %583 = vmatpush.bf16.msrb.mxu2 %v493_v33  ;;  %v494_v41 = vpack.c.bf16 %v422_v34, %v414_v30  ;;  %v396_v42 = vcvt.s32.f32 %v268_v36  ;;  %v270_v43 = vunpack.c.2.s8 %v174_v32  ;;  %v278_v44 = vunpack.c.3.s8 %v174_v32 }
  0x4b   :  { %v483_v45 = vpack.c.bf16 %v403_v37, %v395_v35  ;;  %v404_v46 = vcvt.s32.f32 %v276_v38  ;;  %v397_v47 = vcvt.s32.f32 %v269_v39  ;;  %v405_v48 = vcvt.s32.f32 %v277_v40 }
  0x4c   :  { %596 = vmatpush.bf16.msrb.mxu3 %v494_v41  ;;  %v398_v49 = vcvt.s32.f32 %v270_v43  ;;  %v406_v50 = vcvt.s32.f32 %v278_v44  ;;  %v251_v51 = vunpack.c.0.s8 %v171_v13  ;;  %v259_v52 = vunpack.c.1.s8 %v171_v13  ;;  %v166_v13 = vld [vmem:[#allocation6 + $0x78] sm:$0xff] }
  0x4d   :  { %558 = vmatpush.bf16.msrb.mxu0 %v483_v45  ;;  %v484_v53 = vpack.c.bf16 %v404_v46, %v396_v42  ;;  %v485_v54 = vpack.c.bf16 %v405_v48, %v397_v47  ;;  %v252_v55 = vunpack.c.0.s8 %v172_v22  ;;  %v260_v56 = vunpack.c.1.s8 %v172_v22  ;;  %v155_v42 = vld [vmem:[#allocation6 + $0x20] sm:$0xff]  ;;  %v156_v47 = vld [vmem:[#allocation6 + $0x28] sm:$0xff] }
  0x4e   :  { %v486_v58 = vpack.c.bf16 %v406_v50, %v398_v49  ;;  %v379_v59 = vcvt.s32.f32 %v251_v51  ;;  %v387_v60 = vcvt.s32.f32 %v259_v52  ;;  %v253_v61 = vunpack.c.0.s8 %v173_v27  ;;  %v157_v52 = vld [vmem:[#allocation6 + $0x30] sm:$0xff] }
  0x4f   :  { %571 = vmatpush.bf16.msrb.mxu1 %v484_v53  ;;  %584 = vmatpush.bf16.msrb.mxu2 %v485_v54  ;;  %v380_v62 = vcvt.s32.f32 %v252_v55  ;;  %v388_v63 = vcvt.s32.f32 %v260_v56  ;;  %v261_v0 = vunpack.c.1.s8 %v173_v27  ;;  %v254_v1 = vunpack.c.0.s8 %v174_v32 }
  0x50   :  { %597 = vmatpush.bf16.msrb.mxu3 %v486_v58  ;;  %v475_v3 = vpack.c.bf16 %v387_v60, %v379_v59  ;;  %v381_v5 = vcvt.s32.f32 %v253_v61  ;;  %v262_v6 = vunpack.c.1.s8 %v174_v32  ;;  %v235_v7 = vunpack.c.2.s8 %v163_v57 }
  0x51   :  { %v476_v9 = vpack.c.bf16 %v388_v63, %v380_v62  ;;  %v389_v10 = vcvt.s32.f32 %v261_v0  ;;  %v382_v11 = vcvt.s32.f32 %v254_v1  ;;  %v243_v12 = vunpack.c.3.s8 %v163_v57 }
  0x52   :  { %559 = vmatpush.bf16.msrb.mxu0 %v475_v3  ;;  %v390_v14 = vcvt.s32.f32 %v262_v6  ;;  %v363_v15 = vcvt.s32.f32 %v235_v7  ;;  %v236_v16 = vunpack.c.2.s8 %v164_v2  ;;  %v244_v17 = vunpack.c.3.s8 %v164_v2 }
  0x53   :  { %572 = vmatpush.bf16.msrb.mxu1 %v476_v9  ;;  %v477_v18 = vpack.c.bf16 %v389_v10, %v381_v5  ;;  %v371_v19 = vcvt.s32.f32 %v243_v12  ;;  %v237_v20 = vunpack.c.2.s8 %v165_v8  ;;  %v245_v21 = vunpack.c.3.s8 %v165_v8 }
  0x54   :  { %v478_v22 = vpack.c.bf16 %v390_v14, %v382_v11  ;;  %v364_v23 = vcvt.s32.f32 %v236_v16  ;;  %v372_v24 = vcvt.s32.f32 %v244_v17  ;;  %v238_v25 = vunpack.c.2.s8 %v166_v13 }
  0x55   :  { %585 = vmatpush.bf16.msrb.mxu2 %v477_v18  ;;  %v467_v26 = vpack.c.bf16 %v371_v19, %v363_v15  ;;  %v365_v27 = vcvt.s32.f32 %v237_v20  ;;  %v373_v28 = vcvt.s32.f32 %v245_v21  ;;  %v246_v29 = vunpack.c.3.s8 %v166_v13 }
  0x56   :  { %598 = vmatpush.bf16.msrb.mxu3 %v478_v22  ;;  %v468_v30 = vpack.c.bf16 %v372_v24, %v364_v23  ;;  %v366_v31 = vcvt.s32.f32 %v238_v25  ;;  %v219_v32 = vunpack.c.0.s8 %v163_v57  ;;  %v227_v33 = vunpack.c.1.s8 %v163_v57  ;;  %v158_v57 = vld [vmem:[#allocation6 + $0x38] sm:$0xff]  ;;  %v682_v23 = vld [vmem:[#allocation9 + $0x60] sm:$0xff] }
  0x57   :  { %560 = vmatpush.bf16.msrb.mxu0 %v467_v26  ;;  %v469_v34 = vpack.c.bf16 %v373_v28, %v365_v27  ;;  %v374_v35 = vcvt.s32.f32 %v246_v29  ;;  %v220_v36 = vunpack.c.0.s8 %v164_v2  ;;  %v228_v37 = vunpack.c.1.s8 %v164_v2  ;;  %v698_v28 = vld [vmem:[#allocation9 + $0xe0] sm:$0xff] }
  0x58   :  { %573 = vmatpush.bf16.msrb.mxu1 %v468_v30  ;;  %v347_v38 = vcvt.s32.f32 %v219_v32  ;;  %v355_v39 = vcvt.s32.f32 %v227_v33  ;;  %v221_v40 = vunpack.c.0.s8 %v165_v8  ;;  %v229_v41 = vunpack.c.1.s8 %v165_v8 }
  0x59   :  { %586 = vmatpush.bf16.msrb.mxu2 %v469_v34  ;;  %v470_v43 = vpack.c.bf16 %v374_v35, %v366_v31  ;;  %v348_v44 = vcvt.s32.f32 %v220_v36  ;;  %v356_v45 = vcvt.s32.f32 %v228_v37  ;;  %v222_v46 = vunpack.c.0.s8 %v166_v13 }
  0x5a   :  { %v459_v48 = vpack.c.bf16 %v355_v39, %v347_v38  ;;  %v349_v49 = vcvt.s32.f32 %v221_v40  ;;  %v357_v50 = vcvt.s32.f32 %v229_v41  ;;  %v230_v51 = vunpack.c.1.s8 %v166_v13 }
  0x5b   :  { %599 = vmatpush.bf16.msrb.mxu3 %v470_v43  ;;  %v460_v53 = vpack.c.bf16 %v356_v45, %v348_v44  ;;  %v350_v54 = vcvt.s32.f32 %v222_v46  ;;  %v203_v55 = vunpack.c.2.s8 %v155_v42  ;;  %v211_v56 = vunpack.c.3.s8 %v155_v42  ;;  %v714_v45 = vld [vmem:[#allocation9 + $0x160] sm:$0xff] }
  0x5c   :  { %561 = vmatpush.bf16.msrb.mxu0 %v459_v48  ;;  %v461_v58 = vpack.c.bf16 %v357_v50, %v349_v49  ;;  %v358_v59 = vcvt.s32.f32 %v230_v51  ;;  %v204_v60 = vunpack.c.2.s8 %v156_v47  ;;  %v212_v61 = vunpack.c.3.s8 %v156_v47  ;;  %v730_v50 = vld [vmem:[#allocation9 + $0x1e0] sm:$0xff] }
  0x5d   :  { %574 = vmatpush.bf16.msrb.mxu1 %v460_v53  ;;  %v331_v62 = vcvt.s32.f32 %v203_v55  ;;  %v339_v63 = vcvt.s32.f32 %v211_v56  ;;  %v205_v0 = vunpack.c.2.s8 %v157_v52  ;;  %v213_v1 = vunpack.c.3.s8 %v157_v52  ;;  %v678_v55 = vld [vmem:[#allocation9 + $0x40] sm:$0xff] }
  0x5e   :  { %587 = vmatpush.bf16.msrb.mxu2 %v461_v58  ;;  %v462_v2 = vpack.c.bf16 %v358_v59, %v350_v54  ;;  %v332_v3 = vcvt.s32.f32 %v204_v60  ;;  %v340_v5 = vcvt.s32.f32 %v212_v61  ;;  %v206_v6 = vunpack.c.2.s8 %v158_v57  ;;  %v694_v60 = vld [vmem:[#allocation9 + $0xc0] sm:$0xff] }
  0x5f   :  { %v451_v7 = vpack.c.bf16 %v339_v63, %v331_v62  ;;  %v333_v8 = vcvt.s32.f32 %v205_v0  ;;  %v341_v9 = vcvt.s32.f32 %v213_v1  ;;  %v214_v10 = vunpack.c.3.s8 %v158_v57 }
  0x60   :  { %600 = vmatpush.bf16.msrb.mxu3 %v462_v2  ;;  %v452_v11 = vpack.c.bf16 %v340_v5, %v332_v3  ;;  %v334_v12 = vcvt.s32.f32 %v206_v6  ;;  %v187_v13 = vunpack.c.0.s8 %v155_v42  ;;  %v195_v14 = vunpack.c.1.s8 %v155_v42 }
  0x61   :  { %562 = vmatpush.bf16.msrb.mxu0 %v451_v7  ;;  %v453_v15 = vpack.c.bf16 %v341_v9, %v333_v8  ;;  %v342_v16 = vcvt.s32.f32 %v214_v10  ;;  %v188_v17 = vunpack.c.0.s8 %v156_v47  ;;  %v196_v18 = vunpack.c.1.s8 %v156_v47 }
  0x62   :  { %575 = vmatpush.bf16.msrb.mxu1 %v452_v11  ;;  %v315_v19 = vcvt.s32.f32 %v187_v13  ;;  %v323_v20 = vcvt.s32.f32 %v195_v14  ;;  %v189_v21 = vunpack.c.0.s8 %v157_v52  ;;  %v197_v22 = vunpack.c.1.s8 %v157_v52 }
  0x63   :  { %588 = vmatpush.bf16.msrb.mxu2 %v453_v15  ;;  %v454_v24 = vpack.c.bf16 %v342_v16, %v334_v12  ;;  %v316_v25 = vcvt.s32.f32 %v188_v17  ;;  %v324_v26 = vcvt.s32.f32 %v196_v18  ;;  %v190_v27 = vunpack.c.0.s8 %v158_v57 }
  0x64   :  { %v443_v29 = vpack.c.bf16 %v323_v20, %v315_v19  ;;  %v317_v30 = vcvt.s32.f32 %v189_v21  ;;  %v325_v31 = vcvt.s32.f32 %v197_v22  ;;  %v198_v32 = vunpack.c.1.s8 %v158_v57 }
  0x65   :  { %601 = vmatpush.bf16.msrb.mxu3 %v454_v24  ;;  %v444_v33 = vpack.c.bf16 %v324_v26, %v316_v25  ;;  %v318_v34 = vcvt.s32.f32 %v190_v27  ;;  %v854_v35 = vunpack.c.2.s8 %v682_v23  ;;  %v858_v36 = vunpack.c.3.s8 %v682_v23  ;;  %v710_v25 = vld [vmem:[#allocation9 + $0x140] sm:$0xff] }
  0x66   :  { %563 = vmatpush.bf16.msrb.mxu0 %v443_v29  ;;  %v445_v37 = vpack.c.bf16 %v325_v31, %v317_v30  ;;  %v326_v38 = vcvt.s32.f32 %v198_v32  ;;  %v918_v39 = vunpack.c.2.s8 %v698_v28  ;;  %v922_v40 = vunpack.c.3.s8 %v698_v28  ;;  %v726_v30 = vld [vmem:[#allocation9 + $0x1c0] sm:$0xff] }
  0x67   :  { %576 = vmatpush.bf16.msrb.mxu1 %v444_v33  ;;  %v1366_v41 = vcvt.s32.f32 %v854_v35  ;;  %v1370_v42 = vcvt.s32.f32 %v858_v36  ;;  %v846_v43 = vunpack.c.0.s8 %v682_v23  ;;  %v850_v44 = vunpack.c.1.s8 %v682_v23  ;;  %v674_v35 = vld [vmem:[#allocation9 + $0x20] sm:$0xff] }
  0x68   :  { %589 = vmatpush.bf16.msrb.mxu2 %v445_v37  ;;  %v446_v46 = vpack.c.bf16 %v326_v38, %v318_v34  ;;  %v1430_v47 = vcvt.s32.f32 %v918_v39  ;;  %v1434_v48 = vcvt.s32.f32 %v922_v40  ;;  %v910_v49 = vunpack.c.0.s8 %v698_v28  ;;  %v690_v40 = vld [vmem:[#allocation9 + $0xa0] sm:$0xff] }
  0x69   :  { %564 = vmatmul.bf16.vlgmr.msrb.gmra.mxu0 %v6534_v4  ;;  %v1850_v51 = vpack.c.bf16 %v1370_v42, %v1366_v41  ;;  %v1358_v52 = vcvt.s32.f32 %v846_v43  ;;  %v1362_v53 = vcvt.s32.f32 %v850_v44  ;;  %v914_v54 = vunpack.c.1.s8 %v698_v28 }
  0x6a   :  { %602 = vmatpush.bf16.msrb.mxu3 %v446_v46  ;;  %577 = vmatmul.bf16.vlgmr.msrb.gmra.mxu1 %v6534_v4  ;;  %v1882_v56 = vpack.c.bf16 %v1434_v48, %v1430_v47  ;;  %v1422_v57 = vcvt.s32.f32 %v910_v49  ;;  %v982_v58 = vunpack.c.2.s8 %v714_v45  ;;  %v986_v59 = vunpack.c.3.s8 %v714_v45 }
  0x6b   :  { %590 = vmatmul.bf16.vlgmr.msrb.gmra.mxu2 %v6534_v4  ;;  %2086 = vmatpush.bf16.msra.mxu0 %v1850_v51  ;;  %v1846_v61 = vpack.c.bf16 %v1362_v53, %v1358_v52  ;;  %v1426_v62 = vcvt.s32.f32 %v914_v54  ;;  %v1046_v63 = vunpack.c.2.s8 %v730_v50  ;;  %v1050_v0 = vunpack.c.3.s8 %v730_v50 }
  0x6c   :  { %2099 = vmatpush.bf16.msra.mxu1 %v1882_v56  ;;  %v1494_v1 = vcvt.s32.f32 %v982_v58  ;;  %v1498_v2 = vcvt.s32.f32 %v986_v59  ;;  %v838_v3 = vunpack.c.2.s8 %v678_v55  ;;  %v842_v5 = vunpack.c.3.s8 %v678_v55 }
  0x6d   :  { %603 = vmatmul.bf16.vlgmr.msrb.gmra.mxu3 %v6534_v4  ;;  %v1878_v6 = vpack.c.bf16 %v1426_v62, %v1422_v57  ;;  %v1558_v7 = vcvt.s32.f32 %v1046_v63  ;;  %v1562_v8 = vcvt.s32.f32 %v1050_v0  ;;  %v902_v9 = vunpack.c.2.s8 %v694_v60 }
  0x6e   :  { %v1914_v10 = vpack.c.bf16 %v1498_v2, %v1494_v1  ;;  %v1350_v11 = vcvt.s32.f32 %v838_v3  ;;  %v1354_v12 = vcvt.s32.f32 %v842_v5  ;;  %v906_v13 = vunpack.c.3.s8 %v694_v60 }
  0x6f   :  { %2087 = vmatpush.bf16.msra.mxu0 %v1846_v61  ;;  %v1946_v14 = vpack.c.bf16 %v1562_v8, %v1558_v7  ;;  %v1414_v15 = vcvt.s32.f32 %v902_v9  ;;  %v974_v16 = vunpack.c.0.s8 %v714_v45  ;;  %v978_v17 = vunpack.c.1.s8 %v714_v45 }
  0x70   :  { %2100 = vmatpush.bf16.msra.mxu1 %v1878_v6  ;;  %2112 = vmatpush.bf16.msra.mxu2 %v1914_v10  ;;  %v1842_v18 = vpack.c.bf16 %v1354_v12, %v1350_v11  ;;  %v1418_v19 = vcvt.s32.f32 %v906_v13  ;;  %v1038_v20 = vunpack.c.0.s8 %v730_v50  ;;  %v1042_v21 = vunpack.c.1.s8 %v730_v50  ;;  %v706_v6 = vld [vmem:[#allocation9 + $0x120] sm:$0xff] }
  0x71   :  { %2125 = vmatpush.bf16.msra.mxu3 %v1946_v14  ;;  %v1486_v4 = vcvt.s32.f32 %v974_v16  ;;  %v1490_v22 = vcvt.s32.f32 %v978_v17  ;;  %v830_v23 = vunpack.c.0.s8 %v678_v55  ;;  %v834_v24 = vunpack.c.1.s8 %v678_v55  ;;  %v722_v11 = vld [vmem:[#allocation9 + $0x1a0] sm:$0xff] }
  0x72   :  { %v1874_v26 = vpack.c.bf16 %v1418_v19, %v1414_v15  ;;  %v1550_v27 = vcvt.s32.f32 %v1038_v20  ;;  %v1554_v28 = vcvt.s32.f32 %v1042_v21  ;;  %v894_v29 = vunpack.c.0.s8 %v694_v60  ;;  %v670_v16 = vld [vmem:[#allocation9] sm:$0xff] }
  0x73   :  { %2088 = vmatpush.bf16.msra.mxu0 %v1842_v18  ;;  %v1910_v31 = vpack.c.bf16 %v1490_v22, %v1486_v4  ;;  %v1342_v32 = vcvt.s32.f32 %v830_v23  ;;  %v1346_v33 = vcvt.s32.f32 %v834_v24  ;;  %v898_v34 = vunpack.c.1.s8 %v694_v60  ;;  %v686_v21 = vld [vmem:[#allocation9 + $0x80] sm:$0xff] }
  0x74   :  { %2101 = vmatpush.bf16.msra.mxu1 %v1874_v26  ;;  %v1942_v36 = vpack.c.bf16 %v1554_v28, %v1550_v27  ;;  %v1406_v37 = vcvt.s32.f32 %v894_v29  ;;  %v966_v38 = vunpack.c.2.s8 %v710_v25  ;;  %v970_v39 = vunpack.c.3.s8 %v710_v25 }
  0x75   :  { %2113 = vmatpush.bf16.msra.mxu2 %v1910_v31  ;;  %v1838_v41 = vpack.c.bf16 %v1346_v33, %v1342_v32  ;;  %v1410_v42 = vcvt.s32.f32 %v898_v34  ;;  %v1030_v43 = vunpack.c.2.s8 %v726_v30  ;;  %v1034_v44 = vunpack.c.3.s8 %v726_v30 }
  0x76   :  { %2126 = vmatpush.bf16.msra.mxu3 %v1942_v36  ;;  %v1478_v45 = vcvt.s32.f32 %v966_v38  ;;  %v1482_v46 = vcvt.s32.f32 %v970_v39  ;;  %v822_v47 = vunpack.c.2.s8 %v674_v35  ;;  %v826_v48 = vunpack.c.3.s8 %v674_v35 }
  0x77   :  { %2089 = vmatpush.bf16.msra.mxu0 %v1838_v41  ;;  %v1870_v49 = vpack.c.bf16 %v1410_v42, %v1406_v37  ;;  %v1542_v50 = vcvt.s32.f32 %v1030_v43  ;;  %v1546_v51 = vcvt.s32.f32 %v1034_v44  ;;  %v886_v52 = vunpack.c.2.s8 %v690_v40 }
  0x78   :  { %v1906_v53 = vpack.c.bf16 %v1482_v46, %v1478_v45  ;;  %v1334_v54 = vcvt.s32.f32 %v822_v47  ;;  %v1338_v55 = vcvt.s32.f32 %v826_v48  ;;  %v890_v56 = vunpack.c.3.s8 %v690_v40 }
  0x79   :  { %2102 = vmatpush.bf16.msra.mxu1 %v1870_v49  ;;  %v1938_v57 = vpack.c.bf16 %v1546_v51, %v1542_v50  ;;  %v1398_v58 = vcvt.s32.f32 %v886_v52  ;;  %v958_v59 = vunpack.c.0.s8 %v710_v25  ;;  %v962_v60 = vunpack.c.1.s8 %v710_v25  ;;  %v746_v49 = vld [vmem:[#allocation9 + $0x260] sm:$0xff] }
  0x7a   :  { %2114 = vmatpush.bf16.msra.mxu2 %v1906_v53  ;;  %v1834_v61 = vpack.c.bf16 %v1338_v55, %v1334_v54  ;;  %v1402_v62 = vcvt.s32.f32 %v890_v56  ;;  %v1022_v63 = vunpack.c.0.s8 %v726_v30  ;;  %v1026_v0 = vunpack.c.1.s8 %v726_v30  ;;  %v762_v54 = vld [vmem:[#allocation9 + $0x2e0] sm:$0xff] }
  0x7b   :  { %2127 = vmatpush.bf16.msra.mxu3 %v1938_v57  ;;  %v1470_v1 = vcvt.s32.f32 %v958_v59  ;;  %v1474_v2 = vcvt.s32.f32 %v962_v60  ;;  %v814_v3 = vunpack.c.0.s8 %v674_v35  ;;  %v818_v5 = vunpack.c.1.s8 %v674_v35  ;;  %v702_v59 = vld [vmem:[#allocation9 + $0x100] sm:$0xff] }
  0x7c   :  { %2090 = vmatpush.bf16.msra.mxu0 %v1834_v61  ;;  %v1866_v7 = vpack.c.bf16 %v1402_v62, %v1398_v58  ;;  %v1534_v8 = vcvt.s32.f32 %v1022_v63  ;;  %v1538_v9 = vcvt.s32.f32 %v1026_v0  ;;  %v878_v10 = vunpack.c.0.s8 %v690_v40  ;;  %v718_v0 = vld [vmem:[#allocation9 + $0x180] sm:$0xff] }
  0x7d   :  { %v1902_v12 = vpack.c.bf16 %v1474_v2, %v1470_v1  ;;  %v1326_v13 = vcvt.s32.f32 %v814_v3  ;;  %v1330_v14 = vcvt.s32.f32 %v818_v5  ;;  %v882_v15 = vunpack.c.1.s8 %v690_v40 }
  0x7e   :  { %2103 = vmatpush.bf16.msra.mxu1 %v1866_v7  ;;  %v1934_v17 = vpack.c.bf16 %v1538_v9, %v1534_v8  ;;  %v1390_v18 = vcvt.s32.f32 %v878_v10  ;;  %v950_v19 = vunpack.c.2.s8 %v706_v6  ;;  %v954_v20 = vunpack.c.3.s8 %v706_v6 }
  0x7f   :  { %2115 = vmatpush.bf16.msra.mxu2 %v1902_v12  ;;  %v1830_v4 = vpack.c.bf16 %v1330_v14, %v1326_v13  ;;  %v1394_v22 = vcvt.s32.f32 %v882_v15  ;;  %v1014_v23 = vunpack.c.2.s8 %v722_v11  ;;  %v1018_v24 = vunpack.c.3.s8 %v722_v11 }
  0x80   :  { %2128 = vmatpush.bf16.msra.mxu3 %v1934_v17  ;;  %v1462_v25 = vcvt.s32.f32 %v950_v19  ;;  %v1466_v26 = vcvt.s32.f32 %v954_v20  ;;  %v806_v27 = vunpack.c.2.s8 %v670_v16  ;;  %v810_v28 = vunpack.c.3.s8 %v670_v16 }
  0x81   :  { %2091 = vmatpush.bf16.msra.mxu0 %v1830_v4  ;;  %v1862_v29 = vpack.c.bf16 %v1394_v22, %v1390_v18  ;;  %v1526_v30 = vcvt.s32.f32 %v1014_v23  ;;  %v1530_v31 = vcvt.s32.f32 %v1018_v24  ;;  %v870_v32 = vunpack.c.2.s8 %v686_v21 }
  0x82   :  { %v1898_v33 = vpack.c.bf16 %v1466_v26, %v1462_v25  ;;  %v1318_v34 = vcvt.s32.f32 %v806_v27  ;;  %v1322_v35 = vcvt.s32.f32 %v810_v28  ;;  %v874_v36 = vunpack.c.3.s8 %v686_v21 }
  0x83   :  { %2104 = vmatpush.bf16.msra.mxu1 %v1862_v29  ;;  %v1930_v37 = vpack.c.bf16 %v1530_v31, %v1526_v30  ;;  %v1382_v38 = vcvt.s32.f32 %v870_v32  ;;  %v942_v39 = vunpack.c.0.s8 %v706_v6  ;;  %v946_v40 = vunpack.c.1.s8 %v706_v6  ;;  %v778_v29 = vld [vmem:[#allocation9 + $0x360] sm:$0xff] }
  0x84   :  { %2116 = vmatpush.bf16.msra.mxu2 %v1898_v33  ;;  %v1826_v41 = vpack.c.bf16 %v1322_v35, %v1318_v34  ;;  %v1386_v42 = vcvt.s32.f32 %v874_v36  ;;  %v1006_v43 = vunpack.c.0.s8 %v722_v11  ;;  %v1010_v44 = vunpack.c.1.s8 %v722_v11  ;;  %v794_v34 = vld [vmem:[#allocation9 + $0x3e0] sm:$0xff] }
  0x85   :  { %2129 = vmatpush.bf16.msra.mxu3 %v1930_v37  ;;  %v1454_v45 = vcvt.s32.f32 %v942_v39  ;;  %v1458_v46 = vcvt.s32.f32 %v946_v40  ;;  %v798_v47 = vunpack.c.0.s8 %v670_v16  ;;  %v802_v48 = vunpack.c.1.s8 %v670_v16  ;;  %v742_v39 = vld [vmem:[#allocation9 + $0x240] sm:$0xff] }
  0x86   :  { %2092 = vmatpush.bf16.msra.mxu0 %v1826_v41  ;;  %v1858_v50 = vpack.c.bf16 %v1386_v42, %v1382_v38  ;;  %v1518_v51 = vcvt.s32.f32 %v1006_v43  ;;  %v1522_v52 = vcvt.s32.f32 %v1010_v44  ;;  %v862_v53 = vunpack.c.0.s8 %v686_v21  ;;  %v758_v44 = vld [vmem:[#allocation9 + $0x2c0] sm:$0xff] }
  0x87   :  { %v1894_v55 = vpack.c.bf16 %v1458_v46, %v1454_v45  ;;  %v1310_v56 = vcvt.s32.f32 %v798_v47  ;;  %v1314_v57 = vcvt.s32.f32 %v802_v48  ;;  %v866_v58 = vunpack.c.1.s8 %v686_v21 }
  0x88   :  { %2105 = vmatpush.bf16.msra.mxu1 %v1858_v50  ;;  %v1926_v60 = vpack.c.bf16 %v1522_v52, %v1518_v51  ;;  %v1374_v61 = vcvt.s32.f32 %v862_v53  ;;  %v1110_v62 = vunpack.c.2.s8 %v746_v49  ;;  %v1114_v63 = vunpack.c.3.s8 %v746_v49 }
  0x89   :  { %2117 = vmatpush.bf16.msra.mxu2 %v1894_v55  ;;  %v1822_v1 = vpack.c.bf16 %v1314_v57, %v1310_v56  ;;  %v1378_v2 = vcvt.s32.f32 %v866_v58  ;;  %v1174_v3 = vunpack.c.2.s8 %v762_v54  ;;  %v1178_v5 = vunpack.c.3.s8 %v762_v54 }
  0x8a   :  { %2130 = vmatpush.bf16.msra.mxu3 %v1926_v60  ;;  %v1622_v6 = vcvt.s32.f32 %v1110_v62  ;;  %v1626_v7 = vcvt.s32.f32 %v1114_v63  ;;  %v934_v8 = vunpack.c.2.s8 %v702_v59  ;;  %v938_v9 = vunpack.c.3.s8 %v702_v59 }
  0x8b   :  { %2093 = vmatpush.bf16.msra.mxu0 %v1822_v1  ;;  %v1854_v10 = vpack.c.bf16 %v1378_v2, %v1374_v61  ;;  %v1686_v11 = vcvt.s32.f32 %v1174_v3  ;;  %v1690_v12 = vcvt.s32.f32 %v1178_v5  ;;  %v998_v13 = vunpack.c.2.s8 %v718_v0 }
  0x8c   :  { %v1978_v14 = vpack.c.bf16 %v1626_v7, %v1622_v6  ;;  %v1446_v15 = vcvt.s32.f32 %v934_v8  ;;  %v1450_v16 = vcvt.s32.f32 %v938_v9  ;;  %v1002_v17 = vunpack.c.3.s8 %v718_v0 }
  0x8d   :  { %2106 = vmatpush.bf16.msra.mxu1 %v1854_v10  ;;  %v2010_v18 = vpack.c.bf16 %v1690_v12, %v1686_v11  ;;  %v1510_v19 = vcvt.s32.f32 %v998_v13  ;;  %v1102_v20 = vunpack.c.0.s8 %v746_v49  ;;  %v1106_v21 = vunpack.c.1.s8 %v746_v49  ;;  %v774_v10 = vld [vmem:[#allocation9 + $0x340] sm:$0xff] }
  0x8e   :  { %v1890_v4 = vpack.c.bf16 %v1450_v16, %v1446_v15  ;;  %v1514_v22 = vcvt.s32.f32 %v1002_v17  ;;  %v1166_v23 = vunpack.c.0.s8 %v762_v54  ;;  %v1170_v24 = vunpack.c.1.s8 %v762_v54  ;;  %v790_v15 = vld [vmem:[#allocation9 + $0x3c0] sm:$0xff] }
  0x8f   :  { %2138 = vmatpush.bf16.msrb.mxu0 %v1978_v14  ;;  %v1614_v25 = vcvt.s32.f32 %v1102_v20  ;;  %v1618_v26 = vcvt.s32.f32 %v1106_v21  ;;  %v926_v27 = vunpack.c.0.s8 %v702_v59  ;;  %v930_v28 = vunpack.c.1.s8 %v702_v59  ;;  %v6546_v20 = vld [vmem:[#allocation9 + $0x220] sm:$0xff] }
  0x90   :  { %2118 = vmatpush.bf16.msra.mxu2 %v1890_v4  ;;  %v1922_v30 = vpack.c.bf16 %v1514_v22, %v1510_v19  ;;  %v1678_v31 = vcvt.s32.f32 %v1166_v23  ;;  %v1682_v32 = vcvt.s32.f32 %v1170_v24  ;;  %v990_v33 = vunpack.c.0.s8 %v718_v0  ;;  %v754_v24 = vld [vmem:[#allocation9 + $0x2a0] sm:$0xff] }
  0x91   :  { %2151 = vmatpush.bf16.msrb.mxu1 %v2010_v18  ;;  %v1974_v35 = vpack.c.bf16 %v1618_v26, %v1614_v25  ;;  %v1438_v36 = vcvt.s32.f32 %v926_v27  ;;  %v1442_v37 = vcvt.s32.f32 %v930_v28  ;;  %v994_v38 = vunpack.c.1.s8 %v718_v0 }
  0x92   :  { %2131 = vmatpush.bf16.msra.mxu3 %v1922_v30  ;;  %v2006_v40 = vpack.c.bf16 %v1682_v32, %v1678_v31  ;;  %v1502_v41 = vcvt.s32.f32 %v990_v33  ;;  %v1238_v42 = vunpack.c.2.s8 %v778_v29  ;;  %v1242_v43 = vunpack.c.3.s8 %v778_v29 }
  0x93   :  { %2139 = vmatpush.bf16.msrb.mxu0 %v1974_v35  ;;  %v1886_v45 = vpack.c.bf16 %v1442_v37, %v1438_v36  ;;  %v1506_v46 = vcvt.s32.f32 %v994_v38  ;;  %v1302_v47 = vunpack.c.2.s8 %v794_v34  ;;  %v1306_v48 = vunpack.c.3.s8 %v794_v34 }
  0x94   :  { %v1750_v49 = vcvt.s32.f32 %v1238_v42  ;;  %v1754_v50 = vcvt.s32.f32 %v1242_v43  ;;  %v1094_v51 = vunpack.c.2.s8 %v742_v39  ;;  %v1098_v52 = vunpack.c.3.s8 %v742_v39  ;;  %v149_v42 = vld [vmem:[#allocation12 + $0x42] ss:$8 sm:$0xf0] }
  0x95   :  { %2152 = vmatpush.bf16.msrb.mxu1 %v2006_v40  ;;  %2119 = vmatpush.bf16.msra.mxu2 %v1886_v45  ;;  %v1918_v53 = vpack.c.bf16 %v1506_v46, %v1502_v41  ;;  %v1814_v54 = vcvt.s32.f32 %v1302_v47  ;;  %v1818_v55 = vcvt.s32.f32 %v1306_v48  ;;  %v1158_v56 = vunpack.c.2.s8 %v758_v44  ;;  %v148_v41 = vld [vmem:[#allocation12 + $0x42] ss:$8 sm:$0xf]  ;;  %v144_v47 = vld [vmem:[#allocation12] ss:$8 sm:$0xf] }
  0x96   :  { %v2042_v57 = vpack.c.bf16 %v1754_v50, %v1750_v49  ;;  %v1606_v58 = vcvt.s32.f32 %v1094_v51  ;;  %v1610_v59 = vcvt.s32.f32 %v1098_v52  ;;  %v1162_v60 = vunpack.c.3.s8 %v758_v44  ;;  %v145_v48 = vld [vmem:[#allocation12] ss:$8 sm:$0xf0] }
  0x97   :  { %2132 = vmatpush.bf16.msra.mxu3 %v1918_v53  ;;  %v2074_v61 = vpack.c.bf16 %v1818_v55, %v1814_v54  ;;  %v1670_v62 = vcvt.s32.f32 %v1158_v56  ;;  %v1230_v63 = vunpack.c.0.s8 %v778_v29  ;;  %v1234_v0 = vunpack.c.1.s8 %v778_v29 }
  0x98   :  { %v1970_v1 = vpack.c.bf16 %v1610_v59, %v1606_v58  ;;  %v1674_v2 = vcvt.s32.f32 %v1162_v60  ;;  %v1294_v3 = vunpack.c.0.s8 %v794_v34  ;;  %v1298_v5 = vunpack.c.1.s8 %v794_v34 }
  0x99   :  { %2164 = vmatpush.bf16.msrb.mxu2 %v2042_v57  ;;  %v1742_v6 = vcvt.s32.f32 %v1230_v63  ;;  %v1746_v7 = vcvt.s32.f32 %v1234_v0  ;;  %v1086_v8 = vunpack.c.0.s8 %v742_v39  ;;  %v1090_v9 = vunpack.c.1.s8 %v742_v39 }
  0x9a   :  { %2140 = vmatpush.bf16.msrb.mxu0 %v1970_v1  ;;  %v2002_v11 = vpack.c.bf16 %v1674_v2, %v1670_v62  ;;  %v1806_v12 = vcvt.s32.f32 %v1294_v3  ;;  %v1810_v13 = vcvt.s32.f32 %v1298_v5  ;;  %v1150_v14 = vunpack.c.0.s8 %v758_v44 }
  0x9b   :  { %2177 = vmatpush.bf16.msrb.mxu3 %v2074_v61  ;;  %v2038_v16 = vpack.c.bf16 %v1746_v7, %v1742_v6  ;;  %v1598_v17 = vcvt.s32.f32 %v1086_v8  ;;  %v1602_v18 = vcvt.s32.f32 %v1090_v9  ;;  %v1154_v19 = vunpack.c.1.s8 %v758_v44  ;;  %v770_v7 = vld [vmem:[#allocation9 + $0x320] sm:$0xff] }
  0x9c   :  { %2153 = vmatpush.bf16.msrb.mxu1 %v2002_v11  ;;  %v2070_v21 = vpack.c.bf16 %v1810_v13, %v1806_v12  ;;  %v1662_v4 = vcvt.s32.f32 %v1150_v14  ;;  %v1222_v22 = vunpack.c.2.s8 %v774_v10  ;;  %v1226_v23 = vunpack.c.3.s8 %v774_v10  ;;  %v786_v8 = vld [vmem:[#allocation9 + $0x3a0] sm:$0xff] }
  0x9d   :  { %2165 = vmatpush.bf16.msrb.mxu2 %v2038_v16  ;;  %v1966_v25 = vpack.c.bf16 %v1602_v18, %v1598_v17  ;;  %v1666_v26 = vcvt.s32.f32 %v1154_v19  ;;  %v1286_v27 = vunpack.c.2.s8 %v790_v15  ;;  %v1290_v28 = vunpack.c.3.s8 %v790_v15  ;;  %v734_v9 = vld [vmem:[#allocation9 + $0x200] sm:$0xff] }
  0x9e   :  { %v1734_v29 = vcvt.s32.f32 %v1222_v22  ;;  %v1738_v30 = vcvt.s32.f32 %v1226_v23  ;;  %v1078_v31 = vunpack.c.2.s8 %v6546_v20  ;;  %v1082_v32 = vunpack.c.3.s8 %v6546_v20  ;;  %v750_v18 = vld [vmem:[#allocation9 + $0x280] sm:$0xff] }
  0x9f   :  { %2178 = vmatpush.bf16.msrb.mxu3 %v2070_v21  ;;  %2141 = vmatpush.bf16.msrb.mxu0 %v1966_v25  ;;  %v1998_v33 = vpack.c.bf16 %v1666_v26, %v1662_v4  ;;  %v1798_v34 = vcvt.s32.f32 %v1286_v27  ;;  %v1802_v35 = vcvt.s32.f32 %v1290_v28  ;;  %v1142_v36 = vunpack.c.2.s8 %v754_v24 }
  0xa0   :  { %v2034_v37 = vpack.c.bf16 %v1738_v30, %v1734_v29  ;;  %v1590_v38 = vcvt.s32.f32 %v1078_v31  ;;  %v1594_v39 = vcvt.s32.f32 %v1082_v32  ;;  %v1146_v40 = vunpack.c.3.s8 %v754_v24 }
  0xa1   :  { %2154 = vmatpush.bf16.msrb.mxu1 %v1998_v33  ;;  %v2066_v43 = vpack.c.bf16 %v1802_v35, %v1798_v34  ;;  %v1654_v44 = vcvt.s32.f32 %v1142_v36  ;;  %v1214_v45 = vunpack.c.0.s8 %v774_v10  ;;  %v1218_v46 = vunpack.c.1.s8 %v774_v10 }
  0xa2   :  { %2166 = vmatpush.bf16.msrb.mxu2 %v2034_v37  ;;  %v1962_v49 = vpack.c.bf16 %v1594_v39, %v1590_v38  ;;  %v1658_v50 = vcvt.s32.f32 %v1146_v40  ;;  %v1278_v51 = vunpack.c.0.s8 %v790_v15  ;;  %v1282_v52 = vunpack.c.1.s8 %v790_v15 }
  0xa3   :  { %2179 = vmatpush.bf16.msrb.mxu3 %v2066_v43  ;;  %v1726_v53 = vcvt.s32.f32 %v1214_v45  ;;  %v1730_v54 = vcvt.s32.f32 %v1218_v46  ;;  %v6550_v55 = vor.u32 %v149_v42, %v148_v41  ;;  %v6552_v59 = vor.u32 %v145_v48, %v144_v47  ;;  %v683_v42 = vld [vmem:[#allocation9 + $0x68] sm:$0xff] }
  0xa4   :  { %2142 = vmatpush.bf16.msrb.mxu0 %v1962_v49  ;;  %v1994_v56 = vpack.c.bf16 %v1658_v50, %v1654_v44  ;;  %v1790_v57 = vcvt.s32.f32 %v1278_v51  ;;  %v1794_v58 = vcvt.s32.f32 %v1282_v52  ;;  %v1070_v63 = vunpack.c.0.s8 %v6546_v20  ;;  %v699_v51 = vld [vmem:[#allocation9 + $0xe8] sm:$0xff] }
  0xa5   :  { %v2030_v60 = vpack.c.bf16 %v1730_v54, %v1726_v53  ;;  %v609_v62 = vperm.slane %v6550_v55, 0  ;;  %v1074_v0 = vunpack.c.1.s8 %v6546_v20  ;;  %v1134_v1 = vunpack.c.0.s8 %v754_v24 }
  0xa6   :  { %2155 = vmatpush.bf16.msrb.mxu1 %v1994_v56  ;;  %v2062_v61 = vpack.c.bf16 %v1794_v58, %v1790_v57  ;;  %v1138_v2 = vunpack.c.1.s8 %v754_v24  ;;  %v634_v3 = vperm.slane %v6552_v59, 0  ;;  %v610_v5 = vperm.slane %v6550_v55, 1  ;;  %v766_v57 = vld [vmem:[#allocation9 + $0x300] sm:$0xff] }
  0xa7   :  { %2167 = vmatpush.bf16.msrb.mxu2 %v2030_v60  ;;  %v635_v6 = vperm.slane %v6552_v59, 1  ;;  %v1582_v10 = vcvt.s32.f32 %v1070_v63  ;;  %v1586_v11 = vcvt.s32.f32 %v1074_v0  ;;  %v1646_v12 = vcvt.s32.f32 %v1134_v1  ;;  %v782_v0 = vld [vmem:[#allocation9 + $0x380] sm:$0xff] }
  0xa8   :  { %2180 = vmatpush.bf16.msrb.mxu3 %v2062_v61  ;;  %v1650_v13 = vcvt.s32.f32 %v1138_v2  ;;  %v1206_v14 = vunpack.c.2.s8 %v770_v7  ;;  %v1210_v15 = vunpack.c.3.s8 %v770_v7  ;;  %v1270_v16 = vunpack.c.2.s8 %v786_v8 }
  0xa9   :  { %v1274_v17 = vunpack.c.3.s8 %v786_v8  ;;  %v1958_v19 = vpack.c.bf16 %v1586_v11, %v1582_v10  ;;  %v1062_v21 = vunpack.c.2.s8 %v734_v9  ;;  %v1066_v4 = vunpack.c.3.s8 %v734_v9 }
  0xaa   :  { %v1990_v20 = vpack.c.bf16 %v1650_v13, %v1646_v12  ;;  %v1718_v22 = vcvt.s32.f32 %v1206_v14  ;;  %v1722_v23 = vcvt.s32.f32 %v1210_v15  ;;  %v1782_v24 = vcvt.s32.f32 %v1270_v16 }
  0xab   :  { %v1786_v25 = vcvt.s32.f32 %v1274_v17  ;;  %2143 = vmatpush.bf16.msrb.mxu0 %v1958_v19  ;;  %v1574_v26 = vcvt.s32.f32 %v1062_v21  ;;  %v1578_v27 = vcvt.s32.f32 %v1066_v4  ;;  %v1126_v28 = vunpack.c.2.s8 %v750_v18 }
  0xac   :  { %2156 = vmatpush.bf16.msrb.mxu1 %v1990_v20  ;;  %v1130_v29 = vunpack.c.3.s8 %v750_v18  ;;  %v2026_v30 = vpack.c.bf16 %v1722_v23, %v1718_v22  ;;  %v611_v32 = vperm.slane %v6550_v55, 2  ;;  %v636_v33 = vperm.slane %v6552_v59, 2 }
  0xad   :  { %v2058_v31 = vpack.c.bf16 %v1786_v25, %v1782_v24  ;;  %v1954_v34 = vpack.c.bf16 %v1578_v27, %v1574_v26  ;;  %v1638_v35 = vcvt.s32.f32 %v1126_v28  ;;  %v1198_v37 = vunpack.c.0.s8 %v770_v7 }
  0xae   :  { %v1642_v36 = vcvt.s32.f32 %v1130_v29  ;;  %2168 = vmatpush.bf16.msrb.mxu2 %v2026_v30  ;;  %v612_v38 = vperm.slane %v6550_v55, 3  ;;  %v637_v39 = vperm.slane %v6552_v59, 3  ;;  %v1202_v40 = vunpack.c.1.s8 %v770_v7 }
  0xaf   :  { %2181 = vmatpush.bf16.msrb.mxu3 %v2058_v31  ;;  %v1262_v41 = vunpack.c.0.s8 %v786_v8  ;;  %2144 = vmatpush.bf16.msrb.mxu0 %v1954_v34  ;;  %v1710_v44 = vcvt.s32.f32 %v1198_v37  ;;  %v1266_v45 = vunpack.c.1.s8 %v786_v8  ;;  %v1054_v46 = vunpack.c.0.s8 %v734_v9  ;;  %v715_v34 = vld [vmem:[#allocation9 + $0x168] sm:$0xff] }
  0xb0   :  { %v1986_v43 = vpack.c.bf16 %v1642_v36, %v1638_v35  ;;  %v1714_v47 = vcvt.s32.f32 %v1202_v40  ;;  %v1058_v49 = vunpack.c.1.s8 %v734_v9  ;;  %v1118_v50 = vunpack.c.0.s8 %v750_v18 }
  0xb1   :  { %v1774_v48 = vcvt.s32.f32 %v1262_v41  ;;  %v1778_v52 = vcvt.s32.f32 %v1266_v45  ;;  %v1566_v53 = vcvt.s32.f32 %v1054_v46  ;;  %v1122_v54 = vunpack.c.1.s8 %v750_v18  ;;  %v6584_v41 = vld [vmem:[#allocation9 + $0x1e8] sm:$0xff] }
  0xb2   :  { %2157 = vmatpush.bf16.msrb.mxu1 %v1986_v43  ;;  %v855_v56 = vunpack.c.2.s8 %v683_v42  ;;  %v2022_v58 = vpack.c.bf16 %v1714_v47, %v1710_v44  ;;  %v1570_v60 = vcvt.s32.f32 %v1058_v49  ;;  %v1630_v61 = vcvt.s32.f32 %v1118_v50  ;;  %v6588_v46 = vld [vmem:[#allocation9 + $0x48] sm:$0xff] }
  0xb3   :  { %v859_v63 = vunpack.c.3.s8 %v683_v42  ;;  %v2054_v1 = vpack.c.bf16 %v1778_v52, %v1774_v48  ;;  %v1634_v2 = vcvt.s32.f32 %v1122_v54  ;;  %v919_v8 = vunpack.c.2.s8 %v699_v51 }
  0xb4   :  { %v6564_v7 = vcvt.s32.f32 %v855_v56  ;;  %2169 = vmatpush.bf16.msrb.mxu2 %v2022_v58  ;;  %v1950_v9 = vpack.c.bf16 %v1570_v60, %v1566_v53  ;;  %v923_v11 = vunpack.c.3.s8 %v699_v51  ;;  %v1190_v12 = vunpack.c.2.s8 %v766_v57 }
  0xb5   :  { %v6566_v10 = vcvt.s32.f32 %v859_v63  ;;  %2182 = vmatpush.bf16.msrb.mxu3 %v2054_v1  ;;  %v1982_v13 = vpack.c.bf16 %v1634_v2, %v1630_v61  ;;  %v6568_v14 = vcvt.s32.f32 %v919_v8  ;;  %v1194_v15 = vunpack.c.3.s8 %v766_v57  ;;  %v695_v63 = vld [vmem:[#allocation9 + $0xc8] sm:$0xff] }
  0xb6   :  { %v1254_v16 = vunpack.c.2.s8 %v782_v0  ;;  %2145 = vmatpush.bf16.msrb.mxu0 %v1950_v9  ;;  %v6572_v18 = vcvt.s32.f32 %v923_v11  ;;  %v1702_v19 = vcvt.s32.f32 %v1190_v12  ;;  %v1258_v20 = vunpack.c.3.s8 %v782_v0 }
  0xb7   :  { %v1851_v17 = vpack.c.bf16 %v6566_v10, %v6564_v7  ;;  %2158 = vmatpush.bf16.msrb.mxu1 %v1982_v13  ;;  %v1706_v21 = vcvt.s32.f32 %v1194_v15  ;;  %v847_v22 = vunpack.c.0.s8 %v683_v42  ;;  %v851_v23 = vunpack.c.1.s8 %v683_v42  ;;  %v6682_v7 = vld [vmem:[#allocation9 + $0xa8] sm:$0xff] }
  0xb8   :  { %v1766_v4 = vcvt.s32.f32 %v1254_v16  ;;  %v1883_v24 = vpack.c.bf16 %v6572_v18, %v6568_v14  ;;  %v1770_v25 = vcvt.s32.f32 %v1258_v20  ;;  %v911_v26 = vunpack.c.0.s8 %v699_v51  ;;  %v6673_v18 = vld [vmem:[#allocation9 + $0x28] sm:$0xff] }
  0xb9   :  { %v915_v27 = vunpack.c.1.s8 %v699_v51  ;;  %v2018_v28 = vpack.c.bf16 %v1706_v21, %v1702_v19  ;;  %v6576_v29 = vcvt.s32.f32 %v847_v22  ;;  %v6578_v30 = vcvt.s32.f32 %v851_v23 }
  0xba   :  { %v1182_v31 = vunpack.c.0.s8 %v766_v57  ;;  %v2050_v35 = vpack.c.bf16 %v1770_v25, %v1766_v4  ;;  %v6580_v36 = vcvt.s32.f32 %v911_v26  ;;  %v1186_v40 = vunpack.c.1.s8 %v766_v57 }
  0xbb   :  { %v6582_v37 = vcvt.s32.f32 %v915_v27  ;;  %2170 = vmatpush.bf16.msrb.mxu2 %v2018_v28  ;;  %v1847_v42 = vpack.c.bf16 %v6578_v30, %v6576_v29  ;;  %v1246_v44 = vunpack.c.0.s8 %v782_v0  ;;  %v1250_v45 = vunpack.c.1.s8 %v782_v0 }
  0xbc   :  { %v1694_v43 = vcvt.s32.f32 %v1182_v31  ;;  %2183 = vmatpush.bf16.msrb.mxu3 %v2050_v35  ;;  %v1698_v48 = vcvt.s32.f32 %v1186_v40  ;;  %v983_v49 = vunpack.c.2.s8 %v715_v34  ;;  %v987_v50 = vunpack.c.3.s8 %v715_v34 }
  0xbd   :  { %v1879_v47 = vpack.c.bf16 %v6582_v37, %v6580_v36  ;;  %v1758_v51 = vcvt.s32.f32 %v1246_v44  ;;  %v1762_v52 = vcvt.s32.f32 %v1250_v45  ;;  %v1047_v53 = vunpack.c.2.s8 %v6584_v41  ;;  %v6638_v44 = vld [vmem:[#allocation9 + $0x148] sm:$0xff] }
  0xbe   :  { %v1051_v54 = vunpack.c.3.s8 %v6584_v41  ;;  %v2014_v57 = vpack.c.bf16 %v1698_v48, %v1694_v43  ;;  %v6594_v58 = vcvt.s32.f32 %v983_v49  ;;  %v6596_v60 = vcvt.s32.f32 %v987_v50 }
  0xbf   :  { %v839_v61 = vunpack.c.2.s8 %v6588_v46  ;;  %v2046_v2 = vpack.c.bf16 %v1762_v52, %v1758_v51  ;;  %v6601_v8 = vcvt.s32.f32 %v1047_v53  ;;  %v843_v13 = vunpack.c.3.s8 %v6588_v46 }
  0xc0   :  { %v526_v56 = vpop.f32.mrf.mxu1  ;;  %v6603_v9 = vcvt.s32.f32 %v1051_v54  ;;  %2171 = vmatpush.bf16.msrb.mxu2 %v2014_v57  ;;  %v1915_v12 = vpack.c.bf16 %v6596_v60, %v6594_v58  ;;  %v903_v19 = vunpack.c.2.s8 %v695_v63  ;;  %v907_v20 = vunpack.c.3.s8 %v695_v63  ;;  %v707_v60 = vld [vmem:[#allocation9 + $0x128] sm:$0xff] }
  0xc1   :  { %v513_v0 = vpop.f32.mrf.mxu0  ;;  %v626_v1 = vmul.f32 %v610_v5, %v526_v56  ;;  %v6610_v15 = vcvt.s32.f32 %v839_v61  ;;  %2184 = vmatpush.bf16.msrb.mxu3 %v2046_v2  ;;  %v6618_v21 = vcvt.s32.f32 %v843_v13  ;;  %v975_v4 = vunpack.c.0.s8 %v715_v34  ;;  %v727_v2 = vld [vmem:[#allocation9 + $0x1c8] sm:$0xff] }
  0xc2   :  { %v625_v11 = vmul.f32 %v609_v62, %v513_v0  ;;  %v1947_v5 = vpack.c.bf16 %v6603_v9, %v6601_v8  ;;  %v979_v22 = vunpack.c.1.s8 %v715_v34  ;;  %v6620_v25 = vcvt.s32.f32 %v903_v19 }
  0xc3   :  { %v651_v16 = vadd.f32 %v635_v6, %v626_v1  ;;  %v6622_v26 = vcvt.s32.f32 %v907_v20  ;;  %v1039_v6 = vunpack.c.0.s8 %v6584_v41  ;;  %v1843_v28 = vpack.c.bf16 %v6618_v21, %v6610_v15 }
  0xc4   :  { %v650_v62 = vadd.f32 %v634_v3, %v625_v11  ;;  %v6627_v31 = vcvt.s32.f32 %v975_v4  ;;  %v6629_v35 = vcvt.s32.f32 %v979_v22  ;;  %v1043_v40 = vunpack.c.1.s8 %v6584_v41 }
  0xc5   :  { %v659_v23 = vmax.f32 %v651_v16, 0.0  ;;  %v1875_v34 = vpack.c.bf16 %v6622_v26, %v6620_v25  ;;  %v6636_v43 = vcvt.s32.f32 %v1039_v6  ;;  %v831_v51 = vunpack.c.0.s8 %v6588_v46 }
  0xc6   :  { %v658_v27 = vmax.f32 %v650_v62, 0.0  ;;  %v1911_v50 = vpack.c.bf16 %v6629_v35, %v6627_v31  ;;  %v835_v52 = vunpack.c.1.s8 %v6588_v46  ;;  %v6649_v56 = vcvt.s32.f32 %v1043_v40 }
  0xc7   :  { %v6631_v3 = vpack.c.bf16 %v659_v23, %v659_v23  ;;  %v895_v57 = vunpack.c.0.s8 %v695_v63  ;;  %v899_v61 = vunpack.c.1.s8 %v695_v63  ;;  %v6657_v46 = vcvt.s32.f32 %v831_v51 }
  0xc8   :  { %v6640_v45 = vpack.c.bf16 %v658_v27, %v658_v27  ;;  %v552_v48 = vpop.f32.mrf.mxu3  ;;  %v528_v49 = vpop.f32.mrf.mxu1  ;;  %v6659_v1 = vcvt.s32.f32 %v835_v52  ;;  %v1031_v19 = vunpack.c.2.s8 %v727_v2  ;;  %v1035_v20 = vunpack.c.3.s8 %v727_v2 }
  0xc9   :  { %v539_v53 = vpop.f32.mrf.mxu2  ;;  %v628_v54 = vmul.f32 %v612_v38, %v552_v48  ;;  %v515_v41 = vpop.f32.mrf.mxu0  ;;  %2107 = vmatmul.bf16.vlgmr.msra.gmra.mxu1 %v6631_v3  ;;  %v967_v38 = vunpack.c.2.s8 %v6638_v44  ;;  %v6669_v63 = vcvt.s32.f32 %v895_v57  ;;  %v6671_v14 = vcvt.s32.f32 %v899_v61 }
  0xca   :  { %v627_v0 = vmul.f32 %v611_v32, %v539_v53  ;;  %2094 = vmatmul.bf16.vlgmr.msra.gmra.mxu0 %v6640_v45  ;;  %2203 = vmatpush.bf16.msra.mxu1 %v1883_v24  ;;  %v1943_v32 = vpack.c.bf16 %v6649_v56, %v6636_v43  ;;  %v1839_v13 = vpack.c.bf16 %v6659_v1, %v6657_v46  ;;  %v823_v4 = vunpack.c.2.s8 %v6673_v18 }
  0xcb   :  { %v653_v11 = vadd.f32 %v637_v39, %v628_v54  ;;  %2190 = vmatpush.bf16.msra.mxu0 %v1851_v17  ;;  %v971_v39 = vunpack.c.3.s8 %v6638_v44  ;;  %v6680_v16 = vcvt.s32.f32 %v967_v38  ;;  %v1871_v17 = vpack.c.bf16 %v6671_v14, %v6669_v63 }
  0xcc   :  { %v652_v24 = vadd.f32 %v636_v33, %v627_v0  ;;  %v827_v22 = vunpack.c.3.s8 %v6673_v18  ;;  %v1543_v6 = vcvt.s32.f32 %v1031_v19  ;;  %v1547_v27 = vcvt.s32.f32 %v1035_v20  ;;  %v723_v0 = vld [vmem:[#allocation9 + $0x1a8] sm:$0xff] }
  0xcd   :  { %v661_v10 = vmax.f32 %v653_v11, 0.0  ;;  %v6689_v33 = vcvt.s32.f32 %v971_v39  ;;  %v887_v40 = vunpack.c.2.s8 %v6682_v7  ;;  %v891_v52 = vunpack.c.3.s8 %v6682_v7  ;;  %v687_v39 = vld [vmem:[#allocation9 + $0x88] sm:$0xff] }
  0xce   :  { %v660_v62 = vmax.f32 %v652_v24, 0.0  ;;  %2204 = vmatpush.bf16.msra.mxu1 %v1879_v47  ;;  %v1335_v47 = vcvt.s32.f32 %v823_v4  ;;  %v1339_v48 = vcvt.s32.f32 %v827_v22  ;;  %v1939_v51 = vpack.c.bf16 %v1547_v27, %v1543_v6 }
  0xcf   :  { %v6693_v23 = vpack.c.bf16 %v661_v10, %v661_v10  ;;  %2191 = vmatpush.bf16.msra.mxu0 %v1847_v42  ;;  %v1907_v37 = vpack.c.bf16 %v6689_v33, %v6680_v16  ;;  %v1399_v29 = vcvt.s32.f32 %v887_v40  ;;  %v959_v30 = vunpack.c.0.s8 %v6638_v44 }
  0xd0   :  { %v6699_v43 = vpack.c.bf16 %v660_v62, %v660_v62  ;;  %v554_v36 = vpop.f32.mrf.mxu3  ;;  %v1835_v42 = vpack.c.bf16 %v1339_v48, %v1335_v47  ;;  %v963_v53 = vunpack.c.1.s8 %v6638_v44  ;;  %v1023_v54 = vunpack.c.0.s8 %v727_v2 }
  0xd1   :  { %v541_v49 = vpop.f32.mrf.mxu2  ;;  %2133 = vmatmul.bf16.vlgmr.msra.gmra.mxu3 %v6693_v23  ;;  %v1027_v41 = vunpack.c.1.s8 %v727_v2  ;;  %v1403_v56 = vcvt.s32.f32 %v891_v52  ;;  %v1471_v57 = vcvt.s32.f32 %v959_v30  ;;  %v613_v61 = vperm.slane %v6550_v55, 4 }
  0xd2   :  { %2120 = vmatmul.bf16.vlgmr.msra.gmra.mxu2 %v6699_v43  ;;  %2229 = vmatpush.bf16.msra.mxu3 %v1947_v5  ;;  %v638_v8 = vperm.slane %v6552_v59, 4  ;;  %v1475_v9 = vcvt.s32.f32 %v963_v53  ;;  %v1535_v5 = vcvt.s32.f32 %v1023_v54  ;;  %v614_v58 = vperm.slane %v6550_v55, 5  ;;  %v747_v54 = vld [vmem:[#allocation9 + $0x268] sm:$0xff] }
  0xd3   :  { %2216 = vmatpush.bf16.msra.mxu2 %v1915_v12  ;;  %2192 = vmatpush.bf16.msra.mxu0 %v1843_v28  ;;  %v1539_v44 = vcvt.s32.f32 %v1027_v41  ;;  %v1867_v12 = vpack.c.bf16 %v1403_v56, %v1399_v29  ;;  %v639_v15 = vperm.slane %v6552_v59, 5  ;;  %v815_v21 = vunpack.c.0.s8 %v6673_v18 }
  0xd4   :  { %2205 = vmatpush.bf16.msra.mxu1 %v1875_v34  ;;  %v819_v28 = vunpack.c.1.s8 %v6673_v18  ;;  %v1903_v46 = vpack.c.bf16 %v1475_v9, %v1471_v57  ;;  %v879_v25 = vunpack.c.0.s8 %v6682_v7  ;;  %v883_v26 = vunpack.c.1.s8 %v6682_v7  ;;  %v671_v34 = vld [vmem:[#allocation9 + $0x8] sm:$0xff] }
  0xd5   :  { %v1935_v1 = vpack.c.bf16 %v1539_v44, %v1535_v5  ;;  %v1327_v38 = vcvt.s32.f32 %v815_v21  ;;  %v951_v11 = vunpack.c.2.s8 %v707_v60  ;;  %v955_v63 = vunpack.c.3.s8 %v707_v60  ;;  %v763_v5 = vld [vmem:[#allocation9 + $0x2e8] sm:$0xff] }
  0xd6   :  { %2230 = vmatpush.bf16.msra.mxu3 %v1943_v32  ;;  %v1331_v2 = vcvt.s32.f32 %v819_v28  ;;  %v1391_v14 = vcvt.s32.f32 %v879_v25  ;;  %v1395_v18 = vcvt.s32.f32 %v883_v26  ;;  %v1015_v32 = vunpack.c.2.s8 %v723_v0 }
  0xd7   :  { %2217 = vmatpush.bf16.msra.mxu2 %v1911_v50  ;;  %2193 = vmatpush.bf16.msra.mxu0 %v1839_v13  ;;  %v1019_v24 = vunpack.c.3.s8 %v723_v0  ;;  %v1463_v10 = vcvt.s32.f32 %v951_v11  ;;  %v1467_v19 = vcvt.s32.f32 %v955_v63  ;;  %v807_v7 = vunpack.c.2.s8 %v671_v34 }
  0xd8   :  { %2206 = vmatpush.bf16.msra.mxu1 %v1871_v17  ;;  %v1831_v16 = vpack.c.bf16 %v1331_v2, %v1327_v38  ;;  %v1863_v20 = vpack.c.bf16 %v1395_v18, %v1391_v14  ;;  %v1527_v62 = vcvt.s32.f32 %v1015_v32  ;;  %v811_v35 = vunpack.c.3.s8 %v671_v34 }
  0xd9   :  { %v1531_v31 = vcvt.s32.f32 %v1019_v24  ;;  %v1899_v50 = vpack.c.bf16 %v1467_v19, %v1463_v10  ;;  %v1319_v13 = vcvt.s32.f32 %v807_v7  ;;  %v871_v33 = vunpack.c.2.s8 %v687_v39 }
  0xda   :  { %2231 = vmatpush.bf16.msra.mxu3 %v1939_v51  ;;  %v875_v17 = vunpack.c.3.s8 %v687_v39  ;;  %v1323_v22 = vcvt.s32.f32 %v811_v35  ;;  %v615_v6 = vperm.slane %v6550_v55, 6  ;;  %v640_v27 = vperm.slane %v6552_v59, 6 }
  0xdb   :  { %2218 = vmatpush.bf16.msra.mxu2 %v1907_v37  ;;  %2194 = vmatpush.bf16.msra.mxu0 %v1835_v42  ;;  %v1931_v4 = vpack.c.bf16 %v1531_v31, %v1527_v62  ;;  %v1383_v40 = vcvt.s32.f32 %v871_v33  ;;  %v616_v47 = vperm.slane %v6550_v55, 7  ;;  %v641_v48 = vperm.slane %v6552_v59, 7 }
  0xdc   :  { %2207 = vmatpush.bf16.msra.mxu1 %v1867_v12  ;;  %v1387_v36 = vcvt.s32.f32 %v875_v17  ;;  %v1827_v37 = vpack.c.bf16 %v1323_v22, %v1319_v13  ;;  %v943_v49 = vunpack.c.0.s8 %v707_v60  ;;  %v947_v51 = vunpack.c.1.s8 %v707_v60 }
  0xdd   :  { %v1007_v52 = vunpack.c.0.s8 %v723_v0  ;;  %v1011_v30 = vunpack.c.1.s8 %v723_v0  ;;  %v799_v42 = vunpack.c.0.s8 %v671_v34  ;;  %v803_v53 = vunpack.c.1.s8 %v671_v34  ;;  %v6735_v0 = vld [vmem:[#allocation9 + $0x188] sm:$0xff] }
  0xde   :  { %2232 = vmatpush.bf16.msra.mxu3 %v1935_v1  ;;  %v1859_v29 = vpack.c.bf16 %v1387_v36, %v1383_v40  ;;  %v1455_v41 = vcvt.s32.f32 %v943_v49  ;;  %v1459_v56 = vcvt.s32.f32 %v947_v51  ;;  %v863_v9 = vunpack.c.0.s8 %v687_v39  ;;  %v703_v1 = vld [vmem:[#allocation9 + $0x108] sm:$0xff] }
  0xdf   :  { %2219 = vmatpush.bf16.msra.mxu2 %v1903_v46  ;;  %2195 = vmatpush.bf16.msra.mxu0 %v1831_v16  ;;  %v1519_v57 = vcvt.s32.f32 %v1007_v52  ;;  %v1523_v44 = vcvt.s32.f32 %v1011_v30  ;;  %v1311_v12 = vcvt.s32.f32 %v799_v42  ;;  %v1315_v21 = vcvt.s32.f32 %v803_v53 }
  0xe0   :  { %2208 = vmatpush.bf16.msra.mxu1 %v1863_v20  ;;  %v867_v28 = vunpack.c.1.s8 %v687_v39  ;;  %v1895_v60 = vpack.c.bf16 %v1459_v56, %v1455_v41  ;;  %v1375_v46 = vcvt.s32.f32 %v863_v9  ;;  %v1111_v25 = vunpack.c.2.s8 %v747_v54 }
  0xe1   :  { %v1115_v26 = vunpack.c.3.s8 %v747_v54  ;;  %v1927_v34 = vpack.c.bf16 %v1523_v44, %v1519_v57  ;;  %v1823_v38 = vpack.c.bf16 %v1315_v21, %v1311_v12  ;;  %v1175_v11 = vunpack.c.2.s8 %v763_v5  ;;  %v6756_v57 = vld [vmem:[#allocation9 + $0x368] sm:$0xff] }
  0xe2   :  { %2233 = vmatpush.bf16.msra.mxu3 %v1931_v4  ;;  %v1379_v2 = vcvt.s32.f32 %v867_v28  ;;  %v6737_v63 = vcvt.s32.f32 %v1111_v25  ;;  %v1179_v18 = vunpack.c.3.s8 %v763_v5  ;;  %v935_v32 = vunpack.c.2.s8 %v703_v1 }
  0xe3   :  { %2220 = vmatpush.bf16.msra.mxu2 %v1899_v50  ;;  %2196 = vmatpush.bf16.msra.mxu0 %v1827_v37  ;;  %v6739_v14 = vcvt.s32.f32 %v1115_v26  ;;  %v6741_v39 = vcvt.s32.f32 %v1175_v11  ;;  %v939_v16 = vunpack.c.3.s8 %v703_v1  ;;  %v999_v10 = vunpack.c.2.s8 %v6735_v0 }
  0xe4   :  { %2209 = vmatpush.bf16.msra.mxu1 %v1859_v29  ;;  %v1855_v24 = vpack.c.bf16 %v1379_v2, %v1375_v46  ;;  %v1691_v20 = vcvt.s32.f32 %v1179_v18  ;;  %v1447_v62 = vcvt.s32.f32 %v935_v32  ;;  %v1003_v31 = vunpack.c.3.s8 %v6735_v0 }
  0xe5   :  { %v1979_v7 = vpack.c.bf16 %v6739_v14, %v6737_v63  ;;  %v1451_v13 = vcvt.s32.f32 %v939_v16  ;;  %v1511_v33 = vcvt.s32.f32 %v999_v10  ;;  %v1103_v17 = vunpack.c.0.s8 %v747_v54  ;;  %v759_v10 = vld [vmem:[#allocation9 + $0x2c8] sm:$0xff] }
  0xe6   :  { %v565_v19 = vpop.f32.mrf.mxu0  ;;  %2234 = vmatpush.bf16.msra.mxu3 %v1927_v34  ;;  %v2011_v22 = vpack.c.bf16 %v1691_v20, %v6741_v39  ;;  %v1515_v40 = vcvt.s32.f32 %v1003_v31  ;;  %v1107_v36 = vunpack.c.1.s8 %v747_v54  ;;  %v1171_v42 = vunpack.c.1.s8 %v763_v5 }
  0xe7   :  { %v629_v35 = vmul.f32 %v613_v61, %v565_v19  ;;  %v578_v50 = vpop.f32.mrf.mxu1  ;;  %2221 = vmatpush.bf16.msra.mxu2 %v1895_v60  ;;  %2197 = vmatpush.bf16.msra.mxu0 %v1823_v38  ;;  %v1891_v49 = vpack.c.bf16 %v1451_v13, %v1447_v62  ;;  %v1615_v51 = vcvt.s32.f32 %v1103_v17  ;;  %v1167_v61 = vunpack.c.0.s8 %v763_v5  ;;  %v6762_v5 = vld [vmem:[#allocation9 + $0x3e8] sm:$0xff] }
  0xe8   :  { %v630_v4 = vmul.f32 %v614_v58, %v578_v50  ;;  %2210 = vmatpush.bf16.msra.mxu1 %v1855_v24  ;;  %v1923_v29 = vpack.c.bf16 %v1515_v40, %v1511_v33  ;;  %v1619_v30 = vcvt.s32.f32 %v1107_v36  ;;  %v927_v41 = vunpack.c.0.s8 %v703_v1  ;;  %v6764_v60 = vld [vmem:[#allocation9 + $0x248] sm:$0xff] }
  0xe9   :  { %v654_v37 = vadd.f32 %v638_v8, %v629_v35  ;;  %v1679_v58 = vcvt.s32.f32 %v1167_v61  ;;  %v931_v56 = vunpack.c.1.s8 %v703_v1  ;;  %v1683_v8 = vcvt.s32.f32 %v1171_v42 }
  0xea   :  { %v655_v52 = vadd.f32 %v639_v15, %v630_v4  ;;  %2235 = vmatpush.bf16.msra.mxu3 %v1923_v29  ;;  %v1975_v9 = vpack.c.bf16 %v1619_v30, %v1615_v51  ;;  %v991_v44 = vunpack.c.0.s8 %v6735_v0  ;;  %v1439_v21 = vcvt.s32.f32 %v927_v41 }
  0xeb   :  { %v662_v53 = vmax.f32 %v654_v37, 0.0  ;;  %2222 = vmatpush.bf16.msra.mxu2 %v1891_v49  ;;  %v1443_v15 = vcvt.s32.f32 %v931_v56  ;;  %v995_v28 = vunpack.c.1.s8 %v6735_v0  ;;  %v2007_v26 = vpack.c.bf16 %v1683_v8, %v1679_v58  ;;  %v775_v58 = vld [vmem:[#allocation9 + $0x348] sm:$0xff] }
  0xec   :  { %v663_v54 = vmax.f32 %v655_v52, 0.0  ;;  %v1503_v34 = vcvt.s32.f32 %v991_v44  ;;  %v1239_v38 = vunpack.c.2.s8 %v6756_v57  ;;  %v1243_v14 = vunpack.c.3.s8 %v6756_v57  ;;  %v791_v8 = vld [vmem:[#allocation9 + $0x3c8] sm:$0xff] }
  0xed   :  { %v6759_v12 = vpack.c.bf16 %v662_v53, %v662_v53  ;;  %v1887_v63 = vpack.c.bf16 %v1443_v15, %v1439_v21  ;;  %v1507_v0 = vcvt.s32.f32 %v995_v28  ;;  %v1303_v24 = vunpack.c.2.s8 %v6762_v5 }
  0xee   :  { %v6766_v46 = vpack.c.bf16 %v663_v54, %v663_v54  ;;  %v591_v1 = vpop.f32.mrf.mxu2  ;;  %v567_v25 = vpop.f32.mrf.mxu0  ;;  %v1751_v32 = vcvt.s32.f32 %v1239_v38  ;;  %v1307_v39 = vunpack.c.3.s8 %v6762_v5  ;;  %v1095_v16 = vunpack.c.2.s8 %v6764_v60 }
  0xef   :  { %v631_v2 = vmul.f32 %v615_v6, %v591_v1  ;;  %2146 = vmatmul.bf16.vlgmr.msrb.gmra.mxu0 %v6759_v12  ;;  %v580_v11 = vpop.f32.mrf.mxu1  ;;  %2223 = vmatpush.bf16.msra.mxu2 %v1887_v63  ;;  %v1919_v20 = vpack.c.bf16 %v1507_v0, %v1503_v34  ;;  %v1755_v62 = vcvt.s32.f32 %v1243_v14  ;;  %v1815_v31 = vcvt.s32.f32 %v1303_v24  ;;  %v739_v1 = vld [vmem:[#allocation9 + $0x228] sm:$0xff] }
  0xf0   :  { %v604_v18 = vpop.f32.mrf.mxu3  ;;  %2159 = vmatmul.bf16.vlgmr.msrb.gmra.mxu1 %v6766_v46  ;;  %2242 = vmatpush.bf16.msrb.mxu0 %v1979_v7  ;;  %v1819_v7 = vcvt.s32.f32 %v1307_v39  ;;  %v1099_v35 = vunpack.c.3.s8 %v6764_v60  ;;  %v1607_v50 = vcvt.s32.f32 %v1095_v16  ;;  %v1159_v4 = vunpack.c.2.s8 %v759_v10 }
  0xf1   :  { %v656_v6 = vadd.f32 %v640_v27, %v631_v2  ;;  %v632_v19 = vmul.f32 %v616_v47, %v604_v18  ;;  %2255 = vmatpush.bf16.msrb.mxu1 %v2011_v22  ;;  %2236 = vmatpush.bf16.msra.mxu3 %v1919_v20  ;;  %v2043_v17 = vpack.c.bf16 %v1755_v62, %v1751_v32  ;;  %v1163_v47 = vunpack.c.3.s8 %v759_v10 }
  0xf2   :  { %v2075_v27 = vpack.c.bf16 %v1819_v7, %v1815_v31  ;;  %v1611_v55 = vcvt.s32.f32 %v1099_v35  ;;  %v1231_v22 = vunpack.c.0.s8 %v6756_v57  ;;  %v1671_v37 = vcvt.s32.f32 %v1159_v4 }
  0xf3   :  { %v664_v13 = vmax.f32 %v656_v6, 0.0  ;;  %v657_v33 = vadd.f32 %v641_v48, %v632_v19  ;;  %v1235_v49 = vunpack.c.1.s8 %v6756_v57  ;;  %v1675_v59 = vcvt.s32.f32 %v1163_v47 }
  0xf4   :  { %2243 = vmatpush.bf16.msrb.mxu0 %v1975_v9  ;;  %v1971_v61 = vpack.c.bf16 %v1611_v55, %v1607_v50  ;;  %v1743_v48 = vcvt.s32.f32 %v1231_v22  ;;  %v1295_v52 = vunpack.c.0.s8 %v6762_v5  ;;  %v1299_v42 = vunpack.c.1.s8 %v6762_v5 }
  0xf5   :  { %v6785_v40 = vpack.c.bf16 %v664_v13, %v664_v13  ;;  %v665_v36 = vmax.f32 %v657_v33, 0.0  ;;  %2256 = vmatpush.bf16.msrb.mxu1 %v2007_v26  ;;  %v1747_v30 = vcvt.s32.f32 %v1235_v49  ;;  %v1087_v53 = vunpack.c.0.s8 %v6764_v60 }
  0xf6   :  { %v593_v51 = vpop.f32.mrf.mxu2  ;;  %v2003_v56 = vpack.c.bf16 %v1675_v59, %v1671_v37  ;;  %v1807_v57 = vcvt.s32.f32 %v1295_v52  ;;  %v1091_v54 = vunpack.c.1.s8 %v6764_v60  ;;  %v1151_v9 = vunpack.c.0.s8 %v759_v10  ;;  %v755_v60 = vld [vmem:[#allocation9 + $0x2a8] sm:$0xff] }
  0xf7   :  { %v6789_v29 = vpack.c.bf16 %v665_v36, %v665_v36  ;;  %2172 = vmatmul.bf16.vlgmr.msrb.gmra.mxu2 %v6785_v40  ;;  %v2039_v44 = vpack.c.bf16 %v1747_v30, %v1743_v48  ;;  %v1811_v21 = vcvt.s32.f32 %v1299_v42  ;;  %v1599_v15 = vcvt.s32.f32 %v1087_v53  ;;  %v771_v36 = vld [vmem:[#allocation9 + $0x328] sm:$0xff] }
  0xf8   :  { %v606_v41 = vpop.f32.mrf.mxu3  ;;  %2268 = vmatpush.bf16.msrb.mxu2 %v2043_v17  ;;  %2244 = vmatpush.bf16.msrb.mxu0 %v1971_v61  ;;  %v1155_v28 = vunpack.c.1.s8 %v759_v10  ;;  %v1603_v5 = vcvt.s32.f32 %v1091_v54  ;;  %v1663_v25 = vcvt.s32.f32 %v1151_v9  ;;  %v1223_v26 = vunpack.c.2.s8 %v775_v58  ;;  %v787_v59 = vld [vmem:[#allocation9 + $0x3a8] sm:$0xff] }
  0xf9   :  { %2185 = vmatmul.bf16.vlgmr.msrb.gmra.mxu3 %v6789_v29  ;;  %2257 = vmatpush.bf16.msrb.mxu1 %v2003_v56  ;;  %v1227_v34 = vunpack.c.3.s8 %v775_v58  ;;  %v2071_v38 = vpack.c.bf16 %v1811_v21, %v1807_v57  ;;  %v1287_v11 = vunpack.c.2.s8 %v791_v8  ;;  %v1291_v63 = vunpack.c.3.s8 %v791_v8  ;;  %v735_v53 = vld [vmem:[#allocation9 + $0x208] sm:$0xff] }
  0xfa   :  { %2281 = vmatpush.bf16.msrb.mxu3 %v2075_v27  ;;  %v1667_v2 = vcvt.s32.f32 %v1155_v28  ;;  %v1967_v0 = vpack.c.bf16 %v1603_v5, %v1599_v15  ;;  %v1735_v14 = vcvt.s32.f32 %v1223_v26  ;;  %v1079_v32 = vunpack.c.2.s8 %v739_v1  ;;  %v751_v21 = vld [vmem:[#allocation9 + $0x288] sm:$0xff] }
  0xfb   :  { %v1739_v18 = vcvt.s32.f32 %v1227_v34  ;;  %v1799_v39 = vcvt.s32.f32 %v1287_v11  ;;  %v1803_v16 = vcvt.s32.f32 %v1291_v63  ;;  %v1083_v10 = vunpack.c.3.s8 %v739_v1 }
  0xfc   :  { %2269 = vmatpush.bf16.msrb.mxu2 %v2039_v44  ;;  %v1999_v24 = vpack.c.bf16 %v1667_v2, %v1663_v25  ;;  %2245 = vmatpush.bf16.msrb.mxu0 %v1967_v0  ;;  %v1591_v19 = vcvt.s32.f32 %v1079_v32  ;;  %v1143_v20 = vunpack.c.2.s8 %v755_v60  ;;  %v1147_v62 = vunpack.c.3.s8 %v755_v60 }
  0xfd   :  { %v2035_v6 = vpack.c.bf16 %v1739_v18, %v1735_v14  ;;  %v2067_v31 = vpack.c.bf16 %v1803_v16, %v1799_v39  ;;  %v1595_v7 = vcvt.s32.f32 %v1083_v10  ;;  %v1215_v35 = vunpack.c.0.s8 %v775_v58 }
  0xfe   :  { %2282 = vmatpush.bf16.msrb.mxu3 %v2071_v38  ;;  %2258 = vmatpush.bf16.msrb.mxu1 %v1999_v24  ;;  %v1219_v50 = vunpack.c.1.s8 %v775_v58  ;;  %v1655_v13 = vcvt.s32.f32 %v1143_v20  ;;  %v1659_v33 = vcvt.s32.f32 %v1147_v62  ;;  %v1279_v17 = vunpack.c.0.s8 %v791_v8 }
  0xff   :  { %2198 = vmatmul.bf16.vlgmr.msra.gmra.mxu0 %v6640_v45  ;;  %v1283_v4 = vunpack.c.1.s8 %v791_v8  ;;  %v1963_v27 = vpack.c.bf16 %v1595_v7, %v1591_v19  ;;  %v1727_v55 = vcvt.s32.f32 %v1215_v35  ;;  %v1071_v22 = vunpack.c.0.s8 %v739_v1 }
 0x100   :  { %2270 = vmatpush.bf16.msrb.mxu2 %v2035_v6  ;;  %2211 = vmatmul.bf16.vlgmr.msra.gmra.mxu1 %v6631_v3  ;;  %v1731_v47 = vcvt.s32.f32 %v1219_v50  ;;  %v1995_v37 = vpack.c.bf16 %v1659_v33, %v1655_v13  ;;  %v1791_v49 = vcvt.s32.f32 %v1279_v17  ;;  %v1075_v61 = vunpack.c.1.s8 %v739_v1  ;;  %v700_v33 = vld [vmem:[#allocation9 + $0xf0] sm:$0xff] }
 0x101   :  { %v1795_v51 = vcvt.s32.f32 %v1283_v4  ;;  %2246 = vmatpush.bf16.msrb.mxu0 %v1963_v27  ;;  %v1583_v52 = vcvt.s32.f32 %v1071_v22  ;;  %v1135_v30 = vunpack.c.0.s8 %v755_v60  ;;  %v1139_v42 = vunpack.c.1.s8 %v755_v60 }
 0x102   :  { %2283 = vmatpush.bf16.msrb.mxu3 %v2067_v31  ;;  %v2031_v48 = vpack.c.bf16 %v1731_v47, %v1727_v55  ;;  %2259 = vmatpush.bf16.msrb.mxu1 %v1995_v37  ;;  %v1587_v41 = vcvt.s32.f32 %v1075_v61  ;;  %v1207_v56 = vunpack.c.2.s8 %v771_v36  ;;  %v1211_v57 = vunpack.c.3.s8 %v771_v36  ;;  %v684_v31 = vld [vmem:[#allocation9 + $0x70] sm:$0xff]  ;;  %v767_v47 = vld [vmem:[#allocation9 + $0x308] sm:$0xff] }
 0x103   :  { %v2063_v58 = vpack.c.bf16 %v1795_v51, %v1791_v49  ;;  %v1647_v54 = vcvt.s32.f32 %v1135_v30  ;;  %v1651_v9 = vcvt.s32.f32 %v1139_v42  ;;  %v1271_v8 = vunpack.c.2.s8 %v787_v59 }
 0x104   :  { %2271 = vmatpush.bf16.msrb.mxu2 %v2031_v48  ;;  %v1275_v44 = vunpack.c.3.s8 %v787_v59  ;;  %v1959_v15 = vpack.c.bf16 %v1587_v41, %v1583_v52  ;;  %v1719_v28 = vcvt.s32.f32 %v1207_v56  ;;  %v1723_v1 = vcvt.s32.f32 %v1211_v57  ;;  %v783_v52 = vld [vmem:[#allocation9 + $0x388] sm:$0xff] }
 0x105   :  { %v1063_v5 = vunpack.c.2.s8 %v735_v53  ;;  %v1991_v25 = vpack.c.bf16 %v1651_v9, %v1647_v54  ;;  %v1783_v26 = vcvt.s32.f32 %v1271_v8  ;;  %v1067_v38 = vunpack.c.3.s8 %v735_v53 }
 0x106   :  { %2284 = vmatpush.bf16.msrb.mxu3 %v2063_v58  ;;  %v1787_v34 = vcvt.s32.f32 %v1275_v44  ;;  %2247 = vmatpush.bf16.msrb.mxu0 %v1959_v15  ;;  %v2027_v2 = vpack.c.bf16 %v1723_v1, %v1719_v28  ;;  %v1127_v63 = vunpack.c.2.s8 %v751_v21  ;;  %v1131_v60 = vunpack.c.3.s8 %v751_v21 }
 0x107   :  { %2224 = vmatmul.bf16.vlgmr.msra.gmra.mxu2 %v6699_v43  ;;  %v1575_v11 = vcvt.s32.f32 %v1063_v5  ;;  %2260 = vmatpush.bf16.msrb.mxu1 %v1991_v25  ;;  %v1579_v14 = vcvt.s32.f32 %v1067_v38  ;;  %v1199_v18 = vunpack.c.0.s8 %v771_v36  ;;  %v1203_v32 = vunpack.c.1.s8 %v771_v36 }
 0x108   :  { %v2059_v0 = vpack.c.bf16 %v1787_v34, %v1783_v26  ;;  %2272 = vmatpush.bf16.msrb.mxu2 %v2027_v2  ;;  %v1639_v24 = vcvt.s32.f32 %v1127_v63  ;;  %v1643_v39 = vcvt.s32.f32 %v1131_v60  ;;  %v1263_v16 = vunpack.c.0.s8 %v787_v59 }
 0x109   :  { %2237 = vmatmul.bf16.vlgmr.msra.gmra.mxu3 %v6693_v23  ;;  %v1267_v10 = vunpack.c.1.s8 %v787_v59  ;;  %v1955_v6 = vpack.c.bf16 %v1579_v14, %v1575_v11  ;;  %v1711_v19 = vcvt.s32.f32 %v1199_v18  ;;  %v1715_v20 = vcvt.s32.f32 %v1203_v32 }
 0x10a   :  { %2285 = vmatpush.bf16.msrb.mxu3 %v2059_v0  ;;  %v1055_v62 = vunpack.c.0.s8 %v735_v53  ;;  %v1987_v7 = vpack.c.bf16 %v1643_v39, %v1639_v24  ;;  %v1775_v35 = vcvt.s32.f32 %v1263_v16  ;;  %v1059_v13 = vunpack.c.1.s8 %v735_v53  ;;  %v716_v0 = vld [vmem:[#allocation9 + $0x170] sm:$0xff] }
 0x10b   :  { %v1779_v50 = vcvt.s32.f32 %v1267_v10  ;;  %2248 = vmatpush.bf16.msrb.mxu0 %v1955_v6  ;;  %v2023_v17 = vpack.c.bf16 %v1715_v20, %v1711_v19  ;;  %v1119_v27 = vunpack.c.0.s8 %v751_v21  ;;  %v1123_v55 = vunpack.c.1.s8 %v751_v21  ;;  %v732_v39 = vld [vmem:[#allocation9 + $0x1f0] sm:$0xff] }
 0x10c   :  { %v1567_v4 = vcvt.s32.f32 %v1055_v62  ;;  %2261 = vmatpush.bf16.msrb.mxu1 %v1987_v7  ;;  %v1571_v36 = vcvt.s32.f32 %v1059_v13  ;;  %v856_v37 = vunpack.c.2.s8 %v684_v31  ;;  %v860_v49 = vunpack.c.3.s8 %v684_v31  ;;  %v680_v20 = vld [vmem:[#allocation9 + $0x50] sm:$0xff] }
 0x10d   :  { %v2055_v22 = vpack.c.bf16 %v1779_v50, %v1775_v35  ;;  %2273 = vmatpush.bf16.msrb.mxu2 %v2023_v17  ;;  %v1631_v51 = vcvt.s32.f32 %v1119_v27  ;;  %v1635_v61 = vcvt.s32.f32 %v1123_v55  ;;  %v920_v59 = vunpack.c.2.s8 %v700_v33 }
 0x10e   :  { %v924_v48 = vunpack.c.3.s8 %v700_v33  ;;  %v1951_v30 = vpack.c.bf16 %v1571_v36, %v1567_v4  ;;  %v1368_v42 = vcvt.s32.f32 %v856_v37  ;;  %v1372_v53 = vcvt.s32.f32 %v860_v49  ;;  %v696_v4 = vld [vmem:[#allocation9 + $0xd0] sm:$0xff] }
 0x10f   :  { %2286 = vmatpush.bf16.msrb.mxu3 %v2055_v22  ;;  %v1191_v58 = vunpack.c.2.s8 %v767_v47  ;;  %v1983_v41 = vpack.c.bf16 %v1635_v61, %v1631_v51  ;;  %v1432_v56 = vcvt.s32.f32 %v920_v59  ;;  %v1195_v54 = vunpack.c.3.s8 %v767_v47 }
 0x110   :  { %v1436_v57 = vcvt.s32.f32 %v924_v48  ;;  %2249 = vmatpush.bf16.msrb.mxu0 %v1951_v30  ;;  %v1852_v9 = vpack.c.bf16 %v1372_v53, %v1368_v42  ;;  %v1255_v44 = vunpack.c.2.s8 %v783_v52  ;;  %v1259_v21 = vunpack.c.3.s8 %v783_v52 }
 0x111   :  { %v1703_v8 = vcvt.s32.f32 %v1191_v58  ;;  %2262 = vmatpush.bf16.msrb.mxu1 %v1983_v41  ;;  %v1707_v28 = vcvt.s32.f32 %v1195_v54  ;;  %v848_v1 = vunpack.c.0.s8 %v684_v31  ;;  %v852_v5 = vunpack.c.1.s8 %v684_v31 }
 0x112   :  { %v1884_v15 = vpack.c.bf16 %v1436_v57, %v1432_v56  ;;  %v1767_v25 = vcvt.s32.f32 %v1255_v44  ;;  %v1771_v26 = vcvt.s32.f32 %v1259_v21  ;;  %v912_v34 = vunpack.c.0.s8 %v700_v33 }
 0x113   :  { %v916_v38 = vunpack.c.1.s8 %v700_v33  ;;  %v2019_v2 = vpack.c.bf16 %v1707_v28, %v1703_v8  ;;  %2250 = vmatmul.bf16.vlgmr.msrb.gmra.mxu0 %v6759_v12  ;;  %v1360_v11 = vcvt.s32.f32 %v848_v1  ;;  %v1364_v63 = vcvt.s32.f32 %v852_v5 }
 0x114   :  { %2294 = vmatpush.bf16.msra.mxu0 %v1852_v9  ;;  %v1183_v60 = vunpack.c.0.s8 %v767_v47  ;;  %v2051_v14 = vpack.c.bf16 %v1771_v26, %v1767_v25  ;;  %2263 = vmatmul.bf16.vlgmr.msrb.gmra.mxu1 %v6766_v46  ;;  %v1424_v18 = vcvt.s32.f32 %v912_v34  ;;  %v1187_v24 = vunpack.c.1.s8 %v767_v47  ;;  %v728_v26 = vld [vmem:[#allocation9 + $0x1d0] sm:$0xff] }
 0x115   :  { %2307 = vmatpush.bf16.msra.mxu1 %v1884_v15  ;;  %v1428_v32 = vcvt.s32.f32 %v916_v38  ;;  %2274 = vmatpush.bf16.msrb.mxu2 %v2019_v2  ;;  %v1848_v16 = vpack.c.bf16 %v1364_v63, %v1360_v11  ;;  %v1247_v6 = vunpack.c.0.s8 %v783_v52  ;;  %v1251_v19 = vunpack.c.1.s8 %v783_v52  ;;  %v712_v15 = vld [vmem:[#allocation9 + $0x150] sm:$0xff] }
 0x116   :  { %v1695_v10 = vcvt.s32.f32 %v1183_v60  ;;  %2287 = vmatpush.bf16.msrb.mxu3 %v2051_v14  ;;  %v1699_v31 = vcvt.s32.f32 %v1187_v24  ;;  %v984_v7 = vunpack.c.2.s8 %v716_v0  ;;  %v988_v35 = vunpack.c.3.s8 %v716_v0  ;;  %v676_v63 = vld [vmem:[#allocation9 + $0x30] sm:$0xff] }
 0x117   :  { %v1880_v62 = vpack.c.bf16 %v1428_v32, %v1424_v18  ;;  %v1759_v50 = vcvt.s32.f32 %v1247_v6  ;;  %v1763_v13 = vcvt.s32.f32 %v1251_v19  ;;  %v1048_v33 = vunpack.c.2.s8 %v732_v39 }
 0x118   :  { %2295 = vmatpush.bf16.msra.mxu0 %v1848_v16  ;;  %v1052_v17 = vunpack.c.3.s8 %v732_v39  ;;  %v2015_v27 = vpack.c.bf16 %v1699_v31, %v1695_v10  ;;  %v1496_v55 = vcvt.s32.f32 %v984_v7  ;;  %v1500_v47 = vcvt.s32.f32 %v988_v35  ;;  %v692_v10 = vld [vmem:[#allocation9 + $0xb0] sm:$0xff] }
 0x119   :  { %2308 = vmatpush.bf16.msra.mxu1 %v1880_v62  ;;  %v840_v22 = vunpack.c.2.s8 %v680_v20  ;;  %v2047_v36 = vpack.c.bf16 %v1763_v13, %v1759_v50  ;;  %v1560_v37 = vcvt.s32.f32 %v1048_v33  ;;  %v844_v51 = vunpack.c.3.s8 %v680_v20 }
 0x11a   :  { %v1564_v49 = vcvt.s32.f32 %v1052_v17  ;;  %2275 = vmatpush.bf16.msrb.mxu2 %v2015_v27  ;;  %v1916_v61 = vpack.c.bf16 %v1500_v47, %v1496_v55  ;;  %v904_v48 = vunpack.c.2.s8 %v696_v4  ;;  %v908_v52 = vunpack.c.3.s8 %v696_v4 }
 0x11b   :  { %v1352_v59 = vcvt.s32.f32 %v840_v22  ;;  %2288 = vmatpush.bf16.msrb.mxu3 %v2047_v36  ;;  %v1356_v42 = vcvt.s32.f32 %v844_v51  ;;  %v976_v53 = vunpack.c.0.s8 %v716_v0  ;;  %v980_v58 = vunpack.c.1.s8 %v716_v0 }
 0x11c   :  { %v1948_v30 = vpack.c.bf16 %v1564_v49, %v1560_v37  ;;  %v1416_v41 = vcvt.s32.f32 %v904_v48  ;;  %v1420_v56 = vcvt.s32.f32 %v908_v52  ;;  %v1040_v57 = vunpack.c.0.s8 %v732_v39 }
 0x11d   :  { %v1044_v54 = vunpack.c.1.s8 %v732_v39  ;;  %v1844_v9 = vpack.c.bf16 %v1356_v42, %v1352_v59  ;;  %2276 = vmatmul.bf16.vlgmr.msrb.gmra.mxu2 %v6785_v40  ;;  %v1488_v8 = vcvt.s32.f32 %v976_v53  ;;  %v1492_v44 = vcvt.s32.f32 %v980_v58 }
 0x11e   :  { %2320 = vmatpush.bf16.msra.mxu2 %v1916_v61  ;;  %v832_v21 = vunpack.c.0.s8 %v680_v20  ;;  %v1876_v28 = vpack.c.bf16 %v1420_v56, %v1416_v41  ;;  %2289 = vmatmul.bf16.vlgmr.msrb.gmra.mxu3 %v6789_v29  ;;  %v1552_v1 = vcvt.s32.f32 %v1040_v57  ;;  %v836_v25 = vunpack.c.1.s8 %v680_v20  ;;  %v724_v56 = vld [vmem:[#allocation9 + $0x1b0] sm:$0xff] }
 0x11f   :  { %2333 = vmatpush.bf16.msra.mxu3 %v1948_v30  ;;  %v1556_v5 = vcvt.s32.f32 %v1044_v54  ;;  %2296 = vmatpush.bf16.msra.mxu0 %v1844_v9  ;;  %v1912_v34 = vpack.c.bf16 %v1492_v44, %v1488_v8  ;;  %v896_v2 = vunpack.c.0.s8 %v696_v4  ;;  %v900_v11 = vunpack.c.1.s8 %v696_v4  ;;  %v708_v30 = vld [vmem:[#allocation9 + $0x130] sm:$0xff] }
 0x120   :  { %v1344_v38 = vcvt.s32.f32 %v832_v21  ;;  %2309 = vmatpush.bf16.msra.mxu1 %v1876_v28  ;;  %v1348_v0 = vcvt.s32.f32 %v836_v25  ;;  %v968_v14 = vunpack.c.2.s8 %v712_v15  ;;  %v972_v18 = vunpack.c.3.s8 %v712_v15  ;;  %v672_v44 = vld [vmem:[#allocation9 + $0x10] sm:$0xff] }
 0x121   :  { %v1944_v60 = vpack.c.bf16 %v1556_v5, %v1552_v1  ;;  %v1408_v32 = vcvt.s32.f32 %v896_v2  ;;  %v1412_v24 = vcvt.s32.f32 %v900_v11  ;;  %v1032_v39 = vunpack.c.2.s8 %v728_v26 }
 0x122   :  { %2321 = vmatpush.bf16.msra.mxu2 %v1912_v34  ;;  %v1036_v16 = vunpack.c.3.s8 %v728_v26  ;;  %v1840_v6 = vpack.c.bf16 %v1348_v0, %v1344_v38  ;;  %v1480_v19 = vcvt.s32.f32 %v968_v14  ;;  %v1484_v20 = vcvt.s32.f32 %v972_v18  ;;  %v688_v38 = vld [vmem:[#allocation9 + $0x90] sm:$0xff] }
 0x123   :  { %2334 = vmatpush.bf16.msra.mxu3 %v1944_v60  ;;  %v824_v62 = vunpack.c.2.s8 %v676_v63  ;;  %v1872_v31 = vpack.c.bf16 %v1412_v24, %v1408_v32  ;;  %v1544_v7 = vcvt.s32.f32 %v1032_v39  ;;  %v828_v50 = vunpack.c.3.s8 %v676_v63 }
 0x124   :  { %v1548_v35 = vcvt.s32.f32 %v1036_v16  ;;  %2297 = vmatpush.bf16.msra.mxu0 %v1840_v6  ;;  %v1908_v13 = vpack.c.bf16 %v1484_v20, %v1480_v19  ;;  %v888_v17 = vunpack.c.2.s8 %v692_v10  ;;  %v892_v4 = vunpack.c.3.s8 %v692_v10 }
 0x125   :  { %v1336_v33 = vcvt.s32.f32 %v824_v62  ;;  %2310 = vmatpush.bf16.msra.mxu1 %v1872_v31  ;;  %v1340_v55 = vcvt.s32.f32 %v828_v50  ;;  %v960_v47 = vunpack.c.0.s8 %v712_v15  ;;  %v964_v22 = vunpack.c.1.s8 %v712_v15 }
 0x126   :  { %v1940_v27 = vpack.c.bf16 %v1548_v35, %v1544_v7  ;;  %2322 = vmatpush.bf16.msra.mxu2 %v1908_v13  ;;  %v1400_v36 = vcvt.s32.f32 %v888_v17  ;;  %v1404_v37 = vcvt.s32.f32 %v892_v4  ;;  %v1024_v49 = vunpack.c.0.s8 %v728_v26 }
 0x127   :  { %v1028_v51 = vunpack.c.1.s8 %v728_v26  ;;  %v1836_v61 = vpack.c.bf16 %v1340_v55, %v1336_v33  ;;  %v1472_v59 = vcvt.s32.f32 %v960_v47  ;;  %v1476_v48 = vcvt.s32.f32 %v964_v22 }
 0x128   :  { %2335 = vmatpush.bf16.msra.mxu3 %v1940_v27  ;;  %v816_v52 = vunpack.c.0.s8 %v676_v63  ;;  %v1868_v42 = vpack.c.bf16 %v1404_v37, %v1400_v36  ;;  %v1536_v53 = vcvt.s32.f32 %v1024_v49  ;;  %v820_v41 = vunpack.c.1.s8 %v676_v63  ;;  %v748_v27 = vld [vmem:[#allocation9 + $0x270] sm:$0xff] }
 0x129   :  { %v1540_v58 = vcvt.s32.f32 %v1028_v51  ;;  %2298 = vmatpush.bf16.msra.mxu0 %v1836_v61  ;;  %v1904_v57 = vpack.c.bf16 %v1476_v48, %v1472_v59  ;;  %v880_v9 = vunpack.c.0.s8 %v692_v10  ;;  %v884_v8 = vunpack.c.1.s8 %v692_v10  ;;  %v764_v37 = vld [vmem:[#allocation9 + $0x2f0] sm:$0xff] }
 0x12a   :  { %v1328_v54 = vcvt.s32.f32 %v816_v52  ;;  %2311 = vmatpush.bf16.msra.mxu1 %v1868_v42  ;;  %v1332_v15 = vcvt.s32.f32 %v820_v41  ;;  %v952_v28 = vunpack.c.2.s8 %v708_v30  ;;  %v956_v1 = vunpack.c.3.s8 %v708_v30  ;;  %v704_v48 = vld [vmem:[#allocation9 + $0x110] sm:$0xff] }
 0x12b   :  { %v1936_v21 = vpack.c.bf16 %v1540_v58, %v1536_v53  ;;  %2323 = vmatpush.bf16.msra.mxu2 %v1904_v57  ;;  %v1392_v5 = vcvt.s32.f32 %v880_v9  ;;  %v1396_v25 = vcvt.s32.f32 %v884_v8  ;;  %v1016_v26 = vunpack.c.2.s8 %v724_v56 }
 0x12c   :  { %v1020_v34 = vunpack.c.3.s8 %v724_v56  ;;  %v1832_v2 = vpack.c.bf16 %v1332_v15, %v1328_v54  ;;  %v1464_v11 = vcvt.s32.f32 %v952_v28  ;;  %v1468_v63 = vcvt.s32.f32 %v956_v1  ;;  %v720_v54 = vld [vmem:[#allocation9 + $0x190] sm:$0xff] }
 0x12d   :  { %2336 = vmatpush.bf16.msra.mxu3 %v1936_v21  ;;  %v808_v60 = vunpack.c.2.s8 %v672_v44  ;;  %v1864_v0 = vpack.c.bf16 %v1396_v25, %v1392_v5  ;;  %v1528_v14 = vcvt.s32.f32 %v1016_v26  ;;  %v812_v32 = vunpack.c.3.s8 %v672_v44 }
 0x12e   :  { %v1532_v18 = vcvt.s32.f32 %v1020_v34  ;;  %2299 = vmatpush.bf16.msra.mxu0 %v1832_v2  ;;  %v1900_v24 = vpack.c.bf16 %v1468_v63, %v1464_v11  ;;  %v872_v16 = vunpack.c.2.s8 %v688_v38  ;;  %v876_v10 = vunpack.c.3.s8 %v688_v38 }
 0x12f   :  { %v1320_v39 = vcvt.s32.f32 %v808_v60  ;;  %2312 = vmatpush.bf16.msra.mxu1 %v1864_v0  ;;  %v1324_v19 = vcvt.s32.f32 %v812_v32  ;;  %v944_v20 = vunpack.c.0.s8 %v708_v30  ;;  %v948_v62 = vunpack.c.1.s8 %v708_v30 }
 0x130   :  { %v1932_v6 = vpack.c.bf16 %v1532_v18, %v1528_v14  ;;  %2324 = vmatpush.bf16.msra.mxu2 %v1900_v24  ;;  %v1384_v31 = vcvt.s32.f32 %v872_v16  ;;  %v1388_v7 = vcvt.s32.f32 %v876_v10  ;;  %v1008_v35 = vunpack.c.0.s8 %v724_v56 }
 0x131   :  { %v1012_v50 = vunpack.c.1.s8 %v724_v56  ;;  %v1828_v13 = vpack.c.bf16 %v1324_v19, %v1320_v39  ;;  %v1456_v33 = vcvt.s32.f32 %v944_v20  ;;  %v1460_v17 = vcvt.s32.f32 %v948_v62 }
 0x132   :  { %2337 = vmatpush.bf16.msra.mxu3 %v1932_v6  ;;  %v800_v4 = vunpack.c.0.s8 %v672_v44  ;;  %v1860_v55 = vpack.c.bf16 %v1388_v7, %v1384_v31  ;;  %v1520_v47 = vcvt.s32.f32 %v1008_v35  ;;  %v804_v36 = vunpack.c.1.s8 %v672_v44  ;;  %v780_v6 = vld [vmem:[#allocation9 + $0x370] sm:$0xff] }
 0x133   :  { %v1524_v22 = vcvt.s32.f32 %v1012_v50  ;;  %2300 = vmatpush.bf16.msra.mxu0 %v1828_v13  ;;  %v1896_v49 = vpack.c.bf16 %v1460_v17, %v1456_v33  ;;  %v864_v61 = vunpack.c.0.s8 %v688_v38  ;;  %v868_v59 = vunpack.c.1.s8 %v688_v38  ;;  %v796_v7 = vld [vmem:[#allocation9 + $0x3f0] sm:$0xff] }
 0x134   :  { %v1312_v51 = vcvt.s32.f32 %v800_v4  ;;  %2313 = vmatpush.bf16.msra.mxu1 %v1860_v55  ;;  %v1316_v30 = vcvt.s32.f32 %v804_v36  ;;  %v1112_v42 = vunpack.c.2.s8 %v748_v27  ;;  %v1116_v53 = vunpack.c.3.s8 %v748_v27  ;;  %v744_v17 = vld [vmem:[#allocation9 + $0x250] sm:$0xff] }
 0x135   :  { %v1928_v52 = vpack.c.bf16 %v1524_v22, %v1520_v47  ;;  %2325 = vmatpush.bf16.msra.mxu2 %v1896_v49  ;;  %v1376_v58 = vcvt.s32.f32 %v864_v61  ;;  %v1380_v41 = vcvt.s32.f32 %v868_v59  ;;  %v1176_v56 = vunpack.c.2.s8 %v764_v37 }
 0x136   :  { %v1180_v57 = vunpack.c.3.s8 %v764_v37  ;;  %v1824_v9 = vpack.c.bf16 %v1316_v30, %v1312_v51  ;;  %v1624_v8 = vcvt.s32.f32 %v1112_v42  ;;  %v1628_v44 = vcvt.s32.f32 %v1116_v53  ;;  %v760_v51 = vld [vmem:[#allocation9 + $0x2d0] sm:$0xff] }
 0x137   :  { %2338 = vmatpush.bf16.msra.mxu3 %v1928_v52  ;;  %v936_v21 = vunpack.c.2.s8 %v704_v48  ;;  %v1856_v15 = vpack.c.bf16 %v1380_v41, %v1376_v58  ;;  %v1688_v28 = vcvt.s32.f32 %v1176_v56  ;;  %v940_v5 = vunpack.c.3.s8 %v704_v48 }
 0x138   :  { %v1692_v1 = vcvt.s32.f32 %v1180_v57  ;;  %2301 = vmatpush.bf16.msra.mxu0 %v1824_v9  ;;  %v1980_v25 = vpack.c.bf16 %v1628_v44, %v1624_v8  ;;  %v1000_v34 = vunpack.c.2.s8 %v720_v54  ;;  %v1004_v38 = vunpack.c.3.s8 %v720_v54 }
 0x139   :  { %v1448_v26 = vcvt.s32.f32 %v936_v21  ;;  %2314 = vmatpush.bf16.msra.mxu1 %v1856_v15  ;;  %v1452_v11 = vcvt.s32.f32 %v940_v5  ;;  %v1104_v63 = vunpack.c.0.s8 %v748_v27  ;;  %v1108_v60 = vunpack.c.1.s8 %v748_v27 }
 0x13a   :  { %v2012_v2 = vpack.c.bf16 %v1692_v1, %v1688_v28  ;;  %v1512_v0 = vcvt.s32.f32 %v1000_v34  ;;  %v1516_v14 = vcvt.s32.f32 %v1004_v38  ;;  %v1168_v18 = vunpack.c.0.s8 %v764_v37 }
 0x13b   :  { %v1172_v32 = vunpack.c.1.s8 %v764_v37  ;;  %v1892_v24 = vpack.c.bf16 %v1452_v11, %v1448_v26  ;;  %2302 = vmatmul.bf16.vlgmr.msra.gmra.mxu0 %v6640_v45  ;;  %v1616_v39 = vcvt.s32.f32 %v1104_v63  ;;  %v1620_v16 = vcvt.s32.f32 %v1108_v60 }
 0x13c   :  { %2346 = vmatpush.bf16.msrb.mxu0 %v1980_v25  ;;  %v928_v10 = vunpack.c.0.s8 %v704_v48  ;;  %v1924_v19 = vpack.c.bf16 %v1516_v14, %v1512_v0  ;;  %2315 = vmatmul.bf16.vlgmr.msra.gmra.mxu1 %v6631_v3  ;;  %v1680_v20 = vcvt.s32.f32 %v1168_v18  ;;  %v932_v31 = vunpack.c.1.s8 %v704_v48  ;;  %v792_v14 = vld [vmem:[#allocation9 + $0x3d0] sm:$0xff] }
 0x13d   :  { %2359 = vmatpush.bf16.msrb.mxu1 %v2012_v2  ;;  %v1684_v62 = vcvt.s32.f32 %v1172_v32  ;;  %2326 = vmatpush.bf16.msra.mxu2 %v1892_v24  ;;  %v1976_v35 = vpack.c.bf16 %v1620_v16, %v1616_v39  ;;  %v992_v13 = vunpack.c.0.s8 %v720_v54  ;;  %v996_v33 = vunpack.c.1.s8 %v720_v54  ;;  %v776_v2 = vld [vmem:[#allocation9 + $0x350] sm:$0xff] }
 0x13e   :  { %v1440_v50 = vcvt.s32.f32 %v928_v10  ;;  %2339 = vmatpush.bf16.msra.mxu3 %v1924_v19  ;;  %v1444_v27 = vcvt.s32.f32 %v932_v31  ;;  %v1240_v55 = vunpack.c.2.s8 %v780_v6  ;;  %v1244_v47 = vunpack.c.3.s8 %v780_v6  ;;  %v740_v16 = vld [vmem:[#allocation9 + $0x230] sm:$0xff] }
 0x13f   :  { %v2008_v4 = vpack.c.bf16 %v1684_v62, %v1680_v20  ;;  %v1504_v22 = vcvt.s32.f32 %v992_v13  ;;  %v1508_v36 = vcvt.s32.f32 %v996_v33  ;;  %v1304_v37 = vunpack.c.2.s8 %v796_v7 }
 0x140   :  { %2347 = vmatpush.bf16.msrb.mxu0 %v1976_v35  ;;  %v1308_v49 = vunpack.c.3.s8 %v796_v7  ;;  %v1888_v61 = vpack.c.bf16 %v1444_v27, %v1440_v50  ;;  %v1752_v59 = vcvt.s32.f32 %v1240_v55  ;;  %v1756_v48 = vcvt.s32.f32 %v1244_v47  ;;  %v756_v50 = vld [vmem:[#allocation9 + $0x2b0] sm:$0xff] }
 0x141   :  { %2360 = vmatpush.bf16.msrb.mxu1 %v2008_v4  ;;  %v1096_v52 = vunpack.c.2.s8 %v744_v17  ;;  %v1920_v30 = vpack.c.bf16 %v1508_v36, %v1504_v22  ;;  %v1816_v42 = vcvt.s32.f32 %v1304_v37  ;;  %v1100_v58 = vunpack.c.3.s8 %v744_v17 }
 0x142   :  { %v1820_v53 = vcvt.s32.f32 %v1308_v49  ;;  %2327 = vmatpush.bf16.msra.mxu2 %v1888_v61  ;;  %v2044_v41 = vpack.c.bf16 %v1756_v48, %v1752_v59  ;;  %v1160_v57 = vunpack.c.2.s8 %v760_v51  ;;  %v1164_v54 = vunpack.c.3.s8 %v760_v51 }
 0x143   :  { %v1608_v56 = vcvt.s32.f32 %v1096_v52  ;;  %2340 = vmatpush.bf16.msra.mxu3 %v1920_v30  ;;  %v1612_v8 = vcvt.s32.f32 %v1100_v58  ;;  %v1232_v44 = vunpack.c.0.s8 %v780_v6  ;;  %v1236_v21 = vunpack.c.1.s8 %v780_v6 }
 0x144   :  { %v2076_v9 = vpack.c.bf16 %v1820_v53, %v1816_v42  ;;  %v1672_v15 = vcvt.s32.f32 %v1160_v57  ;;  %v1676_v28 = vcvt.s32.f32 %v1164_v54  ;;  %v1296_v1 = vunpack.c.0.s8 %v796_v7 }
 0x145   :  { %v1300_v5 = vunpack.c.1.s8 %v796_v7  ;;  %2328 = vmatmul.bf16.vlgmr.msra.gmra.mxu2 %v6699_v43  ;;  %v1972_v25 = vpack.c.bf16 %v1612_v8, %v1608_v56  ;;  %v1744_v26 = vcvt.s32.f32 %v1232_v44  ;;  %v1748_v34 = vcvt.s32.f32 %v1236_v21 }
 0x146   :  { %2372 = vmatpush.bf16.msrb.mxu2 %v2044_v41  ;;  %v1088_v38 = vunpack.c.0.s8 %v744_v17  ;;  %2341 = vmatmul.bf16.vlgmr.msra.gmra.mxu3 %v6693_v23  ;;  %v2004_v11 = vpack.c.bf16 %v1676_v28, %v1672_v15  ;;  %v1808_v63 = vcvt.s32.f32 %v1296_v1  ;;  %v1092_v0 = vunpack.c.1.s8 %v744_v17  ;;  %v788_v28 = vld [vmem:[#allocation9 + $0x3b0] sm:$0xff] }
 0x147   :  { %2385 = vmatpush.bf16.msrb.mxu3 %v2076_v9  ;;  %v1812_v60 = vcvt.s32.f32 %v1300_v5  ;;  %2348 = vmatpush.bf16.msrb.mxu0 %v1972_v25  ;;  %v2040_v18 = vpack.c.bf16 %v1748_v34, %v1744_v26  ;;  %v1152_v24 = vunpack.c.0.s8 %v760_v51  ;;  %v1156_v39 = vunpack.c.1.s8 %v760_v51  ;;  %v772_v9 = vld [vmem:[#allocation9 + $0x330] sm:$0xff]  ;;  %v6808_v1 = vpop.f32.mrf.mxu0 }
 0x148   :  { %v1600_v32 = vcvt.s32.f32 %v1088_v38  ;;  %2361 = vmatpush.bf16.msrb.mxu1 %v2004_v11  ;;  %v1604_v6 = vcvt.s32.f32 %v1092_v0  ;;  %v1224_v19 = vunpack.c.2.s8 %v776_v2  ;;  %v1228_v20 = vunpack.c.3.s8 %v776_v2  ;;  %v736_v38 = vld [vmem:[#allocation9 + $0x210] sm:$0xff]  ;;  %v6810_v0 = vpop.f32.mrf.mxu1 }
 0x149   :  { %v2072_v10 = vpack.c.bf16 %v1812_v60, %v1808_v63  ;;  %v1664_v62 = vcvt.s32.f32 %v1152_v24  ;;  %v1668_v31 = vcvt.s32.f32 %v1156_v39  ;;  %v1288_v7 = vunpack.c.2.s8 %v792_v14  ;;  %v752_v39 = vld [vmem:[#allocation9 + $0x290] sm:$0xff] }
 0x14a   :  { %2373 = vmatpush.bf16.msrb.mxu2 %v2040_v18  ;;  %v1292_v35 = vunpack.c.3.s8 %v792_v14  ;;  %v1968_v13 = vpack.c.bf16 %v1604_v6, %v1600_v32  ;;  %v1736_v33 = vcvt.s32.f32 %v1224_v19  ;;  %v1740_v17 = vcvt.s32.f32 %v1228_v20 }
 0x14b   :  { %2386 = vmatpush.bf16.msrb.mxu3 %v2072_v10  ;;  %v1080_v4 = vunpack.c.2.s8 %v740_v16  ;;  %v2000_v27 = vpack.c.bf16 %v1668_v31, %v1664_v62  ;;  %v1800_v55 = vcvt.s32.f32 %v1288_v7  ;;  %v1084_v22 = vunpack.c.3.s8 %v740_v16 }
 0x14c   :  { %v1804_v47 = vcvt.s32.f32 %v1292_v35  ;;  %2349 = vmatpush.bf16.msrb.mxu0 %v1968_v13  ;;  %v2036_v36 = vpack.c.bf16 %v1740_v17, %v1736_v33  ;;  %v1144_v49 = vunpack.c.2.s8 %v756_v50  ;;  %v1148_v51 = vunpack.c.3.s8 %v756_v50 }
 0x14d   :  { %v1592_v37 = vcvt.s32.f32 %v1080_v4  ;;  %2362 = vmatpush.bf16.msrb.mxu1 %v2000_v27  ;;  %v1596_v59 = vcvt.s32.f32 %v1084_v22  ;;  %v1216_v48 = vunpack.c.0.s8 %v776_v2  ;;  %v1220_v52 = vunpack.c.1.s8 %v776_v2 }
 0x14e   :  { %v2068_v61 = vpack.c.bf16 %v1804_v47, %v1800_v55  ;;  %2374 = vmatpush.bf16.msrb.mxu2 %v2036_v36  ;;  %v1656_v30 = vcvt.s32.f32 %v1144_v49  ;;  %v1660_v42 = vcvt.s32.f32 %v1148_v51  ;;  %v1280_v53 = vunpack.c.0.s8 %v792_v14 }
 0x14f   :  { %v1284_v58 = vunpack.c.1.s8 %v792_v14  ;;  %v1964_v41 = vpack.c.bf16 %v1596_v59, %v1592_v37  ;;  %v1728_v56 = vcvt.s32.f32 %v1216_v48  ;;  %v1732_v57 = vcvt.s32.f32 %v1220_v52  ;;  %v2097_v49 = vpop.f32.mrf.mxu0  ;;  %v685_v52 = vld [vmem:[#allocation9 + $0x78] sm:$0xff] }
 0x150   :  { %2387 = vmatpush.bf16.msrb.mxu3 %v2068_v61  ;;  %v1072_v54 = vunpack.c.0.s8 %v740_v16  ;;  %v1996_v8 = vpack.c.bf16 %v1660_v42, %v1656_v30  ;;  %v1792_v44 = vcvt.s32.f32 %v1280_v53  ;;  %v1076_v15 = vunpack.c.1.s8 %v740_v16 }
 0x151   :  { %v1796_v21 = vcvt.s32.f32 %v1284_v58  ;;  %2350 = vmatpush.bf16.msrb.mxu0 %v1964_v41  ;;  %v2032_v5 = vpack.c.bf16 %v1732_v57, %v1728_v56  ;;  %v1136_v26 = vunpack.c.0.s8 %v756_v50  ;;  %v1140_v34 = vunpack.c.1.s8 %v756_v50  ;;  %v701_v41 = vld [vmem:[#allocation9 + $0xf8] sm:$0xff]  ;;  %v2110_v56 = vpop.f32.mrf.mxu1 }
 0x152   :  { %v1584_v25 = vcvt.s32.f32 %v1072_v54  ;;  %2363 = vmatpush.bf16.msrb.mxu1 %v1996_v8  ;;  %v1588_v11 = vcvt.s32.f32 %v1076_v15  ;;  %v1208_v63 = vunpack.c.2.s8 %v772_v9  ;;  %v1212_v60 = vunpack.c.3.s8 %v772_v9 }
 0x153   :  { %v2064_v2 = vpack.c.bf16 %v1796_v21, %v1792_v44  ;;  %2375 = vmatpush.bf16.msrb.mxu2 %v2032_v5  ;;  %v1648_v14 = vcvt.s32.f32 %v1136_v26  ;;  %v1652_v18 = vcvt.s32.f32 %v1140_v34  ;;  %v1272_v32 = vunpack.c.2.s8 %v788_v28  ;;  %v768_v44 = vld [vmem:[#allocation9 + $0x310] sm:$0xff] }
 0x154   :  { %v1276_v24 = vunpack.c.3.s8 %v788_v28  ;;  %v1960_v16 = vpack.c.bf16 %v1588_v11, %v1584_v25  ;;  %v1720_v10 = vcvt.s32.f32 %v1208_v63  ;;  %v1724_v6 = vcvt.s32.f32 %v1212_v60  ;;  %v784_v11 = vld [vmem:[#allocation9 + $0x390] sm:$0xff] }
 0x155   :  { %2388 = vmatpush.bf16.msrb.mxu3 %v2064_v2  ;;  %v1064_v19 = vunpack.c.2.s8 %v736_v38  ;;  %v1992_v20 = vpack.c.bf16 %v1652_v18, %v1648_v14  ;;  %v1784_v62 = vcvt.s32.f32 %v1272_v32  ;;  %v1068_v7 = vunpack.c.3.s8 %v736_v38 }
 0x156   :  { %v1788_v31 = vcvt.s32.f32 %v1276_v24  ;;  %2351 = vmatpush.bf16.msrb.mxu0 %v1960_v16  ;;  %v2028_v35 = vpack.c.bf16 %v1724_v6, %v1720_v10  ;;  %v1128_v13 = vunpack.c.2.s8 %v752_v39  ;;  %v1132_v33 = vunpack.c.3.s8 %v752_v39  ;;  %v6812_v16 = vpop.f32.mrf.mxu2  ;;  %v6814_v10 = vpop.f32.mrf.mxu3 }
 0x157   :  { %v1576_v50 = vcvt.s32.f32 %v1064_v19  ;;  %2364 = vmatpush.bf16.msrb.mxu1 %v1992_v20  ;;  %v1580_v4 = vcvt.s32.f32 %v1068_v7  ;;  %v1200_v27 = vunpack.c.0.s8 %v772_v9  ;;  %v1204_v55 = vunpack.c.1.s8 %v772_v9 }
 0x158   :  { %v2060_v17 = vpack.c.bf16 %v1788_v31, %v1784_v62  ;;  %2376 = vmatpush.bf16.msrb.mxu2 %v2028_v35  ;;  %v1640_v47 = vcvt.s32.f32 %v1128_v13  ;;  %v1644_v22 = vcvt.s32.f32 %v1132_v33  ;;  %v1264_v36 = vunpack.c.0.s8 %v788_v28 }
 0x159   :  { %v1268_v37 = vunpack.c.1.s8 %v788_v28  ;;  %v1956_v51 = vpack.c.bf16 %v1580_v4, %v1576_v50  ;;  %v1712_v61 = vcvt.s32.f32 %v1200_v27  ;;  %v1716_v59 = vcvt.s32.f32 %v1204_v55 }
 0x15a   :  { %2389 = vmatpush.bf16.msrb.mxu3 %v2060_v17  ;;  %v1056_v48 = vunpack.c.0.s8 %v736_v38  ;;  %v1988_v30 = vpack.c.bf16 %v1644_v22, %v1640_v47  ;;  %v1776_v42 = vcvt.s32.f32 %v1264_v36  ;;  %v1060_v58 = vunpack.c.1.s8 %v736_v38  ;;  %v717_v36 = vld [vmem:[#allocation9 + $0x178] sm:$0xff] }
 0x15b   :  { %v1780_v53 = vcvt.s32.f32 %v1268_v37  ;;  %2352 = vmatpush.bf16.msrb.mxu0 %v1956_v51  ;;  %v2024_v57 = vpack.c.bf16 %v1716_v59, %v1712_v61  ;;  %v1120_v9 = vunpack.c.0.s8 %v752_v39  ;;  %v1124_v8 = vunpack.c.1.s8 %v752_v39  ;;  %v733_v59 = vld [vmem:[#allocation9 + $0x1f8] sm:$0xff] }
 0x15c   :  { %v1568_v54 = vcvt.s32.f32 %v1056_v48  ;;  %2365 = vmatpush.bf16.msrb.mxu1 %v1988_v30  ;;  %v1572_v15 = vcvt.s32.f32 %v1060_v58  ;;  %v857_v28 = vunpack.c.2.s8 %v685_v52  ;;  %v861_v5 = vunpack.c.3.s8 %v685_v52 }
 0x15d   :  { %v2056_v21 = vpack.c.bf16 %v1780_v53, %v1776_v42  ;;  %2377 = vmatpush.bf16.msrb.mxu2 %v2024_v57  ;;  %v1632_v25 = vcvt.s32.f32 %v1120_v9  ;;  %v1636_v26 = vcvt.s32.f32 %v1124_v8  ;;  %v921_v34 = vunpack.c.2.s8 %v701_v41  ;;  %v6818_v53 = vld [vmem:[#allocation9 + $0x58] sm:$0xff] }
 0x15e   :  { %v925_v2 = vunpack.c.3.s8 %v701_v41  ;;  %v1952_v38 = vpack.c.bf16 %v1572_v15, %v1568_v54  ;;  %v1369_v63 = vcvt.s32.f32 %v857_v28  ;;  %v1373_v60 = vcvt.s32.f32 %v861_v5  ;;  %v697_v15 = vld [vmem:[#allocation9 + $0xd8] sm:$0xff]  ;;  %v2136_v28 = vpop.f32.mrf.mxu3 }
 0x15f   :  { %2390 = vmatpush.bf16.msrb.mxu3 %v2056_v21  ;;  %v1192_v14 = vunpack.c.2.s8 %v768_v44  ;;  %v1984_v18 = vpack.c.bf16 %v1636_v26, %v1632_v25  ;;  %v1433_v32 = vcvt.s32.f32 %v921_v34  ;;  %v1196_v39 = vunpack.c.3.s8 %v768_v44 }
 0x160   :  { %v1437_v24 = vcvt.s32.f32 %v925_v2  ;;  %2353 = vmatpush.bf16.msrb.mxu0 %v1952_v38  ;;  %v1853_v6 = vpack.c.bf16 %v1373_v60, %v1369_v63  ;;  %v1256_v20 = vunpack.c.2.s8 %v784_v11  ;;  %v1260_v62 = vunpack.c.3.s8 %v784_v11 }
 0x161   :  { %v1704_v19 = vcvt.s32.f32 %v1192_v14  ;;  %2366 = vmatpush.bf16.msrb.mxu1 %v1984_v18  ;;  %v1708_v7 = vcvt.s32.f32 %v1196_v39  ;;  %v849_v35 = vunpack.c.0.s8 %v685_v52  ;;  %v853_v50 = vunpack.c.1.s8 %v685_v52 }
 0x162   :  { %v1885_v31 = vpack.c.bf16 %v1437_v24, %v1433_v32  ;;  %v1768_v13 = vcvt.s32.f32 %v1256_v20  ;;  %v1772_v33 = vcvt.s32.f32 %v1260_v62  ;;  %v913_v17 = vunpack.c.0.s8 %v701_v41 }
 0x163   :  { %v917_v4 = vunpack.c.1.s8 %v701_v41  ;;  %v2020_v27 = vpack.c.bf16 %v1708_v7, %v1704_v19  ;;  %2354 = vmatmul.bf16.vlgmr.msrb.gmra.mxu0 %v6759_v12  ;;  %v1361_v55 = vcvt.s32.f32 %v849_v35  ;;  %v1365_v47 = vcvt.s32.f32 %v853_v50 }
 0x164   :  { %2398 = vmatpush.bf16.msra.mxu0 %v1853_v6  ;;  %v1184_v22 = vunpack.c.0.s8 %v768_v44  ;;  %v2052_v37 = vpack.c.bf16 %v1772_v33, %v1768_v13  ;;  %2367 = vmatmul.bf16.vlgmr.msrb.gmra.mxu1 %v6766_v46  ;;  %v1425_v49 = vcvt.s32.f32 %v913_v17  ;;  %v1188_v61 = vunpack.c.1.s8 %v768_v44  ;;  %v2123_v44 = vpop.f32.mrf.mxu2  ;;  %v713_v17 = vld [vmem:[#allocation9 + $0x158] sm:$0xff] }
 0x165   :  { %2411 = vmatpush.bf16.msra.mxu1 %v1885_v31  ;;  %v1429_v51 = vcvt.s32.f32 %v917_v4  ;;  %2378 = vmatpush.bf16.msrb.mxu2 %v2020_v27  ;;  %v1849_v48 = vpack.c.bf16 %v1365_v47, %v1361_v55  ;;  %v1248_v30 = vunpack.c.0.s8 %v784_v11  ;;  %v1252_v42 = vunpack.c.1.s8 %v784_v11 }
 0x166   :  { %v1696_v52 = vcvt.s32.f32 %v1184_v22  ;;  %2391 = vmatpush.bf16.msrb.mxu3 %v2052_v37  ;;  %v1700_v41 = vcvt.s32.f32 %v1188_v61  ;;  %v985_v56 = vunpack.c.2.s8 %v717_v36  ;;  %v989_v57 = vunpack.c.3.s8 %v717_v36  ;;  %v729_v22 = vld [vmem:[#allocation9 + $0x1d8] sm:$0xff] }
 0x167   :  { %v1881_v58 = vpack.c.bf16 %v1429_v51, %v1425_v49  ;;  %v1760_v54 = vcvt.s32.f32 %v1248_v30  ;;  %v1764_v9 = vcvt.s32.f32 %v1252_v42  ;;  %v1049_v8 = vunpack.c.2.s8 %v733_v59  ;;  %v677_v61 = vld [vmem:[#allocation9 + $0x38] sm:$0xff] }
 0x168   :  { %2399 = vmatpush.bf16.msra.mxu0 %v1849_v48  ;;  %v1053_v21 = vunpack.c.3.s8 %v733_v59  ;;  %v2016_v5 = vpack.c.bf16 %v1700_v41, %v1696_v52  ;;  %v1497_v25 = vcvt.s32.f32 %v985_v56  ;;  %v1501_v26 = vcvt.s32.f32 %v989_v57  ;;  %v693_v41 = vld [vmem:[#allocation9 + $0xb8] sm:$0xff] }
 0x169   :  { %2412 = vmatpush.bf16.msra.mxu1 %v1881_v58  ;;  %v841_v34 = vunpack.c.2.s8 %v6818_v53  ;;  %v2048_v2 = vpack.c.bf16 %v1764_v9, %v1760_v54  ;;  %v1561_v11 = vcvt.s32.f32 %v1049_v8  ;;  %v845_v63 = vunpack.c.3.s8 %v6818_v53 }
 0x16a   :  { %v1565_v38 = vcvt.s32.f32 %v1053_v21  ;;  %2379 = vmatpush.bf16.msrb.mxu2 %v2016_v5  ;;  %v1917_v60 = vpack.c.bf16 %v1501_v26, %v1497_v25  ;;  %v905_v18 = vunpack.c.2.s8 %v697_v15  ;;  %v909_v32 = vunpack.c.3.s8 %v697_v15 }
 0x16b   :  { %v1353_v14 = vcvt.s32.f32 %v841_v34  ;;  %2392 = vmatpush.bf16.msrb.mxu3 %v2048_v2  ;;  %v1357_v39 = vcvt.s32.f32 %v845_v63  ;;  %v977_v6 = vunpack.c.0.s8 %v717_v36  ;;  %v981_v19 = vunpack.c.1.s8 %v717_v36 }
 0x16c   :  { %v1949_v24 = vpack.c.bf16 %v1565_v38, %v1561_v11  ;;  %v1417_v20 = vcvt.s32.f32 %v905_v18  ;;  %v1421_v62 = vcvt.s32.f32 %v909_v32  ;;  %v1041_v31 = vunpack.c.0.s8 %v733_v59 }
 0x16d   :  { %v1045_v7 = vunpack.c.1.s8 %v733_v59  ;;  %2380 = vmatmul.bf16.vlgmr.msrb.gmra.mxu2 %v6785_v40  ;;  %v1845_v35 = vpack.c.bf16 %v1357_v39, %v1353_v14  ;;  %v1489_v50 = vcvt.s32.f32 %v977_v6  ;;  %v1493_v13 = vcvt.s32.f32 %v981_v19 }
 0x16e   :  { %2424 = vmatpush.bf16.msra.mxu2 %v1917_v60  ;;  %v6825_v33 = vadd.f32 %v6810_v0, %v6808_v1  ;;  %2393 = vmatmul.bf16.vlgmr.msrb.gmra.mxu3 %v6789_v29  ;;  %v1877_v4 = vpack.c.bf16 %v1421_v62, %v1417_v20  ;;  %v1553_v27 = vcvt.s32.f32 %v1041_v31  ;;  %v833_v47 = vunpack.c.0.s8 %v6818_v53  ;;  %v709_v31 = vld [vmem:[#allocation9 + $0x138] sm:$0xff] }
 0x16f   :  { %2437 = vmatpush.bf16.msra.mxu3 %v1949_v24  ;;  %v1557_v55 = vcvt.s32.f32 %v1045_v7  ;;  %2400 = vmatpush.bf16.msra.mxu0 %v1845_v35  ;;  %v1913_v36 = vpack.c.bf16 %v1493_v13, %v1489_v50  ;;  %v837_v37 = vunpack.c.1.s8 %v6818_v53  ;;  %v897_v49 = vunpack.c.0.s8 %v697_v15 }
 0x170   :  { %v901_v51 = vunpack.c.1.s8 %v697_v15  ;;  %2413 = vmatpush.bf16.msra.mxu1 %v1877_v4  ;;  %v1345_v1 = vcvt.s32.f32 %v833_v47  ;;  %v969_v0 = vunpack.c.2.s8 %v713_v17  ;;  %v973_v48 = vunpack.c.3.s8 %v713_v17  ;;  %v6830_v4 = vpop.f32.mrf.mxu0 }
 0x171   :  { %v1945_v59 = vpack.c.bf16 %v1557_v55, %v1553_v27  ;;  %v1349_v52 = vcvt.s32.f32 %v837_v37  ;;  %v1409_v30 = vcvt.s32.f32 %v897_v49  ;;  %v1033_v58 = vunpack.c.2.s8 %v729_v22  ;;  %v6832_v27 = vpop.f32.mrf.mxu1  ;;  %v673_v37 = vld [vmem:[#allocation9 + $0x18] sm:$0xff] }
 0x172   :  { %2425 = vmatpush.bf16.msra.mxu2 %v1913_v36  ;;  %v1413_v42 = vcvt.s32.f32 %v901_v51  ;;  %v1481_v56 = vcvt.s32.f32 %v969_v0  ;;  %v1485_v57 = vcvt.s32.f32 %v973_v48  ;;  %v1037_v54 = vunpack.c.3.s8 %v729_v22 }
 0x173   :  { %2438 = vmatpush.bf16.msra.mxu3 %v1945_v59  ;;  %v825_v9 = vunpack.c.2.s8 %v677_v61  ;;  %v1841_v53 = vpack.c.bf16 %v1349_v52, %v1345_v1  ;;  %v1545_v21 = vcvt.s32.f32 %v1033_v58  ;;  %v829_v15 = vunpack.c.3.s8 %v677_v61  ;;  %v689_v1 = vld [vmem:[#allocation9 + $0x98] sm:$0xff] }
 0x174   :  { %v1873_v8 = vpack.c.bf16 %v1413_v42, %v1409_v30  ;;  %v1909_v44 = vpack.c.bf16 %v1485_v57, %v1481_v56  ;;  %v1549_v28 = vcvt.s32.f32 %v1037_v54  ;;  %v889_v25 = vunpack.c.2.s8 %v693_v41 }
 0x175   :  { %v1337_v5 = vcvt.s32.f32 %v825_v9  ;;  %2401 = vmatpush.bf16.msra.mxu0 %v1841_v53  ;;  %v1341_v26 = vcvt.s32.f32 %v829_v15  ;;  %v893_v34 = vunpack.c.3.s8 %v693_v41  ;;  %v961_v2 = vunpack.c.0.s8 %v713_v17 }
 0x176   :  { %2414 = vmatpush.bf16.msra.mxu1 %v1873_v8  ;;  %v965_v11 = vunpack.c.1.s8 %v713_v17  ;;  %2426 = vmatpush.bf16.msra.mxu2 %v1909_v44  ;;  %v1941_v38 = vpack.c.bf16 %v1549_v28, %v1545_v21  ;;  %v1401_v63 = vcvt.s32.f32 %v889_v25  ;;  %v1025_v60 = vunpack.c.0.s8 %v729_v22  ;;  %v725_v17 = vld [vmem:[#allocation9 + $0x1b8] sm:$0xff] }
 0x177   :  { %v1029_v14 = vunpack.c.1.s8 %v729_v22  ;;  %v1837_v18 = vpack.c.bf16 %v1341_v26, %v1337_v5  ;;  %v1405_v32 = vcvt.s32.f32 %v893_v34  ;;  %v1473_v24 = vcvt.s32.f32 %v961_v2 }
 0x178   :  { %v1477_v39 = vcvt.s32.f32 %v965_v11  ;;  %2439 = vmatpush.bf16.msra.mxu3 %v1941_v38  ;;  %v1537_v6 = vcvt.s32.f32 %v1025_v60  ;;  %v817_v20 = vunpack.c.0.s8 %v677_v61  ;;  %v821_v62 = vunpack.c.1.s8 %v677_v61  ;;  %v2149_v2 = vpop.f32.mrf.mxu0 }
 0x179   :  { %v1541_v19 = vcvt.s32.f32 %v1029_v14  ;;  %2402 = vmatpush.bf16.msra.mxu0 %v1837_v18  ;;  %v1869_v7 = vpack.c.bf16 %v1405_v32, %v1401_v63  ;;  %v881_v50 = vunpack.c.0.s8 %v693_v41  ;;  %v885_v13 = vunpack.c.1.s8 %v693_v41  ;;  %v2162_v11 = vpop.f32.mrf.mxu1  ;;  %v749_v18 = vld [vmem:[#allocation9 + $0x278] sm:$0xff] }
 0x17a   :  { %v1905_v35 = vpack.c.bf16 %v1477_v39, %v1473_v24  ;;  %v1329_v47 = vcvt.s32.f32 %v817_v20  ;;  %v1333_v22 = vcvt.s32.f32 %v821_v62  ;;  %v2122_v36 = vadd.f32 %v6812_v16, %v6825_v33 }
 0x17b   :  { %v1937_v55 = vpack.c.bf16 %v1541_v19, %v1537_v6  ;;  %2415 = vmatpush.bf16.msra.mxu1 %v1869_v7  ;;  %v1393_v49 = vcvt.s32.f32 %v881_v50  ;;  %v1397_v51 = vcvt.s32.f32 %v885_v13  ;;  %v953_v61 = vunpack.c.2.s8 %v709_v31  ;;  %v765_v19 = vld [vmem:[#allocation9 + $0x2f8] sm:$0xff] }
 0x17c   :  { %2427 = vmatpush.bf16.msra.mxu2 %v1905_v35  ;;  %v957_v59 = vunpack.c.3.s8 %v709_v31  ;;  %v1833_v0 = vpack.c.bf16 %v1333_v22, %v1329_v47  ;;  %v6837_v48 = vadd.f32 %v6814_v10, %v2122_v36  ;;  %v1017_v52 = vunpack.c.2.s8 %v725_v17  ;;  %v705_v35 = vld [vmem:[#allocation9 + $0x118] sm:$0xff] }
 0x17d   :  { %2440 = vmatpush.bf16.msra.mxu3 %v1937_v55  ;;  %v1021_v30 = vunpack.c.3.s8 %v725_v17  ;;  %v1865_v42 = vpack.c.bf16 %v1397_v51, %v1393_v49  ;;  %v1465_v58 = vcvt.s32.f32 %v953_v61  ;;  %v809_v56 = vunpack.c.2.s8 %v673_v37  ;;  %v721_v47 = vld [vmem:[#allocation9 + $0x198] sm:$0xff] }
 0x17e   :  { %v1469_v41 = vcvt.s32.f32 %v957_v59  ;;  %2403 = vmatpush.bf16.msra.mxu0 %v1833_v0  ;;  %v1529_v16 = vcvt.s32.f32 %v1017_v52  ;;  %v813_v57 = vunpack.c.3.s8 %v673_v37  ;;  %v873_v54 = vunpack.c.2.s8 %v689_v1 }
 0x17f   :  { %v1533_v33 = vcvt.s32.f32 %v1021_v30  ;;  %2416 = vmatpush.bf16.msra.mxu1 %v1865_v42  ;;  %v1321_v53 = vcvt.s32.f32 %v809_v56  ;;  %v877_v8 = vunpack.c.3.s8 %v689_v1  ;;  %v945_v21 = vunpack.c.0.s8 %v709_v31 }
 0x180   :  { %v1901_v9 = vpack.c.bf16 %v1469_v41, %v1465_v58  ;;  %v1325_v44 = vcvt.s32.f32 %v813_v57  ;;  %v1385_v10 = vcvt.s32.f32 %v873_v54  ;;  %v949_v28 = vunpack.c.1.s8 %v709_v31  ;;  %v6839_v58 = vpop.f32.mrf.mxu2  ;;  %v6841_v41 = vpop.f32.mrf.mxu3 }
 0x181   :  { %v1933_v15 = vpack.c.bf16 %v1533_v33, %v1529_v16  ;;  %v1389_v5 = vcvt.s32.f32 %v877_v8  ;;  %v1457_v25 = vcvt.s32.f32 %v945_v21  ;;  %v1009_v26 = vunpack.c.0.s8 %v725_v17 }
 0x182   :  { %2428 = vmatpush.bf16.msra.mxu2 %v1901_v9  ;;  %v1013_v34 = vunpack.c.1.s8 %v725_v17  ;;  %v1829_v38 = vpack.c.bf16 %v1325_v44, %v1321_v53  ;;  %v1461_v63 = vcvt.s32.f32 %v949_v28  ;;  %v801_v60 = vunpack.c.0.s8 %v673_v37 }
 0x183   :  { %2441 = vmatpush.bf16.msra.mxu3 %v1933_v15  ;;  %v805_v14 = vunpack.c.1.s8 %v673_v37  ;;  %v1861_v32 = vpack.c.bf16 %v1389_v5, %v1385_v10  ;;  %v1521_v24 = vcvt.s32.f32 %v1009_v26  ;;  %v865_v6 = vunpack.c.0.s8 %v689_v1 }
 0x184   :  { %v1525_v39 = vcvt.s32.f32 %v1013_v34  ;;  %2404 = vmatpush.bf16.msra.mxu0 %v1829_v38  ;;  %v1897_v20 = vpack.c.bf16 %v1461_v63, %v1457_v25  ;;  %v1313_v62 = vcvt.s32.f32 %v801_v60  ;;  %v869_v7 = vunpack.c.1.s8 %v689_v1  ;;  %v781_v34 = vld [vmem:[#allocation9 + $0x378] sm:$0xff] }
 0x185   :  { %v1317_v31 = vcvt.s32.f32 %v805_v14  ;;  %2417 = vmatpush.bf16.msra.mxu1 %v1861_v32  ;;  %v1377_v13 = vcvt.s32.f32 %v865_v6  ;;  %v1113_v17 = vunpack.c.2.s8 %v749_v18  ;;  %v1117_v55 = vunpack.c.3.s8 %v749_v18  ;;  %v797_v60 = vld [vmem:[#allocation9 + $0x3f8] sm:$0xff] }
 0x186   :  { %v1929_v50 = vpack.c.bf16 %v1525_v39, %v1521_v24  ;;  %2429 = vmatpush.bf16.msra.mxu2 %v1897_v20  ;;  %v1381_v36 = vcvt.s32.f32 %v869_v7  ;;  %v1177_v37 = vunpack.c.2.s8 %v765_v19  ;;  %v1181_v49 = vunpack.c.3.s8 %v765_v19  ;;  %v745_v39 = vld [vmem:[#allocation9 + $0x258] sm:$0xff]  ;;  %v6847_v7 = vpop.f32.mrf.mxu1 }
 0x187   :  { %v1825_v22 = vpack.c.bf16 %v1317_v31, %v1313_v62  ;;  %v1625_v51 = vcvt.s32.f32 %v1113_v17  ;;  %v1629_v61 = vcvt.s32.f32 %v1117_v55  ;;  %v937_v59 = vunpack.c.2.s8 %v705_v35  ;;  %v761_v62 = vld [vmem:[#allocation9 + $0x2d8] sm:$0xff]  ;;  %v6845_v31 = vpop.f32.mrf.mxu0 }
 0x188   :  { %2442 = vmatpush.bf16.msra.mxu3 %v1929_v50  ;;  %v941_v0 = vunpack.c.3.s8 %v705_v35  ;;  %v1857_v52 = vpack.c.bf16 %v1381_v36, %v1377_v13  ;;  %v1689_v1 = vcvt.s32.f32 %v1177_v37  ;;  %v1693_v30 = vcvt.s32.f32 %v1181_v49  ;;  %v2175_v17 = vpop.f32.mrf.mxu2  ;;  %v2188_v55 = vpop.f32.mrf.mxu3 }
 0x189   :  { %2405 = vmatpush.bf16.msra.mxu0 %v1825_v22  ;;  %v1001_v42 = vunpack.c.2.s8 %v721_v47  ;;  %v1981_v56 = vpack.c.bf16 %v1629_v61, %v1625_v51  ;;  %v1449_v16 = vcvt.s32.f32 %v937_v59  ;;  %v1005_v57 = vunpack.c.3.s8 %v721_v47 }
 0x18a   :  { %v1453_v33 = vcvt.s32.f32 %v941_v0  ;;  %2418 = vmatpush.bf16.msra.mxu1 %v1857_v52  ;;  %v2013_v54 = vpack.c.bf16 %v1693_v30, %v1689_v1  ;;  %v1105_v53 = vunpack.c.0.s8 %v749_v18  ;;  %v1109_v8 = vunpack.c.1.s8 %v749_v18 }
 0x18b   :  { %v1513_v9 = vcvt.s32.f32 %v1001_v42  ;;  %v1517_v15 = vcvt.s32.f32 %v1005_v57  ;;  %v1169_v44 = vunpack.c.0.s8 %v765_v19  ;;  %v1173_v10 = vunpack.c.1.s8 %v765_v19 }
 0x18c   :  { %v1893_v21 = vpack.c.bf16 %v1453_v33, %v1449_v16  ;;  %2406 = vmatmul.bf16.vlgmr.msra.gmra.mxu0 %v6640_v45  ;;  %v1617_v28 = vcvt.s32.f32 %v1105_v53  ;;  %v1621_v5 = vcvt.s32.f32 %v1109_v8  ;;  %v929_v25 = vunpack.c.0.s8 %v705_v35 }
 0x18d   :  { %2450 = vmatpush.bf16.msrb.mxu0 %v1981_v56  ;;  %v933_v26 = vunpack.c.1.s8 %v705_v35  ;;  %v1925_v2 = vpack.c.bf16 %v1517_v15, %v1513_v9  ;;  %2419 = vmatmul.bf16.vlgmr.msra.gmra.mxu1 %v6631_v3  ;;  %v1681_v11 = vcvt.s32.f32 %v1169_v44  ;;  %v1685_v38 = vcvt.s32.f32 %v1173_v10  ;;  %v777_v10 = vld [vmem:[#allocation9 + $0x358] sm:$0xff] }
 0x18e   :  { %2463 = vmatpush.bf16.msrb.mxu1 %v2013_v54  ;;  %2430 = vmatpush.bf16.msra.mxu2 %v1893_v21  ;;  %v993_v63 = vunpack.c.0.s8 %v721_v47  ;;  %v1977_v14 = vpack.c.bf16 %v1621_v5, %v1617_v28  ;;  %v1441_v18 = vcvt.s32.f32 %v929_v25  ;;  %v997_v24 = vunpack.c.1.s8 %v721_v47  ;;  %v793_v25 = vld [vmem:[#allocation9 + $0x3d8] sm:$0xff] }
 0x18f   :  { %v1445_v32 = vcvt.s32.f32 %v933_v26  ;;  %2443 = vmatpush.bf16.msra.mxu3 %v1925_v2  ;;  %v2009_v45 = vpack.c.bf16 %v1685_v38, %v1681_v11  ;;  %v1241_v19 = vunpack.c.2.s8 %v781_v34  ;;  %v1245_v20 = vunpack.c.3.s8 %v781_v34  ;;  %v2201_v26 = vpop.f32.mrf.mxu0 }
 0x190   :  { %v1505_v6 = vcvt.s32.f32 %v993_v63  ;;  %v1509_v35 = vcvt.s32.f32 %v997_v24  ;;  %v1305_v50 = vunpack.c.2.s8 %v797_v60  ;;  %v1309_v13 = vunpack.c.3.s8 %v797_v60 }
 0x191   :  { %2451 = vmatpush.bf16.msrb.mxu0 %v1977_v14  ;;  %v1889_v3 = vpack.c.bf16 %v1445_v32, %v1441_v18  ;;  %v1753_v47 = vcvt.s32.f32 %v1241_v19  ;;  %v1757_v22 = vcvt.s32.f32 %v1245_v20  ;;  %v1097_v36 = vunpack.c.2.s8 %v745_v39  ;;  %v741_v18 = vld [vmem:[#allocation9 + $0x238] sm:$0xff] }
 0x192   :  { %2464 = vmatpush.bf16.msrb.mxu1 %v2009_v45  ;;  %v1101_v37 = vunpack.c.3.s8 %v745_v39  ;;  %v1921_v49 = vpack.c.bf16 %v1509_v35, %v1505_v6  ;;  %v1817_v51 = vcvt.s32.f32 %v1305_v50  ;;  %v1821_v61 = vcvt.s32.f32 %v1309_v13  ;;  %v757_v6 = vld [vmem:[#allocation9 + $0x2b8] sm:$0xff] }
 0x193   :  { %2431 = vmatpush.bf16.msra.mxu2 %v1889_v3  ;;  %v1161_v59 = vunpack.c.2.s8 %v761_v62  ;;  %v2045_v0 = vpack.c.bf16 %v1757_v22, %v1753_v47  ;;  %v1609_v52 = vcvt.s32.f32 %v1097_v36  ;;  %v1165_v30 = vunpack.c.3.s8 %v761_v62 }
 0x194   :  { %v1613_v1 = vcvt.s32.f32 %v1101_v37  ;;  %2444 = vmatpush.bf16.msra.mxu3 %v1921_v49  ;;  %v2077_v42 = vpack.c.bf16 %v1821_v61, %v1817_v51  ;;  %v2148_v16 = vadd.f32 %v6830_v4, %v6837_v48  ;;  %v1233_v33 = vunpack.c.0.s8 %v781_v34  ;;  %v6856_v61 = vpop.f32.mrf.mxu2 }
 0x195   :  { %v1673_v56 = vcvt.s32.f32 %v1161_v59  ;;  %v1677_v54 = vcvt.s32.f32 %v1165_v30  ;;  %v1237_v9 = vunpack.c.1.s8 %v781_v34  ;;  %v1297_v53 = vunpack.c.0.s8 %v797_v60  ;;  %v2214_v34 = vpop.f32.mrf.mxu1  ;;  %v6858_v59 = vpop.f32.mrf.mxu3 }
 0x196   :  { %v1973_v57 = vpack.c.bf16 %v1613_v1, %v1609_v52  ;;  %2432 = vmatmul.bf16.vlgmr.msra.gmra.mxu2 %v6699_v43  ;;  %v6853_v8 = vadd.f32 %v6832_v27, %v2148_v16  ;;  %v1745_v21 = vcvt.s32.f32 %v1233_v33  ;;  %v1301_v15 = vunpack.c.1.s8 %v797_v60  ;;  %v789_v34 = vld [vmem:[#allocation9 + $0x3b8] sm:$0xff] }
 0x197   :  { %2476 = vmatpush.bf16.msrb.mxu2 %v2045_v0  ;;  %v1089_v44 = vunpack.c.0.s8 %v745_v39  ;;  %2445 = vmatmul.bf16.vlgmr.msra.gmra.mxu3 %v6693_v23  ;;  %v2005_v4 = vpack.c.bf16 %v1677_v54, %v1673_v56  ;;  %v1749_v48 = vcvt.s32.f32 %v1237_v9  ;;  %v1809_v28 = vcvt.s32.f32 %v1297_v53 }
 0x198   :  { %2489 = vmatpush.bf16.msrb.mxu3 %v2077_v42  ;;  %2452 = vmatpush.bf16.msrb.mxu0 %v1973_v57  ;;  %v1093_v5 = vunpack.c.1.s8 %v745_v39  ;;  %v1813_v2 = vcvt.s32.f32 %v1301_v15  ;;  %v1153_v43 = vunpack.c.0.s8 %v761_v62  ;;  %v1157_v38 = vunpack.c.1.s8 %v761_v62 }
 0x199   :  { %v1601_v11 = vcvt.s32.f32 %v1089_v44  ;;  %2465 = vmatpush.bf16.msrb.mxu1 %v2005_v4  ;;  %v2041_v27 = vpack.c.bf16 %v1749_v48, %v1745_v21  ;;  %v1225_v60 = vunpack.c.2.s8 %v777_v10  ;;  %v1229_v14 = vunpack.c.3.s8 %v777_v10  ;;  %v773_v4 = vld [vmem:[#allocation9 + $0x338] sm:$0xff]  ;;  %v6860_v48 = vpop.f32.mrf.mxu0 }
 0x19a   :  { %v1605_v63 = vcvt.s32.f32 %v1093_v5  ;;  %v2073_v32 = vpack.c.bf16 %v1813_v2, %v1809_v28  ;;  %v1665_v23 = vcvt.s32.f32 %v1153_v43  ;;  %v1669_v24 = vcvt.s32.f32 %v1157_v38  ;;  %v737_v2 = vld [vmem:[#allocation9 + $0x218] sm:$0xff] }
 0x19b   :  { %v1289_v45 = vunpack.c.2.s8 %v793_v25  ;;  %2477 = vmatpush.bf16.msrb.mxu2 %v2041_v27  ;;  %v1737_v19 = vcvt.s32.f32 %v1225_v60  ;;  %v1741_v20 = vcvt.s32.f32 %v1229_v14  ;;  %v1293_v3 = vunpack.c.3.s8 %v793_v25 }
 0x19c   :  { %v1969_v39 = vpack.c.bf16 %v1605_v63, %v1601_v11  ;;  %2490 = vmatpush.bf16.msrb.mxu3 %v2073_v32  ;;  %v2001_v35 = vpack.c.bf16 %v1669_v24, %v1665_v23  ;;  %v1081_v62 = vunpack.c.2.s8 %v741_v18  ;;  %v1085_v13 = vunpack.c.3.s8 %v741_v18 }
 0x19d   :  { %v1801_v50 = vcvt.s32.f32 %v1289_v45  ;;  %v2037_v17 = vpack.c.bf16 %v1741_v20, %v1737_v19  ;;  %v1805_v55 = vcvt.s32.f32 %v1293_v3  ;;  %v1145_v47 = vunpack.c.2.s8 %v757_v6  ;;  %v6862_v28 = vpop.f32.mrf.mxu1  ;;  %v6869_v20 = vld [vmem:[#allocation12 + $0x43] ss:$8 sm:$0xf] }
 0x19e   :  { %2453 = vmatpush.bf16.msrb.mxu0 %v1969_v39  ;;  %v1149_v22 = vunpack.c.3.s8 %v757_v6  ;;  %2466 = vmatpush.bf16.msrb.mxu1 %v2001_v35  ;;  %v1593_v36 = vcvt.s32.f32 %v1081_v62  ;;  %v1597_v37 = vcvt.s32.f32 %v1085_v13  ;;  %v1217_v49 = vunpack.c.0.s8 %v777_v10 }
 0x19f   :  { %v1221_v51 = vunpack.c.1.s8 %v777_v10  ;;  %2478 = vmatpush.bf16.msrb.mxu2 %v2037_v17  ;;  %v2069_v0 = vpack.c.bf16 %v1805_v55, %v1801_v50  ;;  %v1657_v52 = vcvt.s32.f32 %v1145_v47  ;;  %v1281_v30 = vunpack.c.0.s8 %v793_v25 }
 0x1a0   :  { %v1661_v1 = vcvt.s32.f32 %v1149_v22  ;;  %v1965_v42 = vpack.c.bf16 %v1597_v37, %v1593_v36  ;;  %v1729_v56 = vcvt.s32.f32 %v1217_v49  ;;  %v1285_v33 = vunpack.c.1.s8 %v793_v25 }
 0x1a1   :  { %v1733_v16 = vcvt.s32.f32 %v1221_v51  ;;  %2491 = vmatpush.bf16.msrb.mxu3 %v2069_v0  ;;  %v1793_v54 = vcvt.s32.f32 %v1281_v30  ;;  %v1073_v9 = vunpack.c.0.s8 %v741_v18  ;;  %v1077_v53 = vunpack.c.1.s8 %v741_v18  ;;  %v753_v18 = vld [vmem:[#allocation9 + $0x298] sm:$0xff]  ;;  %v2253_v36 = vpop.f32.mrf.mxu0 }
 0x1a2   :  { %v1997_v57 = vpack.c.bf16 %v1661_v1, %v1657_v52  ;;  %2454 = vmatpush.bf16.msrb.mxu0 %v1965_v42  ;;  %v1797_v15 = vcvt.s32.f32 %v1285_v33  ;;  %v1137_v44 = vunpack.c.0.s8 %v757_v6  ;;  %v1141_v10 = vunpack.c.1.s8 %v757_v6  ;;  %v2227_v6 = vpop.f32.mrf.mxu2 }
 0x1a3   :  { %v2033_v21 = vpack.c.bf16 %v1733_v16, %v1729_v56  ;;  %v1585_v5 = vcvt.s32.f32 %v1073_v9  ;;  %v1589_v26 = vcvt.s32.f32 %v1077_v53  ;;  %v2174_v25 = vadd.f32 %v6839_v58, %v6853_v8  ;;  %v2240_v58 = vpop.f32.mrf.mxu3  ;;  %v2542_v16 = vld [vmem:[#allocation11 + $0x30] sm:$0xff] }
 0x1a4   :  { %2467 = vmatpush.bf16.msrb.mxu1 %v1997_v57  ;;  %v2065_v11 = vpack.c.bf16 %v1797_v15, %v1793_v54  ;;  %v1649_v43 = vcvt.s32.f32 %v1137_v44  ;;  %v1653_v38 = vcvt.s32.f32 %v1141_v10  ;;  %v1209_v60 = vunpack.c.2.s8 %v773_v4  ;;  %v2550_v53 = vld [vmem:[#allocation11 + $0x70] sm:$0xff] }
 0x1a5   :  { %2479 = vmatpush.bf16.msrb.mxu2 %v2033_v21  ;;  %v1961_v27 = vpack.c.bf16 %v1589_v26, %v1585_v5  ;;  %v6867_v63 = vadd.f32 %v6841_v41, %v2174_v25  ;;  %v1213_v14 = vunpack.c.3.s8 %v773_v4  ;;  %v1273_v23 = vunpack.c.2.s8 %v789_v34  ;;  %v2266_v37 = vpop.f32.mrf.mxu1 }
 0x1a6   :  { %2492 = vmatpush.bf16.msrb.mxu3 %v2065_v11  ;;  %v1993_v32 = vpack.c.bf16 %v1653_v38, %v1649_v43  ;;  %v1277_v24 = vunpack.c.3.s8 %v789_v34  ;;  %v1065_v45 = vunpack.c.2.s8 %v737_v2  ;;  %v1721_v8 = vcvt.s32.f32 %v1209_v60  ;;  %v769_v43 = vld [vmem:[#allocation9 + $0x318] sm:$0xff] }
 0x1a7   :  { %2455 = vmatpush.bf16.msrb.mxu0 %v1961_v27  ;;  %v1725_v39 = vcvt.s32.f32 %v1213_v14  ;;  %v1069_v19 = vunpack.c.3.s8 %v737_v2  ;;  %v1785_v3 = vcvt.s32.f32 %v1273_v23  ;;  %v1129_v50 = vunpack.c.2.s8 %v753_v18 }
 0x1a8   :  { %2468 = vmatpush.bf16.msrb.mxu1 %v1993_v32  ;;  %v1789_v41 = vcvt.s32.f32 %v1277_v24  ;;  %v1577_v35 = vcvt.s32.f32 %v1065_v45  ;;  %v1133_v17 = vunpack.c.3.s8 %v753_v18  ;;  %v1201_v22 = vunpack.c.0.s8 %v773_v4 }
 0x1a9   :  { %v2029_v62 = vpack.c.bf16 %v1725_v39, %v1721_v8  ;;  %v1581_v13 = vcvt.s32.f32 %v1069_v19  ;;  %v1641_v47 = vcvt.s32.f32 %v1129_v50  ;;  %v2503_v49 = vperm.slane %v6869_v20, 0 }
 0x1aa   :  { %v2061_v55 = vpack.c.bf16 %v1789_v41, %v1785_v3  ;;  %v1645_v0 = vcvt.s32.f32 %v1133_v17  ;;  %v1205_v52 = vunpack.c.1.s8 %v773_v4  ;;  %v1713_v1 = vcvt.s32.f32 %v1201_v22  ;;  %v6876_v4 = vpop.f32.mrf.mxu2 }
 0x1ab   :  { %2480 = vmatpush.bf16.msrb.mxu2 %v2029_v62  ;;  %v1957_v51 = vpack.c.bf16 %v1581_v13, %v1577_v35  ;;  %v1265_v30 = vunpack.c.0.s8 %v789_v34  ;;  %v1269_v42 = vunpack.c.1.s8 %v789_v34  ;;  %v1057_v56 = vunpack.c.0.s8 %v737_v2  ;;  %v6878_v5 = vpop.f32.mrf.mxu3 }
 0x1ac   :  { %2493 = vmatpush.bf16.msrb.mxu3 %v2061_v55  ;;  %v1989_v33 = vpack.c.bf16 %v1645_v0, %v1641_v47  ;;  %v6874_v57 = vadd.f32 %v6847_v7, %v6845_v31  ;;  %v1717_v54 = vcvt.s32.f32 %v1205_v52  ;;  %v1061_v9 = vunpack.c.1.s8 %v737_v2  ;;  %v785_v2 = vld [vmem:[#allocation9 + $0x398] sm:$0xff] }
 0x1ad   :  { %2456 = vmatpush.bf16.msrb.mxu0 %v1957_v51  ;;  %v1777_v21 = vcvt.s32.f32 %v1265_v30  ;;  %v1781_v15 = vcvt.s32.f32 %v1269_v42  ;;  %v1569_v44 = vcvt.s32.f32 %v1057_v56  ;;  %v1121_v10 = vunpack.c.0.s8 %v753_v18  ;;  %v2540_v56 = vld [vmem:[#allocation11 + $0x20] sm:$0xff] }
 0x1ae   :  { %2469 = vmatpush.bf16.msrb.mxu1 %v1989_v33  ;;  %v2025_v26 = vpack.c.bf16 %v1717_v54, %v1713_v1  ;;  %v1573_v25 = vcvt.s32.f32 %v1061_v9  ;;  %v1125_v34 = vunpack.c.1.s8 %v753_v18  ;;  %v2596_v11 = vunpack.c.2.s8 %v2542_v16 }
 0x1af   :  { %v2057_v38 = vpack.c.bf16 %v1781_v15, %v1777_v21  ;;  %v1633_v31 = vcvt.s32.f32 %v1121_v10  ;;  %v2598_v7 = vunpack.c.3.s8 %v2542_v16  ;;  %v2628_v27 = vunpack.c.2.s8 %v2550_v53  ;;  %v2548_v21 = vld [vmem:[#allocation11 + $0x60] sm:$0xff] }
 0x1b0   :  { %2481 = vmatpush.bf16.msrb.mxu2 %v2025_v26  ;;  %v1953_v60 = vpack.c.bf16 %v1573_v25, %v1569_v44  ;;  %v1637_v14 = vcvt.s32.f32 %v1125_v34  ;;  %v2724_v32 = vcvt.s32.f32 %v2596_v11  ;;  %v2630_v23 = vunpack.c.3.s8 %v2550_v53 }
 0x1b1   :  { %2494 = vmatpush.bf16.msrb.mxu3 %v2057_v38  ;;  %v2726_v24 = vcvt.s32.f32 %v2598_v7  ;;  %v2756_v45 = vcvt.s32.f32 %v2628_v27  ;;  %v1193_v6 = vunpack.c.2.s8 %v769_v43  ;;  %v1197_v58 = vunpack.c.3.s8 %v769_v43 }
 0x1b2   :  { %2457 = vmatpush.bf16.msrb.mxu0 %v1953_v60  ;;  %v1985_v8 = vpack.c.bf16 %v1637_v14, %v1633_v31  ;;  %v2758_v18 = vcvt.s32.f32 %v2630_v23  ;;  %v1257_v39 = vunpack.c.2.s8 %v785_v2  ;;  %v1261_v19 = vunpack.c.3.s8 %v785_v2  ;;  %v2279_v51 = vpop.f32.mrf.mxu2  ;;  %v2538_v60 = vld [vmem:[#allocation11 + $0x10] sm:$0xff] }
 0x1b3   :  { %v2838_v3 = vpack.c.bf16 %v2726_v24, %v2724_v32  ;;  %v1705_v41 = vcvt.s32.f32 %v1193_v6  ;;  %v1709_v35 = vcvt.s32.f32 %v1197_v58  ;;  %v2592_v50 = vunpack.c.0.s8 %v2542_v16  ;;  %v2292_v0 = vpop.f32.mrf.mxu3 }
 0x1b4   :  { %2470 = vmatpush.bf16.msrb.mxu1 %v1985_v8  ;;  %v2854_v62 = vpack.c.bf16 %v2758_v18, %v2756_v45  ;;  %v1769_v13 = vcvt.s32.f32 %v1257_v39  ;;  %v1773_v17 = vcvt.s32.f32 %v1261_v19  ;;  %v2594_v55 = vunpack.c.1.s8 %v2542_v16 }
 0x1b5   :  { %v2021_v47 = vpack.c.bf16 %v1709_v35, %v1705_v41  ;;  %v2720_v22 = vcvt.s32.f32 %v2592_v50  ;;  %v2624_v36 = vunpack.c.0.s8 %v2550_v53  ;;  %v2626_v37 = vunpack.c.1.s8 %v2550_v53  ;;  %2458 = vmatmul.bf16.vlgmr.msrb.gmra.mxu0 %v6759_v12 }
 0x1b6   :  { %2892 = vmatpush.bf16.msra.mxu0 %v2838_v3  ;;  %v2053_v52 = vpack.c.bf16 %v1773_v17, %v1769_v13  ;;  %v2722_v1 = vcvt.s32.f32 %v2594_v55  ;;  %v1185_v30 = vunpack.c.0.s8 %v769_v43  ;;  %v1189_v42 = vunpack.c.1.s8 %v769_v43 }
 0x1b7   :  { %2482 = vmatpush.bf16.msrb.mxu2 %v2021_v47  ;;  %2471 = vmatmul.bf16.vlgmr.msrb.gmra.mxu1 %v6766_v46  ;;  %v2752_v33 = vcvt.s32.f32 %v2624_v36  ;;  %v2754_v16 = vcvt.s32.f32 %v2626_v37  ;;  %v1249_v54 = vunpack.c.0.s8 %v785_v2  ;;  %v1253_v9 = vunpack.c.1.s8 %v785_v2 }
 0x1b8   :  { %2905 = vmatpush.bf16.msra.mxu1 %v2854_v62  ;;  %2495 = vmatpush.bf16.msrb.mxu3 %v2053_v52  ;;  %v2836_v53 = vpack.c.bf16 %v2722_v1, %v2720_v22  ;;  %v1697_v15 = vcvt.s32.f32 %v1185_v30  ;;  %v1701_v44 = vcvt.s32.f32 %v1189_v42  ;;  %v2226_v10 = vadd.f32 %v6856_v61, %v6874_v57  ;;  %v6887_v19 = vpop.f32.mrf.mxu0  ;;  %v6892_v62 = vld [vmem:[#allocation12 + $0x1] ss:$8 sm:$0xf] }
 0x1b9   :  { %v2852_v12 = vpack.c.bf16 %v2754_v16, %v2752_v33  ;;  %v1761_v26 = vcvt.s32.f32 %v1249_v54  ;;  %v1765_v25 = vcvt.s32.f32 %v1253_v9  ;;  %v2588_v34 = vunpack.c.2.s8 %v2540_v56  ;;  %v6889_v3 = vpop.f32.mrf.mxu1  ;;  %v2536_v1 = vld [vmem:[#allocation11] sm:$0xff] }
 0x1ba   :  { %2893 = vmatpush.bf16.msra.mxu0 %v2836_v53  ;;  %v2017_v11 = vpack.c.bf16 %v1701_v44, %v1697_v15  ;;  %v2239_v46 = vadd.f32 %v6858_v59, %v2226_v10  ;;  %v2590_v43 = vunpack.c.3.s8 %v2540_v56  ;;  %v2620_v38 = vunpack.c.2.s8 %v2548_v21  ;;  %v2546_v59 = vld [vmem:[#allocation11 + $0x50] sm:$0xff]  ;;  %v2544_v33 = vld [vmem:[#allocation11 + $0x40] sm:$0xff] }
 0x1bb   :  { %v2049_v31 = vpack.c.bf16 %v1765_v25, %v1761_v26  ;;  %v2716_v7 = vcvt.s32.f32 %v2588_v34  ;;  %v2622_v27 = vunpack.c.3.s8 %v2548_v21  ;;  %v2584_v2 = vunpack.c.0.s8 %v2540_v56 }
 0x1bc   :  { %2906 = vmatpush.bf16.msra.mxu1 %v2852_v12  ;;  %2483 = vmatpush.bf16.msrb.mxu2 %v2017_v11  ;;  %v2718_v14 = vcvt.s32.f32 %v2590_v43  ;;  %v2748_v32 = vcvt.s32.f32 %v2620_v38  ;;  %v2252_v61 = vadd.f32 %v6860_v48, %v2239_v46  ;;  %v2586_v57 = vunpack.c.1.s8 %v2540_v56  ;;  %v2543_v38 = vld [vmem:[#allocation11 + $0x38] sm:$0xff] }
 0x1bd   :  { %2496 = vmatpush.bf16.msrb.mxu3 %v2049_v31  ;;  %v2750_v23 = vcvt.s32.f32 %v2622_v27  ;;  %v2712_v24 = vcvt.s32.f32 %v2584_v2  ;;  %v2616_v45 = vunpack.c.0.s8 %v2548_v21  ;;  %v2618_v6 = vunpack.c.1.s8 %v2548_v21 }
 0x1be   :  { %v2834_v58 = vpack.c.bf16 %v2718_v14, %v2716_v7  ;;  %v2265_v8 = vadd.f32 %v6862_v28, %v2252_v61  ;;  %v2714_v18 = vcvt.s32.f32 %v2586_v57  ;;  %v2580_v39 = vunpack.c.2.s8 %v2538_v60 }
 0x1bf   :  { %2484 = vmatmul.bf16.vlgmr.msrb.gmra.mxu2 %v6785_v40  ;;  %v2850_v41 = vpack.c.bf16 %v2750_v23, %v2748_v32  ;;  %v2744_v48 = vcvt.s32.f32 %v2616_v45  ;;  %v2746_v35 = vcvt.s32.f32 %v2618_v6  ;;  %v2582_v50 = vunpack.c.3.s8 %v2538_v60  ;;  %v2551_v32 = vld [vmem:[#allocation11 + $0x78] sm:$0xff] }
 0x1c0   :  { %2497 = vmatmul.bf16.vlgmr.msrb.gmra.mxu3 %v6789_v29  ;;  %2894 = vmatpush.bf16.msra.mxu0 %v2834_v58  ;;  %v2832_v13 = vpack.c.bf16 %v2714_v18, %v2712_v24  ;;  %v2708_v17 = vcvt.s32.f32 %v2580_v39  ;;  %v2612_v28 = vunpack.c.2.s8 %v2546_v59  ;;  %v2614_v55 = vunpack.c.3.s8 %v2546_v59  ;;  %v2305_v25 = vpop.f32.mrf.mxu0 }
 0x1c1   :  { %2907 = vmatpush.bf16.msra.mxu1 %v2850_v41  ;;  %v2848_v47 = vpack.c.bf16 %v2746_v35, %v2744_v48  ;;  %v2710_v22 = vcvt.s32.f32 %v2582_v50  ;;  %v2576_v36 = vunpack.c.0.s8 %v2538_v60  ;;  %v2578_v37 = vunpack.c.1.s8 %v2538_v60  ;;  %v2539_v25 = vld [vmem:[#allocation11 + $0x18] sm:$0xff] }
 0x1c2   :  { %v2740_v51 = vcvt.s32.f32 %v2612_v28  ;;  %v2742_v40 = vcvt.s32.f32 %v2614_v55  ;;  %v2608_v0 = vunpack.c.0.s8 %v2546_v59  ;;  %v2610_v52 = vunpack.c.1.s8 %v2546_v59  ;;  %v2541_v55 = vld [vmem:[#allocation11 + $0x28] sm:$0xff] }
 0x1c3   :  { %v2511_v30 = vmul.f32 %v2503_v49, %v6867_v63  ;;  %v2516_v29 = vperm.slane %v6892_v62, 0  ;;  %v2830_v42 = vpack.c.bf16 %v2710_v22, %v2708_v17  ;;  %v2278_v56 = vadd.f32 %v6876_v4, %v2265_v8  ;;  %v2318_v4 = vpop.f32.mrf.mxu1 }
 0x1c4   :  { %2895 = vmatpush.bf16.msra.mxu0 %v2832_v13  ;;  %v2846_v16 = vpack.c.bf16 %v2742_v40, %v2740_v51  ;;  %v2704_v54 = vcvt.s32.f32 %v2576_v36  ;;  %v2706_v9 = vcvt.s32.f32 %v2578_v37  ;;  %v2504_v21 = vperm.slane %v6869_v20, 1  ;;  %v2549_v37 = vld [vmem:[#allocation11 + $0x68] sm:$0xff]  ;;  %v2547_v4 = vld [vmem:[#allocation11 + $0x58] sm:$0xff] }
 0x1c5   :  { %2908 = vmatpush.bf16.msra.mxu1 %v2848_v47  ;;  %v2736_v53 = vcvt.s32.f32 %v2608_v0  ;;  %v2738_v15 = vcvt.s32.f32 %v2610_v52  ;;  %v2291_v44 = vadd.f32 %v6878_v5, %v2278_v56  ;;  %v2572_v10 = vunpack.c.2.s8 %v2536_v1 }
 0x1c6   :  { %v2517_v63 = vperm.slane %v6892_v62, 1  ;;  %v2574_v49 = vunpack.c.3.s8 %v2536_v1  ;;  %v2604_v12 = vunpack.c.2.s8 %v2544_v33  ;;  %v2606_v26 = vunpack.c.3.s8 %v2544_v33 }
 0x1c7   :  { %v2512_v34 = vmul.f32 %v2504_v21, %v2291_v44  ;;  %v2700_v11 = vcvt.s32.f32 %v2572_v10  ;;  %v2568_v46 = vunpack.c.0.s8 %v2536_v1  ;;  %v2570_v43 = vunpack.c.1.s8 %v2536_v1 }
 0x1c8   :  { %2896 = vmatpush.bf16.msra.mxu0 %v2830_v42  ;;  %v2828_v31 = vpack.c.bf16 %v2706_v9, %v2704_v54  ;;  %v2702_v7 = vcvt.s32.f32 %v2574_v49  ;;  %v2600_v27 = vunpack.c.0.s8 %v2544_v33  ;;  %v2844_v2 = vpack.c.bf16 %v2738_v15, %v2736_v53  ;;  %v6903_v45 = vpop.f32.mrf.mxu2 }
 0x1c9   :  { %2909 = vmatpush.bf16.msra.mxu1 %v2846_v16  ;;  %v2732_v5 = vcvt.s32.f32 %v2604_v12  ;;  %v2734_v60 = vcvt.s32.f32 %v2606_v26  ;;  %v2602_v14 = vunpack.c.1.s8 %v2544_v33  ;;  %v2524_v61 = vadd.f32 %v2516_v29, %v2511_v30  ;;  %v6905_v6 = vpop.f32.mrf.mxu3 }
 0x1ca   :  { %v2525_v57 = vadd.f32 %v2517_v63, %v2512_v34  ;;  %v2696_v23 = vcvt.s32.f32 %v2568_v46  ;;  %v2597_v24 = vunpack.c.2.s8 %v2543_v38  ;;  %v2826_v59 = vpack.c.bf16 %v2702_v7, %v2700_v11 }
 0x1cb   :  { %v2698_v58 = vcvt.s32.f32 %v2570_v43  ;;  %v2728_v8 = vcvt.s32.f32 %v2600_v27  ;;  %v2599_v18 = vunpack.c.3.s8 %v2543_v38  ;;  %v2730_v39 = vcvt.s32.f32 %v2602_v14 }
 0x1cc   :  { %2897 = vmatpush.bf16.msra.mxu0 %v2828_v31  ;;  %v2629_v41 = vunpack.c.2.s8 %v2551_v32  ;;  %v2631_v48 = vunpack.c.3.s8 %v2551_v32  ;;  %v2593_v35 = vunpack.c.0.s8 %v2543_v38  ;;  %v2842_v50 = vpack.c.bf16 %v2734_v60, %v2732_v5 }
 0x1cd   :  { %2910 = vmatpush.bf16.msra.mxu1 %v2844_v2  ;;  %v2725_v13 = vcvt.s32.f32 %v2597_v24  ;;  %v2727_v17 = vcvt.s32.f32 %v2599_v18  ;;  %v2595_v28 = vunpack.c.1.s8 %v2543_v38  ;;  %v2625_v36 = vunpack.c.0.s8 %v2551_v32 }
 0x1ce   :  { %v2757_v47 = vcvt.s32.f32 %v2629_v41  ;;  %v2759_v22 = vcvt.s32.f32 %v2631_v48  ;;  %v2528_v51 = vmax.f32 %v2524_v61, 0.0  ;;  %v2529_v40 = vmax.f32 %v2525_v57, 0.0  ;;  %v6915_v48 = vld [vmem:[#allocation11 + $0x8] sm:$0xff] }
 0x1cf   :  { %v2824_v0 = vpack.c.bf16 %v2698_v58, %v2696_v23  ;;  %v2627_v52 = vunpack.c.1.s8 %v2551_v32  ;;  %v2840_v1 = vpack.c.bf16 %v2730_v39, %v2728_v8  ;;  %v2721_v30 = vcvt.s32.f32 %v2593_v35  ;;  %v2558_v32 = vld [vmem:[#allocation11 + $0xb0] sm:$0xff] }
 0x1d0   :  { %2898 = vmatpush.bf16.msra.mxu0 %v2826_v59  ;;  %v2589_v29 = vunpack.c.2.s8 %v2541_v55  ;;  %v2591_v42 = vunpack.c.3.s8 %v2541_v55  ;;  %v2839_v56 = vpack.c.bf16 %v2727_v17, %v2725_v13  ;;  %v2723_v33 = vcvt.s32.f32 %v2595_v28  ;;  %v2331_v15 = vpop.f32.mrf.mxu2 }
 0x1d1   :  { %2911 = vmatpush.bf16.msra.mxu1 %v2842_v50  ;;  %v2621_v16 = vunpack.c.2.s8 %v2549_v37  ;;  %v2623_v54 = vunpack.c.3.s8 %v2549_v37  ;;  %v2855_v9 = vpack.c.bf16 %v2759_v22, %v2757_v47  ;;  %v2753_v21 = vcvt.s32.f32 %v2625_v36  ;;  %v2344_v44 = vpop.f32.mrf.mxu3 }
 0x1d2   :  { %v2755_v53 = vcvt.s32.f32 %v2627_v52  ;;  %v6907_v10 = vpack.c.bf16 %v2528_v51, %v2528_v51  ;;  %v6909_v63 = vpack.c.bf16 %v2529_v40, %v2529_v40  ;;  %v2717_v49 = vcvt.s32.f32 %v2589_v29 }
 0x1d3   :  { %v2719_v12 = vcvt.s32.f32 %v2591_v42  ;;  %v2585_v26 = vunpack.c.0.s8 %v2541_v55  ;;  %v2837_v34 = vpack.c.bf16 %v2723_v33, %v2721_v30  ;;  %v2749_v11 = vcvt.s32.f32 %v2621_v16  ;;  %v2545_v30 = vld [vmem:[#allocation11 + $0x48] sm:$0xff]  ;;  %v2556_v33 = vld [vmem:[#allocation11 + $0xa0] sm:$0xff] }
 0x1d4   :  { %2899 = vmatpush.bf16.msra.mxu0 %v2824_v0  ;;  %v2751_v46 = vcvt.s32.f32 %v2623_v54  ;;  %v2587_v43 = vunpack.c.1.s8 %v2541_v55  ;;  %v2853_v38 = vpack.c.bf16 %v2755_v53, %v2753_v21  ;;  %v2317_v31 = vadd.f32 %v6889_v3, %v6887_v19 }
 0x1d5   :  { %2912 = vmatpush.bf16.msra.mxu1 %v2840_v1  ;;  %v2617_v7 = vunpack.c.0.s8 %v2549_v37  ;;  %v2619_v27 = vunpack.c.1.s8 %v2549_v37  ;;  %v2581_v2 = vunpack.c.2.s8 %v2539_v25  ;;  %v2583_v5 = vunpack.c.3.s8 %v2539_v25 }
 0x1d6   :  { %v2613_v60 = vunpack.c.2.s8 %v2547_v4  ;;  %v2615_v14 = vunpack.c.3.s8 %v2547_v4  ;;  %v2835_v61 = vpack.c.bf16 %v2719_v12, %v2717_v49  ;;  %v2713_v57 = vcvt.s32.f32 %v2585_v26 }
 0x1d7   :  { %2900 = vmatmul.bf16.vlgmr.msra.gmra.mxu0 %v6907_v10  ;;  %v2577_v23 = vunpack.c.0.s8 %v2539_v25  ;;  %v2579_v24 = vunpack.c.1.s8 %v2539_v25  ;;  %v2851_v59 = vpack.c.bf16 %v2751_v46, %v2749_v11  ;;  %v2715_v58 = vcvt.s32.f32 %v2587_v43  ;;  %v2554_v25 = vld [vmem:[#allocation11 + $0x90] sm:$0xff] }
 0x1d8   :  { %2944 = vmatpush.bf16.msrb.mxu0 %v2839_v56  ;;  %2913 = vmatmul.bf16.vlgmr.msra.gmra.mxu1 %v6909_v63  ;;  %v2609_v8 = vunpack.c.0.s8 %v2547_v4  ;;  %v2611_v19 = vunpack.c.1.s8 %v2547_v4  ;;  %v2745_v3 = vcvt.s32.f32 %v2617_v7  ;;  %v2747_v18 = vcvt.s32.f32 %v2619_v27 }
 0x1d9   :  { %2957 = vmatpush.bf16.msrb.mxu1 %v2855_v9  ;;  %v2660_v39 = vunpack.c.2.s8 %v2558_v32  ;;  %v2662_v41 = vunpack.c.3.s8 %v2558_v32  ;;  %v2709_v35 = vcvt.s32.f32 %v2581_v2  ;;  %v2711_v50 = vcvt.s32.f32 %v2583_v5 }
 0x1da   :  { %v2741_v13 = vcvt.s32.f32 %v2613_v60  ;;  %v2743_v17 = vcvt.s32.f32 %v2615_v14  ;;  %v2705_v28 = vcvt.s32.f32 %v2577_v23  ;;  %v2707_v55 = vcvt.s32.f32 %v2579_v24 }
 0x1db   :  { %v2788_v47 = vcvt.s32.f32 %v2660_v39  ;;  %v2790_v22 = vcvt.s32.f32 %v2662_v41  ;;  %v2833_v36 = vpack.c.bf16 %v2715_v58, %v2713_v57  ;;  %v6917_v37 = vcvt.s32.f32 %v2609_v8 }
 0x1dc   :  { %2945 = vmatpush.bf16.msrb.mxu0 %v2837_v34  ;;  %v2739_v51 = vcvt.s32.f32 %v2611_v19  ;;  %v2573_v40 = vunpack.c.2.s8 %v6915_v48  ;;  %v2849_v0 = vpack.c.bf16 %v2747_v18, %v2745_v3  ;;  %v2575_v1 = vunpack.c.3.s8 %v6915_v48 }
 0x1dd   :  { %2958 = vmatpush.bf16.msrb.mxu1 %v2853_v38  ;;  %v2870_v52 = vpack.c.bf16 %v2790_v22, %v2788_v47  ;;  %v2656_v29 = vunpack.c.0.s8 %v2558_v32  ;;  %v2831_v42 = vpack.c.bf16 %v2711_v50, %v2709_v35  ;;  %v2658_v56 = vunpack.c.1.s8 %v2558_v32 }
 0x1de   :  { %v2847_v54 = vpack.c.bf16 %v2743_v17, %v2741_v13  ;;  %v2829_v9 = vpack.c.bf16 %v2707_v55, %v2705_v28  ;;  %v2330_v21 = vadd.f32 %v6903_v45, %v2317_v31  ;;  %v2845_v44 = vpack.c.bf16 %v2739_v51, %v6917_v37  ;;  %v2552_v17 = vld [vmem:[#allocation11 + $0x80] sm:$0xff] }
 0x1df   :  { %2918 = vmatpush.bf16.msra.mxu2 %v2870_v52  ;;  %v2784_v53 = vcvt.s32.f32 %v2656_v29  ;;  %v2701_v49 = vcvt.s32.f32 %v2573_v40  ;;  %v2605_v12 = vunpack.c.2.s8 %v2545_v30  ;;  %v2786_v26 = vcvt.s32.f32 %v2658_v56 }
 0x1e0   :  { %2946 = vmatpush.bf16.msrb.mxu0 %v2835_v61  ;;  %v2355_v16 = vpop.f32.mrf.mxu0  ;;  %v2703_v4 = vcvt.s32.f32 %v2575_v1  ;;  %v2607_v34 = vunpack.c.3.s8 %v2545_v30  ;;  %v2652_v11 = vunpack.c.2.s8 %v2556_v33  ;;  %v2654_v46 = vunpack.c.3.s8 %v2556_v33 }
 0x1e1   :  { %2959 = vmatpush.bf16.msrb.mxu1 %v2851_v59  ;;  %v2368_v15 = vpop.f32.mrf.mxu1  ;;  %v2868_v43 = vpack.c.bf16 %v2786_v26, %v2784_v53  ;;  %v2569_v38 = vunpack.c.0.s8 %v6915_v48  ;;  %v2648_v7 = vunpack.c.0.s8 %v2556_v33  ;;  %v2650_v27 = vunpack.c.1.s8 %v2556_v33 }
 0x1e2   :  { %v2571_v45 = vunpack.c.1.s8 %v6915_v48  ;;  %v2780_v31 = vcvt.s32.f32 %v2652_v11  ;;  %v2782_v2 = vcvt.s32.f32 %v2654_v46  ;;  %v2644_v5 = vunpack.c.2.s8 %v2554_v25  ;;  %v2557_v11 = vld [vmem:[#allocation11 + $0xa8] sm:$0xff] }
 0x1e3   :  { %v2733_v60 = vcvt.s32.f32 %v2605_v12  ;;  %2919 = vmatpush.bf16.msra.mxu2 %v2868_v43  ;;  %v2776_v14 = vcvt.s32.f32 %v2648_v7  ;;  %v2778_v32 = vcvt.s32.f32 %v2650_v27  ;;  %v2646_v61 = vunpack.c.3.s8 %v2554_v25 }
 0x1e4   :  { %2947 = vmatpush.bf16.msrb.mxu0 %v2833_v36  ;;  %v2735_v57 = vcvt.s32.f32 %v2607_v34  ;;  %v2601_v23 = vunpack.c.0.s8 %v2545_v30  ;;  %v2603_v24 = vunpack.c.1.s8 %v2545_v30  ;;  %v2866_v59 = vpack.c.bf16 %v2782_v2, %v2780_v31  ;;  %v2559_v30 = vld [vmem:[#allocation11 + $0xb8] sm:$0xff] }
 0x1e5   :  { %2960 = vmatpush.bf16.msrb.mxu1 %v2849_v0  ;;  %v2343_v58 = vadd.f32 %v6905_v6, %v2330_v21  ;;  %v2827_v19 = vpack.c.bf16 %v2703_v4, %v2701_v49  ;;  %v2697_v3 = vcvt.s32.f32 %v2569_v38  ;;  %v2699_v18 = vcvt.s32.f32 %v2571_v45 }
 0x1e6   :  { %v2772_v39 = vcvt.s32.f32 %v2644_v5  ;;  %v2864_v48 = vpack.c.bf16 %v2778_v32, %v2776_v14  ;;  %v2774_v35 = vcvt.s32.f32 %v2646_v61  ;;  %v2640_v50 = vunpack.c.0.s8 %v2554_v25  ;;  %v2566_v32 = vld [vmem:[#allocation11 + $0xf0] sm:$0xff] }
 0x1e7   :  { %2920 = vmatpush.bf16.msra.mxu2 %v2866_v59  ;;  %v2642_v13 = vunpack.c.1.s8 %v2554_v25  ;;  %v2843_v28 = vpack.c.bf16 %v2735_v57, %v2733_v60  ;;  %v2729_v55 = vcvt.s32.f32 %v2601_v23  ;;  %v2731_v47 = vcvt.s32.f32 %v2603_v24 }
 0x1e8   :  { %2948 = vmatpush.bf16.msrb.mxu0 %v2831_v42  ;;  %v2357_v8 = vpop.f32.mrf.mxu0  ;;  %v2356_v22 = vadd.f32 %v2355_v16, %v2343_v58  ;;  %v2825_v36 = vpack.c.bf16 %v2699_v18, %v2697_v3  ;;  %v2636_v6 = vunpack.c.2.s8 %v2552_v17  ;;  %v2862_v37 = vpack.c.bf16 %v2774_v35, %v2772_v39  ;;  %v2564_v39 = vld [vmem:[#allocation11 + $0xe0] sm:$0xff] }
 0x1e9   :  { %2961 = vmatpush.bf16.msrb.mxu1 %v2847_v54  ;;  %v2370_v41 = vpop.f32.mrf.mxu1  ;;  %v2768_v51 = vcvt.s32.f32 %v2640_v50  ;;  %v2770_v40 = vcvt.s32.f32 %v2642_v13  ;;  %v2638_v0 = vunpack.c.3.s8 %v2552_v17  ;;  %v2841_v52 = vpack.c.bf16 %v2731_v47, %v2729_v55  ;;  %v2555_v13 = vld [vmem:[#allocation11 + $0x98] sm:$0xff] }
 0x1ea   :  { %v2369_v1 = vadd.f32 %v2368_v15, %v2356_v22  ;;  %v2764_v42 = vcvt.s32.f32 %v2636_v6  ;;  %v2632_v56 = vunpack.c.0.s8 %v2552_v17  ;;  %v2634_v53 = vunpack.c.1.s8 %v2552_v17 }
 0x1eb   :  { %2921 = vmatpush.bf16.msra.mxu2 %v2864_v48  ;;  %v2860_v16 = vpack.c.bf16 %v2770_v40, %v2768_v51  ;;  %v2766_v21 = vcvt.s32.f32 %v2638_v0  ;;  %v2663_v49 = vunpack.c.3.s8 %v2559_v30  ;;  %v2518_v26 = vperm.slane %v6892_v62, 2 }
 0x1ec   :  { %2949 = vmatpush.bf16.msrb.mxu0 %v2829_v9  ;;  %v2505_v9 = vperm.slane %v6869_v20, 2  ;;  %v2760_v4 = vcvt.s32.f32 %v2632_v56  ;;  %v2762_v20 = vcvt.s32.f32 %v2634_v53  ;;  %v2657_v38 = vunpack.c.0.s8 %v2559_v30 }
 0x1ed   :  { %2962 = vmatpush.bf16.msrb.mxu1 %v2845_v44  ;;  %v2661_v44 = vunpack.c.2.s8 %v2559_v30  ;;  %v2858_v25 = vpack.c.bf16 %v2766_v21, %v2764_v42  ;;  %v2791_v46 = vcvt.s32.f32 %v2663_v49  ;;  %v2659_v7 = vunpack.c.1.s8 %v2559_v30  ;;  %v2562_v30 = vld [vmem:[#allocation11 + $0xd0] sm:$0xff]  ;;  %v2553_v49 = vld [vmem:[#allocation11 + $0x88] sm:$0xff] }
 0x1ee   :  { %v2653_v31 = vunpack.c.2.s8 %v2557_v11  ;;  %v2856_v5 = vpack.c.bf16 %v2762_v20, %v2760_v4  ;;  %v2785_v60 = vcvt.s32.f32 %v2657_v38  ;;  %v2692_v61 = vunpack.c.2.s8 %v2566_v32 }
 0x1ef   :  { %2922 = vmatpush.bf16.msra.mxu2 %v2862_v37  ;;  %v2789_v34 = vcvt.s32.f32 %v2661_v44  ;;  %v2787_v14 = vcvt.s32.f32 %v2659_v7  ;;  %v2694_v57 = vunpack.c.3.s8 %v2566_v32  ;;  %v2649_v59 = vunpack.c.0.s8 %v2557_v11 }
 0x1f0   :  { %2950 = vmatpush.bf16.msrb.mxu0 %v2827_v19  ;;  %v2381_v29 = vpop.f32.mrf.mxu2  ;;  %v2781_v24 = vcvt.s32.f32 %v2653_v31  ;;  %v2651_v58 = vunpack.c.1.s8 %v2557_v11  ;;  %v2820_v8 = vcvt.s32.f32 %v2692_v61  ;;  %v2688_v3 = vunpack.c.0.s8 %v2566_v32 }
 0x1f1   :  { %2963 = vmatpush.bf16.msrb.mxu1 %v2843_v28  ;;  %v2382_v33 = vadd.f32 %v2381_v29, %v2369_v1  ;;  %v2394_v54 = vpop.f32.mrf.mxu3  ;;  %v2822_v19 = vcvt.s32.f32 %v2694_v57  ;;  %v2690_v18 = vunpack.c.1.s8 %v2566_v32  ;;  %v2869_v41 = vpack.c.bf16 %v2787_v14, %v2785_v60 }
 0x1f2   :  { %v2684_v35 = vunpack.c.2.s8 %v2564_v39  ;;  %v2686_v50 = vunpack.c.3.s8 %v2564_v39  ;;  %v2816_v28 = vcvt.s32.f32 %v2688_v3  ;;  %v2680_v37 = vunpack.c.0.s8 %v2564_v39 }
 0x1f3   :  { %v2395_v12 = vadd.f32 %v2394_v54, %v2382_v33  ;;  %2923 = vmatpush.bf16.msra.mxu2 %v2860_v16  ;;  %v2886_v17 = vpack.c.bf16 %v2822_v19, %v2820_v8  ;;  %v2818_v55 = vcvt.s32.f32 %v2690_v18  ;;  %v2682_v51 = vunpack.c.1.s8 %v2564_v39 }
 0x1f4   :  { %2951 = vmatpush.bf16.msrb.mxu0 %v2825_v36  ;;  %v2812_v47 = vcvt.s32.f32 %v2684_v35  ;;  %v2814_v22 = vcvt.s32.f32 %v2686_v50  ;;  %v2777_v36 = vcvt.s32.f32 %v2649_v59  ;;  %v2779_v0 = vcvt.s32.f32 %v2651_v58  ;;  %v2560_v58 = vld [vmem:[#allocation11 + $0xc0] sm:$0xff] }
 0x1f5   :  { %2964 = vmatpush.bf16.msrb.mxu1 %v2841_v52  ;;  %v2513_v15 = vmul.f32 %v2505_v9, %v2395_v12  ;;  %2931 = vmatpush.bf16.msra.mxu3 %v2886_v17  ;;  %v2884_v6 = vpack.c.bf16 %v2818_v55, %v2816_v28  ;;  %v2645_v52 = vunpack.c.2.s8 %v2555_v13  ;;  %v2647_v1 = vunpack.c.3.s8 %v2555_v13  ;;  %v2567_v17 = vld [vmem:[#allocation11 + $0xf8] sm:$0xff] }
 0x1f6   :  { %v2641_v29 = vunpack.c.0.s8 %v2555_v13  ;;  %v2643_v42 = vunpack.c.1.s8 %v2555_v13  ;;  %v2882_v56 = vpack.c.bf16 %v2814_v22, %v2812_v47  ;;  %v2808_v33 = vcvt.s32.f32 %v2680_v37 }
 0x1f7   :  { %2952 = vmatmul.bf16.vlgmr.msrb.gmra.mxu0 %v6907_v10  ;;  %v2526_v43 = vadd.f32 %v2518_v26, %v2513_v15  ;;  %2924 = vmatpush.bf16.msra.mxu2 %v2858_v25  ;;  %v2871_v10 = vpack.c.bf16 %v2791_v46, %v2789_v34  ;;  %v2810_v54 = vcvt.s32.f32 %v2682_v51  ;;  %v2676_v9 = vunpack.c.2.s8 %v2562_v30 }
 0x1f8   :  { %2965 = vmatmul.bf16.vlgmr.msrb.gmra.mxu1 %v6909_v63  ;;  %v2383_v27 = vpop.f32.mrf.mxu2  ;;  %v2655_v63 = vunpack.c.3.s8 %v2557_v11  ;;  %v2678_v16 = vunpack.c.3.s8 %v2562_v30  ;;  %v2865_v21 = vpack.c.bf16 %v2779_v0, %v2777_v36  ;;  %v2773_v53 = vcvt.s32.f32 %v2645_v52 }
 0x1f9   :  { %v2530_v45 = vmax.f32 %v2526_v43, 0.0  ;;  %v2396_v2 = vpop.f32.mrf.mxu3  ;;  %2932 = vmatpush.bf16.msra.mxu3 %v2884_v6  ;;  %v2775_v44 = vcvt.s32.f32 %v2647_v1  ;;  %v2769_v26 = vcvt.s32.f32 %v2641_v29  ;;  %v2771_v25 = vcvt.s32.f32 %v2643_v42  ;;  %v2565_v42 = vld [vmem:[#allocation11 + $0xe8] sm:$0xff] }
 0x1fa   :  { %v2783_v48 = vcvt.s32.f32 %v2655_v63  ;;  %v2880_v4 = vpack.c.bf16 %v2810_v54, %v2808_v33  ;;  %v2804_v20 = vcvt.s32.f32 %v2676_v9  ;;  %v2806_v34 = vcvt.s32.f32 %v2678_v16 }
 0x1fb   :  { %v6930_v23 = vpack.c.bf16 %v2530_v45, %v2530_v45  ;;  %2925 = vmatpush.bf16.msra.mxu2 %v2856_v5  ;;  %v2863_v11 = vpack.c.bf16 %v2775_v44, %v2773_v53  ;;  %v2637_v46 = vunpack.c.2.s8 %v2553_v49  ;;  %v2639_v43 = vunpack.c.3.s8 %v2553_v49 }
 0x1fc   :  { %v2867_v40 = vpack.c.bf16 %v2783_v48, %v2781_v24  ;;  %v2861_v38 = vpack.c.bf16 %v2771_v25, %v2769_v26  ;;  %v2878_v7 = vpack.c.bf16 %v2806_v34, %v2804_v20  ;;  %v2633_v31 = vunpack.c.0.s8 %v2553_v49  ;;  %v2563_v26 = vld [vmem:[#allocation11 + $0xd8] sm:$0xff] }
 0x1fd   :  { %2933 = vmatpush.bf16.msra.mxu3 %v2882_v56  ;;  %v2765_v27 = vcvt.s32.f32 %v2637_v46  ;;  %v2767_v45 = vcvt.s32.f32 %v2639_v43  ;;  %v2635_v2 = vunpack.c.1.s8 %v2553_v49  ;;  %v2672_v32 = vunpack.c.0.s8 %v2562_v30 }
 0x1fe   :  { %2926 = vmatmul.bf16.vlgmr.msra.gmra.mxu2 %v6930_v23  ;;  %v2761_v14 = vcvt.s32.f32 %v2633_v31  ;;  %v2674_v61 = vunpack.c.1.s8 %v2562_v30  ;;  %v2668_v19 = vunpack.c.2.s8 %v2560_v58  ;;  %v2670_v3 = vunpack.c.3.s8 %v2560_v58  ;;  %v2561_v31 = vld [vmem:[#allocation11 + $0xc8] sm:$0xff] }
 0x1ff   :  { %2970 = vmatpush.bf16.msrb.mxu2 %v2871_v10  ;;  %v2859_v60 = vpack.c.bf16 %v2767_v45, %v2765_v27  ;;  %v2763_v63 = vcvt.s32.f32 %v2635_v2  ;;  %v2800_v57 = vcvt.s32.f32 %v2672_v32  ;;  %v2664_v50 = vunpack.c.0.s8 %v2560_v58 }
 0x200   :  { %v2802_v24 = vcvt.s32.f32 %v2674_v61  ;;  %v2798_v48 = vcvt.s32.f32 %v2670_v3  ;;  %v2666_v13 = vunpack.c.1.s8 %v2560_v58  ;;  %v2693_v28 = vunpack.c.2.s8 %v2567_v17 }
 0x201   :  { %2934 = vmatpush.bf16.msra.mxu3 %v2880_v4  ;;  %v2857_v59 = vpack.c.bf16 %v2763_v63, %v2761_v14  ;;  %v2695_v55 = vunpack.c.3.s8 %v2567_v17  ;;  %v2792_v47 = vcvt.s32.f32 %v2664_v50  ;;  %v2689_v0 = vunpack.c.0.s8 %v2567_v17 }
 0x202   :  { %v2876_v8 = vpack.c.bf16 %v2802_v24, %v2800_v57  ;;  %v2794_v22 = vcvt.s32.f32 %v2666_v13  ;;  %v2821_v36 = vcvt.s32.f32 %v2693_v28  ;;  %v2691_v52 = vunpack.c.1.s8 %v2567_v17  ;;  %v6224_v17 = vld [vmem:[#allocation12 + $0x43] ss:$8 sm:$0xf] }
 0x203   :  { %2971 = vmatpush.bf16.msrb.mxu2 %v2869_v41  ;;  %v2796_v41 = vcvt.s32.f32 %v2668_v19  ;;  %v2823_v6 = vcvt.s32.f32 %v2695_v55  ;;  %v2817_v30 = vcvt.s32.f32 %v2689_v0  ;;  %v2685_v33 = vunpack.c.2.s8 %v2565_v42 }
 0x204   :  { %v2872_v37 = vpack.c.bf16 %v2794_v22, %v2792_v47  ;;  %v2819_v29 = vcvt.s32.f32 %v2691_v52  ;;  %v2687_v54 = vunpack.c.3.s8 %v2565_v42  ;;  %v2683_v53 = vunpack.c.1.s8 %v2565_v42 }
 0x205   :  { %2935 = vmatpush.bf16.msra.mxu3 %v2878_v7  ;;  %v2874_v35 = vpack.c.bf16 %v2798_v48, %v2796_v41  ;;  %v2677_v4 = vunpack.c.2.s8 %v2563_v26  ;;  %v2679_v20 = vunpack.c.3.s8 %v2563_v26  ;;  %v2673_v43 = vunpack.c.0.s8 %v2563_v26 }
 0x206   :  { %v2885_v56 = vpack.c.bf16 %v2819_v29, %v2817_v30  ;;  %v2815_v9 = vcvt.s32.f32 %v2687_v54  ;;  %v2811_v49 = vcvt.s32.f32 %v2683_v53  ;;  %v2665_v24 = vunpack.c.0.s8 %v2561_v31 }
 0x207   :  { %2972 = vmatpush.bf16.msrb.mxu2 %v2867_v40  ;;  %v2887_v40 = vpack.c.bf16 %v2823_v6, %v2821_v36  ;;  %v2805_v34 = vcvt.s32.f32 %v2677_v4  ;;  %v2801_v7 = vcvt.s32.f32 %v2673_v43  ;;  %v2506_v28 = vperm.slane %v6224_v17, 3 }
 0x208   :  { %v2793_v58 = vcvt.s32.f32 %v2665_v24  ;;  %v2519_v55 = vperm.slane %v6892_v62, 3  ;;  %vm3166_vm2 = vcmask 15360  }
 0x209   :  { %v6933_v12 = vpop.f32.mrf.mxu0  ;;  %2936 = vmatpush.bf16.msra.mxu3 %v2876_v8 }
 0x20a   :  { %v6935_v15 = vpop.f32.mrf.mxu1 }
 0x20b   :  { %2973 = vmatpush.bf16.msrb.mxu2 %v2865_v21  ;;  %v2681_v21 = vunpack.c.0.s8 %v2565_v42  ;;  %v2421_v14 = vadd.f32 %v6935_v15, %v6933_v12 }
 0x20d   :  { %2937 = vmatpush.bf16.msra.mxu3 %v2874_v35  ;;  %v2809_v44 = vcvt.s32.f32 %v2681_v21 }
 0x20f   :  { %2974 = vmatpush.bf16.msrb.mxu2 %v2863_v11  ;;  %v2881_v25 = vpack.c.bf16 %v2811_v49, %v2809_v44  ;;  %v2807_v11 = vcvt.s32.f32 %v2679_v20 }
 0x211   :  { %v2409_v5 = vpop.f32.mrf.mxu0  ;;  %2938 = vmatpush.bf16.msra.mxu3 %v2872_v37  ;;  %v2879_v46 = vpack.c.bf16 %v2807_v11, %v2805_v34 }
 0x212   :  { %v2422_v10 = vpop.f32.mrf.mxu1 }
 0x213   :  { %2975 = vmatpush.bf16.msrb.mxu2 %v2861_v38  ;;  %v2675_v38 = vunpack.c.1.s8 %v2563_v26  ;;  %v2669_v10 = vunpack.c.2.s8 %v2561_v31 }
 0x215   :  { %2983 = vmatpush.bf16.msrb.mxu3 %v2887_v40  ;;  %v2803_v27 = vcvt.s32.f32 %v2675_v38  ;;  %v2797_v63 = vcvt.s32.f32 %v2669_v10  ;;  %v3015_v10 = vld [vmem:[%s7248_s4 + $0x8] sm:$0xff] }
 0x216   :  { %v3028_v24 = vunpack.c.2.s8 %v3015_v10 }
 0x217   :  { %2976 = vmatpush.bf16.msrb.mxu2 %v2859_v60  ;;  %v2877_v5 = vpack.c.bf16 %v2803_v27, %v2801_v7  ;;  %v2671_v60 = vunpack.c.3.s8 %v2561_v31 }
 0x219   :  { %v6937_v18 = vpop.f32.mrf.mxu2  ;;  %2984 = vmatpush.bf16.msrb.mxu3 %v2885_v56  ;;  %v2799_v32 = vcvt.s32.f32 %v2671_v60 }
 0x21a   :  { %v6939_v39 = vpop.f32.mrf.mxu3  ;;  %v2434_v61 = vadd.f32 %v6937_v18, %v2421_v14 }
 0x21b   :  { %2977 = vmatpush.bf16.msrb.mxu2 %v2857_v59  ;;  %v2875_v57 = vpack.c.bf16 %v2799_v32, %v2797_v63  ;;  %v2667_v59 = vunpack.c.1.s8 %v2561_v31 }
 0x21c   :  { %v2447_v19 = vadd.f32 %v6939_v39, %v2434_v61 }
 0x21d   :  { %v2795_v8 = vcvt.s32.f32 %v2667_v59  ;;  %v3029_v59 = vunpack.c.3.s8 %v3015_v10 }
 0x21e   :  { %2978 = vmatmul.bf16.vlgmr.msrb.gmra.mxu2 %v6930_v23  ;;  %v2813_v23 = vcvt.s32.f32 %v2685_v33 }
 0x21f   :  { %v2873_v48 = vpack.c.bf16 %v2795_v8, %v2793_v58  ;;  %v3060_v8 = vcvt.s32.f32 %v3028_v24  ;;  %v2535_v24 = vld [vmem:[#allocation12 + $0x44] ss:$8 sm:$0x3] }
 0x220   :  { %v2883_v16 = vpack.c.bf16 %v2815_v9, %v2813_v23  ;;  %v3017_v23 = vld [vmem:[%s7248_s4 + $0x18] sm:$0xff]  ;;  %v3016_v9 = vld [vmem:[%s7248_s4 + $0x10] sm:$0xff] }
 0x221   :  { %v2435_v51 = vpop.f32.mrf.mxu2  ;;  %v3037_v21 = vunpack.c.3.s8 %v3017_v23  ;;  %v3034_v53 = vunpack.c.0.s8 %v3017_v23  ;;  %v3035_v44 = vunpack.c.1.s8 %v3017_v23  ;;  %v3032_v49 = vunpack.c.2.s8 %v3016_v9 }
 0x222   :  { %v2448_v1 = vpop.f32.mrf.mxu3  ;;  %2985 = vmatpush.bf16.msrb.mxu3 %v2883_v16  ;;  %v3036_v16 = vunpack.c.2.s8 %v3017_v23  ;;  %v3033_v26 = vunpack.c.3.s8 %v3016_v9  ;;  %v3030_v38 = vunpack.c.0.s8 %v3016_v9 }
 0x223   :  { %v3069_v20 = vcvt.s32.f32 %v3037_v21  ;;  %v3066_v34 = vcvt.s32.f32 %v3034_v53  ;;  %v3067_v11 = vcvt.s32.f32 %v3035_v44  ;;  %v3064_v31 = vcvt.s32.f32 %v3032_v49  ;;  %v3019_v44 = vld [vmem:[%s7248_s4 + $0x28] sm:$0xff] }
 0x224   :  { %v3068_v4 = vcvt.s32.f32 %v3036_v16  ;;  %v3062_v63 = vcvt.s32.f32 %v3030_v38 }
 0x226   :  { %2986 = vmatpush.bf16.msrb.mxu3 %v2881_v25  ;;  %v3093_v43 = vpack.c.bf16 %v3069_v20, %v3068_v4 }
 0x228   :  { %3104 = vmatpush.bf16.msra.mxu0 %v3093_v43  ;;  %v3043_v43 = vunpack.c.1.s8 %v3019_v44 }
 0x22a   :  { %2987 = vmatpush.bf16.msrb.mxu3 %v2879_v46  ;;  %v3021_v46 = vld [vmem:[%s7248_s4 + $0x38] sm:$0xff] }
 0x22b   :  { %v3052_v7 = vunpack.c.2.s8 %v3021_v46  ;;  %v3053_v27 = vunpack.c.3.s8 %v3021_v46 }
 0x22d   :  { %v3084_v60 = vcvt.s32.f32 %v3052_v7  ;;  %v3085_v14 = vcvt.s32.f32 %v3053_v27  ;;  %v3075_v7 = vcvt.s32.f32 %v3043_v43  ;;  %v3018_v27 = vld [vmem:[%s7248_s4 + $0x20] sm:$0xff] }
 0x22e   :  { %2988 = vmatpush.bf16.msrb.mxu3 %v2877_v5  ;;  %v3031_v5 = vunpack.c.1.s8 %v3016_v9 }
 0x22f   :  { %v3101_v32 = vpack.c.bf16 %v3085_v14, %v3084_v60  ;;  %v3038_v14 = vunpack.c.0.s8 %v3018_v27 }
 0x231   :  { %3117 = vmatpush.bf16.msra.mxu1 %v3101_v32  ;;  %v3070_v32 = vcvt.s32.f32 %v3038_v14 }
 0x232   :  { %v2459_v45 = vpop.f32.mrf.mxu0  ;;  %2989 = vmatpush.bf16.msrb.mxu3 %v2875_v57  ;;  %v3063_v57 = vcvt.s32.f32 %v3031_v5 }
 0x233   :  { %v2460_v35 = vadd.f32 %v2459_v45, %v2447_v19  ;;  %v3092_v45 = vpack.c.bf16 %v3067_v11, %v3066_v34  ;;  %v3061_v19 = vcvt.s32.f32 %v3029_v59  ;;  %v2533_v59 = vld [vmem:[#allocation12 + $0x2] ss:$8 sm:$0x3] }
 0x234   :  { %v2472_v2 = vpop.f32.mrf.mxu1  ;;  %v3090_v58 = vpack.c.bf16 %v3063_v57, %v3062_v63  ;;  %v3039_v63 = vunpack.c.1.s8 %v3018_v27 }
 0x235   :  { %v2473_v50 = vadd.f32 %v2472_v2, %v2460_v35  ;;  %v3065_v2 = vcvt.s32.f32 %v3033_v26  ;;  %3105 = vmatpush.bf16.msra.mxu0 %v3092_v45  ;;  %v3044_v26 = vunpack.c.2.s8 %v3019_v44 }
 0x236   :  { %2990 = vmatpush.bf16.msrb.mxu3 %v2873_v48 }
 0x237   :  { %v3091_v61 = vpack.c.bf16 %v3065_v2, %v3064_v31  ;;  %v3076_v20 = vcvt.s32.f32 %v3044_v26  ;;  %v3040_v31 = vunpack.c.2.s8 %v3018_v27  ;;  %v3041_v2 = vunpack.c.3.s8 %v3018_v27 }
 0x239   :  { %3106 = vmatpush.bf16.msra.mxu0 %v3091_v61  ;;  %v3072_v5 = vcvt.s32.f32 %v3040_v31  ;;  %v3071_v61 = vcvt.s32.f32 %v3039_v63 }
 0x23a   :  { %v2461_v3 = vpop.f32.mrf.mxu0 }
 0x23b   :  { %v3089_v3 = vpack.c.bf16 %v3061_v19, %v3060_v8  ;;  %v3094_v57 = vpack.c.bf16 %v3071_v61, %v3070_v32  ;;  %v3133_v32 = vld [vmem:[#allocation12 + $0x4] ss:$0 sm:$0xff] }
 0x23c   :  { %v2474_v41 = vpop.f32.mrf.mxu1 }
 0x23d   :  { %3107 = vmatpush.bf16.msra.mxu0 %v3090_v58  ;;  %v2997_v58 = vperm.slane %v2535_v24, 0 }
 0x241   :  { %3108 = vmatpush.bf16.msra.mxu0 %v3089_v3  ;;  %v3004_v3 = vperm.slane %v2533_v59, 0 }
 0x242   :  { %v2485_v12 = vpop.f32.mrf.mxu2 }
 0x243   :  { %v2486_v15 = vadd.f32 %v2485_v12, %v2473_v50  ;;  %v2498_v13 = vpop.f32.mrf.mxu3  ;;  %v3026_v50 = vunpack.c.0.s8 %v3015_v10  ;;  %v3027_v12 = vunpack.c.1.s8 %v3015_v10  ;;  %v3073_v10 = vcvt.s32.f32 %v3041_v2 }
 0x245   :  { %v2499_v18 = vadd.f32 %v2498_v13, %v2486_v15  ;;  %v3050_v15 = vunpack.c.0.s8 %v3021_v46  ;;  %v3051_v13 = vunpack.c.1.s8 %v3021_v46  ;;  %v3058_v17 = vcvt.s32.f32 %v3026_v50 }
 0x246   :  { %v3042_v46 = vunpack.c.0.s8 %v3019_v44  ;;  %v3095_v60 = vpack.c.bf16 %v3073_v10, %v3072_v5 }
 0x247   :  { %v2514_v47 = vmul.f32 %v2506_v28, %v2499_v18  ;;  %v3059_v28 = vcvt.s32.f32 %v3027_v12  ;;  %v3082_v18 = vcvt.s32.f32 %v3050_v15 }
 0x248   :  { %v3074_v38 = vcvt.s32.f32 %v3042_v46 }
 0x249   :  { %v2527_v22 = vadd.f32 %v2519_v55, %v2514_v47  ;;  %v3083_v55 = vcvt.s32.f32 %v3051_v13  ;;  %v3014_v47 = vld [vmem:[%s7248_s4] sm:$0xff]  ;;  %v2998_v13 = vperm.slane %v2535_v24, 1 }
 0x24a   :  { %v2487_v36 = vpop.f32.mrf.mxu2  ;;  %v3096_v45 = vpack.c.bf16 %v3075_v7, %v3074_v38  ;;  %v3202_v24 = vld [vmem:[%s7251_s7] sm:$0xff] }
 0x24b   :  { %v2531_v6 = vmax.f32 %v2527_v22, 0.0  ;;  %v2500_v37 = vpop.f32.mrf.mxu3  ;;  %v3020_v22 = vld [vmem:[%s7248_s4 + $0x30] sm:$0xff]  ;;  %v3088_v36 = vpack.c.bf16 %v3059_v28, %v3058_v17 }
 0x24c   :  { %v3024_v37 = vunpack.c.2.s8 %v3014_v47  ;;  %v3047_v23 = vunpack.c.1.s8 %v3020_v22 }
 0x24d   :  { %v2891_v39 = vpack.c.bf16 %v2531_v6, %v2531_v6  ;;  %v3100_v6 = vpack.c.bf16 %v3083_v55, %v3082_v18  ;;  %3109 = vmatpush.bf16.msra.mxu0 %v3088_v36  ;;  %v3005_v18 = vperm.slane %v2533_v59, 1  ;;  %v3203_v59 = vld [vmem:[%s7251_s7 + $0x8] sm:$0xff] }
 0x24e   :  { %v3079_v53 = vcvt.s32.f32 %v3047_v23 }
 0x24f   :  { %2939 = vmatmul.bf16.vlgmr.msra.gmra.mxu3 %v2891_v39  ;;  %3118 = vmatpush.bf16.msra.mxu1 %v3100_v6 }
 0x254   :  { %v2901_v51 = vpop.f32.mrf.mxu0 }
 0x255   :  { %v2914_v40 = vpop.f32.mrf.mxu1 }
 0x256   :  { %v2915_v0 = vadd.f32 %v2914_v40, %v2901_v51  ;;  %v3048_v51 = vunpack.c.2.s8 %v3020_v22  ;;  %v3049_v40 = vunpack.c.3.s8 %v3020_v22 }
 0x25c   :  { %v2903_v52 = vpop.f32.mrf.mxu0 }
 0x25d   :  { %v2916_v1 = vpop.f32.mrf.mxu1 }
 0x25e   :  { %v3080_v1 = vcvt.s32.f32 %v3048_v51  ;;  %v3137_v51 = vld [vmem:[%s7249_s5 + $0x18] sm:$0xff] }
 0x25f   :  { %2991 = vmatmul.bf16.vlgmr.msrb.gmra.mxu3 %v2891_v39  ;;  %v3025_v39 = vunpack.c.3.s8 %v3014_v47 }
 0x261   :  { %v3057_v52 = vcvt.s32.f32 %v3025_v39  ;;  %v3138_v39 = vld [vmem:[%s7249_s5 + $0x20] sm:$0xff] }
 0x274   :  { %v2953_v30 = vpop.f32.mrf.mxu0 }
 0x275   :  { %v2966_v29 = vpop.f32.mrf.mxu1 }
 0x276   :  { %v2967_v42 = vadd.f32 %v2966_v29, %v2953_v30  ;;  %v3081_v30 = vcvt.s32.f32 %v3049_v40  ;;  %v3136_v40 = vld [vmem:[%s7249_s5 + $0x10] sm:$0xff] }
 0x27c   :  { %v2955_v56 = vpop.f32.mrf.mxu0 }
 0x27d   :  { %v2968_v33 = vpop.f32.mrf.mxu1  ;;  %v3023_v56 = vunpack.c.1.s8 %v3014_v47 }
 0x27e   :  { %v3046_v33 = vunpack.c.0.s8 %v3020_v22 }
 0x27f   :  { %v3055_v16 = vcvt.s32.f32 %v3023_v56 }
 0x280   :  { %v3078_v21 = vcvt.s32.f32 %v3046_v33 }
 0x281   :  { %v2927_v54 = vpop.f32.mrf.mxu2 }
 0x282   :  { %v6947_v62 = vadd.f32 %v2927_v54, %v2915_v0  ;;  %v3056_v0 = vcvt.s32.f32 %v3024_v37  ;;  %v3099_v54 = vpack.c.bf16 %v3081_v30, %v3080_v1  ;;  %v3098_v4 = vpack.c.bf16 %v3079_v53, %v3078_v21  ;;  %v3140_v37 = vld [vmem:[%s7249_s5 + $0x30] sm:$0xff]  ;;  %v3169_v1 = vld [vmem:[%s7250_s6] sm:$0x3] }
 0x283   :  { %6203 = vmatpush.msk.msra.mxu3 %vm3173_vm0, %v3169_v1  ;;  %v3204_v53 = vld [vmem:[%s7251_s7 + $0x10] sm:$0xff]  ;;  %v3199_v1 = vld [vmem:[#allocation12 + $0x6] ss:$8 sm:$0x3] }
 0x284   :  { %v3087_v29 = vpack.c.bf16 %v3057_v52, %v3056_v0  ;;  %3119 = vmatpush.bf16.msra.mxu1 %v3099_v54  ;;  %v3135_v0 = vld [vmem:[%s7249_s5 + $0x8] sm:$0xff]  ;;  %v3134_v52 = vld [vmem:[%s7249_s5] sm:$0xff]  ;;  %v3220_v26 = vunpack.c.3.s8 %v3204_v53 }
 0x285   :  { %v3012_v54 = vld [vmem:[#allocation12 + $0x3] ss:$0 sm:$0xff] }
 0x286   :  { %3110 = vmatpush.bf16.msra.mxu0 %v3087_v29  ;;  %v3236_v38 = vcvt.s32.f32 %v3220_v26 }
 0x288   :  { %3120 = vmatpush.bf16.msra.mxu1 %v3098_v4 }
 0x289   :  { %v2929_v25 = vpop.f32.mrf.mxu2 }
 0x28a   :  { %v3045_v25 = vunpack.c.3.s8 %v3019_v44  ;;  %v3205_v44 = vld [vmem:[%s7251_s7 + $0x18] sm:$0xff] }
 0x28b   :  { %v3221_v4 = vunpack.c.3.s8 %v3205_v44  ;;  %v3217_v46 = vunpack.c.1.s8 %v3205_v44 }
 0x28c   :  { %v3077_v34 = vcvt.s32.f32 %v3045_v25  ;;  %v3219_v25 = vunpack.c.2.s8 %v3205_v44 }
 0x28d   :  { %v3237_v27 = vcvt.s32.f32 %v3221_v4  ;;  %v3233_v5 = vcvt.s32.f32 %v3217_v46 }
 0x28e   :  { %v3097_v11 = vpack.c.bf16 %v3077_v34, %v3076_v20  ;;  %v3214_v20 = vunpack.c.0.s8 %v3204_v53  ;;  %v3216_v34 = vunpack.c.1.s8 %v3204_v53  ;;  %v3235_v7 = vcvt.s32.f32 %v3219_v25 }
 0x290   :  { %3121 = vmatpush.bf16.msra.mxu1 %v3097_v11  ;;  %v3215_v11 = vunpack.c.0.s8 %v3205_v44  ;;  %v3232_v31 = vcvt.s32.f32 %v3216_v34 }
 0x292   :  { %v3231_v2 = vcvt.s32.f32 %v3215_v11 }
 0x294   :  { %3122 = vmatpush.bf16.msra.mxu1 %v3096_v45  ;;  %v3230_v45 = vcvt.s32.f32 %v3214_v20  ;;  %v3243_v63 = vpack.c.bf16 %v3233_v5, %v3231_v2 }
 0x296   :  { %v3242_v14 = vpack.c.bf16 %v3232_v31, %v3230_v45 }
 0x298   :  { %3123 = vmatpush.bf16.msra.mxu1 %v3095_v60  ;;  %v3245_v60 = vpack.c.bf16 %v3237_v27, %v3235_v7 }
 0x29a   :  { %3267 = vmatpush.bf16.msrb.mxu3 %v3245_v60 }
 0x29c   :  { %3124 = vmatpush.bf16.msra.mxu1 %v3094_v57 }
 0x29e   :  { %3268 = vmatpush.bf16.msrb.mxu3 %v3243_v63 }
 0x2a1   :  { %v2979_v41 = vpop.f32.mrf.mxu2 }
 0x2a2   :  { %v6961_v48 = vadd.f32 %v2979_v41, %v2967_v42  ;;  %v3022_v42 = vunpack.c.0.s8 %v3014_v47 }
 0x2a4   :  { %v3054_v9 = vcvt.s32.f32 %v3022_v42  ;;  %v3013_v42 = vld [vmem:[#allocation12 + $0x45] ss:$0 sm:$0xff] }
 0x2a6   :  { %v3086_v49 = vpack.c.bf16 %v3055_v16, %v3054_v9 }
 0x2a8   :  { %3111 = vmatpush.bf16.msra.mxu0 %v3086_v49  ;;  %v3218_v49 = vunpack.c.2.s8 %v3204_v53 }
 0x2a9   :  { %v2981_v35 = vpop.f32.mrf.mxu2 }
 0x2aa   :  { %v3234_v43 = vcvt.s32.f32 %v3218_v49 }
 0x2ac   :  { %v3244_v10 = vpack.c.bf16 %v3236_v38, %v3234_v43 }
 0x2d2   :  { %v2940_v8 = vpop.f32.mrf.mxu3 }
 0x2d3   :  { %v2941_v19 = vadd.f32 %v2940_v8, %v6947_v62  ;;  %v3141_v62 = vld [vmem:[%s7249_s5 + $0x38] sm:$0xff]  ;;  %v3212_v8 = vunpack.c.3.s8 %v3202_v24 }
 0x2d4   :  { %3154 = vmatpush.msra.mxu2 %v3141_v62 }
 0x2d5   :  { %v3001_v41 = vmul.f32 %v2997_v58, %v2941_v19  ;;  %v3210_v58 = vunpack.c.2.s8 %v3202_v24  ;;  %v3211_v19 = vunpack.c.2.s8 %v3203_v59 }
 0x2d6   :  { %3155 = vmatpush.msra.mxu2 %v3140_v37 }
 0x2d7   :  { %v3008_v35 = vadd.f32 %v3004_v3, %v3001_v41  ;;  %v3213_v3 = vunpack.c.3.s8 %v3203_v59  ;;  %v3226_v41 = vcvt.s32.f32 %v3210_v58 }
 0x2d9   :  { %v3010_v50 = vmax.f32 %v3008_v35, 0.0  ;;  %v3228_v35 = vcvt.s32.f32 %v3212_v8 }
 0x2da   :  { %v2942_v12 = vpop.f32.mrf.mxu3 }
 0x2db   :  { %v3102_v15 = vpack.c.bf16 %v3010_v50, %v3010_v50  ;;  %v3227_v50 = vcvt.s32.f32 %v3211_v19  ;;  %v3229_v12 = vcvt.s32.f32 %v3213_v3 }
 0x2dd   :  { %3112 = vmatmul.bf16.vlgmr.msra.gmra.mxu0 %v3102_v15  ;;  %v3240_v15 = vpack.c.bf16 %v3228_v35, %v3226_v41 }
 0x2e2   :  { %v2992_v17 = vpop.f32.mrf.mxu3 }
 0x2e3   :  { %v2993_v28 = vadd.f32 %v2992_v17, %v6961_v48  ;;  %v3139_v48 = vld [vmem:[%s7249_s5 + $0x28] sm:$0xff]  ;;  %v3206_v17 = vunpack.c.0.s8 %v3202_v24 }
 0x2e4   :  { %3156 = vmatpush.msra.mxu2 %v3139_v48  ;;  %v3168_v48 = vld [vmem:[#allocation12 + $0x5] ss:$0 sm:$0xff] }
 0x2e5   :  { %v3002_v55 = vmul.f32 %v2998_v13, %v2993_v28  ;;  %v3241_v13 = vpack.c.bf16 %v3229_v12, %v3227_v50  ;;  %v3208_v28 = vunpack.c.1.s8 %v3202_v24 }
 0x2e6   :  { %3157 = vmatpush.msra.mxu2 %v3138_v39 }
 0x2e7   :  { %v3009_v47 = vadd.f32 %v3005_v18, %v3002_v55  ;;  %v3207_v18 = vunpack.c.0.s8 %v3203_v59  ;;  %v3209_v55 = vunpack.c.1.s8 %v3203_v59  ;;  %3269 = vmatpush.bf16.msrb.mxu3 %v3241_v13 }
 0x2e8   :  { %3158 = vmatpush.msra.mxu2 %v3137_v51 }
 0x2e9   :  { %v3011_v22 = vmax.f32 %v3009_v47, 0.0  ;;  %v3222_v47 = vcvt.s32.f32 %v3206_v17 }
 0x2ea   :  { %v2994_v36 = vpop.f32.mrf.mxu3  ;;  %3159 = vmatpush.msra.mxu2 %v3136_v40 }
 0x2eb   :  { %v3103_v6 = vpack.c.bf16 %v3011_v22, %v3011_v22  ;;  %v3224_v22 = vcvt.s32.f32 %v3208_v28  ;;  %v3223_v36 = vcvt.s32.f32 %v3207_v18 }
 0x2ec   :  { %3160 = vmatpush.msra.mxu2 %v3135_v0 }
 0x2ed   :  { %3125 = vmatmul.bf16.vlgmr.msra.gmra.mxu1 %v3103_v6  ;;  %v3225_v6 = vcvt.s32.f32 %v3209_v55  ;;  %v3238_v62 = vpack.c.bf16 %v3224_v22, %v3222_v47 }
 0x2ee   :  { %3161 = vmatpush.msra.mxu2 %v3134_v52  ;;  %v3201_v52 = vld [vmem:[#allocation12 + $0x80] ss:$8 sm:$0x3] }
 0x2ef   :  { %v3239_v37 = vpack.c.bf16 %v3225_v6, %v3223_v36 }
 0x2f0   :  { %3254 = vmatpush.bf16.msrb.mxu2 %v3244_v10 }
 0x2f1   :  { %3270 = vmatpush.bf16.msrb.mxu3 %v3239_v37 }
 0x2f4   :  { %3255 = vmatpush.bf16.msrb.mxu2 %v3242_v14 }
 0x2f8   :  { %3256 = vmatpush.bf16.msrb.mxu2 %v3240_v15 }
 0x2fc   :  { %3257 = vmatpush.bf16.msrb.mxu2 %v3238_v62 }
 0x35a   :  { %v3113_v30 = vpop.f32.mrf.mxu0 }
 0x362   :  { %v3115_v29 = vpop.f32.mrf.mxu0 }
 0x363   :  { %v3278_v29 = vperm.slane %v3201_v52, 1 }
 0x36a   :  { %v3126_v56 = vpop.f32.mrf.mxu1 }
 0x36b   :  { %v3127_v33 = vadd.f32 %v3126_v56, %v3113_v30  ;;  %v3277_v30 = vperm.slane %v3201_v52, 0  ;;  %v3285_v56 = vperm.slane %v3199_v1, 1 }
 0x36d   :  { %v3130_v23 = vmul.f32 %v3127_v33, %v3013_v42  ;;  %v3284_v42 = vperm.slane %v3199_v1, 0 }
 0x36f   :  { %v3131_v9 = vadd.f32 %v3130_v23, %v3012_v54 }
 0x371   :  { %v3132_v16 = vmax.f32 %v3131_v9, 0.0 }
 0x372   :  { %v3128_v21 = vpop.f32.mrf.mxu1 }
 0x373   :  { %6202 = vmatmul.msk.f32.vlgmr.msra.gmra.mxu2 %vm3142_vm1, %v3132_v16 }
 0x3f6   :  { %v3163_v61 = vpop.f32.mrf.mxu2 }
 0x3f7   :  { %v3164_v57 = vadd.f32 %v3163_v61, %v3133_v32 }
 0x3f9   :  { %3167 = vst.msk [vmem:[%s7257_s13] sm:$0xff] %vm3166_vm2, %v3164_v57  ;;  %6204 = vmatmul.msk.f32.vlgmr.msra.gmra.mxu3 %vm3166_vm2, %v3164_v57 }
 0x47c   :  { %v3194_v39 = vpop.f32.mrf.mxu3 }
 0x47d   :  { %v3195_v51 = vadd.f32 %v3194_v39, %v3168_v48 }
 0x47f   :  { %v3197_v40 = vmax.f32 %v3195_v51, 0.0 }
 0x481   :  { %v3246_v0 = vpack.c.bf16 %v3197_v40, %v3197_v40 }
 0x483   :  { %6205 = vmatmul.msk.bf16.vlgmr.msrb.gmra.mxu2 %vm3142_vm1, %v3246_v0  ;;  %6206 = vmatmul.msk.bf16.vlgmr.msrb.gmra.mxu3 %vm3142_vm1, %v3246_v0 }
 0x506   :  { %v3259_v33 = vpop.f32.mrf.mxu2  ;;  %v3272_v54 = vpop.f32.mrf.mxu3 }
 0x507   :  { %v3281_v23 = vmul.f32 %v3277_v30, %v3259_v33  ;;  %v3282_v9 = vmul.f32 %v3278_v29, %v3272_v54 }
 0x509   :  { %v7031_v16 = vadd.f32 %v3284_v42, %v3281_v23  ;;  %v7033_v21 = vadd.f32 %v3285_v56, %v3282_v9 }
 0x50b   :  { %v3290_v53 = vmax.f32 %v7031_v16, 0.0  ;;  %v3291_v44 = vmax.f32 %v7033_v21, 0.0 }
 0x50e   :  { %v3261_v49 = vpop.f32.mrf.mxu2  ;;  %v3274_v26 = vpop.f32.mrf.mxu3 }
 0x50f   :  { %6423 = dma.done.wait [#allocation5], 4096 }
 0x510   :  { %6424 = vsyncadd [#allocation5], 4294963200  ;;  %v3312_v25 = vld [vmem:[#allocation2 + $0x60] sm:$0xff]  ;;  %v3313_v20 = vld [vmem:[#allocation2 + $0x68] sm:$0xff] }
 0x511   :  { %v3328_v4 = vld [vmem:[#allocation2 + $0xe0] sm:$0xff]  ;;  %v3388_v34 = vunpack.c.2.s8 %v3312_v25  ;;  %v3392_v11 = vunpack.c.3.s8 %v3312_v25  ;;  %v3329_v38 = vld [vmem:[#allocation2 + $0xe8] sm:$0xff]  ;;  %v3389_v7 = vunpack.c.2.s8 %v3313_v20  ;;  %v3393_v27 = vunpack.c.3.s8 %v3313_v20 }
 0x512   :  { %v3452_v46 = vunpack.c.2.s8 %v3328_v4  ;;  %v3456_v43 = vunpack.c.3.s8 %v3328_v4  ;;  %v3453_v45 = vunpack.c.2.s8 %v3329_v38  ;;  %v3457_v31 = vunpack.c.3.s8 %v3329_v38  ;;  %v3308_v35 = vld [vmem:[#allocation2 + $0x40] sm:$0xff]  ;;  %v3309_v37 = vld [vmem:[#allocation2 + $0x48] sm:$0xff] }
 0x513   :  { %v3516_v2 = vcvt.s32.f32 %v3388_v34  ;;  %v3520_v5 = vcvt.s32.f32 %v3392_v11  ;;  %v3517_v14 = vcvt.s32.f32 %v3389_v7  ;;  %v3521_v63 = vcvt.s32.f32 %v3393_v27  ;;  %v3324_v47 = vld [vmem:[#allocation2 + $0xc0] sm:$0xff]  ;;  %v3325_v0 = vld [vmem:[#allocation2 + $0xc8] sm:$0xff] }
 0x514   :  { %v3580_v10 = vcvt.s32.f32 %v3452_v46  ;;  %v3584_v60 = vcvt.s32.f32 %v3456_v43  ;;  %v3581_v32 = vcvt.s32.f32 %v3453_v45  ;;  %v3585_v61 = vcvt.s32.f32 %v3457_v31 }
 0x515   :  { %v3616_v57 = vpack.c.bf16 %v3520_v5, %v3516_v2  ;;  %v3380_v59 = vunpack.c.0.s8 %v3312_v25  ;;  %v3384_v58 = vunpack.c.1.s8 %v3312_v25  ;;  %v3617_v8 = vpack.c.bf16 %v3521_v63, %v3517_v14  ;;  %v3304_v2 = vld [vmem:[#allocation2 + $0x20] sm:$0xff] }
 0x516   :  { %v3648_v24 = vpack.c.bf16 %v3584_v60, %v3580_v10  ;;  %v3649_v19 = vpack.c.bf16 %v3585_v61, %v3581_v32  ;;  %v3444_v3 = vunpack.c.0.s8 %v3328_v4  ;;  %v3448_v41 = vunpack.c.1.s8 %v3328_v4 }
 0x517   :  { %3654 = vmatpush.bf16.msrb.mxu0 %v3616_v57  ;;  %v3508_v50 = vcvt.s32.f32 %v3380_v59  ;;  %v3512_v12 = vcvt.s32.f32 %v3384_v58  ;;  %v3381_v15 = vunpack.c.0.s8 %v3313_v20  ;;  %v3385_v13 = vunpack.c.1.s8 %v3313_v20  ;;  %3680 = vmatpush.bf16.msra.mxu2 %v3617_v8 }
 0x518   :  { %3667 = vmatpush.bf16.msrb.mxu1 %v3648_v24  ;;  %3693 = vmatpush.bf16.msra.mxu3 %v3649_v19  ;;  %v3572_v17 = vcvt.s32.f32 %v3444_v3  ;;  %v3576_v28 = vcvt.s32.f32 %v3448_v41  ;;  %v3445_v18 = vunpack.c.0.s8 %v3329_v38  ;;  %v3449_v55 = vunpack.c.1.s8 %v3329_v38  ;;  %v3320_v24 = vld [vmem:[#allocation2 + $0xa0] sm:$0xff]  ;;  %v3305_v3 = vld [vmem:[#allocation2 + $0x28] sm:$0xff] }
 0x519   :  { %v3612_v22 = vpack.c.bf16 %v3512_v12, %v3508_v50  ;;  %v3509_v36 = vcvt.s32.f32 %v3381_v15  ;;  %v3513_v6 = vcvt.s32.f32 %v3385_v13  ;;  %v3372_v62 = vunpack.c.2.s8 %v3308_v35  ;;  %v3321_v15 = vld [vmem:[#allocation2 + $0xa8] sm:$0xff] }
 0x51a   :  { %v3644_v48 = vpack.c.bf16 %v3576_v28, %v3572_v17  ;;  %v3573_v39 = vcvt.s32.f32 %v3445_v18  ;;  %v3577_v51 = vcvt.s32.f32 %v3449_v55  ;;  %v3376_v40 = vunpack.c.3.s8 %v3308_v35 }
 0x51b   :  { %3655 = vmatpush.bf16.msrb.mxu0 %v3612_v22  ;;  %v3613_v52 = vpack.c.bf16 %v3513_v6, %v3509_v36  ;;  %v3500_v1 = vcvt.s32.f32 %v3372_v62  ;;  %v3436_v30 = vunpack.c.2.s8 %v3324_v47  ;;  %v3440_v29 = vunpack.c.3.s8 %v3324_v47 }
 0x51c   :  { %3668 = vmatpush.bf16.msrb.mxu1 %v3644_v48  ;;  %v3645_v42 = vpack.c.bf16 %v3577_v51, %v3573_v39  ;;  %v3504_v56 = vcvt.s32.f32 %v3376_v40  ;;  %v3373_v33 = vunpack.c.2.s8 %v3309_v37  ;;  %v3377_v54 = vunpack.c.3.s8 %v3309_v37 }
 0x51d   :  { %3681 = vmatpush.bf16.msra.mxu2 %v3613_v52  ;;  %v3564_v23 = vcvt.s32.f32 %v3436_v30  ;;  %v3568_v9 = vcvt.s32.f32 %v3440_v29  ;;  %v3437_v49 = vunpack.c.2.s8 %v3325_v0  ;;  %v3441_v26 = vunpack.c.3.s8 %v3325_v0 }
 0x51e   :  { %3694 = vmatpush.bf16.msra.mxu3 %v3645_v42  ;;  %v3608_v25 = vpack.c.bf16 %v3504_v56, %v3500_v1  ;;  %v3501_v4 = vcvt.s32.f32 %v3373_v33  ;;  %v3505_v20 = vcvt.s32.f32 %v3377_v54  ;;  %v3364_v34 = vunpack.c.0.s8 %v3308_v35 }
 0x51f   :  { %v3640_v11 = vpack.c.bf16 %v3568_v9, %v3564_v23  ;;  %v3565_v46 = vcvt.s32.f32 %v3437_v49  ;;  %v3569_v43 = vcvt.s32.f32 %v3441_v26  ;;  %v3368_v38 = vunpack.c.1.s8 %v3308_v35  ;;  %v3300_v23 = vld [vmem:[#allocation2] sm:$0xff] }
 0x520   :  { %3656 = vmatpush.bf16.msrb.mxu0 %v3608_v25  ;;  %v3609_v7 = vpack.c.bf16 %v3505_v20, %v3501_v4  ;;  %v3492_v27 = vcvt.s32.f32 %v3364_v34  ;;  %v3428_v45 = vunpack.c.0.s8 %v3324_v47  ;;  %v3432_v31 = vunpack.c.1.s8 %v3324_v47 }
 0x521   :  { %3669 = vmatpush.bf16.msrb.mxu1 %v3640_v11  ;;  %v3641_v5 = vpack.c.bf16 %v3569_v43, %v3565_v46  ;;  %v3496_v10 = vcvt.s32.f32 %v3368_v38  ;;  %v3365_v60 = vunpack.c.0.s8 %v3309_v37  ;;  %v3369_v14 = vunpack.c.1.s8 %v3309_v37  ;;  %v3316_v46 = vld [vmem:[#allocation2 + $0x80] sm:$0xff] }
 0x522   :  { %3682 = vmatpush.bf16.msra.mxu2 %v3609_v7  ;;  %v3556_v63 = vcvt.s32.f32 %v3428_v45  ;;  %v3560_v32 = vcvt.s32.f32 %v3432_v31  ;;  %v3429_v61 = vunpack.c.0.s8 %v3325_v0  ;;  %v3433_v57 = vunpack.c.1.s8 %v3325_v0  ;;  %v3301_v45 = vld [vmem:[#allocation2 + $0x8] sm:$0xff] }
 0x523   :  { %3695 = vmatpush.bf16.msra.mxu3 %v3641_v5  ;;  %v3604_v59 = vpack.c.bf16 %v3496_v10, %v3492_v27  ;;  %v3493_v58 = vcvt.s32.f32 %v3365_v60  ;;  %v3497_v8 = vcvt.s32.f32 %v3369_v14  ;;  %v3356_v19 = vunpack.c.2.s8 %v3304_v2  ;;  %v3317_v60 = vld [vmem:[#allocation2 + $0x88] sm:$0xff] }
 0x524   :  { %v3636_v41 = vpack.c.bf16 %v3560_v32, %v3556_v63  ;;  %v3557_v35 = vcvt.s32.f32 %v3429_v61  ;;  %v3561_v50 = vcvt.s32.f32 %v3433_v57  ;;  %v3360_v12 = vunpack.c.3.s8 %v3304_v2 }
 0x525   :  { %3657 = vmatpush.bf16.msrb.mxu0 %v3604_v59  ;;  %v3605_v13 = vpack.c.bf16 %v3497_v8, %v3493_v58  ;;  %v3484_v17 = vcvt.s32.f32 %v3356_v19  ;;  %v3420_v28 = vunpack.c.2.s8 %v3320_v24  ;;  %v3424_v18 = vunpack.c.3.s8 %v3320_v24 }
 0x526   :  { %3670 = vmatpush.bf16.msrb.mxu1 %v3636_v41  ;;  %v3637_v55 = vpack.c.bf16 %v3561_v50, %v3557_v35  ;;  %v3488_v47 = vcvt.s32.f32 %v3360_v12  ;;  %v3357_v22 = vunpack.c.2.s8 %v3305_v3  ;;  %v3361_v36 = vunpack.c.3.s8 %v3305_v3 }
 0x527   :  { %3683 = vmatpush.bf16.msra.mxu2 %v3605_v13  ;;  %v3548_v6 = vcvt.s32.f32 %v3420_v28  ;;  %v3552_v62 = vcvt.s32.f32 %v3424_v18  ;;  %v3421_v37 = vunpack.c.2.s8 %v3321_v15  ;;  %v3425_v48 = vunpack.c.3.s8 %v3321_v15 }
 0x528   :  { %3696 = vmatpush.bf16.msra.mxu3 %v3637_v55  ;;  %v3600_v39 = vpack.c.bf16 %v3488_v47, %v3484_v17  ;;  %v3485_v51 = vcvt.s32.f32 %v3357_v22  ;;  %v3489_v40 = vcvt.s32.f32 %v3361_v36  ;;  %v3348_v0 = vunpack.c.0.s8 %v3304_v2 }
 0x529   :  { %v3632_v52 = vpack.c.bf16 %v3552_v62, %v3548_v6  ;;  %v3549_v1 = vcvt.s32.f32 %v3421_v37  ;;  %v3553_v30 = vcvt.s32.f32 %v3425_v48  ;;  %v3352_v29 = vunpack.c.1.s8 %v3304_v2  ;;  %v3314_v6 = vld [vmem:[#allocation2 + $0x70] sm:$0xff] }
 0x52a   :  { %3658 = vmatpush.bf16.msrb.mxu0 %v3600_v39  ;;  %v3601_v42 = vpack.c.bf16 %v3489_v40, %v3485_v51  ;;  %v3476_v56 = vcvt.s32.f32 %v3348_v0  ;;  %v3412_v33 = vunpack.c.0.s8 %v3320_v24  ;;  %v3416_v54 = vunpack.c.1.s8 %v3320_v24 }
 0x52b   :  { %3671 = vmatpush.bf16.msrb.mxu1 %v3632_v52  ;;  %v3633_v9 = vpack.c.bf16 %v3553_v30, %v3549_v1  ;;  %v3480_v49 = vcvt.s32.f32 %v3352_v29  ;;  %v3349_v26 = vunpack.c.0.s8 %v3305_v3  ;;  %v3353_v25 = vunpack.c.1.s8 %v3305_v3  ;;  %v3330_v1 = vld [vmem:[#allocation2 + $0xf0] sm:$0xff] }
 0x52c   :  { %3684 = vmatpush.bf16.msra.mxu2 %v3601_v42  ;;  %v3540_v4 = vcvt.s32.f32 %v3412_v33  ;;  %v3544_v20 = vcvt.s32.f32 %v3416_v54  ;;  %v3413_v34 = vunpack.c.0.s8 %v3321_v15  ;;  %v3417_v11 = vunpack.c.1.s8 %v3321_v15  ;;  %v3315_v33 = vld [vmem:[#allocation2 + $0x78] sm:$0xff] }
 0x52d   :  { %3697 = vmatpush.bf16.msra.mxu3 %v3633_v9  ;;  %v3596_v43 = vpack.c.bf16 %v3480_v49, %v3476_v56  ;;  %v3477_v38 = vcvt.s32.f32 %v3349_v26  ;;  %v3481_v7 = vcvt.s32.f32 %v3353_v25  ;;  %v3340_v27 = vunpack.c.2.s8 %v3300_v23  ;;  %v3331_v26 = vld [vmem:[#allocation2 + $0xf8] sm:$0xff] }
 0x52e   :  { %v3628_v31 = vpack.c.bf16 %v3544_v20, %v3540_v4  ;;  %v3541_v2 = vcvt.s32.f32 %v3413_v34  ;;  %v3545_v5 = vcvt.s32.f32 %v3417_v11  ;;  %v3344_v10 = vunpack.c.3.s8 %v3300_v23 }
 0x52f   :  { %3659 = vmatpush.bf16.msrb.mxu0 %v3596_v43  ;;  %v3597_v14 = vpack.c.bf16 %v3481_v7, %v3477_v38  ;;  %v3468_v63 = vcvt.s32.f32 %v3340_v27  ;;  %v3404_v32 = vunpack.c.2.s8 %v3316_v46  ;;  %v3408_v61 = vunpack.c.3.s8 %v3316_v46 }
 0x530   :  { %3672 = vmatpush.bf16.msrb.mxu1 %v3628_v31  ;;  %v3629_v57 = vpack.c.bf16 %v3545_v5, %v3541_v2  ;;  %v3472_v24 = vcvt.s32.f32 %v3344_v10  ;;  %v3341_v59 = vunpack.c.2.s8 %v3301_v45  ;;  %v3345_v58 = vunpack.c.3.s8 %v3301_v45 }
 0x531   :  { %3685 = vmatpush.bf16.msra.mxu2 %v3597_v14  ;;  %v3532_v8 = vcvt.s32.f32 %v3404_v32  ;;  %v3536_v19 = vcvt.s32.f32 %v3408_v61  ;;  %v3405_v3 = vunpack.c.2.s8 %v3317_v60  ;;  %v3409_v41 = vunpack.c.3.s8 %v3317_v60 }
 0x532   :  { %3698 = vmatpush.bf16.msra.mxu3 %v3629_v57  ;;  %v3592_v35 = vpack.c.bf16 %v3472_v24, %v3468_v63  ;;  %v3469_v50 = vcvt.s32.f32 %v3341_v59  ;;  %v3473_v12 = vcvt.s32.f32 %v3345_v58  ;;  %v3332_v15 = vunpack.c.0.s8 %v3300_v23 }
 0x533   :  { %v3624_v13 = vpack.c.bf16 %v3536_v19, %v3532_v8  ;;  %v3533_v17 = vcvt.s32.f32 %v3405_v3  ;;  %v3537_v28 = vcvt.s32.f32 %v3409_v41  ;;  %v3336_v18 = vunpack.c.1.s8 %v3300_v23 }
 0x534   :  { %3660 = vmatpush.bf16.msrb.mxu0 %v3592_v35  ;;  %v3593_v55 = vpack.c.bf16 %v3473_v12, %v3469_v50  ;;  %v3460_v47 = vcvt.s32.f32 %v3332_v15  ;;  %v3396_v22 = vunpack.c.0.s8 %v3316_v46  ;;  %v3400_v36 = vunpack.c.1.s8 %v3316_v46 }
 0x535   :  { %3673 = vmatpush.bf16.msrb.mxu1 %v3624_v13  ;;  %v3625_v62 = vpack.c.bf16 %v3537_v28, %v3533_v17  ;;  %v3464_v37 = vcvt.s32.f32 %v3336_v18  ;;  %v3333_v48 = vunpack.c.0.s8 %v3301_v45  ;;  %v3337_v39 = vunpack.c.1.s8 %v3301_v45  ;;  %v3310_v13 = vld [vmem:[#allocation2 + $0x50] sm:$0xff] }
 0x536   :  { %3686 = vmatpush.bf16.msra.mxu2 %v3593_v55  ;;  %v3524_v51 = vcvt.s32.f32 %v3396_v22  ;;  %v3528_v40 = vcvt.s32.f32 %v3400_v36  ;;  %v3397_v0 = vunpack.c.0.s8 %v3317_v60  ;;  %v3401_v52 = vunpack.c.1.s8 %v3317_v60  ;;  %v3326_v17 = vld [vmem:[#allocation2 + $0xd0] sm:$0xff]  ;;  %v3311_v22 = vld [vmem:[#allocation2 + $0x58] sm:$0xff] }
 0x537   :  { %3699 = vmatpush.bf16.msra.mxu3 %v3625_v62  ;;  %v3588_v30 = vpack.c.bf16 %v3464_v37, %v3460_v47  ;;  %v3461_v29 = vcvt.s32.f32 %v3333_v48  ;;  %v3465_v42 = vcvt.s32.f32 %v3337_v39  ;;  %v3390_v56 = vunpack.c.2.s8 %v3314_v6  ;;  %v3327_v48 = vld [vmem:[#allocation2 + $0xd8] sm:$0xff] }
 0x538   :  { %v3620_v54 = vpack.c.bf16 %v3528_v40, %v3524_v51  ;;  %v3525_v23 = vcvt.s32.f32 %v3397_v0  ;;  %v3529_v9 = vcvt.s32.f32 %v3401_v52  ;;  %v3394_v49 = vunpack.c.3.s8 %v3314_v6 }
 0x539   :  { %3661 = vmatpush.bf16.msrb.mxu0 %v3588_v30  ;;  %v3589_v25 = vpack.c.bf16 %v3465_v42, %v3461_v29  ;;  %v3518_v4 = vcvt.s32.f32 %v3390_v56  ;;  %v3454_v20 = vunpack.c.2.s8 %v3330_v1  ;;  %v3458_v34 = vunpack.c.3.s8 %v3330_v1 }
 0x53a   :  { %3674 = vmatpush.bf16.msrb.mxu1 %v3620_v54  ;;  %v3621_v11 = vpack.c.bf16 %v3529_v9, %v3525_v23  ;;  %v3522_v46 = vcvt.s32.f32 %v3394_v49  ;;  %v3391_v43 = vunpack.c.2.s8 %v3315_v33  ;;  %v3395_v38 = vunpack.c.3.s8 %v3315_v33 }
 0x53b   :  { %3687 = vmatpush.bf16.msra.mxu2 %v3589_v25  ;;  %v3582_v7 = vcvt.s32.f32 %v3454_v20  ;;  %v3586_v27 = vcvt.s32.f32 %v3458_v34  ;;  %v3455_v45 = vunpack.c.2.s8 %v3331_v26  ;;  %v3459_v31 = vunpack.c.3.s8 %v3331_v26 }
 0x53c   :  { %3700 = vmatpush.bf16.msra.mxu3 %v3621_v11  ;;  %v3618_v2 = vpack.c.bf16 %v3522_v46, %v3518_v4  ;;  %v3519_v5 = vcvt.s32.f32 %v3391_v43  ;;  %v3523_v10 = vcvt.s32.f32 %v3395_v38  ;;  %v3382_v60 = vunpack.c.0.s8 %v3314_v6 }
 0x53d   :  { %v3650_v14 = vpack.c.bf16 %v3586_v27, %v3582_v7  ;;  %v3583_v63 = vcvt.s32.f32 %v3455_v45  ;;  %v3587_v32 = vcvt.s32.f32 %v3459_v31  ;;  %v3386_v61 = vunpack.c.1.s8 %v3314_v6  ;;  %v3306_v7 = vld [vmem:[#allocation2 + $0x30] sm:$0xff] }
 0x53e   :  { %3706 = vmatpush.bf16.msra.mxu0 %v3618_v2  ;;  %v3619_v57 = vpack.c.bf16 %v3523_v10, %v3519_v5  ;;  %v3510_v24 = vcvt.s32.f32 %v3382_v60  ;;  %v3446_v59 = vunpack.c.0.s8 %v3330_v1  ;;  %v3450_v58 = vunpack.c.1.s8 %v3330_v1  ;;  %v3322_v5 = vld [vmem:[#allocation2 + $0xb0] sm:$0xff] }
 0x53f   :  { %3719 = vmatpush.bf16.msra.mxu1 %v3650_v14  ;;  %v3651_v8 = vpack.c.bf16 %v3587_v32, %v3583_v63  ;;  %v3514_v19 = vcvt.s32.f32 %v3386_v61  ;;  %v3383_v3 = vunpack.c.0.s8 %v3315_v33  ;;  %v3387_v41 = vunpack.c.1.s8 %v3315_v33  ;;  %v3307_v32 = vld [vmem:[#allocation2 + $0x38] sm:$0xff] }
 0x540   :  { %3732 = vmatpush.bf16.msrb.mxu2 %v3619_v57  ;;  %v3574_v35 = vcvt.s32.f32 %v3446_v59  ;;  %v3578_v50 = vcvt.s32.f32 %v3450_v58  ;;  %v3447_v12 = vunpack.c.0.s8 %v3331_v26  ;;  %v3451_v15 = vunpack.c.1.s8 %v3331_v26 }
 0x541   :  { %3745 = vmatpush.bf16.msrb.mxu3 %v3651_v8  ;;  %v3614_v28 = vpack.c.bf16 %v3514_v19, %v3510_v24  ;;  %v3511_v18 = vcvt.s32.f32 %v3383_v3  ;;  %v3515_v55 = vcvt.s32.f32 %v3387_v41  ;;  %v7040_v47 = vpack.c.bf16 %v3290_v53, %v3290_v53  ;;  %v3323_v41 = vld [vmem:[#allocation2 + $0xb8] sm:$0xff] }
 0x542   :  { %v3646_v36 = vpack.c.bf16 %v3578_v50, %v3574_v35  ;;  %v3575_v6 = vcvt.s32.f32 %v3447_v12  ;;  %v3579_v62 = vcvt.s32.f32 %v3451_v15  ;;  %v7045_v37 = vpack.c.bf16 %v3291_v44, %v3291_v44 }
 0x543   :  { %3707 = vmatpush.bf16.msra.mxu0 %v3614_v28  ;;  %v3615_v39 = vpack.c.bf16 %v3515_v55, %v3511_v18  ;;  %3688 = vmatmul.bf16.vlgmr.msra.gmra.mxu2 %v7040_v47  ;;  %v3374_v51 = vunpack.c.2.s8 %v3310_v13  ;;  %v3378_v40 = vunpack.c.3.s8 %v3310_v13  ;;  %v3438_v16 = vunpack.c.2.s8 %v3326_v17 }
 0x544   :  { %3720 = vmatpush.bf16.msra.mxu1 %v3646_v36  ;;  %v3647_v53 = vpack.c.bf16 %v3579_v62, %v3575_v6  ;;  %3701 = vmatmul.bf16.vlgmr.msra.gmra.mxu3 %v7045_v37  ;;  %v3442_v0 = vunpack.c.3.s8 %v3326_v17  ;;  %v3375_v52 = vunpack.c.2.s8 %v3311_v22  ;;  %v3379_v1 = vunpack.c.3.s8 %v3311_v22 }
 0x545   :  { %3733 = vmatpush.bf16.msrb.mxu2 %v3615_v39  ;;  %v3502_v21 = vcvt.s32.f32 %v3374_v51  ;;  %v3506_v30 = vcvt.s32.f32 %v3378_v40  ;;  %v3566_v44 = vcvt.s32.f32 %v3438_v16  ;;  %v3439_v29 = vunpack.c.2.s8 %v3327_v48  ;;  %3662 = vmatmul.bf16.vlgmr.msrb.gmra.mxu0 %v7040_v47 }
 0x546   :  { %3746 = vmatpush.bf16.msrb.mxu3 %v3647_v53  ;;  %v3570_v42 = vcvt.s32.f32 %v3442_v0  ;;  %v3503_v56 = vcvt.s32.f32 %v3375_v52  ;;  %v3507_v33 = vcvt.s32.f32 %v3379_v1  ;;  %v3443_v54 = vunpack.c.3.s8 %v3327_v48  ;;  %3675 = vmatmul.bf16.vlgmr.msrb.gmra.mxu1 %v7045_v37 }
 0x547   :  { %v3610_v23 = vpack.c.bf16 %v3506_v30, %v3502_v21  ;;  %v3567_v9 = vcvt.s32.f32 %v3439_v29  ;;  %v3366_v49 = vunpack.c.0.s8 %v3310_v13  ;;  %v3370_v26 = vunpack.c.1.s8 %v3310_v13 }
 0x548   :  { %v3642_v25 = vpack.c.bf16 %v3570_v42, %v3566_v44  ;;  %v3611_v4 = vpack.c.bf16 %v3507_v33, %v3503_v56  ;;  %v3571_v20 = vcvt.s32.f32 %v3443_v54  ;;  %v3430_v34 = vunpack.c.0.s8 %v3326_v17  ;;  %v3302_v44 = vld [vmem:[#allocation2 + $0x10] sm:$0xff] }
 0x549   :  { %3708 = vmatpush.bf16.msra.mxu0 %v3610_v23  ;;  %v3494_v11 = vcvt.s32.f32 %v3366_v49  ;;  %v3498_v46 = vcvt.s32.f32 %v3370_v26  ;;  %v3434_v43 = vunpack.c.1.s8 %v3326_v17  ;;  %v3367_v38 = vunpack.c.0.s8 %v3311_v22  ;;  %v3318_v54 = vld [vmem:[#allocation2 + $0x90] sm:$0xff] }
 0x54a   :  { %3721 = vmatpush.bf16.msra.mxu1 %v3642_v25  ;;  %3734 = vmatpush.bf16.msrb.mxu2 %v3611_v4  ;;  %v3643_v27 = vpack.c.bf16 %v3571_v20, %v3567_v9  ;;  %v3558_v45 = vcvt.s32.f32 %v3430_v34  ;;  %v3371_v31 = vunpack.c.1.s8 %v3311_v22  ;;  %v3431_v2 = vunpack.c.0.s8 %v3327_v48  ;;  %v3303_v25 = vld [vmem:[#allocation2 + $0x18] sm:$0xff] }
 0x54b   :  { %v3606_v10 = vpack.c.bf16 %v3498_v46, %v3494_v11  ;;  %v3562_v60 = vcvt.s32.f32 %v3434_v43  ;;  %v3495_v14 = vcvt.s32.f32 %v3367_v38  ;;  %v3435_v63 = vunpack.c.1.s8 %v3327_v48 }
 0x54c   :  { %3747 = vmatpush.bf16.msrb.mxu3 %v3643_v27  ;;  %v3499_v61 = vcvt.s32.f32 %v3371_v31  ;;  %v3559_v57 = vcvt.s32.f32 %v3431_v2  ;;  %v3358_v24 = vunpack.c.2.s8 %v3306_v7  ;;  %v3362_v59 = vunpack.c.3.s8 %v3306_v7  ;;  %v3319_v27 = vld [vmem:[#allocation2 + $0x98] sm:$0xff] }
 0x54d   :  { %3709 = vmatpush.bf16.msra.mxu0 %v3606_v10  ;;  %v3638_v58 = vpack.c.bf16 %v3562_v60, %v3558_v45  ;;  %v3563_v8 = vcvt.s32.f32 %v3435_v63  ;;  %v3422_v19 = vunpack.c.2.s8 %v3322_v5  ;;  %v3426_v3 = vunpack.c.3.s8 %v3322_v5 }
 0x54e   :  { %v3607_v35 = vpack.c.bf16 %v3499_v61, %v3495_v14  ;;  %v3486_v50 = vcvt.s32.f32 %v3358_v24  ;;  %v3490_v12 = vcvt.s32.f32 %v3362_v59  ;;  %v3359_v15 = vunpack.c.2.s8 %v3307_v32 }
 0x54f   :  { %3722 = vmatpush.bf16.msra.mxu1 %v3638_v58  ;;  %v3639_v13 = vpack.c.bf16 %v3563_v8, %v3559_v57  ;;  %v3550_v17 = vcvt.s32.f32 %v3422_v19  ;;  %v3554_v28 = vcvt.s32.f32 %v3426_v3  ;;  %v3363_v18 = vunpack.c.3.s8 %v3307_v32 }
 0x550   :  { %3735 = vmatpush.bf16.msrb.mxu2 %v3607_v35  ;;  %v3602_v55 = vpack.c.bf16 %v3490_v12, %v3486_v50  ;;  %v3487_v22 = vcvt.s32.f32 %v3359_v15  ;;  %v3423_v36 = vunpack.c.2.s8 %v3323_v41  ;;  %v3427_v6 = vunpack.c.3.s8 %v3323_v41 }
 0x551   :  { %3748 = vmatpush.bf16.msrb.mxu3 %v3639_v13  ;;  %v3634_v62 = vpack.c.bf16 %v3554_v28, %v3550_v17  ;;  %v3491_v48 = vcvt.s32.f32 %v3363_v18  ;;  %v3350_v39 = vunpack.c.0.s8 %v3306_v7  ;;  %v3354_v51 = vunpack.c.1.s8 %v3306_v7 }
 0x552   :  { %3710 = vmatpush.bf16.msra.mxu0 %v3602_v55  ;;  %v3551_v40 = vcvt.s32.f32 %v3423_v36  ;;  %v3555_v16 = vcvt.s32.f32 %v3427_v6  ;;  %v3414_v53 = vunpack.c.0.s8 %v3322_v5  ;;  %v3418_v0 = vunpack.c.1.s8 %v3322_v5 }
 0x553   :  { %3723 = vmatpush.bf16.msra.mxu1 %v3634_v62  ;;  %v3603_v52 = vpack.c.bf16 %v3491_v48, %v3487_v22  ;;  %v3478_v1 = vcvt.s32.f32 %v3350_v39  ;;  %v3482_v21 = vcvt.s32.f32 %v3354_v51  ;;  %v3351_v30 = vunpack.c.0.s8 %v3307_v32 }
 0x554   :  { %v3635_v29 = vpack.c.bf16 %v3555_v16, %v3551_v40  ;;  %v3542_v42 = vcvt.s32.f32 %v3414_v53  ;;  %v3546_v56 = vcvt.s32.f32 %v3418_v0  ;;  %v3355_v33 = vunpack.c.1.s8 %v3307_v32 }
 0x555   :  { %3736 = vmatpush.bf16.msrb.mxu2 %v3603_v52  ;;  %v3598_v23 = vpack.c.bf16 %v3482_v21, %v3478_v1  ;;  %v3479_v9 = vcvt.s32.f32 %v3351_v30  ;;  %v3415_v49 = vunpack.c.0.s8 %v3323_v41  ;;  %v3419_v26 = vunpack.c.1.s8 %v3323_v41  ;;  %v3299_v52 = vld [vmem:[#allocation12 + $0x81] ss:$8 sm:$0xf]  ;;  %v3297_v1 = vld [vmem:[#allocation12 + $0x7] ss:$8 sm:$0xf] }
 0x556   :  { %3749 = vmatpush.bf16.msrb.mxu3 %v3635_v29  ;;  %v3630_v4 = vpack.c.bf16 %v3546_v56, %v3542_v42  ;;  %v3483_v20 = vcvt.s32.f32 %v3355_v33  ;;  %v3342_v34 = vunpack.c.2.s8 %v3302_v44  ;;  %v3346_v11 = vunpack.c.3.s8 %v3302_v44 }
 0x557   :  { %3711 = vmatpush.bf16.msra.mxu0 %v3598_v23  ;;  %v3543_v46 = vcvt.s32.f32 %v3415_v49  ;;  %v3547_v43 = vcvt.s32.f32 %v3419_v26  ;;  %v3406_v38 = vunpack.c.2.s8 %v3318_v54  ;;  %v3410_v7 = vunpack.c.3.s8 %v3318_v54 }
 0x558   :  { %3724 = vmatpush.bf16.msra.mxu1 %v3630_v4  ;;  %v3599_v45 = vpack.c.bf16 %v3483_v20, %v3479_v9  ;;  %v3470_v31 = vcvt.s32.f32 %v3342_v34  ;;  %v3474_v2 = vcvt.s32.f32 %v3346_v11  ;;  %v3343_v5 = vunpack.c.2.s8 %v3303_v25 }
 0x559   :  { %v3631_v10 = vpack.c.bf16 %v3547_v43, %v3543_v46  ;;  %v3534_v60 = vcvt.s32.f32 %v3406_v38  ;;  %v3538_v14 = vcvt.s32.f32 %v3410_v7  ;;  %v3347_v63 = vunpack.c.3.s8 %v3303_v25 }
 0x55a   :  { %3737 = vmatpush.bf16.msrb.mxu2 %v3599_v45  ;;  %v3594_v32 = vpack.c.bf16 %v3474_v2, %v3470_v31  ;;  %v3471_v61 = vcvt.s32.f32 %v3343_v5  ;;  %v3407_v57 = vunpack.c.2.s8 %v3319_v27  ;;  %v3411_v24 = vunpack.c.3.s8 %v3319_v27 }
 0x55b   :  { %3750 = vmatpush.bf16.msrb.mxu3 %v3631_v10  ;;  %v3626_v59 = vpack.c.bf16 %v3538_v14, %v3534_v60  ;;  %v3475_v58 = vcvt.s32.f32 %v3347_v63  ;;  %v3334_v8 = vunpack.c.0.s8 %v3302_v44  ;;  %v3338_v19 = vunpack.c.1.s8 %v3302_v44 }
 0x55c   :  { %3712 = vmatpush.bf16.msra.mxu0 %v3594_v32  ;;  %v3535_v3 = vcvt.s32.f32 %v3407_v57  ;;  %v3539_v41 = vcvt.s32.f32 %v3411_v24  ;;  %v3398_v35 = vunpack.c.0.s8 %v3318_v54  ;;  %v3402_v50 = vunpack.c.1.s8 %v3318_v54 }
 0x55d   :  { %3725 = vmatpush.bf16.msra.mxu1 %v3626_v59  ;;  %v3595_v12 = vpack.c.bf16 %v3475_v58, %v3471_v61  ;;  %v3462_v15 = vcvt.s32.f32 %v3334_v8  ;;  %v3466_v13 = vcvt.s32.f32 %v3338_v19  ;;  %v3335_v17 = vunpack.c.0.s8 %v3303_v25 }
 0x55e   :  { %v3627_v28 = vpack.c.bf16 %v3539_v41, %v3535_v3  ;;  %v3526_v18 = vcvt.s32.f32 %v3398_v35  ;;  %v3530_v55 = vcvt.s32.f32 %v3402_v50  ;;  %v3339_v22 = vunpack.c.1.s8 %v3303_v25 }
 0x55f   :  { %3738 = vmatpush.bf16.msrb.mxu2 %v3595_v12  ;;  %v3590_v36 = vpack.c.bf16 %v3466_v13, %v3462_v15  ;;  %v3463_v6 = vcvt.s32.f32 %v3335_v17  ;;  %v3399_v62 = vunpack.c.0.s8 %v3319_v27  ;;  %v3403_v48 = vunpack.c.1.s8 %v3319_v27 }
 0x560   :  { %3751 = vmatpush.bf16.msrb.mxu3 %v3627_v28  ;;  %v3622_v39 = vpack.c.bf16 %v3530_v55, %v3526_v18  ;;  %v3467_v51 = vcvt.s32.f32 %v3339_v22  ;;  %v3759_v30 = vperm.slane %v3299_v52, 0  ;;  %v3772_v42 = vperm.slane %v3297_v1, 0 }
 0x561   :  { %3713 = vmatpush.bf16.msra.mxu0 %v3590_v36  ;;  %v3527_v40 = vcvt.s32.f32 %v3399_v62  ;;  %v3531_v16 = vcvt.s32.f32 %v3403_v48  ;;  %v3760_v54 = vperm.slane %v3299_v52, 1  ;;  %v3773_v26 = vperm.slane %v3297_v1, 1 }
 0x562   :  { %3726 = vmatpush.bf16.msra.mxu1 %v3622_v39  ;;  %v3591_v53 = vpack.c.bf16 %v3467_v51, %v3463_v6  ;;  %v3761_v38 = vperm.slane %v3299_v52, 2  ;;  %v3774_v45 = vperm.slane %v3297_v1, 2  ;;  %v3762_v14 = vperm.slane %v3299_v52, 3 }
 0x563   :  { %v3623_v0 = vpack.c.bf16 %v3531_v16, %v3527_v40  ;;  %v3775_v57 = vperm.slane %v3297_v1, 3 }
 0x564   :  { %3739 = vmatpush.bf16.msrb.mxu2 %v3591_v53  ;;  %3714 = vmatmul.bf16.vlgmr.msra.gmra.mxu0 %v7040_v47 }
 0x565   :  { %3752 = vmatpush.bf16.msrb.mxu3 %v3623_v0  ;;  %3727 = vmatmul.bf16.vlgmr.msra.gmra.mxu1 %v7045_v37 }
 0x567   :  { %3740 = vmatmul.bf16.vlgmr.msrb.gmra.mxu2 %v7040_v47 }
 0x568   :  { %3753 = vmatmul.bf16.vlgmr.msrb.gmra.mxu3 %v7045_v37 }
 0x5c2   :  { %v3663_v21 = vpop.f32.mrf.mxu0 }
 0x5c3   :  { %v3676_v44 = vpop.f32.mrf.mxu1 }
 0x5c4   :  { %v3677_v29 = vadd.f32 %v3676_v44, %v3663_v21 }
 0x5c6   :  { %v3767_v56 = vmul.f32 %v3759_v30, %v3677_v29  ;;  %v3689_v33 = vpop.f32.mrf.mxu2 }
 0x5c7   :  { %v3702_v23 = vpop.f32.mrf.mxu3 }
 0x5c8   :  { %v7055_v9 = vadd.f32 %v3772_v42, %v3767_v56  ;;  %v3703_v49 = vadd.f32 %v3702_v23, %v3689_v33 }
 0x5ca   :  { %v3784_v25 = vmax.f32 %v7055_v9, 0.0  ;;  %v3768_v47 = vmul.f32 %v3760_v54, %v3703_v49  ;;  %v3665_v4 = vpop.f32.mrf.mxu0 }
 0x5cb   :  { %v3678_v37 = vpop.f32.mrf.mxu1 }
 0x5cc   :  { %v7058_v20 = vadd.f32 %v3773_v26, %v3768_v47 }
 0x5ce   :  { %v3785_v34 = vmax.f32 %v7058_v20, 0.0  ;;  %v3691_v11 = vpop.f32.mrf.mxu2 }
 0x5cf   :  { %v3704_v46 = vpop.f32.mrf.mxu3 }
 0x5e1   :  { %v3715_v43 = vpop.f32.mrf.mxu0 }
 0x5e2   :  { %v3728_v7 = vpop.f32.mrf.mxu1 }
 0x5e3   :  { %v3729_v27 = vadd.f32 %v3728_v7, %v3715_v43 }
 0x5e5   :  { %v3769_v31 = vmul.f32 %v3761_v38, %v3729_v27 }
 0x5e7   :  { %v7061_v2 = vadd.f32 %v3774_v45, %v3769_v31 }
 0x5e9   :  { %v3786_v5 = vmax.f32 %v7061_v2, 0.0  ;;  %v3717_v10 = vpop.f32.mrf.mxu0 }
 0x5ea   :  { %v3741_v60 = vpop.f32.mrf.mxu2  ;;  %v3730_v63 = vpop.f32.mrf.mxu1 }
 0x5eb   :  { %v3754_v32 = vpop.f32.mrf.mxu3 }
 0x5ec   :  { %v3755_v61 = vadd.f32 %v3754_v32, %v3741_v60 }
 0x5ee   :  { %v3770_v24 = vmul.f32 %v3762_v14, %v3755_v61 }
 0x5f0   :  { %v7064_v59 = vadd.f32 %v3775_v57, %v3770_v24 }
 0x5f2   :  { %v3787_v58 = vmax.f32 %v7064_v59, 0.0  ;;  %v3743_v8 = vpop.f32.mrf.mxu2 }
 0x5f3   :  { %v3756_v19 = vpop.f32.mrf.mxu3 }
 0x5f4   :  { %6425 = dma.done.wait [#allocation5 + $0x1], 16384 }
 0x5f5   :  { %6426 = vsyncadd [#allocation5 + $0x1], 4294950912  ;;  %v3824_v3 = vld [vmem:[#allocation3 + $0xc0] sm:$0xff]  ;;  %v3826_v9 = vld [vmem:[#allocation3 + $0xd0] sm:$0xff] }
 0x5f6   :  { %v3856_v41 = vld [vmem:[#allocation3 + $0x1c0] sm:$0xff]  ;;  %v4040_v50 = vunpack.c.2.s8 %v3824_v3  ;;  %v4048_v12 = vunpack.c.3.s8 %v3824_v3  ;;  %v4024_v52 = vunpack.c.0.s8 %v3824_v3  ;;  %v4032_v1 = vunpack.c.1.s8 %v3824_v3 }
 0x5f7   :  { %v3888_v35 = vld [vmem:[#allocation3 + $0x2c0] sm:$0xff]  ;;  %v4168_v15 = vunpack.c.2.s8 %v3856_v41  ;;  %v4176_v13 = vunpack.c.3.s8 %v3856_v41  ;;  %v4152_v44 = vunpack.c.0.s8 %v3856_v41  ;;  %v4160_v29 = vunpack.c.1.s8 %v3856_v41 }
 0x5f8   :  { %v3920_v17 = vld [vmem:[#allocation3 + $0x3c0] sm:$0xff]  ;;  %v4296_v28 = vunpack.c.2.s8 %v3888_v35  ;;  %v4304_v18 = vunpack.c.3.s8 %v3888_v35  ;;  %v4552_v36 = vcvt.s32.f32 %v4040_v50  ;;  %v4560_v6 = vcvt.s32.f32 %v4048_v12 }
 0x5f9   :  { %v4424_v55 = vunpack.c.2.s8 %v3920_v17  ;;  %v4432_v22 = vunpack.c.3.s8 %v3920_v17  ;;  %v4680_v62 = vcvt.s32.f32 %v4168_v15  ;;  %v4688_v48 = vcvt.s32.f32 %v4176_v13  ;;  %v3816_v42 = vld [vmem:[#allocation3 + $0x80] sm:$0xff] }
 0x5fa   :  { %v4808_v39 = vcvt.s32.f32 %v4296_v28  ;;  %v4816_v51 = vcvt.s32.f32 %v4304_v18  ;;  %v5008_v53 = vpack.c.bf16 %v4560_v6, %v4552_v36  ;;  %v4536_v56 = vcvt.s32.f32 %v4024_v52  ;;  %v3848_v37 = vld [vmem:[#allocation3 + $0x180] sm:$0xff] }
 0x5fb   :  { %v4936_v40 = vcvt.s32.f32 %v4424_v55  ;;  %v4944_v16 = vcvt.s32.f32 %v4432_v22  ;;  %v5072_v0 = vpack.c.bf16 %v4688_v48, %v4680_v62  ;;  %v4544_v33 = vcvt.s32.f32 %v4032_v1  ;;  %v3880_v7 = vld [vmem:[#allocation3 + $0x280] sm:$0xff] }
 0x5fc   :  { %v5136_v21 = vpack.c.bf16 %v4816_v51, %v4808_v39  ;;  %5212 = vmatpush.bf16.msrb.mxu0 %v5008_v53  ;;  %v4280_v54 = vunpack.c.0.s8 %v3888_v35  ;;  %v4288_v23 = vunpack.c.1.s8 %v3888_v35  ;;  %v4664_v49 = vcvt.s32.f32 %v4152_v44  ;;  %v3912_v60 = vld [vmem:[#allocation3 + $0x380] sm:$0xff] }
 0x5fd   :  { %v5200_v30 = vpack.c.bf16 %v4944_v16, %v4936_v40  ;;  %5225 = vmatpush.bf16.msrb.mxu1 %v5072_v0  ;;  %v4672_v26 = vcvt.s32.f32 %v4160_v29  ;;  %v4408_v47 = vunpack.c.0.s8 %v3920_v17  ;;  %v4416_v4 = vunpack.c.1.s8 %v3920_v17  ;;  %v3808_v39 = vld [vmem:[#allocation3 + $0x40] sm:$0xff] }
 0x5fe   :  { %5238 = vmatpush.bf16.msra.mxu2 %v5136_v21  ;;  %v5000_v11 = vpack.c.bf16 %v4544_v33, %v4536_v56  ;;  %v4792_v46 = vcvt.s32.f32 %v4280_v54  ;;  %v4800_v43 = vcvt.s32.f32 %v4288_v23  ;;  %v4008_v38 = vunpack.c.2.s8 %v3816_v42  ;;  %v3872_v33 = vld [vmem:[#allocation3 + $0x240] sm:$0xff] }
 0x5ff   :  { %5251 = vmatpush.bf16.msra.mxu3 %v5200_v30  ;;  %v5064_v27 = vpack.c.bf16 %v4672_v26, %v4664_v49  ;;  %v4920_v45 = vcvt.s32.f32 %v4408_v47  ;;  %v4928_v31 = vcvt.s32.f32 %v4416_v4  ;;  %v4016_v10 = vunpack.c.3.s8 %v3816_v42  ;;  %v3840_v30 = vld [vmem:[#allocation3 + $0x140] sm:$0xff] }
 0x600   :  { %5213 = vmatpush.bf16.msrb.mxu0 %v5000_v11  ;;  %v5128_v14 = vpack.c.bf16 %v4800_v43, %v4792_v46  ;;  %v4520_v63 = vcvt.s32.f32 %v4008_v38  ;;  %v4136_v32 = vunpack.c.2.s8 %v3848_v37  ;;  %v4144_v61 = vunpack.c.3.s8 %v3848_v37  ;;  %v3904_v47 = vld [vmem:[#allocation3 + $0x340] sm:$0xff] }
 0x601   :  { %5226 = vmatpush.bf16.msrb.mxu1 %v5064_v27  ;;  %v5192_v57 = vpack.c.bf16 %v4928_v31, %v4920_v45  ;;  %v4528_v24 = vcvt.s32.f32 %v4016_v10  ;;  %v4264_v8 = vunpack.c.2.s8 %v3880_v7  ;;  %v4272_v19 = vunpack.c.3.s8 %v3880_v7 }
 0x602   :  { %5239 = vmatpush.bf16.msra.mxu2 %v5128_v14  ;;  %v4648_v3 = vcvt.s32.f32 %v4136_v32  ;;  %v4656_v41 = vcvt.s32.f32 %v4144_v61  ;;  %v4392_v35 = vunpack.c.2.s8 %v3912_v60  ;;  %v4400_v50 = vunpack.c.3.s8 %v3912_v60 }
 0x603   :  { %5252 = vmatpush.bf16.msra.mxu3 %v5192_v57  ;;  %v4992_v12 = vpack.c.bf16 %v4528_v24, %v4520_v63  ;;  %v4776_v15 = vcvt.s32.f32 %v4264_v8  ;;  %v4784_v13 = vcvt.s32.f32 %v4272_v19  ;;  %v3992_v17 = vunpack.c.0.s8 %v3816_v42 }
 0x604   :  { %v5056_v28 = vpack.c.bf16 %v4656_v41, %v4648_v3  ;;  %v4904_v18 = vcvt.s32.f32 %v4392_v35  ;;  %v4912_v55 = vcvt.s32.f32 %v4400_v50  ;;  %v4000_v22 = vunpack.c.1.s8 %v3816_v42 }
 0x605   :  { %5214 = vmatpush.bf16.msrb.mxu0 %v4992_v12  ;;  %v5120_v36 = vpack.c.bf16 %v4784_v13, %v4776_v15  ;;  %v4504_v6 = vcvt.s32.f32 %v3992_v17  ;;  %v4120_v62 = vunpack.c.0.s8 %v3848_v37  ;;  %v4128_v48 = vunpack.c.1.s8 %v3848_v37  ;;  %v3800_v12 = vld [vmem:[#allocation3] sm:$0xff] }
 0x606   :  { %5227 = vmatpush.bf16.msrb.mxu1 %v5056_v28  ;;  %v5184_v51 = vpack.c.bf16 %v4912_v55, %v4904_v18  ;;  %v4512_v40 = vcvt.s32.f32 %v4000_v22  ;;  %v4248_v16 = vunpack.c.0.s8 %v3880_v7  ;;  %v4256_v53 = vunpack.c.1.s8 %v3880_v7 }
 0x607   :  { %5240 = vmatpush.bf16.msra.mxu2 %v5120_v36  ;;  %v4632_v0 = vcvt.s32.f32 %v4120_v62  ;;  %v4640_v52 = vcvt.s32.f32 %v4128_v48  ;;  %v4376_v1 = vunpack.c.0.s8 %v3912_v60  ;;  %v4384_v21 = vunpack.c.1.s8 %v3912_v60 }
 0x608   :  { %5253 = vmatpush.bf16.msra.mxu3 %v5184_v51  ;;  %v4984_v44 = vpack.c.bf16 %v4512_v40, %v4504_v6  ;;  %v4760_v29 = vcvt.s32.f32 %v4248_v16  ;;  %v4768_v42 = vcvt.s32.f32 %v4256_v53  ;;  %v3976_v56 = vunpack.c.2.s8 %v3808_v39  ;;  %v3832_v6 = vld [vmem:[#allocation3 + $0x100] sm:$0xff] }
 0x609   :  { %v5048_v54 = vpack.c.bf16 %v4640_v52, %v4632_v0  ;;  %v4888_v23 = vcvt.s32.f32 %v4376_v1  ;;  %v4896_v49 = vcvt.s32.f32 %v4384_v21  ;;  %v3984_v26 = vunpack.c.3.s8 %v3808_v39  ;;  %v3864_v40 = vld [vmem:[#allocation3 + $0x200] sm:$0xff] }
 0x60a   :  { %5215 = vmatpush.bf16.msrb.mxu0 %v4984_v44  ;;  %v5112_v4 = vpack.c.bf16 %v4768_v42, %v4760_v29  ;;  %v4488_v37 = vcvt.s32.f32 %v3976_v56  ;;  %v4104_v11 = vunpack.c.2.s8 %v3840_v30  ;;  %v4112_v46 = vunpack.c.3.s8 %v3840_v30  ;;  %v3896_v1 = vld [vmem:[#allocation3 + $0x300] sm:$0xff] }
 0x60b   :  { %5228 = vmatpush.bf16.msrb.mxu1 %v5048_v54  ;;  %v5176_v43 = vpack.c.bf16 %v4896_v49, %v4888_v23  ;;  %v4496_v38 = vcvt.s32.f32 %v3984_v26  ;;  %v4232_v7 = vunpack.c.2.s8 %v3872_v33  ;;  %v4240_v27 = vunpack.c.3.s8 %v3872_v33 }
 0x60c   :  { %5241 = vmatpush.bf16.msra.mxu2 %v5112_v4  ;;  %v4616_v45 = vcvt.s32.f32 %v4104_v11  ;;  %v4624_v31 = vcvt.s32.f32 %v4112_v46  ;;  %v4360_v10 = vunpack.c.2.s8 %v3904_v47  ;;  %v4368_v60 = vunpack.c.3.s8 %v3904_v47 }
 0x60d   :  { %5254 = vmatpush.bf16.msra.mxu3 %v5176_v43  ;;  %v4976_v14 = vpack.c.bf16 %v4496_v38, %v4488_v37  ;;  %v4744_v63 = vcvt.s32.f32 %v4232_v7  ;;  %v4752_v32 = vcvt.s32.f32 %v4240_v27  ;;  %v3960_v61 = vunpack.c.0.s8 %v3808_v39 }
 0x60e   :  { %v5040_v57 = vpack.c.bf16 %v4624_v31, %v4616_v45  ;;  %v4872_v24 = vcvt.s32.f32 %v4360_v10  ;;  %v4880_v8 = vcvt.s32.f32 %v4368_v60  ;;  %v3968_v19 = vunpack.c.1.s8 %v3808_v39 }
 0x60f   :  { %5216 = vmatpush.bf16.msrb.mxu0 %v4976_v14  ;;  %v5104_v3 = vpack.c.bf16 %v4752_v32, %v4744_v63  ;;  %v4472_v41 = vcvt.s32.f32 %v3960_v61  ;;  %v4088_v35 = vunpack.c.0.s8 %v3840_v30  ;;  %v4096_v50 = vunpack.c.1.s8 %v3840_v30  ;;  %v3825_v14 = vld [vmem:[#allocation3 + $0xc8] sm:$0xff] }
 0x610   :  { %5229 = vmatpush.bf16.msrb.mxu1 %v5040_v57  ;;  %v5168_v15 = vpack.c.bf16 %v4880_v8, %v4872_v24  ;;  %v4480_v13 = vcvt.s32.f32 %v3968_v19  ;;  %v4216_v17 = vunpack.c.0.s8 %v3872_v33  ;;  %v4224_v28 = vunpack.c.1.s8 %v3872_v33 }
 0x611   :  { %5242 = vmatpush.bf16.msra.mxu2 %v5104_v3  ;;  %v4600_v18 = vcvt.s32.f32 %v4088_v35  ;;  %v4608_v55 = vcvt.s32.f32 %v4096_v50  ;;  %v4344_v22 = vunpack.c.0.s8 %v3904_v47  ;;  %v4352_v36 = vunpack.c.1.s8 %v3904_v47 }
 0x612   :  { %5255 = vmatpush.bf16.msra.mxu3 %v5168_v15  ;;  %v4968_v62 = vpack.c.bf16 %v4480_v13, %v4472_v41  ;;  %v4728_v48 = vcvt.s32.f32 %v4216_v17  ;;  %v4736_v39 = vcvt.s32.f32 %v4224_v28  ;;  %v3944_v51 = vunpack.c.2.s8 %v3800_v12  ;;  %v3857_v41 = vld [vmem:[#allocation3 + $0x1c8] sm:$0xff] }
 0x613   :  { %v5032_v16 = vpack.c.bf16 %v4608_v55, %v4600_v18  ;;  %v4856_v53 = vcvt.s32.f32 %v4344_v22  ;;  %v4864_v0 = vcvt.s32.f32 %v4352_v36  ;;  %v3952_v52 = vunpack.c.3.s8 %v3800_v12  ;;  %v3889_v13 = vld [vmem:[#allocation3 + $0x2c8] sm:$0xff] }
 0x614   :  { %5217 = vmatpush.bf16.msrb.mxu0 %v4968_v62  ;;  %v5096_v21 = vpack.c.bf16 %v4736_v39, %v4728_v48  ;;  %v4456_v30 = vcvt.s32.f32 %v3944_v51  ;;  %v4072_v44 = vunpack.c.2.s8 %v3832_v6  ;;  %v4080_v29 = vunpack.c.3.s8 %v3832_v6  ;;  %v3921_v22 = vld [vmem:[#allocation3 + $0x3c8] sm:$0xff] }
 0x615   :  { %5230 = vmatpush.bf16.msrb.mxu1 %v5032_v16  ;;  %v5160_v42 = vpack.c.bf16 %v4864_v0, %v4856_v53  ;;  %v4464_v56 = vcvt.s32.f32 %v3952_v52  ;;  %v4200_v33 = vunpack.c.2.s8 %v3864_v40  ;;  %v4208_v54 = vunpack.c.3.s8 %v3864_v40 }
 0x616   :  { %5243 = vmatpush.bf16.msra.mxu2 %v5096_v21  ;;  %v4584_v23 = vcvt.s32.f32 %v4072_v44  ;;  %v4592_v49 = vcvt.s32.f32 %v4080_v29  ;;  %v4328_v26 = vunpack.c.2.s8 %v3896_v1  ;;  %v4336_v47 = vunpack.c.3.s8 %v3896_v1 }
 0x617   :  { %5256 = vmatpush.bf16.msra.mxu3 %v5160_v42  ;;  %v4960_v4 = vpack.c.bf16 %v4464_v56, %v4456_v30  ;;  %v4712_v37 = vcvt.s32.f32 %v4200_v33  ;;  %v4720_v11 = vcvt.s32.f32 %v4208_v54  ;;  %v3928_v46 = vunpack.c.0.s8 %v3800_v12 }
 0x618   :  { %v5024_v43 = vpack.c.bf16 %v4592_v49, %v4584_v23  ;;  %v4840_v38 = vcvt.s32.f32 %v4328_v26  ;;  %v4848_v7 = vcvt.s32.f32 %v4336_v47  ;;  %v3936_v27 = vunpack.c.1.s8 %v3800_v12 }
 0x619   :  { %5218 = vmatpush.bf16.msrb.mxu0 %v4960_v4  ;;  %v5088_v45 = vpack.c.bf16 %v4720_v11, %v4712_v37  ;;  %v4440_v31 = vcvt.s32.f32 %v3928_v46  ;;  %v4056_v10 = vunpack.c.0.s8 %v3832_v6  ;;  %v4064_v60 = vunpack.c.1.s8 %v3832_v6  ;;  %v3817_v4 = vld [vmem:[#allocation3 + $0x88] sm:$0xff] }
 0x61a   :  { %5231 = vmatpush.bf16.msrb.mxu1 %v5024_v43  ;;  %v5152_v63 = vpack.c.bf16 %v4848_v7, %v4840_v38  ;;  %v4448_v32 = vcvt.s32.f32 %v3936_v27  ;;  %v4184_v61 = vunpack.c.0.s8 %v3864_v40  ;;  %v4192_v57 = vunpack.c.1.s8 %v3864_v40 }
 0x61b   :  { %5244 = vmatpush.bf16.msra.mxu2 %v5088_v45  ;;  %v4568_v24 = vcvt.s32.f32 %v4056_v10  ;;  %v4576_v8 = vcvt.s32.f32 %v4064_v60  ;;  %v4312_v19 = vunpack.c.0.s8 %v3896_v1  ;;  %v4320_v3 = vunpack.c.1.s8 %v3896_v1 }
 0x61c   :  { %5257 = vmatpush.bf16.msra.mxu3 %v5152_v63  ;;  %v4952_v35 = vpack.c.bf16 %v4448_v32, %v4440_v31  ;;  %v4696_v50 = vcvt.s32.f32 %v4184_v61  ;;  %v4704_v12 = vcvt.s32.f32 %v4192_v57  ;;  %v4041_v15 = vunpack.c.2.s8 %v3825_v14  ;;  %v3849_v31 = vld [vmem:[#allocation3 + $0x188] sm:$0xff] }
 0x61d   :  { %v5016_v17 = vpack.c.bf16 %v4576_v8, %v4568_v24  ;;  %v4824_v28 = vcvt.s32.f32 %v4312_v19  ;;  %v4832_v18 = vcvt.s32.f32 %v4320_v3  ;;  %v4049_v55 = vunpack.c.3.s8 %v3825_v14  ;;  %v3881_v32 = vld [vmem:[#allocation3 + $0x288] sm:$0xff] }
 0x61e   :  { %5219 = vmatpush.bf16.msrb.mxu0 %v4952_v35  ;;  %v5080_v36 = vpack.c.bf16 %v4704_v12, %v4696_v50  ;;  %v4553_v6 = vcvt.s32.f32 %v4041_v15  ;;  %v4169_v62 = vunpack.c.2.s8 %v3857_v41  ;;  %v4177_v48 = vunpack.c.3.s8 %v3857_v41  ;;  %v3913_v19 = vld [vmem:[#allocation3 + $0x388] sm:$0xff] }
 0x61f   :  { %5232 = vmatpush.bf16.msrb.mxu1 %v5016_v17  ;;  %v5144_v39 = vpack.c.bf16 %v4832_v18, %v4824_v28  ;;  %v4561_v51 = vcvt.s32.f32 %v4049_v55  ;;  %v4297_v40 = vunpack.c.2.s8 %v3889_v13  ;;  %v4305_v16 = vunpack.c.3.s8 %v3889_v13 }
 0x620   :  { %5245 = vmatpush.bf16.msra.mxu2 %v5080_v36  ;;  %v4681_v53 = vcvt.s32.f32 %v4169_v62  ;;  %v4689_v0 = vcvt.s32.f32 %v4177_v48  ;;  %v4425_v52 = vunpack.c.2.s8 %v3921_v22  ;;  %v4433_v1 = vunpack.c.3.s8 %v3921_v22 }
 0x621   :  { %5258 = vmatpush.bf16.msra.mxu3 %v5144_v39  ;;  %v5009_v21 = vpack.c.bf16 %v4561_v51, %v4553_v6  ;;  %v4809_v30 = vcvt.s32.f32 %v4297_v40  ;;  %v4817_v44 = vcvt.s32.f32 %v4305_v16  ;;  %v4025_v29 = vunpack.c.0.s8 %v3825_v14 }
 0x622   :  { %v5073_v42 = vpack.c.bf16 %v4689_v0, %v4681_v53  ;;  %v4937_v56 = vcvt.s32.f32 %v4425_v52  ;;  %v4945_v33 = vcvt.s32.f32 %v4433_v1  ;;  %v4033_v54 = vunpack.c.1.s8 %v3825_v14 }
 0x623   :  { %5264 = vmatpush.bf16.msra.mxu0 %v5009_v21  ;;  %v5137_v23 = vpack.c.bf16 %v4817_v44, %v4809_v30  ;;  %v4537_v49 = vcvt.s32.f32 %v4025_v29  ;;  %v4153_v26 = vunpack.c.0.s8 %v3857_v41  ;;  %v4161_v47 = vunpack.c.1.s8 %v3857_v41  ;;  %v3809_v21 = vld [vmem:[#allocation3 + $0x48] sm:$0xff] }
 0x624   :  { %5277 = vmatpush.bf16.msra.mxu1 %v5073_v42  ;;  %v5201_v37 = vpack.c.bf16 %v4945_v33, %v4937_v56  ;;  %v4545_v11 = vcvt.s32.f32 %v4033_v54  ;;  %v4281_v46 = vunpack.c.0.s8 %v3889_v13  ;;  %v4289_v43 = vunpack.c.1.s8 %v3889_v13 }
 0x625   :  { %5290 = vmatpush.bf16.msrb.mxu2 %v5137_v23  ;;  %v4665_v38 = vcvt.s32.f32 %v4153_v26  ;;  %v4673_v7 = vcvt.s32.f32 %v4161_v47  ;;  %v4409_v27 = vunpack.c.0.s8 %v3921_v22  ;;  %v4417_v45 = vunpack.c.1.s8 %v3921_v22 }
 0x626   :  { %5303 = vmatpush.bf16.msrb.mxu3 %v5201_v37  ;;  %v5001_v10 = vpack.c.bf16 %v4545_v11, %v4537_v49  ;;  %v4793_v60 = vcvt.s32.f32 %v4281_v46  ;;  %v4801_v14 = vcvt.s32.f32 %v4289_v43  ;;  %v4009_v63 = vunpack.c.2.s8 %v3817_v4  ;;  %v3841_v49 = vld [vmem:[#allocation3 + $0x148] sm:$0xff] }
 0x627   :  { %v5065_v61 = vpack.c.bf16 %v4673_v7, %v4665_v38  ;;  %v4921_v57 = vcvt.s32.f32 %v4409_v27  ;;  %v4929_v24 = vcvt.s32.f32 %v4417_v45  ;;  %v4017_v8 = vunpack.c.3.s8 %v3817_v4  ;;  %v3873_v11 = vld [vmem:[#allocation3 + $0x248] sm:$0xff] }
 0x628   :  { %5265 = vmatpush.bf16.msra.mxu0 %v5001_v10  ;;  %v5129_v3 = vpack.c.bf16 %v4801_v14, %v4793_v60  ;;  %v4521_v41 = vcvt.s32.f32 %v4009_v63  ;;  %v4137_v35 = vunpack.c.2.s8 %v3849_v31  ;;  %v4145_v50 = vunpack.c.3.s8 %v3849_v31  ;;  %v3905_v27 = vld [vmem:[#allocation3 + $0x348] sm:$0xff] }
 0x629   :  { %5278 = vmatpush.bf16.msra.mxu1 %v5065_v61  ;;  %v5193_v12 = vpack.c.bf16 %v4929_v24, %v4921_v57  ;;  %v4529_v15 = vcvt.s32.f32 %v4017_v8  ;;  %v4265_v13 = vunpack.c.2.s8 %v3881_v32  ;;  %v4273_v17 = vunpack.c.3.s8 %v3881_v32 }
 0x62a   :  { %5291 = vmatpush.bf16.msrb.mxu2 %v5129_v3  ;;  %v4649_v28 = vcvt.s32.f32 %v4137_v35  ;;  %v4657_v18 = vcvt.s32.f32 %v4145_v50  ;;  %v4393_v55 = vunpack.c.2.s8 %v3913_v19  ;;  %v4401_v22 = vunpack.c.3.s8 %v3913_v19 }
 0x62b   :  { %5304 = vmatpush.bf16.msrb.mxu3 %v5193_v12  ;;  %v4993_v36 = vpack.c.bf16 %v4529_v15, %v4521_v41  ;;  %v4777_v6 = vcvt.s32.f32 %v4265_v13  ;;  %v4785_v62 = vcvt.s32.f32 %v4273_v17  ;;  %v3993_v48 = vunpack.c.0.s8 %v3817_v4 }
 0x62c   :  { %v5057_v39 = vpack.c.bf16 %v4657_v18, %v4649_v28  ;;  %v4905_v51 = vcvt.s32.f32 %v4393_v55  ;;  %v4913_v40 = vcvt.s32.f32 %v4401_v22  ;;  %v4001_v16 = vunpack.c.1.s8 %v3817_v4 }
 0x62d   :  { %5266 = vmatpush.bf16.msra.mxu0 %v4993_v36  ;;  %v5121_v53 = vpack.c.bf16 %v4785_v62, %v4777_v6  ;;  %v4505_v0 = vcvt.s32.f32 %v3993_v48  ;;  %v4121_v52 = vunpack.c.0.s8 %v3849_v31  ;;  %v4129_v1 = vunpack.c.1.s8 %v3849_v31 }
 0x62e   :  { %5279 = vmatpush.bf16.msra.mxu1 %v5057_v39  ;;  %v5185_v30 = vpack.c.bf16 %v4913_v40, %v4905_v51  ;;  %v4513_v44 = vcvt.s32.f32 %v4001_v16  ;;  %v4249_v29 = vunpack.c.0.s8 %v3881_v32  ;;  %v4257_v42 = vunpack.c.1.s8 %v3881_v32 }
 0x62f   :  { %5292 = vmatpush.bf16.msrb.mxu2 %v5121_v53  ;;  %v4633_v56 = vcvt.s32.f32 %v4121_v52  ;;  %v4641_v33 = vcvt.s32.f32 %v4129_v1  ;;  %v4377_v54 = vunpack.c.0.s8 %v3913_v19  ;;  %v4385_v23 = vunpack.c.1.s8 %v3913_v19  ;;  %v3801_v53 = vld [vmem:[#allocation3 + $0x8] sm:$0xff] }
 0x630   :  { %5305 = vmatpush.bf16.msrb.mxu3 %v5185_v30  ;;  %v4985_v26 = vpack.c.bf16 %v4513_v44, %v4505_v0  ;;  %v4761_v47 = vcvt.s32.f32 %v4249_v29  ;;  %v4769_v4 = vcvt.s32.f32 %v4257_v42  ;;  %v3977_v37 = vunpack.c.2.s8 %v3809_v21  ;;  %v3833_v0 = vld [vmem:[#allocation3 + $0x108] sm:$0xff] }
 0x631   :  { %v5049_v46 = vpack.c.bf16 %v4641_v33, %v4633_v56  ;;  %v4889_v43 = vcvt.s32.f32 %v4377_v54  ;;  %v4897_v38 = vcvt.s32.f32 %v4385_v23  ;;  %v3985_v7 = vunpack.c.3.s8 %v3809_v21  ;;  %v3865_v44 = vld [vmem:[#allocation3 + $0x208] sm:$0xff] }
 0x632   :  { %5267 = vmatpush.bf16.msra.mxu0 %v4985_v26  ;;  %v5113_v45 = vpack.c.bf16 %v4769_v4, %v4761_v47  ;;  %v4489_v31 = vcvt.s32.f32 %v3977_v37  ;;  %v4105_v10 = vunpack.c.2.s8 %v3841_v49  ;;  %v4113_v60 = vunpack.c.3.s8 %v3841_v49  ;;  %v3897_v54 = vld [vmem:[#allocation3 + $0x308] sm:$0xff] }
 0x633   :  { %5280 = vmatpush.bf16.msra.mxu1 %v5049_v46  ;;  %v5177_v14 = vpack.c.bf16 %v4897_v38, %v4889_v43  ;;  %v4497_v63 = vcvt.s32.f32 %v3985_v7  ;;  %v4233_v32 = vunpack.c.2.s8 %v3873_v11  ;;  %v4241_v61 = vunpack.c.3.s8 %v3873_v11 }
 0x634   :  { %5293 = vmatpush.bf16.msrb.mxu2 %v5113_v45  ;;  %v4617_v57 = vcvt.s32.f32 %v4105_v10  ;;  %v4625_v24 = vcvt.s32.f32 %v4113_v60  ;;  %v4361_v8 = vunpack.c.2.s8 %v3905_v27  ;;  %v4369_v19 = vunpack.c.3.s8 %v3905_v27 }
 0x635   :  { %5306 = vmatpush.bf16.msrb.mxu3 %v5177_v14  ;;  %v4977_v3 = vpack.c.bf16 %v4497_v63, %v4489_v31  ;;  %v4745_v41 = vcvt.s32.f32 %v4233_v32  ;;  %v4753_v35 = vcvt.s32.f32 %v4241_v61  ;;  %v3961_v50 = vunpack.c.0.s8 %v3809_v21 }
 0x636   :  { %v5041_v12 = vpack.c.bf16 %v4625_v24, %v4617_v57  ;;  %v4873_v15 = vcvt.s32.f32 %v4361_v8  ;;  %v4881_v13 = vcvt.s32.f32 %v4369_v19  ;;  %v3969_v17 = vunpack.c.1.s8 %v3809_v21 }
 0x637   :  { %5268 = vmatpush.bf16.msra.mxu0 %v4977_v3  ;;  %v5105_v28 = vpack.c.bf16 %v4753_v35, %v4745_v41  ;;  %v4473_v18 = vcvt.s32.f32 %v3961_v50  ;;  %v4089_v55 = vunpack.c.0.s8 %v3841_v49  ;;  %v4097_v22 = vunpack.c.1.s8 %v3841_v49 }
 0x638   :  { %5281 = vmatpush.bf16.msra.mxu1 %v5041_v12  ;;  %v5169_v36 = vpack.c.bf16 %v4881_v13, %v4873_v15  ;;  %v4481_v6 = vcvt.s32.f32 %v3969_v17  ;;  %v4217_v62 = vunpack.c.0.s8 %v3873_v11  ;;  %v4225_v48 = vunpack.c.1.s8 %v3873_v11 }
 0x639   :  { %5294 = vmatpush.bf16.msrb.mxu2 %v5105_v28  ;;  %v4601_v39 = vcvt.s32.f32 %v4089_v55  ;;  %v4609_v51 = vcvt.s32.f32 %v4097_v22  ;;  %v4345_v40 = vunpack.c.0.s8 %v3905_v27  ;;  %v4353_v16 = vunpack.c.1.s8 %v3905_v27  ;;  %v3890_v55 = vld [vmem:[#allocation3 + $0x2d0] sm:$0xff] }
 0x63a   :  { %5307 = vmatpush.bf16.msrb.mxu3 %v5169_v36  ;;  %v4969_v52 = vpack.c.bf16 %v4481_v6, %v4473_v18  ;;  %v4729_v1 = vcvt.s32.f32 %v4217_v62  ;;  %v4737_v21 = vcvt.s32.f32 %v4225_v48  ;;  %v7070_v30 = vpack.c.bf16 %v3786_v5, %v3786_v5  ;;  %v3922_v48 = vld [vmem:[#allocation3 + $0x3d0] sm:$0xff] }
 0x63b   :  { %v5033_v29 = vpack.c.bf16 %v4609_v51, %v4601_v39  ;;  %v4857_v42 = vcvt.s32.f32 %v4345_v40  ;;  %v4865_v56 = vcvt.s32.f32 %v4353_v16  ;;  %v7075_v33 = vpack.c.bf16 %v3787_v58, %v3787_v58 }
 0x63c   :  { %5269 = vmatpush.bf16.msra.mxu0 %v4969_v52  ;;  %v5097_v23 = vpack.c.bf16 %v4737_v21, %v4729_v1  ;;  %5246 = vmatmul.bf16.vlgmr.msra.gmra.mxu2 %v7070_v30  ;;  %v3945_v49 = vunpack.c.2.s8 %v3801_v53  ;;  %v3953_v26 = vunpack.c.3.s8 %v3801_v53  ;;  %v4073_v2 = vunpack.c.2.s8 %v3833_v0 }
 0x63d   :  { %5282 = vmatpush.bf16.msra.mxu1 %v5033_v29  ;;  %v5161_v5 = vpack.c.bf16 %v4865_v56, %v4857_v42  ;;  %5259 = vmatmul.bf16.vlgmr.msra.gmra.mxu3 %v7075_v33  ;;  %v4081_v47 = vunpack.c.3.s8 %v3833_v0  ;;  %v4201_v4 = vunpack.c.2.s8 %v3865_v44  ;;  %v4209_v37 = vunpack.c.3.s8 %v3865_v44 }
 0x63e   :  { %5295 = vmatpush.bf16.msrb.mxu2 %v5097_v23  ;;  %v4457_v59 = vcvt.s32.f32 %v3945_v49  ;;  %v4465_v11 = vcvt.s32.f32 %v3953_v26  ;;  %v4585_v58 = vcvt.s32.f32 %v4073_v2  ;;  %v4329_v46 = vunpack.c.2.s8 %v3897_v54 }
 0x63f   :  { %5308 = vmatpush.bf16.msrb.mxu3 %v5161_v5  ;;  %v4593_v43 = vcvt.s32.f32 %v4081_v47  ;;  %v4713_v38 = vcvt.s32.f32 %v4201_v4  ;;  %v4721_v7 = vcvt.s32.f32 %v4209_v37  ;;  %v4337_v27 = vunpack.c.3.s8 %v3897_v54 }
 0x640   :  { %v4961_v45 = vpack.c.bf16 %v4465_v11, %v4457_v59  ;;  %v4841_v31 = vcvt.s32.f32 %v4329_v46  ;;  %v7082_v10 = vpack.c.bf16 %v3784_v25, %v3784_v25  ;;  %v7087_v60 = vpack.c.bf16 %v3785_v34, %v3785_v34  ;;  %v3858_v34 = vld [vmem:[#allocation3 + $0x1d0] sm:$0xff] }
 0x641   :  { %v5025_v14 = vpack.c.bf16 %v4593_v43, %v4585_v58  ;;  %v5089_v63 = vpack.c.bf16 %v4721_v7, %v4713_v38  ;;  %v4849_v32 = vcvt.s32.f32 %v4337_v27  ;;  %v3929_v61 = vunpack.c.0.s8 %v3801_v53  ;;  %v3818_v58 = vld [vmem:[#allocation3 + $0x90] sm:$0xff] }
 0x642   :  { %5270 = vmatpush.bf16.msra.mxu0 %v4961_v45  ;;  %5233 = vmatmul.bf16.vlgmr.msrb.gmra.mxu1 %v7087_v60  ;;  %v3937_v57 = vunpack.c.1.s8 %v3801_v53  ;;  %v4057_v24 = vunpack.c.0.s8 %v3833_v0  ;;  %v4065_v8 = vunpack.c.1.s8 %v3833_v0  ;;  %v4185_v19 = vunpack.c.0.s8 %v3865_v44 }
 0x643   :  { %5283 = vmatpush.bf16.msra.mxu1 %v5025_v14  ;;  %5296 = vmatpush.bf16.msrb.mxu2 %v5089_v63  ;;  %v5153_v25 = vpack.c.bf16 %v4849_v32, %v4841_v31  ;;  %v4441_v3 = vcvt.s32.f32 %v3929_v61  ;;  %v4193_v20 = vunpack.c.1.s8 %v3865_v44  ;;  %v4313_v41 = vunpack.c.0.s8 %v3897_v54  ;;  %v3850_v63 = vld [vmem:[#allocation3 + $0x190] sm:$0xff] }
 0x644   :  { %5220 = vmatmul.bf16.vlgmr.msrb.gmra.mxu0 %v7082_v10  ;;  %v4449_v35 = vcvt.s32.f32 %v3937_v57  ;;  %v4569_v50 = vcvt.s32.f32 %v4057_v24  ;;  %v4577_v12 = vcvt.s32.f32 %v4065_v8  ;;  %v4697_v15 = vcvt.s32.f32 %v4185_v19  ;;  %v3882_v8 = vld [vmem:[#allocation3 + $0x290] sm:$0xff] }
 0x645   :  { %5309 = vmatpush.bf16.msrb.mxu3 %v5153_v25  ;;  %v4705_v13 = vcvt.s32.f32 %v4193_v20  ;;  %v4321_v17 = vunpack.c.1.s8 %v3897_v54  ;;  %v4825_v28 = vcvt.s32.f32 %v4313_v41  ;;  %v4042_v18 = vunpack.c.2.s8 %v3826_v9  ;;  %v3914_v20 = vld [vmem:[#allocation3 + $0x390] sm:$0xff] }
 0x646   :  { %v4953_v22 = vpack.c.bf16 %v4449_v35, %v4441_v3  ;;  %v5017_v36 = vpack.c.bf16 %v4577_v12, %v4569_v50  ;;  %v4050_v6 = vunpack.c.3.s8 %v3826_v9  ;;  %v4170_v62 = vunpack.c.2.s8 %v3858_v34 }
 0x647   :  { %v5081_v39 = vpack.c.bf16 %v4705_v13, %v4697_v15  ;;  %v4833_v51 = vcvt.s32.f32 %v4321_v17  ;;  %v4554_v40 = vcvt.s32.f32 %v4042_v18  ;;  %v4178_v16 = vunpack.c.3.s8 %v3858_v34 }
 0x648   :  { %5271 = vmatpush.bf16.msra.mxu0 %v4953_v22  ;;  %5284 = vmatpush.bf16.msra.mxu1 %v5017_v36  ;;  %v4562_v53 = vcvt.s32.f32 %v4050_v6  ;;  %v4682_v0 = vcvt.s32.f32 %v4170_v62  ;;  %v4298_v52 = vunpack.c.2.s8 %v3890_v55  ;;  %v4306_v1 = vunpack.c.3.s8 %v3890_v55 }
 0x649   :  { %5297 = vmatpush.bf16.msrb.mxu2 %v5081_v39  ;;  %v5145_v21 = vpack.c.bf16 %v4833_v51, %v4825_v28  ;;  %v4690_v44 = vcvt.s32.f32 %v4178_v16  ;;  %v4426_v29 = vunpack.c.2.s8 %v3922_v48  ;;  %v4434_v42 = vunpack.c.3.s8 %v3922_v48 }
 0x64a   :  { %v5010_v56 = vpack.c.bf16 %v4562_v53, %v4554_v40  ;;  %v4810_v54 = vcvt.s32.f32 %v4298_v52  ;;  %v4818_v23 = vcvt.s32.f32 %v4306_v1  ;;  %v4026_v49 = vunpack.c.0.s8 %v3826_v9 }
 0x64b   :  { %5310 = vmatpush.bf16.msrb.mxu3 %v5145_v21  ;;  %v5074_v26 = vpack.c.bf16 %v4690_v44, %v4682_v0  ;;  %v4938_v2 = vcvt.s32.f32 %v4426_v29  ;;  %v4946_v5 = vcvt.s32.f32 %v4434_v42  ;;  %v4034_v47 = vunpack.c.1.s8 %v3826_v9  ;;  %v3810_v21 = vld [vmem:[#allocation3 + $0x50] sm:$0xff] }
 0x64c   :  { %5316 = vmatpush.bf16.msrb.mxu0 %v5010_v56  ;;  %v5138_v4 = vpack.c.bf16 %v4818_v23, %v4810_v54  ;;  %v4538_v37 = vcvt.s32.f32 %v4026_v49  ;;  %v4154_v59 = vunpack.c.0.s8 %v3858_v34  ;;  %v4162_v11 = vunpack.c.1.s8 %v3858_v34  ;;  %5298 = vmatmul.bf16.vlgmr.msrb.gmra.mxu2 %v7070_v30 }
 0x64d   :  { %5329 = vmatpush.bf16.msrb.mxu1 %v5074_v26  ;;  %v5202_v46 = vpack.c.bf16 %v4946_v5, %v4938_v2  ;;  %v4546_v43 = vcvt.s32.f32 %v4034_v47  ;;  %v4282_v38 = vunpack.c.0.s8 %v3890_v55  ;;  %v4290_v7 = vunpack.c.1.s8 %v3890_v55  ;;  %v3842_v2 = vld [vmem:[#allocation3 + $0x150] sm:$0xff] }
 0x64e   :  { %5342 = vmatpush.bf16.msra.mxu2 %v5138_v4  ;;  %v4666_v27 = vcvt.s32.f32 %v4154_v59  ;;  %v4674_v45 = vcvt.s32.f32 %v4162_v11  ;;  %v4410_v31 = vunpack.c.0.s8 %v3922_v48  ;;  %v4418_v14 = vunpack.c.1.s8 %v3922_v48  ;;  %5311 = vmatmul.bf16.vlgmr.msrb.gmra.mxu3 %v7075_v33  ;;  %v3874_v59 = vld [vmem:[#allocation3 + $0x250] sm:$0xff] }
 0x64f   :  { %5355 = vmatpush.bf16.msra.mxu3 %v5202_v46  ;;  %v5002_v32 = vpack.c.bf16 %v4546_v43, %v4538_v37  ;;  %v4794_v61 = vcvt.s32.f32 %v4282_v38  ;;  %v4802_v57 = vcvt.s32.f32 %v4290_v7  ;;  %v4010_v24 = vunpack.c.2.s8 %v3818_v58  ;;  %v3906_v38 = vld [vmem:[#allocation3 + $0x350] sm:$0xff] }
 0x650   :  { %v5066_v19 = vpack.c.bf16 %v4674_v45, %v4666_v27  ;;  %v4922_v9 = vcvt.s32.f32 %v4410_v31  ;;  %v4930_v25 = vcvt.s32.f32 %v4418_v14  ;;  %v4018_v3 = vunpack.c.3.s8 %v3818_v58 }
 0x651   :  { %5317 = vmatpush.bf16.msrb.mxu0 %v5002_v32  ;;  %v5130_v41 = vpack.c.bf16 %v4802_v57, %v4794_v61  ;;  %v4522_v34 = vcvt.s32.f32 %v4010_v24  ;;  %v4138_v35 = vunpack.c.2.s8 %v3850_v63  ;;  %v4146_v50 = vunpack.c.3.s8 %v3850_v63 }
 0x652   :  { %5330 = vmatpush.bf16.msrb.mxu1 %v5066_v19  ;;  %v5194_v12 = vpack.c.bf16 %v4930_v25, %v4922_v9  ;;  %v4530_v15 = vcvt.s32.f32 %v4018_v3  ;;  %v4266_v13 = vunpack.c.2.s8 %v3882_v8  ;;  %v4274_v17 = vunpack.c.3.s8 %v3882_v8 }
 0x653   :  { %5343 = vmatpush.bf16.msra.mxu2 %v5130_v41  ;;  %v4650_v28 = vcvt.s32.f32 %v4138_v35  ;;  %v4658_v18 = vcvt.s32.f32 %v4146_v50  ;;  %v4394_v55 = vunpack.c.2.s8 %v3914_v20  ;;  %v4402_v22 = vunpack.c.3.s8 %v3914_v20  ;;  %5285 = vmatmul.bf16.vlgmr.msra.gmra.mxu1 %v7087_v60 }
 0x654   :  { %5356 = vmatpush.bf16.msra.mxu3 %v5194_v12  ;;  %v4994_v36 = vpack.c.bf16 %v4530_v15, %v4522_v34  ;;  %v4778_v6 = vcvt.s32.f32 %v4266_v13  ;;  %v4786_v62 = vcvt.s32.f32 %v4274_v17  ;;  %v3994_v48 = vunpack.c.0.s8 %v3818_v58  ;;  %5272 = vmatmul.bf16.vlgmr.msra.gmra.mxu0 %v7082_v10 }
 0x655   :  { %v5058_v39 = vpack.c.bf16 %v4658_v18, %v4650_v28  ;;  %v4906_v51 = vcvt.s32.f32 %v4394_v55  ;;  %v4914_v40 = vcvt.s32.f32 %v4402_v22  ;;  %v4002_v16 = vunpack.c.1.s8 %v3818_v58  ;;  %v3802_v28 = vld [vmem:[#allocation3 + $0x10] sm:$0xff] }
 0x656   :  { %5318 = vmatpush.bf16.msrb.mxu0 %v4994_v36  ;;  %v5122_v53 = vpack.c.bf16 %v4786_v62, %v4778_v6  ;;  %v4506_v0 = vcvt.s32.f32 %v3994_v48  ;;  %v4122_v52 = vunpack.c.0.s8 %v3850_v63  ;;  %v4130_v1 = vunpack.c.1.s8 %v3850_v63 }
 0x657   :  { %5331 = vmatpush.bf16.msrb.mxu1 %v5058_v39  ;;  %v5186_v44 = vpack.c.bf16 %v4914_v40, %v4906_v51  ;;  %v4514_v29 = vcvt.s32.f32 %v4002_v16  ;;  %v4250_v42 = vunpack.c.0.s8 %v3882_v8  ;;  %v4258_v56 = vunpack.c.1.s8 %v3882_v8  ;;  %v3834_v51 = vld [vmem:[#allocation3 + $0x110] sm:$0xff] }
 0x658   :  { %5344 = vmatpush.bf16.msra.mxu2 %v5122_v53  ;;  %v4634_v54 = vcvt.s32.f32 %v4122_v52  ;;  %v4642_v23 = vcvt.s32.f32 %v4130_v1  ;;  %v4378_v49 = vunpack.c.0.s8 %v3914_v20  ;;  %v4386_v26 = vunpack.c.1.s8 %v3914_v20  ;;  %v3866_v52 = vld [vmem:[#allocation3 + $0x210] sm:$0xff] }
 0x659   :  { %5357 = vmatpush.bf16.msra.mxu3 %v5186_v44  ;;  %v4986_v5 = vpack.c.bf16 %v4514_v29, %v4506_v0  ;;  %v4762_v47 = vcvt.s32.f32 %v4250_v42  ;;  %v4770_v4 = vcvt.s32.f32 %v4258_v56  ;;  %v3978_v37 = vunpack.c.2.s8 %v3810_v21  ;;  %v3898_v42 = vld [vmem:[#allocation3 + $0x310] sm:$0xff] }
 0x65a   :  { %v5050_v11 = vpack.c.bf16 %v4642_v23, %v4634_v54  ;;  %v4890_v58 = vcvt.s32.f32 %v4378_v49  ;;  %v4898_v46 = vcvt.s32.f32 %v4386_v26  ;;  %v3986_v43 = vunpack.c.3.s8 %v3810_v21 }
 0x65b   :  { %5319 = vmatpush.bf16.msrb.mxu0 %v4986_v5  ;;  %v5114_v7 = vpack.c.bf16 %v4770_v4, %v4762_v47  ;;  %v4490_v27 = vcvt.s32.f32 %v3978_v37  ;;  %v4106_v45 = vunpack.c.2.s8 %v3842_v2  ;;  %v4114_v31 = vunpack.c.3.s8 %v3842_v2 }
 0x65c   :  { %5332 = vmatpush.bf16.msrb.mxu1 %v5050_v11  ;;  %v5178_v14 = vpack.c.bf16 %v4898_v46, %v4890_v58  ;;  %v4498_v63 = vcvt.s32.f32 %v3986_v43  ;;  %v4234_v32 = vunpack.c.2.s8 %v3874_v59  ;;  %v4242_v61 = vunpack.c.3.s8 %v3874_v59 }
 0x65d   :  { %5345 = vmatpush.bf16.msra.mxu2 %v5114_v7  ;;  %v4618_v57 = vcvt.s32.f32 %v4106_v45  ;;  %v4626_v24 = vcvt.s32.f32 %v4114_v31  ;;  %v4362_v8 = vunpack.c.2.s8 %v3906_v38  ;;  %v4370_v19 = vunpack.c.3.s8 %v3906_v38 }
 0x65e   :  { %5358 = vmatpush.bf16.msra.mxu3 %v5178_v14  ;;  %v4978_v9 = vpack.c.bf16 %v4498_v63, %v4490_v27  ;;  %v4746_v25 = vcvt.s32.f32 %v4234_v32  ;;  %v4754_v3 = vcvt.s32.f32 %v4242_v61  ;;  %v3962_v20 = vunpack.c.0.s8 %v3810_v21 }
 0x65f   :  { %v5042_v41 = vpack.c.bf16 %v4626_v24, %v4618_v57  ;;  %v4874_v34 = vcvt.s32.f32 %v4362_v8  ;;  %v4882_v35 = vcvt.s32.f32 %v4370_v19  ;;  %v3970_v50 = vunpack.c.1.s8 %v3810_v21  ;;  %v3827_v57 = vld [vmem:[#allocation3 + $0xd8] sm:$0xff] }
 0x660   :  { %5320 = vmatpush.bf16.msrb.mxu0 %v4978_v9  ;;  %v5106_v12 = vpack.c.bf16 %v4754_v3, %v4746_v25  ;;  %v4474_v15 = vcvt.s32.f32 %v3962_v20  ;;  %v4090_v13 = vunpack.c.0.s8 %v3842_v2  ;;  %v4098_v17 = vunpack.c.1.s8 %v3842_v2 }
 0x661   :  { %5333 = vmatpush.bf16.msrb.mxu1 %v5042_v41  ;;  %v5170_v18 = vpack.c.bf16 %v4882_v35, %v4874_v34  ;;  %v4482_v55 = vcvt.s32.f32 %v3970_v50  ;;  %v4218_v22 = vunpack.c.0.s8 %v3874_v59  ;;  %v4226_v36 = vunpack.c.1.s8 %v3874_v59  ;;  %v3859_v34 = vld [vmem:[#allocation3 + $0x1d8] sm:$0xff] }
 0x662   :  { %5346 = vmatpush.bf16.msra.mxu2 %v5106_v12  ;;  %v4602_v6 = vcvt.s32.f32 %v4090_v13  ;;  %v4610_v62 = vcvt.s32.f32 %v4098_v17  ;;  %v4346_v48 = vunpack.c.0.s8 %v3906_v38  ;;  %v4354_v39 = vunpack.c.1.s8 %v3906_v38  ;;  %v3891_v13 = vld [vmem:[#allocation3 + $0x2d8] sm:$0xff] }
 0x663   :  { %5359 = vmatpush.bf16.msra.mxu3 %v5170_v18  ;;  %v4970_v40 = vpack.c.bf16 %v4482_v55, %v4474_v15  ;;  %v4730_v16 = vcvt.s32.f32 %v4218_v22  ;;  %v4738_v53 = vcvt.s32.f32 %v4226_v36  ;;  %v3946_v0 = vunpack.c.2.s8 %v3802_v28  ;;  %v3923_v22 = vld [vmem:[#allocation3 + $0x3d8] sm:$0xff] }
 0x664   :  { %v5034_v1 = vpack.c.bf16 %v4610_v62, %v4602_v6  ;;  %v4858_v21 = vcvt.s32.f32 %v4346_v48  ;;  %v4866_v44 = vcvt.s32.f32 %v4354_v39  ;;  %v3954_v29 = vunpack.c.3.s8 %v3802_v28 }
 0x665   :  { %5321 = vmatpush.bf16.msrb.mxu0 %v4970_v40  ;;  %v5098_v56 = vpack.c.bf16 %v4738_v53, %v4730_v16  ;;  %v4458_v54 = vcvt.s32.f32 %v3946_v0  ;;  %v4074_v23 = vunpack.c.2.s8 %v3834_v51  ;;  %v4082_v49 = vunpack.c.3.s8 %v3834_v51 }
 0x666   :  { %5334 = vmatpush.bf16.msrb.mxu1 %v5034_v1  ;;  %v5162_v26 = vpack.c.bf16 %v4866_v44, %v4858_v21  ;;  %v4466_v2 = vcvt.s32.f32 %v3954_v29  ;;  %v4202_v5 = vunpack.c.2.s8 %v3866_v52  ;;  %v4210_v47 = vunpack.c.3.s8 %v3866_v52 }
 0x667   :  { %5347 = vmatpush.bf16.msra.mxu2 %v5098_v56  ;;  %v4586_v4 = vcvt.s32.f32 %v4074_v23  ;;  %v4594_v37 = vcvt.s32.f32 %v4082_v49  ;;  %v4330_v59 = vunpack.c.2.s8 %v3898_v42  ;;  %v4338_v11 = vunpack.c.3.s8 %v3898_v42 }
 0x668   :  { %5360 = vmatpush.bf16.msra.mxu3 %v5162_v26  ;;  %v4962_v58 = vpack.c.bf16 %v4466_v2, %v4458_v54  ;;  %v4714_v46 = vcvt.s32.f32 %v4202_v5  ;;  %v4722_v43 = vcvt.s32.f32 %v4210_v47  ;;  %v3930_v38 = vunpack.c.0.s8 %v3802_v28 }
 0x669   :  { %v5026_v7 = vpack.c.bf16 %v4594_v37, %v4586_v4  ;;  %v4842_v27 = vcvt.s32.f32 %v4330_v59  ;;  %v4850_v45 = vcvt.s32.f32 %v4338_v11  ;;  %v3938_v31 = vunpack.c.1.s8 %v3802_v28  ;;  %v3819_v4 = vld [vmem:[#allocation3 + $0x98] sm:$0xff] }
 0x66a   :  { %5322 = vmatpush.bf16.msrb.mxu0 %v4962_v58  ;;  %v5090_v14 = vpack.c.bf16 %v4722_v43, %v4714_v46  ;;  %v4442_v63 = vcvt.s32.f32 %v3930_v38  ;;  %v4058_v32 = vunpack.c.0.s8 %v3834_v51  ;;  %v4066_v61 = vunpack.c.1.s8 %v3834_v51 }
 0x66b   :  { %5335 = vmatpush.bf16.msrb.mxu1 %v5026_v7  ;;  %v5154_v24 = vpack.c.bf16 %v4850_v45, %v4842_v27  ;;  %v4450_v8 = vcvt.s32.f32 %v3938_v31  ;;  %v4186_v19 = vunpack.c.0.s8 %v3866_v52  ;;  %v4194_v9 = vunpack.c.1.s8 %v3866_v52  ;;  %v3851_v27 = vld [vmem:[#allocation3 + $0x198] sm:$0xff] }
 0x66c   :  { %5348 = vmatpush.bf16.msra.mxu2 %v5090_v14  ;;  %v4570_v25 = vcvt.s32.f32 %v4058_v32  ;;  %v4578_v3 = vcvt.s32.f32 %v4066_v61  ;;  %v4314_v20 = vunpack.c.0.s8 %v3898_v42  ;;  %v4322_v41 = vunpack.c.1.s8 %v3898_v42  ;;  %v3883_v32 = vld [vmem:[#allocation3 + $0x298] sm:$0xff] }
 0x66d   :  { %5361 = vmatpush.bf16.msra.mxu3 %v5154_v24  ;;  %v4954_v35 = vpack.c.bf16 %v4450_v8, %v4442_v63  ;;  %v4698_v50 = vcvt.s32.f32 %v4186_v19  ;;  %v4706_v12 = vcvt.s32.f32 %v4194_v9  ;;  %v4043_v15 = vunpack.c.2.s8 %v3827_v57  ;;  %v3915_v19 = vld [vmem:[#allocation3 + $0x398] sm:$0xff] }
 0x66e   :  { %v5018_v17 = vpack.c.bf16 %v4578_v3, %v4570_v25  ;;  %v4826_v28 = vcvt.s32.f32 %v4314_v20  ;;  %v4834_v18 = vcvt.s32.f32 %v4322_v41  ;;  %v4051_v55 = vunpack.c.3.s8 %v3827_v57 }
 0x66f   :  { %5323 = vmatpush.bf16.msrb.mxu0 %v4954_v35  ;;  %v5082_v36 = vpack.c.bf16 %v4706_v12, %v4698_v50  ;;  %v4555_v6 = vcvt.s32.f32 %v4043_v15  ;;  %v4171_v62 = vunpack.c.2.s8 %v3859_v34  ;;  %v4179_v48 = vunpack.c.3.s8 %v3859_v34 }
 0x670   :  { %5336 = vmatpush.bf16.msrb.mxu1 %v5018_v17  ;;  %v5146_v39 = vpack.c.bf16 %v4834_v18, %v4826_v28  ;;  %v4563_v51 = vcvt.s32.f32 %v4051_v55  ;;  %v4299_v40 = vunpack.c.2.s8 %v3891_v13  ;;  %v4307_v16 = vunpack.c.3.s8 %v3891_v13 }
 0x671   :  { %5349 = vmatpush.bf16.msra.mxu2 %v5082_v36  ;;  %v4683_v53 = vcvt.s32.f32 %v4171_v62  ;;  %v4691_v0 = vcvt.s32.f32 %v4179_v48  ;;  %v4427_v52 = vunpack.c.2.s8 %v3923_v22  ;;  %v4435_v1 = vunpack.c.3.s8 %v3923_v22 }
 0x672   :  { %5362 = vmatpush.bf16.msra.mxu3 %v5146_v39  ;;  %v5011_v21 = vpack.c.bf16 %v4563_v51, %v4555_v6  ;;  %v4811_v44 = vcvt.s32.f32 %v4299_v40  ;;  %v4819_v29 = vcvt.s32.f32 %v4307_v16  ;;  %v4027_v42 = vunpack.c.0.s8 %v3827_v57  ;;  %5324 = vmatmul.bf16.vlgmr.msrb.gmra.mxu0 %v7082_v10 }
 0x673   :  { %v5075_v56 = vpack.c.bf16 %v4691_v0, %v4683_v53  ;;  %v4939_v54 = vcvt.s32.f32 %v4427_v52  ;;  %v4947_v23 = vcvt.s32.f32 %v4435_v1  ;;  %v4035_v49 = vunpack.c.1.s8 %v3827_v57  ;;  %5337 = vmatmul.bf16.vlgmr.msrb.gmra.mxu1 %v7087_v60  ;;  %v3811_v53 = vld [vmem:[#allocation3 + $0x58] sm:$0xff] }
 0x674   :  { %5368 = vmatpush.bf16.msra.mxu0 %v5011_v21  ;;  %v5139_v26 = vpack.c.bf16 %v4819_v29, %v4811_v44  ;;  %v4539_v2 = vcvt.s32.f32 %v4027_v42  ;;  %v4155_v5 = vunpack.c.0.s8 %v3859_v34  ;;  %v4163_v47 = vunpack.c.1.s8 %v3859_v34  ;;  %5350 = vmatmul.bf16.vlgmr.msra.gmra.mxu2 %v7070_v30 }
 0x675   :  { %5381 = vmatpush.bf16.msra.mxu1 %v5075_v56  ;;  %v5203_v37 = vpack.c.bf16 %v4947_v23, %v4939_v54  ;;  %v4547_v59 = vcvt.s32.f32 %v4035_v49  ;;  %v4283_v11 = vunpack.c.0.s8 %v3891_v13  ;;  %v4291_v58 = vunpack.c.1.s8 %v3891_v13  ;;  %5363 = vmatmul.bf16.vlgmr.msra.gmra.mxu3 %v7075_v33  ;;  %v3843_v54 = vld [vmem:[#allocation3 + $0x158] sm:$0xff] }
 0x676   :  { %5394 = vmatpush.bf16.msrb.mxu2 %v5139_v26  ;;  %v4667_v46 = vcvt.s32.f32 %v4155_v5  ;;  %v4675_v43 = vcvt.s32.f32 %v4163_v47  ;;  %v4411_v38 = vunpack.c.0.s8 %v3923_v22  ;;  %v4419_v7 = vunpack.c.1.s8 %v3923_v22  ;;  %v3875_v5 = vld [vmem:[#allocation3 + $0x258] sm:$0xff] }
 0x677   :  { %5407 = vmatpush.bf16.msrb.mxu3 %v5203_v37  ;;  %v5003_v45 = vpack.c.bf16 %v4547_v59, %v4539_v2  ;;  %v4795_v31 = vcvt.s32.f32 %v4283_v11  ;;  %v4803_v14 = vcvt.s32.f32 %v4291_v58  ;;  %v4011_v63 = vunpack.c.2.s8 %v3819_v4  ;;  %v3907_v11 = vld [vmem:[#allocation3 + $0x358] sm:$0xff] }
 0x678   :  { %v5067_v61 = vpack.c.bf16 %v4675_v43, %v4667_v46  ;;  %v4923_v57 = vcvt.s32.f32 %v4411_v38  ;;  %v4931_v24 = vcvt.s32.f32 %v4419_v7  ;;  %v4019_v8 = vunpack.c.3.s8 %v3819_v4 }
 0x679   :  { %5369 = vmatpush.bf16.msra.mxu0 %v5003_v45  ;;  %v5131_v9 = vpack.c.bf16 %v4803_v14, %v4795_v31  ;;  %v4523_v25 = vcvt.s32.f32 %v4011_v63  ;;  %v4139_v3 = vunpack.c.2.s8 %v3851_v27  ;;  %v4147_v20 = vunpack.c.3.s8 %v3851_v27 }
 0x67a   :  { %5382 = vmatpush.bf16.msra.mxu1 %v5067_v61  ;;  %v5195_v41 = vpack.c.bf16 %v4931_v24, %v4923_v57  ;;  %v4531_v34 = vcvt.s32.f32 %v4019_v8  ;;  %v4267_v35 = vunpack.c.2.s8 %v3883_v32  ;;  %v4275_v50 = vunpack.c.3.s8 %v3883_v32 }
 0x67b   :  { %5395 = vmatpush.bf16.msrb.mxu2 %v5131_v9  ;;  %v4651_v12 = vcvt.s32.f32 %v4139_v3  ;;  %v4659_v15 = vcvt.s32.f32 %v4147_v20  ;;  %v4395_v13 = vunpack.c.2.s8 %v3915_v19  ;;  %v4403_v17 = vunpack.c.3.s8 %v3915_v19 }
 0x67c   :  { %5408 = vmatpush.bf16.msrb.mxu3 %v5195_v41  ;;  %v4995_v28 = vpack.c.bf16 %v4531_v34, %v4523_v25  ;;  %v4779_v18 = vcvt.s32.f32 %v4267_v35  ;;  %v4787_v55 = vcvt.s32.f32 %v4275_v50  ;;  %v3995_v22 = vunpack.c.0.s8 %v3819_v4 }
 0x67d   :  { %v5059_v36 = vpack.c.bf16 %v4659_v15, %v4651_v12  ;;  %v4907_v6 = vcvt.s32.f32 %v4395_v13  ;;  %v4915_v62 = vcvt.s32.f32 %v4403_v17  ;;  %v4003_v48 = vunpack.c.1.s8 %v3819_v4  ;;  %v3803_v12 = vld [vmem:[#allocation3 + $0x18] sm:$0xff] }
 0x67e   :  { %5370 = vmatpush.bf16.msra.mxu0 %v4995_v28  ;;  %v5123_v39 = vpack.c.bf16 %v4787_v55, %v4779_v18  ;;  %v4507_v51 = vcvt.s32.f32 %v3995_v22  ;;  %v4123_v40 = vunpack.c.0.s8 %v3851_v27  ;;  %v4131_v16 = vunpack.c.1.s8 %v3851_v27 }
 0x67f   :  { %5383 = vmatpush.bf16.msra.mxu1 %v5059_v36  ;;  %v5187_v0 = vpack.c.bf16 %v4915_v62, %v4907_v6  ;;  %v4515_v52 = vcvt.s32.f32 %v4003_v48  ;;  %v4251_v1 = vunpack.c.0.s8 %v3883_v32  ;;  %v4259_v21 = vunpack.c.1.s8 %v3883_v32  ;;  %v3835_v6 = vld [vmem:[#allocation3 + $0x118] sm:$0xff] }
 0x680   :  { %5396 = vmatpush.bf16.msrb.mxu2 %v5123_v39  ;;  %v4635_v44 = vcvt.s32.f32 %v4123_v40  ;;  %v4643_v29 = vcvt.s32.f32 %v4131_v16  ;;  %v4379_v42 = vunpack.c.0.s8 %v3915_v19  ;;  %v4387_v56 = vunpack.c.1.s8 %v3915_v19  ;;  %v3867_v40 = vld [vmem:[#allocation3 + $0x218] sm:$0xff] }
 0x681   :  { %5409 = vmatpush.bf16.msrb.mxu3 %v5187_v0  ;;  %v4987_v23 = vpack.c.bf16 %v4515_v52, %v4507_v51  ;;  %v4763_v49 = vcvt.s32.f32 %v4251_v1  ;;  %v4771_v26 = vcvt.s32.f32 %v4259_v21  ;;  %v3979_v2 = vunpack.c.2.s8 %v3811_v53  ;;  %v3899_v1 = vld [vmem:[#allocation3 + $0x318] sm:$0xff] }
 0x682   :  { %v5051_v47 = vpack.c.bf16 %v4643_v29, %v4635_v44  ;;  %v4891_v4 = vcvt.s32.f32 %v4379_v42  ;;  %v4899_v37 = vcvt.s32.f32 %v4387_v56  ;;  %v3987_v59 = vunpack.c.3.s8 %v3811_v53 }
 0x683   :  { %5371 = vmatpush.bf16.msra.mxu0 %v4987_v23  ;;  %v5115_v58 = vpack.c.bf16 %v4771_v26, %v4763_v49  ;;  %v4491_v46 = vcvt.s32.f32 %v3979_v2  ;;  %v4107_v43 = vunpack.c.2.s8 %v3843_v54  ;;  %v4115_v38 = vunpack.c.3.s8 %v3843_v54 }
 0x684   :  { %5384 = vmatpush.bf16.msra.mxu1 %v5051_v47  ;;  %v5179_v7 = vpack.c.bf16 %v4899_v37, %v4891_v4  ;;  %v4499_v27 = vcvt.s32.f32 %v3987_v59  ;;  %v4235_v45 = vunpack.c.2.s8 %v3875_v5  ;;  %v4243_v31 = vunpack.c.3.s8 %v3875_v5 }
 0x685   :  { %5397 = vmatpush.bf16.msrb.mxu2 %v5115_v58  ;;  %v4619_v14 = vcvt.s32.f32 %v4107_v43  ;;  %v4627_v63 = vcvt.s32.f32 %v4115_v38  ;;  %v4363_v32 = vunpack.c.2.s8 %v3907_v11  ;;  %v4371_v61 = vunpack.c.3.s8 %v3907_v11 }
 0x686   :  { %5410 = vmatpush.bf16.msrb.mxu3 %v5179_v7  ;;  %v4979_v57 = vpack.c.bf16 %v4499_v27, %v4491_v46  ;;  %v4747_v24 = vcvt.s32.f32 %v4235_v45  ;;  %v4755_v8 = vcvt.s32.f32 %v4243_v31  ;;  %v3963_v19 = vunpack.c.0.s8 %v3811_v53 }
 0x687   :  { %v5043_v9 = vpack.c.bf16 %v4627_v63, %v4619_v14  ;;  %v4875_v25 = vcvt.s32.f32 %v4363_v32  ;;  %v4883_v3 = vcvt.s32.f32 %v4371_v61  ;;  %v3971_v20 = vunpack.c.1.s8 %v3811_v53  ;;  %v3828_v14 = vld [vmem:[#allocation3 + $0xe0] sm:$0xff] }
 0x688   :  { %5372 = vmatpush.bf16.msra.mxu0 %v4979_v57  ;;  %v5107_v41 = vpack.c.bf16 %v4755_v8, %v4747_v24  ;;  %v4475_v34 = vcvt.s32.f32 %v3963_v19  ;;  %v4091_v35 = vunpack.c.0.s8 %v3843_v54  ;;  %v4099_v50 = vunpack.c.1.s8 %v3843_v54 }
 0x689   :  { %5385 = vmatpush.bf16.msra.mxu1 %v5043_v9  ;;  %v5171_v15 = vpack.c.bf16 %v4883_v3, %v4875_v25  ;;  %v4483_v13 = vcvt.s32.f32 %v3971_v20  ;;  %v4219_v17 = vunpack.c.0.s8 %v3875_v5  ;;  %v4227_v28 = vunpack.c.1.s8 %v3875_v5  ;;  %v3860_v25 = vld [vmem:[#allocation3 + $0x1e0] sm:$0xff] }
 0x68a   :  { %5398 = vmatpush.bf16.msrb.mxu2 %v5107_v41  ;;  %v4603_v18 = vcvt.s32.f32 %v4091_v35  ;;  %v4611_v55 = vcvt.s32.f32 %v4099_v50  ;;  %v4347_v22 = vunpack.c.0.s8 %v3907_v11  ;;  %v4355_v36 = vunpack.c.1.s8 %v3907_v11  ;;  %v3892_v35 = vld [vmem:[#allocation3 + $0x2e0] sm:$0xff] }
 0x68b   :  { %5411 = vmatpush.bf16.msrb.mxu3 %v5171_v15  ;;  %v4971_v62 = vpack.c.bf16 %v4483_v13, %v4475_v34  ;;  %v4731_v48 = vcvt.s32.f32 %v4219_v17  ;;  %v4739_v39 = vcvt.s32.f32 %v4227_v28  ;;  %v3947_v51 = vunpack.c.2.s8 %v3803_v12  ;;  %v3924_v17 = vld [vmem:[#allocation3 + $0x3e0] sm:$0xff] }
 0x68c   :  { %v5035_v16 = vpack.c.bf16 %v4611_v55, %v4603_v18  ;;  %v4859_v53 = vcvt.s32.f32 %v4347_v22  ;;  %v4867_v0 = vcvt.s32.f32 %v4355_v36  ;;  %v3955_v52 = vunpack.c.3.s8 %v3803_v12 }
 0x68d   :  { %5373 = vmatpush.bf16.msra.mxu0 %v4971_v62  ;;  %v5099_v21 = vpack.c.bf16 %v4739_v39, %v4731_v48  ;;  %v4459_v44 = vcvt.s32.f32 %v3947_v51  ;;  %v4075_v29 = vunpack.c.2.s8 %v3835_v6  ;;  %v4083_v42 = vunpack.c.3.s8 %v3835_v6 }
 0x68e   :  { %5386 = vmatpush.bf16.msra.mxu1 %v5035_v16  ;;  %v5163_v56 = vpack.c.bf16 %v4867_v0, %v4859_v53  ;;  %v4467_v54 = vcvt.s32.f32 %v3955_v52  ;;  %v4203_v23 = vunpack.c.2.s8 %v3867_v40  ;;  %v4211_v49 = vunpack.c.3.s8 %v3867_v40 }
 0x68f   :  { %5399 = vmatpush.bf16.msrb.mxu2 %v5099_v21  ;;  %v4587_v26 = vcvt.s32.f32 %v4075_v29  ;;  %v4595_v2 = vcvt.s32.f32 %v4083_v42  ;;  %v4331_v5 = vunpack.c.2.s8 %v3899_v1  ;;  %v4339_v47 = vunpack.c.3.s8 %v3899_v1 }
 0x690   :  { %5412 = vmatpush.bf16.msrb.mxu3 %v5163_v56  ;;  %v4963_v4 = vpack.c.bf16 %v4467_v54, %v4459_v44  ;;  %v4715_v37 = vcvt.s32.f32 %v4203_v23  ;;  %v4723_v59 = vcvt.s32.f32 %v4211_v49  ;;  %v3931_v11 = vunpack.c.0.s8 %v3803_v12 }
 0x691   :  { %v5027_v58 = vpack.c.bf16 %v4595_v2, %v4587_v26  ;;  %v4843_v46 = vcvt.s32.f32 %v4331_v5  ;;  %v4851_v43 = vcvt.s32.f32 %v4339_v47  ;;  %v3939_v38 = vunpack.c.1.s8 %v3803_v12  ;;  %v3820_v26 = vld [vmem:[#allocation3 + $0xa0] sm:$0xff] }
 0x692   :  { %5374 = vmatpush.bf16.msra.mxu0 %v4963_v4  ;;  %v5091_v7 = vpack.c.bf16 %v4723_v59, %v4715_v37  ;;  %v4443_v27 = vcvt.s32.f32 %v3931_v11  ;;  %v4059_v45 = vunpack.c.0.s8 %v3835_v6  ;;  %v4067_v31 = vunpack.c.1.s8 %v3835_v6 }
 0x693   :  { %5387 = vmatpush.bf16.msra.mxu1 %v5027_v58  ;;  %v5155_v63 = vpack.c.bf16 %v4851_v43, %v4843_v46  ;;  %v4451_v32 = vcvt.s32.f32 %v3939_v38  ;;  %v4187_v61 = vunpack.c.0.s8 %v3867_v40  ;;  %v4195_v57 = vunpack.c.1.s8 %v3867_v40  ;;  %v3852_v46 = vld [vmem:[#allocation3 + $0x1a0] sm:$0xff] }
 0x694   :  { %5400 = vmatpush.bf16.msrb.mxu2 %v5091_v7  ;;  %v4571_v24 = vcvt.s32.f32 %v4059_v45  ;;  %v4579_v8 = vcvt.s32.f32 %v4067_v31  ;;  %v4315_v19 = vunpack.c.0.s8 %v3899_v1  ;;  %v4323_v9 = vunpack.c.1.s8 %v3899_v1  ;;  %v3884_v45 = vld [vmem:[#allocation3 + $0x2a0] sm:$0xff] }
 0x695   :  { %5413 = vmatpush.bf16.msrb.mxu3 %v5155_v63  ;;  %v4955_v3 = vpack.c.bf16 %v4451_v32, %v4443_v27  ;;  %v4699_v20 = vcvt.s32.f32 %v4187_v61  ;;  %v4707_v41 = vcvt.s32.f32 %v4195_v57  ;;  %v4044_v34 = vunpack.c.2.s8 %v3828_v14  ;;  %v3916_v61 = vld [vmem:[#allocation3 + $0x3a0] sm:$0xff] }
 0x696   :  { %v5019_v50 = vpack.c.bf16 %v4579_v8, %v4571_v24  ;;  %v4827_v12 = vcvt.s32.f32 %v4315_v19  ;;  %v4835_v15 = vcvt.s32.f32 %v4323_v9  ;;  %v4052_v13 = vunpack.c.3.s8 %v3828_v14 }
 0x697   :  { %5375 = vmatpush.bf16.msra.mxu0 %v4955_v3  ;;  %v5083_v28 = vpack.c.bf16 %v4707_v41, %v4699_v20  ;;  %v4556_v18 = vcvt.s32.f32 %v4044_v34  ;;  %v4172_v55 = vunpack.c.2.s8 %v3860_v25  ;;  %v4180_v22 = vunpack.c.3.s8 %v3860_v25 }
 0x698   :  { %5388 = vmatpush.bf16.msra.mxu1 %v5019_v50  ;;  %v5147_v36 = vpack.c.bf16 %v4835_v15, %v4827_v12  ;;  %v4564_v6 = vcvt.s32.f32 %v4052_v13  ;;  %v4300_v62 = vunpack.c.2.s8 %v3892_v35  ;;  %v4308_v48 = vunpack.c.3.s8 %v3892_v35 }
 0x699   :  { %5401 = vmatpush.bf16.msrb.mxu2 %v5083_v28  ;;  %v4684_v39 = vcvt.s32.f32 %v4172_v55  ;;  %v4692_v51 = vcvt.s32.f32 %v4180_v22  ;;  %v4428_v40 = vunpack.c.2.s8 %v3924_v17  ;;  %v4436_v16 = vunpack.c.3.s8 %v3924_v17 }
 0x69a   :  { %5414 = vmatpush.bf16.msrb.mxu3 %v5147_v36  ;;  %v5012_v53 = vpack.c.bf16 %v4564_v6, %v4556_v18  ;;  %v4812_v0 = vcvt.s32.f32 %v4300_v62  ;;  %v4820_v52 = vcvt.s32.f32 %v4308_v48  ;;  %v4028_v1 = vunpack.c.0.s8 %v3828_v14  ;;  %5376 = vmatmul.bf16.vlgmr.msra.gmra.mxu0 %v7082_v10 }
 0x69b   :  { %v5076_v21 = vpack.c.bf16 %v4692_v51, %v4684_v39  ;;  %v4940_v44 = vcvt.s32.f32 %v4428_v40  ;;  %v4948_v29 = vcvt.s32.f32 %v4436_v16  ;;  %v4036_v42 = vunpack.c.1.s8 %v3828_v14  ;;  %5389 = vmatmul.bf16.vlgmr.msra.gmra.mxu1 %v7087_v60  ;;  %v3812_v39 = vld [vmem:[#allocation3 + $0x60] sm:$0xff] }
 0x69c   :  { %5420 = vmatpush.bf16.msrb.mxu0 %v5012_v53  ;;  %v5140_v56 = vpack.c.bf16 %v4820_v52, %v4812_v0  ;;  %v4540_v54 = vcvt.s32.f32 %v4028_v1  ;;  %v4156_v23 = vunpack.c.0.s8 %v3860_v25  ;;  %v4164_v49 = vunpack.c.1.s8 %v3860_v25  ;;  %5402 = vmatmul.bf16.vlgmr.msrb.gmra.mxu2 %v7070_v30 }
 0x69d   :  { %5433 = vmatpush.bf16.msrb.mxu1 %v5076_v21  ;;  %v5204_v2 = vpack.c.bf16 %v4948_v29, %v4940_v44  ;;  %v4548_v5 = vcvt.s32.f32 %v4036_v42  ;;  %v4284_v47 = vunpack.c.0.s8 %v3892_v35  ;;  %v4292_v4 = vunpack.c.1.s8 %v3892_v35  ;;  %5415 = vmatmul.bf16.vlgmr.msrb.gmra.mxu3 %v7075_v33  ;;  %v3844_v44 = vld [vmem:[#allocation3 + $0x160] sm:$0xff] }
 0x69e   :  { %5446 = vmatpush.bf16.msra.mxu2 %v5140_v56  ;;  %v4668_v37 = vcvt.s32.f32 %v4156_v23  ;;  %v4676_v59 = vcvt.s32.f32 %v4164_v49  ;;  %v4412_v11 = vunpack.c.0.s8 %v3924_v17  ;;  %v4420_v58 = vunpack.c.1.s8 %v3924_v17  ;;  %v3876_v23 = vld [vmem:[#allocation3 + $0x260] sm:$0xff] }
 0x69f   :  { %5459 = vmatpush.bf16.msra.mxu3 %v5204_v2  ;;  %v5004_v43 = vpack.c.bf16 %v4548_v5, %v4540_v54  ;;  %v4796_v38 = vcvt.s32.f32 %v4284_v47  ;;  %v4804_v7 = vcvt.s32.f32 %v4292_v4  ;;  %v4012_v27 = vunpack.c.2.s8 %v3820_v26  ;;  %v3908_v47 = vld [vmem:[#allocation3 + $0x360] sm:$0xff] }
 0x6a0   :  { %v5068_v31 = vpack.c.bf16 %v4676_v59, %v4668_v37  ;;  %v4924_v14 = vcvt.s32.f32 %v4412_v11  ;;  %v4932_v63 = vcvt.s32.f32 %v4420_v58  ;;  %v4020_v32 = vunpack.c.3.s8 %v3820_v26 }
 0x6a1   :  { %5421 = vmatpush.bf16.msrb.mxu0 %v5004_v43  ;;  %v5132_v57 = vpack.c.bf16 %v4804_v7, %v4796_v38  ;;  %v4524_v24 = vcvt.s32.f32 %v4012_v27  ;;  %v4140_v8 = vunpack.c.2.s8 %v3852_v46  ;;  %v4148_v19 = vunpack.c.3.s8 %v3852_v46 }
 0x6a2   :  { %5434 = vmatpush.bf16.msrb.mxu1 %v5068_v31  ;;  %v5196_v9 = vpack.c.bf16 %v4932_v63, %v4924_v14  ;;  %v4532_v25 = vcvt.s32.f32 %v4020_v32  ;;  %v4268_v3 = vunpack.c.2.s8 %v3884_v45  ;;  %v4276_v20 = vunpack.c.3.s8 %v3884_v45 }
 0x6a3   :  { %5447 = vmatpush.bf16.msra.mxu2 %v5132_v57  ;;  %v4652_v41 = vcvt.s32.f32 %v4140_v8  ;;  %v4660_v34 = vcvt.s32.f32 %v4148_v19  ;;  %v4396_v35 = vunpack.c.2.s8 %v3916_v61  ;;  %v4404_v50 = vunpack.c.3.s8 %v3916_v61 }
 0x6a4   :  { %5460 = vmatpush.bf16.msra.mxu3 %v5196_v9  ;;  %v4996_v12 = vpack.c.bf16 %v4532_v25, %v4524_v24  ;;  %v4780_v15 = vcvt.s32.f32 %v4268_v3  ;;  %v4788_v13 = vcvt.s32.f32 %v4276_v20  ;;  %v3996_v17 = vunpack.c.0.s8 %v3820_v26 }
 0x6a5   :  { %v5060_v28 = vpack.c.bf16 %v4660_v34, %v4652_v41  ;;  %v4908_v18 = vcvt.s32.f32 %v4396_v35  ;;  %v4916_v55 = vcvt.s32.f32 %v4404_v50  ;;  %v4004_v22 = vunpack.c.1.s8 %v3820_v26  ;;  %v3804_v41 = vld [vmem:[#allocation3 + $0x20] sm:$0xff] }
 0x6a6   :  { %5422 = vmatpush.bf16.msrb.mxu0 %v4996_v12  ;;  %v5124_v36 = vpack.c.bf16 %v4788_v13, %v4780_v15  ;;  %v4508_v6 = vcvt.s32.f32 %v3996_v17  ;;  %v4124_v62 = vunpack.c.0.s8 %v3852_v46  ;;  %v4132_v48 = vunpack.c.1.s8 %v3852_v46 }
 0x6a7   :  { %5435 = vmatpush.bf16.msrb.mxu1 %v5060_v28  ;;  %v5188_v51 = vpack.c.bf16 %v4916_v55, %v4908_v18  ;;  %v4516_v40 = vcvt.s32.f32 %v4004_v22  ;;  %v4252_v16 = vunpack.c.0.s8 %v3884_v45  ;;  %v4260_v53 = vunpack.c.1.s8 %v3884_v45  ;;  %v3836_v18 = vld [vmem:[#allocation3 + $0x120] sm:$0xff] }
 0x6a8   :  { %5448 = vmatpush.bf16.msra.mxu2 %v5124_v36  ;;  %v4636_v0 = vcvt.s32.f32 %v4124_v62  ;;  %v4644_v52 = vcvt.s32.f32 %v4132_v48  ;;  %v4380_v1 = vunpack.c.0.s8 %v3916_v61  ;;  %v4388_v21 = vunpack.c.1.s8 %v3916_v61  ;;  %v3868_v62 = vld [vmem:[#allocation3 + $0x220] sm:$0xff] }
 0x6a9   :  { %5461 = vmatpush.bf16.msra.mxu3 %v5188_v51  ;;  %v4988_v29 = vpack.c.bf16 %v4516_v40, %v4508_v6  ;;  %v4764_v42 = vcvt.s32.f32 %v4252_v16  ;;  %v4772_v56 = vcvt.s32.f32 %v4260_v53  ;;  %v3980_v54 = vunpack.c.2.s8 %v3812_v39  ;;  %v3900_v16 = vld [vmem:[#allocation3 + $0x320] sm:$0xff] }
 0x6aa   :  { %v5052_v49 = vpack.c.bf16 %v4644_v52, %v4636_v0  ;;  %v4892_v26 = vcvt.s32.f32 %v4380_v1  ;;  %v4900_v2 = vcvt.s32.f32 %v4388_v21  ;;  %v3988_v5 = vunpack.c.3.s8 %v3812_v39 }
 0x6ab   :  { %5423 = vmatpush.bf16.msrb.mxu0 %v4988_v29  ;;  %v5116_v4 = vpack.c.bf16 %v4772_v56, %v4764_v42  ;;  %v4492_v37 = vcvt.s32.f32 %v3980_v54  ;;  %v4108_v59 = vunpack.c.2.s8 %v3844_v44  ;;  %v4116_v11 = vunpack.c.3.s8 %v3844_v44 }
 0x6ac   :  { %5436 = vmatpush.bf16.msrb.mxu1 %v5052_v49  ;;  %v5180_v58 = vpack.c.bf16 %v4900_v2, %v4892_v26  ;;  %v4500_v46 = vcvt.s32.f32 %v3988_v5  ;;  %v4236_v43 = vunpack.c.2.s8 %v3876_v23  ;;  %v4244_v38 = vunpack.c.3.s8 %v3876_v23 }
 0x6ad   :  { %5449 = vmatpush.bf16.msra.mxu2 %v5116_v4  ;;  %v4620_v7 = vcvt.s32.f32 %v4108_v59  ;;  %v4628_v27 = vcvt.s32.f32 %v4116_v11  ;;  %v4364_v45 = vunpack.c.2.s8 %v3908_v47  ;;  %v4372_v31 = vunpack.c.3.s8 %v3908_v47 }
 0x6ae   :  { %5462 = vmatpush.bf16.msra.mxu3 %v5180_v58  ;;  %v4980_v14 = vpack.c.bf16 %v4500_v46, %v4492_v37  ;;  %v4748_v63 = vcvt.s32.f32 %v4236_v43  ;;  %v4756_v32 = vcvt.s32.f32 %v4244_v38  ;;  %v3964_v61 = vunpack.c.0.s8 %v3812_v39 }
 0x6af   :  { %v5044_v57 = vpack.c.bf16 %v4628_v27, %v4620_v7  ;;  %v4876_v24 = vcvt.s32.f32 %v4364_v45  ;;  %v4884_v8 = vcvt.s32.f32 %v4372_v31  ;;  %v3972_v19 = vunpack.c.1.s8 %v3812_v39  ;;  %v3829_v7 = vld [vmem:[#allocation3 + $0xe8] sm:$0xff] }
 0x6b0   :  { %5424 = vmatpush.bf16.msrb.mxu0 %v4980_v14  ;;  %v5108_v9 = vpack.c.bf16 %v4756_v32, %v4748_v63  ;;  %v4476_v25 = vcvt.s32.f32 %v3964_v61  ;;  %v4092_v3 = vunpack.c.0.s8 %v3844_v44  ;;  %v4100_v20 = vunpack.c.1.s8 %v3844_v44 }
 0x6b1   :  { %5437 = vmatpush.bf16.msrb.mxu1 %v5044_v57  ;;  %v5172_v34 = vpack.c.bf16 %v4884_v8, %v4876_v24  ;;  %v4484_v35 = vcvt.s32.f32 %v3972_v19  ;;  %v4220_v50 = vunpack.c.0.s8 %v3876_v23  ;;  %v4228_v12 = vunpack.c.1.s8 %v3876_v23  ;;  %v3861_v24 = vld [vmem:[#allocation3 + $0x1e8] sm:$0xff] }
 0x6b2   :  { %5450 = vmatpush.bf16.msra.mxu2 %v5108_v9  ;;  %v4604_v15 = vcvt.s32.f32 %v4092_v3  ;;  %v4612_v13 = vcvt.s32.f32 %v4100_v20  ;;  %v4348_v17 = vunpack.c.0.s8 %v3908_v47  ;;  %v4356_v28 = vunpack.c.1.s8 %v3908_v47  ;;  %v3893_v3 = vld [vmem:[#allocation3 + $0x2e8] sm:$0xff] }
 0x6b3   :  { %5463 = vmatpush.bf16.msra.mxu3 %v5172_v34  ;;  %v4972_v55 = vpack.c.bf16 %v4484_v35, %v4476_v25  ;;  %v4732_v22 = vcvt.s32.f32 %v4220_v50  ;;  %v4740_v36 = vcvt.s32.f32 %v4228_v12  ;;  %v3948_v6 = vunpack.c.2.s8 %v3804_v41  ;;  %v3925_v50 = vld [vmem:[#allocation3 + $0x3e8] sm:$0xff] }
 0x6b4   :  { %v5036_v48 = vpack.c.bf16 %v4612_v13, %v4604_v15  ;;  %v4860_v39 = vcvt.s32.f32 %v4348_v17  ;;  %v4868_v51 = vcvt.s32.f32 %v4356_v28  ;;  %v3956_v40 = vunpack.c.3.s8 %v3804_v41 }
 0x6b5   :  { %5425 = vmatpush.bf16.msrb.mxu0 %v4972_v55  ;;  %v5100_v53 = vpack.c.bf16 %v4740_v36, %v4732_v22  ;;  %v4460_v0 = vcvt.s32.f32 %v3948_v6  ;;  %v4076_v52 = vunpack.c.2.s8 %v3836_v18  ;;  %v4084_v1 = vunpack.c.3.s8 %v3836_v18 }
 0x6b6   :  { %5438 = vmatpush.bf16.msrb.mxu1 %v5036_v48  ;;  %v5164_v21 = vpack.c.bf16 %v4868_v51, %v4860_v39  ;;  %v4468_v44 = vcvt.s32.f32 %v3956_v40  ;;  %v4204_v29 = vunpack.c.2.s8 %v3868_v62  ;;  %v4212_v42 = vunpack.c.3.s8 %v3868_v62 }
 0x6b7   :  { %5451 = vmatpush.bf16.msra.mxu2 %v5100_v53  ;;  %v4588_v56 = vcvt.s32.f32 %v4076_v52  ;;  %v4596_v54 = vcvt.s32.f32 %v4084_v1  ;;  %v4332_v23 = vunpack.c.2.s8 %v3900_v16  ;;  %v4340_v49 = vunpack.c.3.s8 %v3900_v16 }
 0x6b8   :  { %5464 = vmatpush.bf16.msra.mxu3 %v5164_v21  ;;  %v4964_v26 = vpack.c.bf16 %v4468_v44, %v4460_v0  ;;  %v4716_v2 = vcvt.s32.f32 %v4204_v29  ;;  %v4724_v5 = vcvt.s32.f32 %v4212_v42  ;;  %v3932_v47 = vunpack.c.0.s8 %v3804_v41 }
 0x6b9   :  { %v5028_v4 = vpack.c.bf16 %v4596_v54, %v4588_v56  ;;  %v4844_v37 = vcvt.s32.f32 %v4332_v23  ;;  %v4852_v59 = vcvt.s32.f32 %v4340_v49  ;;  %v3940_v11 = vunpack.c.1.s8 %v3804_v41  ;;  %v3821_v56 = vld [vmem:[#allocation3 + $0xa8] sm:$0xff] }
 0x6ba   :  { %5426 = vmatpush.bf16.msrb.mxu0 %v4964_v26  ;;  %v5092_v58 = vpack.c.bf16 %v4724_v5, %v4716_v2  ;;  %v4444_v46 = vcvt.s32.f32 %v3932_v47  ;;  %v4060_v43 = vunpack.c.0.s8 %v3836_v18  ;;  %v4068_v38 = vunpack.c.1.s8 %v3836_v18 }
 0x6bb   :  { %5439 = vmatpush.bf16.msrb.mxu1 %v5028_v4  ;;  %v5156_v27 = vpack.c.bf16 %v4852_v59, %v4844_v37  ;;  %v4452_v45 = vcvt.s32.f32 %v3940_v11  ;;  %v4188_v31 = vunpack.c.0.s8 %v3868_v62  ;;  %v4196_v14 = vunpack.c.1.s8 %v3868_v62  ;;  %v3853_v37 = vld [vmem:[#allocation3 + $0x1a8] sm:$0xff] }
 0x6bc   :  { %5452 = vmatpush.bf16.msra.mxu2 %v5092_v58  ;;  %v4572_v63 = vcvt.s32.f32 %v4060_v43  ;;  %v4580_v32 = vcvt.s32.f32 %v4068_v38  ;;  %v4316_v61 = vunpack.c.0.s8 %v3900_v16  ;;  %v4324_v57 = vunpack.c.1.s8 %v3900_v16  ;;  %v3885_v43 = vld [vmem:[#allocation3 + $0x2a8] sm:$0xff] }
 0x6bd   :  { %5465 = vmatpush.bf16.msra.mxu3 %v5156_v27  ;;  %v4956_v8 = vpack.c.bf16 %v4452_v45, %v4444_v46  ;;  %v4700_v19 = vcvt.s32.f32 %v4188_v31  ;;  %v4708_v9 = vcvt.s32.f32 %v4196_v14  ;;  %v4045_v25 = vunpack.c.2.s8 %v3829_v7  ;;  %v3917_v31 = vld [vmem:[#allocation3 + $0x3a8] sm:$0xff] }
 0x6be   :  { %v5020_v20 = vpack.c.bf16 %v4580_v32, %v4572_v63  ;;  %v4828_v41 = vcvt.s32.f32 %v4316_v61  ;;  %v4836_v34 = vcvt.s32.f32 %v4324_v57  ;;  %v4053_v35 = vunpack.c.3.s8 %v3829_v7 }
 0x6bf   :  { %5427 = vmatpush.bf16.msrb.mxu0 %v4956_v8  ;;  %v5084_v12 = vpack.c.bf16 %v4708_v9, %v4700_v19  ;;  %v4557_v15 = vcvt.s32.f32 %v4045_v25  ;;  %v4173_v13 = vunpack.c.2.s8 %v3861_v24  ;;  %v4181_v17 = vunpack.c.3.s8 %v3861_v24 }
 0x6c0   :  { %5440 = vmatpush.bf16.msrb.mxu1 %v5020_v20  ;;  %v5148_v28 = vpack.c.bf16 %v4836_v34, %v4828_v41  ;;  %v4565_v18 = vcvt.s32.f32 %v4053_v35  ;;  %v4301_v55 = vunpack.c.2.s8 %v3893_v3  ;;  %v4309_v22 = vunpack.c.3.s8 %v3893_v3 }
 0x6c1   :  { %5453 = vmatpush.bf16.msra.mxu2 %v5084_v12  ;;  %v4685_v36 = vcvt.s32.f32 %v4173_v13  ;;  %v4693_v6 = vcvt.s32.f32 %v4181_v17  ;;  %v4429_v62 = vunpack.c.2.s8 %v3925_v50  ;;  %v4437_v48 = vunpack.c.3.s8 %v3925_v50 }
 0x6c2   :  { %5466 = vmatpush.bf16.msra.mxu3 %v5148_v28  ;;  %v5013_v39 = vpack.c.bf16 %v4565_v18, %v4557_v15  ;;  %v4813_v51 = vcvt.s32.f32 %v4301_v55  ;;  %v4821_v40 = vcvt.s32.f32 %v4309_v22  ;;  %v4029_v16 = vunpack.c.0.s8 %v3829_v7  ;;  %5428 = vmatmul.bf16.vlgmr.msrb.gmra.mxu0 %v7082_v10 }
 0x6c3   :  { %v5077_v53 = vpack.c.bf16 %v4693_v6, %v4685_v36  ;;  %v4941_v0 = vcvt.s32.f32 %v4429_v62  ;;  %v4949_v52 = vcvt.s32.f32 %v4437_v48  ;;  %v4037_v1 = vunpack.c.1.s8 %v3829_v7  ;;  %5441 = vmatmul.bf16.vlgmr.msrb.gmra.mxu1 %v7087_v60  ;;  %v3813_v36 = vld [vmem:[#allocation3 + $0x68] sm:$0xff] }
 0x6c4   :  { %5472 = vmatpush.bf16.msra.mxu0 %v5013_v39  ;;  %v5141_v21 = vpack.c.bf16 %v4821_v40, %v4813_v51  ;;  %v4541_v44 = vcvt.s32.f32 %v4029_v16  ;;  %v4157_v29 = vunpack.c.0.s8 %v3861_v24  ;;  %v4165_v42 = vunpack.c.1.s8 %v3861_v24  ;;  %5454 = vmatmul.bf16.vlgmr.msra.gmra.mxu2 %v7070_v30 }
 0x6c5   :  { %5485 = vmatpush.bf16.msra.mxu1 %v5077_v53  ;;  %v5205_v54 = vpack.c.bf16 %v4949_v52, %v4941_v0  ;;  %v4549_v23 = vcvt.s32.f32 %v4037_v1  ;;  %v4285_v49 = vunpack.c.0.s8 %v3893_v3  ;;  %v4293_v26 = vunpack.c.1.s8 %v3893_v3  ;;  %5467 = vmatmul.bf16.vlgmr.msra.gmra.mxu3 %v7075_v33  ;;  %v3845_v0 = vld [vmem:[#allocation3 + $0x168] sm:$0xff] }
 0x6c6   :  { %5498 = vmatpush.bf16.msrb.mxu2 %v5141_v21  ;;  %v4669_v2 = vcvt.s32.f32 %v4157_v29  ;;  %v4677_v5 = vcvt.s32.f32 %v4165_v42  ;;  %v4413_v47 = vunpack.c.0.s8 %v3925_v50  ;;  %v4421_v4 = vunpack.c.1.s8 %v3925_v50  ;;  %v3877_v29 = vld [vmem:[#allocation3 + $0x268] sm:$0xff] }
 0x6c7   :  { %5511 = vmatpush.bf16.msrb.mxu3 %v5205_v54  ;;  %v5005_v59 = vpack.c.bf16 %v4549_v23, %v4541_v44  ;;  %v4797_v11 = vcvt.s32.f32 %v4285_v49  ;;  %v4805_v58 = vcvt.s32.f32 %v4293_v26  ;;  %v4013_v46 = vunpack.c.2.s8 %v3821_v56  ;;  %v3909_v49 = vld [vmem:[#allocation3 + $0x368] sm:$0xff] }
 0x6c8   :  { %v5069_v38 = vpack.c.bf16 %v4677_v5, %v4669_v2  ;;  %v4925_v7 = vcvt.s32.f32 %v4413_v47  ;;  %v4933_v27 = vcvt.s32.f32 %v4421_v4  ;;  %v4021_v45 = vunpack.c.3.s8 %v3821_v56 }
 0x6c9   :  { %5473 = vmatpush.bf16.msra.mxu0 %v5005_v59  ;;  %v5133_v14 = vpack.c.bf16 %v4805_v58, %v4797_v11  ;;  %v4525_v63 = vcvt.s32.f32 %v4013_v46  ;;  %v4141_v32 = vunpack.c.2.s8 %v3853_v37  ;;  %v4149_v61 = vunpack.c.3.s8 %v3853_v37  ;;  %v7107_v58 = vpop.f32.mrf.mxu0  ;;  %v7109_v46 = vpop.f32.mrf.mxu1 }
 0x6ca   :  { %5486 = vmatpush.bf16.msra.mxu1 %v5069_v38  ;;  %v5197_v57 = vpack.c.bf16 %v4933_v27, %v4925_v7  ;;  %v4533_v24 = vcvt.s32.f32 %v4021_v45  ;;  %v4269_v8 = vunpack.c.2.s8 %v3885_v43  ;;  %v4277_v19 = vunpack.c.3.s8 %v3885_v43  ;;  %v7111_v45 = vpop.f32.mrf.mxu2 }
 0x6cb   :  { %5499 = vmatpush.bf16.msrb.mxu2 %v5133_v14  ;;  %v4653_v9 = vcvt.s32.f32 %v4141_v32  ;;  %v4661_v25 = vcvt.s32.f32 %v4149_v61  ;;  %v4397_v3 = vunpack.c.2.s8 %v3917_v31  ;;  %v4405_v20 = vunpack.c.3.s8 %v3917_v31 }
 0x6cc   :  { %5512 = vmatpush.bf16.msrb.mxu3 %v5197_v57  ;;  %v4997_v41 = vpack.c.bf16 %v4533_v24, %v4525_v63  ;;  %v4781_v34 = vcvt.s32.f32 %v4269_v8  ;;  %v4789_v35 = vcvt.s32.f32 %v4277_v19  ;;  %v3997_v50 = vunpack.c.0.s8 %v3821_v56 }
 0x6cd   :  { %v5061_v12 = vpack.c.bf16 %v4661_v25, %v4653_v9  ;;  %v4909_v15 = vcvt.s32.f32 %v4397_v3  ;;  %v4917_v13 = vcvt.s32.f32 %v4405_v20  ;;  %v4005_v17 = vunpack.c.1.s8 %v3821_v56 }
 0x6ce   :  { %5474 = vmatpush.bf16.msra.mxu0 %v4997_v41  ;;  %v5125_v28 = vpack.c.bf16 %v4789_v35, %v4781_v34  ;;  %v4509_v18 = vcvt.s32.f32 %v3997_v50  ;;  %v4125_v55 = vunpack.c.0.s8 %v3853_v37  ;;  %v4133_v22 = vunpack.c.1.s8 %v3853_v37  ;;  %v3805_v41 = vld [vmem:[#allocation3 + $0x28] sm:$0xff] }
 0x6cf   :  { %5487 = vmatpush.bf16.msra.mxu1 %v5061_v12  ;;  %v5189_v6 = vpack.c.bf16 %v4917_v13, %v4909_v15  ;;  %v4517_v62 = vcvt.s32.f32 %v4005_v17  ;;  %v4253_v48 = vunpack.c.0.s8 %v3885_v43  ;;  %v4261_v39 = vunpack.c.1.s8 %v3885_v43 }
 0x6d0   :  { %5500 = vmatpush.bf16.msrb.mxu2 %v5125_v28  ;;  %v4637_v51 = vcvt.s32.f32 %v4125_v55  ;;  %v4645_v40 = vcvt.s32.f32 %v4133_v22  ;;  %v4381_v16 = vunpack.c.0.s8 %v3917_v31  ;;  %v4389_v53 = vunpack.c.1.s8 %v3917_v31  ;;  %v7113_v31 = vpop.f32.mrf.mxu3 }
 0x6d1   :  { %5513 = vmatpush.bf16.msrb.mxu3 %v5189_v6  ;;  %v4989_v52 = vpack.c.bf16 %v4517_v62, %v4509_v18  ;;  %v4765_v1 = vcvt.s32.f32 %v4253_v48  ;;  %v4773_v21 = vcvt.s32.f32 %v4261_v39  ;;  %v3981_v44 = vunpack.c.2.s8 %v3813_v36  ;;  %v3837_v18 = vld [vmem:[#allocation3 + $0x128] sm:$0xff] }
 0x6d2   :  { %v5053_v42 = vpack.c.bf16 %v4645_v40, %v4637_v51  ;;  %v4893_v56 = vcvt.s32.f32 %v4381_v16  ;;  %v4901_v54 = vcvt.s32.f32 %v4389_v53  ;;  %v3989_v23 = vunpack.c.3.s8 %v3813_v36  ;;  %v3869_v62 = vld [vmem:[#allocation3 + $0x228] sm:$0xff]  ;;  %v5223_v53 = vpop.f32.mrf.mxu0 }
 0x6d3   :  { %5475 = vmatpush.bf16.msra.mxu0 %v4989_v52  ;;  %v5117_v26 = vpack.c.bf16 %v4773_v21, %v4765_v1  ;;  %v4493_v2 = vcvt.s32.f32 %v3981_v44  ;;  %v4109_v5 = vunpack.c.2.s8 %v3845_v0  ;;  %v4117_v47 = vunpack.c.3.s8 %v3845_v0  ;;  %v3901_v16 = vld [vmem:[#allocation3 + $0x328] sm:$0xff] }
 0x6d4   :  { %5488 = vmatpush.bf16.msra.mxu1 %v5053_v42  ;;  %v5181_v4 = vpack.c.bf16 %v4901_v54, %v4893_v56  ;;  %v4501_v37 = vcvt.s32.f32 %v3989_v23  ;;  %v4237_v59 = vunpack.c.2.s8 %v3877_v29  ;;  %v4245_v11 = vunpack.c.3.s8 %v3877_v29 }
 0x6d5   :  { %5501 = vmatpush.bf16.msrb.mxu2 %v5117_v26  ;;  %v4621_v43 = vcvt.s32.f32 %v4109_v5  ;;  %v4629_v38 = vcvt.s32.f32 %v4117_v47  ;;  %v4365_v7 = vunpack.c.2.s8 %v3909_v49  ;;  %v4373_v27 = vunpack.c.3.s8 %v3909_v49 }
 0x6d6   :  { %5514 = vmatpush.bf16.msrb.mxu3 %v5181_v4  ;;  %v4981_v14 = vpack.c.bf16 %v4501_v37, %v4493_v2  ;;  %v4749_v63 = vcvt.s32.f32 %v4237_v59  ;;  %v4757_v32 = vcvt.s32.f32 %v4245_v11  ;;  %v3965_v61 = vunpack.c.0.s8 %v3813_v36 }
 0x6d7   :  { %v5045_v57 = vpack.c.bf16 %v4629_v38, %v4621_v43  ;;  %v4877_v24 = vcvt.s32.f32 %v4365_v7  ;;  %v4885_v8 = vcvt.s32.f32 %v4373_v27  ;;  %v3973_v19 = vunpack.c.1.s8 %v3813_v36 }
 0x6d8   :  { %5476 = vmatpush.bf16.msra.mxu0 %v4981_v14  ;;  %v5109_v9 = vpack.c.bf16 %v4757_v32, %v4749_v63  ;;  %v4477_v25 = vcvt.s32.f32 %v3965_v61  ;;  %v4093_v3 = vunpack.c.0.s8 %v3845_v0  ;;  %v4101_v20 = vunpack.c.1.s8 %v3845_v0  ;;  %v5236_v0 = vpop.f32.mrf.mxu1  ;;  %v5262_v42 = vpop.f32.mrf.mxu3 }
 0x6d9   :  { %5489 = vmatpush.bf16.msra.mxu1 %v5045_v57  ;;  %v5173_v34 = vpack.c.bf16 %v4885_v8, %v4877_v24  ;;  %v4485_v35 = vcvt.s32.f32 %v3973_v19  ;;  %v4221_v50 = vunpack.c.0.s8 %v3877_v29  ;;  %v4229_v12 = vunpack.c.1.s8 %v3877_v29  ;;  %v5249_v29 = vpop.f32.mrf.mxu2  ;;  %v3830_v57 = vld [vmem:[#allocation3 + $0xf0] sm:$0xff] }
 0x6da   :  { %5502 = vmatpush.bf16.msrb.mxu2 %v5109_v9  ;;  %v4605_v15 = vcvt.s32.f32 %v4093_v3  ;;  %v4613_v13 = vcvt.s32.f32 %v4101_v20  ;;  %v4349_v17 = vunpack.c.0.s8 %v3909_v49  ;;  %v4357_v28 = vunpack.c.1.s8 %v3909_v49 }
 0x6db   :  { %5515 = vmatpush.bf16.msrb.mxu3 %v5173_v34  ;;  %v4973_v55 = vpack.c.bf16 %v4485_v35, %v4477_v25  ;;  %v4733_v22 = vcvt.s32.f32 %v4221_v50  ;;  %v4741_v36 = vcvt.s32.f32 %v4229_v12  ;;  %v3949_v6 = vunpack.c.2.s8 %v3805_v41  ;;  %v3862_v35 = vld [vmem:[#allocation3 + $0x1f0] sm:$0xff] }
 0x6dc   :  { %v5037_v48 = vpack.c.bf16 %v4613_v13, %v4605_v15  ;;  %v4861_v39 = vcvt.s32.f32 %v4349_v17  ;;  %v4869_v51 = vcvt.s32.f32 %v4357_v28  ;;  %v3957_v40 = vunpack.c.3.s8 %v3805_v41  ;;  %v3894_v13 = vld [vmem:[#allocation3 + $0x2f0] sm:$0xff] }
 0x6dd   :  { %5477 = vmatpush.bf16.msra.mxu0 %v4973_v55  ;;  %v5101_v52 = vpack.c.bf16 %v4741_v36, %v4733_v22  ;;  %v4461_v1 = vcvt.s32.f32 %v3949_v6  ;;  %v4077_v21 = vunpack.c.2.s8 %v3837_v18  ;;  %v4085_v44 = vunpack.c.3.s8 %v3837_v18  ;;  %v3926_v22 = vld [vmem:[#allocation3 + $0x3f0] sm:$0xff] }
 0x6de   :  { %5490 = vmatpush.bf16.msra.mxu1 %v5037_v48  ;;  %v5165_v56 = vpack.c.bf16 %v4869_v51, %v4861_v39  ;;  %v4469_v54 = vcvt.s32.f32 %v3957_v40  ;;  %v4205_v23 = vunpack.c.2.s8 %v3869_v62  ;;  %v4213_v49 = vunpack.c.3.s8 %v3869_v62 }
 0x6df   :  { %5503 = vmatpush.bf16.msrb.mxu2 %v5101_v52  ;;  %v4589_v26 = vcvt.s32.f32 %v4077_v21  ;;  %v4597_v2 = vcvt.s32.f32 %v4085_v44  ;;  %v4333_v5 = vunpack.c.2.s8 %v3901_v16  ;;  %v4341_v47 = vunpack.c.3.s8 %v3901_v16 }
 0x6e0   :  { %5516 = vmatpush.bf16.msrb.mxu3 %v5165_v56  ;;  %v4965_v4 = vpack.c.bf16 %v4469_v54, %v4461_v1  ;;  %v4717_v37 = vcvt.s32.f32 %v4205_v23  ;;  %v4725_v59 = vcvt.s32.f32 %v4213_v49  ;;  %v3933_v11 = vunpack.c.0.s8 %v3805_v41 }
 0x6e1   :  { %v5029_v43 = vpack.c.bf16 %v4597_v2, %v4589_v26  ;;  %v4845_v38 = vcvt.s32.f32 %v4333_v5  ;;  %v4853_v7 = vcvt.s32.f32 %v4341_v47  ;;  %v3941_v27 = vunpack.c.1.s8 %v3805_v41 }
 0x6e2   :  { %5478 = vmatpush.bf16.msra.mxu0 %v4965_v4  ;;  %v5093_v14 = vpack.c.bf16 %v4725_v59, %v4717_v37  ;;  %v4445_v63 = vcvt.s32.f32 %v3933_v11  ;;  %v4061_v32 = vunpack.c.0.s8 %v3837_v18  ;;  %v4069_v61 = vunpack.c.1.s8 %v3837_v18  ;;  %v7117_v4 = vld [vmem:[#allocation3 + $0xb0] sm:$0xff] }
 0x6e3   :  { %5491 = vmatpush.bf16.msra.mxu1 %v5029_v43  ;;  %v5157_v24 = vpack.c.bf16 %v4853_v7, %v4845_v38  ;;  %v4453_v8 = vcvt.s32.f32 %v3941_v27  ;;  %v4189_v19 = vunpack.c.0.s8 %v3869_v62  ;;  %v4197_v9 = vunpack.c.1.s8 %v3869_v62  ;;  %v3793_v38 = vld [vmem:[#allocation12 + $0x40] ss:$8 sm:$0xf] }
 0x6e4   :  { %5504 = vmatpush.bf16.msrb.mxu2 %v5093_v14  ;;  %v4573_v25 = vcvt.s32.f32 %v4061_v32  ;;  %v4581_v3 = vcvt.s32.f32 %v4069_v61  ;;  %v4317_v20 = vunpack.c.0.s8 %v3901_v16  ;;  %v4325_v34 = vunpack.c.1.s8 %v3901_v16  ;;  %v3794_v7 = vld [vmem:[#allocation12 + $0x40] ss:$8 sm:$0xf0]  ;;  %v3797_v61 = vld [vmem:[#allocation12 + $0x82] ss:$8 sm:$0xf] }
 0x6e5   :  { %5517 = vmatpush.bf16.msrb.mxu3 %v5157_v24  ;;  %v4957_v50 = vpack.c.bf16 %v4453_v8, %v4445_v63  ;;  %v4701_v41 = vcvt.s32.f32 %v4189_v19  ;;  %v4709_v12 = vcvt.s32.f32 %v4197_v9  ;;  %v4046_v15 = vunpack.c.2.s8 %v3830_v57 }
 0x6e6   :  { %v5021_v17 = vpack.c.bf16 %v4581_v3, %v4573_v25  ;;  %v4829_v28 = vcvt.s32.f32 %v4317_v20  ;;  %v4837_v18 = vcvt.s32.f32 %v4325_v34  ;;  %v4054_v55 = vunpack.c.3.s8 %v3830_v57  ;;  %v3854_v25 = vld [vmem:[#allocation3 + $0x1b0] sm:$0xff] }
 0x6e7   :  { %5479 = vmatpush.bf16.msra.mxu0 %v4957_v50  ;;  %v5085_v36 = vpack.c.bf16 %v4709_v12, %v4701_v41  ;;  %v4558_v6 = vcvt.s32.f32 %v4046_v15  ;;  %v4174_v62 = vunpack.c.2.s8 %v3862_v35  ;;  %v4182_v48 = vunpack.c.3.s8 %v3862_v35 }
 0x6e8   :  { %5492 = vmatpush.bf16.msra.mxu1 %v5021_v17  ;;  %v5149_v39 = vpack.c.bf16 %v4837_v18, %v4829_v28  ;;  %v4566_v51 = vcvt.s32.f32 %v4054_v55  ;;  %v4302_v40 = vunpack.c.2.s8 %v3894_v13  ;;  %v4310_v16 = vunpack.c.3.s8 %v3894_v13  ;;  %v3918_v18 = vld [vmem:[#allocation3 + $0x3b0] sm:$0xff] }
 0x6e9   :  { %5505 = vmatpush.bf16.msrb.mxu2 %v5085_v36  ;;  %v4686_v53 = vcvt.s32.f32 %v4174_v62  ;;  %v4694_v0 = vcvt.s32.f32 %v4182_v48  ;;  %v4430_v52 = vunpack.c.2.s8 %v3926_v22  ;;  %v4438_v1 = vunpack.c.3.s8 %v3926_v22 }
 0x6ea   :  { %5518 = vmatpush.bf16.msrb.mxu3 %v5149_v39  ;;  %v5014_v21 = vpack.c.bf16 %v4566_v51, %v4558_v6  ;;  %v4814_v44 = vcvt.s32.f32 %v4302_v40  ;;  %v4822_v29 = vcvt.s32.f32 %v4310_v16  ;;  %v4030_v42 = vunpack.c.0.s8 %v3830_v57  ;;  %5480 = vmatmul.bf16.vlgmr.msra.gmra.mxu0 %v7082_v10 }
 0x6eb   :  { %v5078_v56 = vpack.c.bf16 %v4694_v0, %v4686_v53  ;;  %v4942_v54 = vcvt.s32.f32 %v4430_v52  ;;  %v4950_v23 = vcvt.s32.f32 %v4438_v1  ;;  %v4038_v49 = vunpack.c.1.s8 %v3830_v57  ;;  %5493 = vmatmul.bf16.vlgmr.msra.gmra.mxu1 %v7087_v60  ;;  %v3798_v57 = vld [vmem:[#allocation12 + $0x82] ss:$8 sm:$0xf0] }
 0x6ec   :  { %5524 = vmatpush.bf16.msrb.mxu0 %v5014_v21  ;;  %v5142_v26 = vpack.c.bf16 %v4822_v29, %v4814_v44  ;;  %v4542_v2 = vcvt.s32.f32 %v4030_v42  ;;  %v4158_v5 = vunpack.c.0.s8 %v3862_v35  ;;  %v4166_v47 = vunpack.c.1.s8 %v3862_v35  ;;  %5506 = vmatmul.bf16.vlgmr.msrb.gmra.mxu2 %v7070_v30 }
 0x6ed   :  { %5537 = vmatpush.bf16.msrb.mxu1 %v5078_v56  ;;  %v5206_v37 = vpack.c.bf16 %v4950_v23, %v4942_v54  ;;  %v4550_v59 = vcvt.s32.f32 %v4038_v49  ;;  %v4286_v11 = vunpack.c.0.s8 %v3894_v13  ;;  %v4294_v43 = vunpack.c.1.s8 %v3894_v13  ;;  %5519 = vmatmul.bf16.vlgmr.msrb.gmra.mxu3 %v7075_v33  ;;  %v3886_v13 = vld [vmem:[#allocation3 + $0x2b0] sm:$0xff] }
 0x6ee   :  { %5550 = vmatpush.bf16.msra.mxu2 %v5142_v26  ;;  %v4670_v27 = vcvt.s32.f32 %v4158_v5  ;;  %v4678_v14 = vcvt.s32.f32 %v4166_v47  ;;  %v4414_v63 = vunpack.c.0.s8 %v3926_v22  ;;  %v4422_v32 = vunpack.c.1.s8 %v3926_v22  ;;  %v3814_v26 = vld [vmem:[#allocation3 + $0x70] sm:$0xff] }
 0x6ef   :  { %5563 = vmatpush.bf16.msra.mxu3 %v5206_v37  ;;  %v5006_v24 = vpack.c.bf16 %v4550_v59, %v4542_v2  ;;  %v4798_v8 = vcvt.s32.f32 %v4286_v11  ;;  %v4806_v19 = vcvt.s32.f32 %v4294_v43  ;;  %v5235_v9 = vadd.f32 %v7109_v46, %v7107_v58 }
 0x6f0   :  { %v5070_v3 = vpack.c.bf16 %v4678_v14, %v4670_v27  ;;  %v4926_v20 = vcvt.s32.f32 %v4414_v63  ;;  %v4934_v34 = vcvt.s32.f32 %v4422_v32  ;;  %v7123_v35 = vor.u32 %v3794_v7, %v3793_v38  ;;  %v3846_v7 = vld [vmem:[#allocation3 + $0x170] sm:$0xff] }
 0x6f1   :  { %5525 = vmatpush.bf16.msrb.mxu0 %v5006_v24  ;;  %v5134_v50 = vpack.c.bf16 %v4806_v19, %v4798_v8  ;;  %v5248_v41 = vadd.f32 %v7111_v45, %v5235_v9  ;;  %v7126_v12 = vor.u32 %v3798_v57, %v3797_v61  ;;  %v4014_v15 = vunpack.c.2.s8 %v7117_v4  ;;  %v3878_v32 = vld [vmem:[#allocation3 + $0x270] sm:$0xff] }
 0x6f2   :  { %5538 = vmatpush.bf16.msrb.mxu1 %v5070_v3  ;;  %v5198_v17 = vpack.c.bf16 %v4934_v34, %v4926_v20  ;;  %v5654_v28 = vperm.slane %v7123_v35, 0  ;;  %v4022_v58 = vunpack.c.3.s8 %v7117_v4  ;;  %v4142_v46 = vunpack.c.2.s8 %v3854_v25  ;;  %v3910_v19 = vld [vmem:[#allocation3 + $0x370] sm:$0xff] }
 0x6f3   :  { %5551 = vmatpush.bf16.msra.mxu2 %v5134_v50  ;;  %v5261_v55 = vadd.f32 %v7113_v31, %v5248_v41  ;;  %v5629_v22 = vperm.slane %v7126_v12, 0  ;;  %v4526_v36 = vcvt.s32.f32 %v4014_v15  ;;  %v4150_v45 = vunpack.c.3.s8 %v3854_v25 }
 0x6f4   :  { %5564 = vmatpush.bf16.msra.mxu3 %v5198_v17  ;;  %v4534_v6 = vcvt.s32.f32 %v4022_v58  ;;  %v4654_v62 = vcvt.s32.f32 %v4142_v46  ;;  %v4270_v48 = vunpack.c.2.s8 %v3886_v13  ;;  %v4278_v39 = vunpack.c.3.s8 %v3886_v13  ;;  %v7138_v46 = vpop.f32.mrf.mxu0 }
 0x6f5   :  { %v5645_v51 = vmul.f32 %v5629_v22, %v5261_v55  ;;  %v4662_v40 = vcvt.s32.f32 %v4150_v45  ;;  %v4398_v16 = vunpack.c.2.s8 %v3918_v18  ;;  %v4406_v53 = vunpack.c.3.s8 %v3918_v18 }
 0x6f6   :  { %v4998_v0 = vpack.c.bf16 %v4534_v6, %v4526_v36  ;;  %v4782_v52 = vcvt.s32.f32 %v4270_v48  ;;  %v4790_v1 = vcvt.s32.f32 %v4278_v39  ;;  %v3998_v21 = vunpack.c.0.s8 %v7117_v4  ;;  %v7142_v6 = vpop.f32.mrf.mxu2 }
 0x6f7   :  { %v7134_v44 = vadd.f32 %v5654_v28, %v5645_v51  ;;  %v5062_v31 = vpack.c.bf16 %v4662_v40, %v4654_v62  ;;  %v4910_v29 = vcvt.s32.f32 %v4398_v16  ;;  %v4918_v42 = vcvt.s32.f32 %v4406_v53  ;;  %v7144_v62 = vpop.f32.mrf.mxu3 }
 0x6f8   :  { %5526 = vmatpush.bf16.msrb.mxu0 %v4998_v0  ;;  %v5126_v56 = vpack.c.bf16 %v4790_v1, %v4782_v52  ;;  %v4006_v54 = vunpack.c.1.s8 %v7117_v4  ;;  %v4510_v23 = vcvt.s32.f32 %v3998_v21  ;;  %v4126_v49 = vunpack.c.0.s8 %v3854_v25 }
 0x6f9   :  { %v5678_v2 = vmax.f32 %v7134_v44, 0.0  ;;  %5539 = vmatpush.bf16.msrb.mxu1 %v5062_v31  ;;  %v5190_v5 = vpack.c.bf16 %v4918_v42, %v4910_v29  ;;  %v4134_v47 = vunpack.c.1.s8 %v3854_v25  ;;  %v4254_v37 = vunpack.c.0.s8 %v3886_v13  ;;  %v3806_v42 = vld [vmem:[#allocation3 + $0x30] sm:$0xff] }
 0x6fa   :  { %5552 = vmatpush.bf16.msra.mxu2 %v5126_v56  ;;  %v4518_v59 = vcvt.s32.f32 %v4006_v54  ;;  %v4638_v11 = vcvt.s32.f32 %v4126_v49  ;;  %v4262_v43 = vunpack.c.1.s8 %v3886_v13  ;;  %v4382_v38 = vunpack.c.0.s8 %v3918_v18 }
 0x6fb   :  { %5565 = vmatpush.bf16.msra.mxu3 %v5190_v5  ;;  %v4646_v27 = vcvt.s32.f32 %v4134_v47  ;;  %v4766_v14 = vcvt.s32.f32 %v4254_v37  ;;  %v4390_v63 = vunpack.c.1.s8 %v3918_v18  ;;  %v3982_v4 = vunpack.c.2.s8 %v3814_v26  ;;  %v7140_v18 = vpop.f32.mrf.mxu1  ;;  %v3838_v5 = vld [vmem:[#allocation3 + $0x130] sm:$0xff] }
 0x6fc   :  { %v4990_v61 = vpack.c.bf16 %v4518_v59, %v4510_v23  ;;  %v4774_v57 = vcvt.s32.f32 %v4262_v43  ;;  %v4894_v24 = vcvt.s32.f32 %v4382_v38  ;;  %v3990_v8 = vunpack.c.3.s8 %v3814_v26 }
 0x6fd   :  { %v5054_v9 = vpack.c.bf16 %v4646_v27, %v4638_v11  ;;  %v4902_v25 = vcvt.s32.f32 %v4390_v63  ;;  %v4494_v3 = vcvt.s32.f32 %v3982_v4  ;;  %v4110_v20 = vunpack.c.2.s8 %v3846_v7  ;;  %v3870_v11 = vld [vmem:[#allocation3 + $0x230] sm:$0xff] }
 0x6fe   :  { %5527 = vmatpush.bf16.msrb.mxu0 %v4990_v61  ;;  %v5118_v34 = vpack.c.bf16 %v4774_v57, %v4766_v14  ;;  %v4502_v50 = vcvt.s32.f32 %v3990_v8  ;;  %v4118_v41 = vunpack.c.3.s8 %v3846_v7  ;;  %v4238_v15 = vunpack.c.2.s8 %v3878_v32  ;;  %v3902_v57 = vld [vmem:[#allocation3 + $0x330] sm:$0xff] }
 0x6ff   :  { %5540 = vmatpush.bf16.msrb.mxu1 %v5054_v9  ;;  %v5182_v13 = vpack.c.bf16 %v4902_v25, %v4894_v24  ;;  %v4622_v17 = vcvt.s32.f32 %v4110_v20  ;;  %v4246_v28 = vunpack.c.3.s8 %v3878_v32  ;;  %v4366_v58 = vunpack.c.2.s8 %v3910_v19  ;;  %v5275_v24 = vpop.f32.mrf.mxu0  ;;  %v5314_v20 = vpop.f32.mrf.mxu3 }
 0x700   :  { %5553 = vmatpush.bf16.msra.mxu2 %v5118_v34  ;;  %v4982_v55 = vpack.c.bf16 %v4502_v50, %v4494_v3  ;;  %v4630_v22 = vcvt.s32.f32 %v4118_v41  ;;  %v4750_v36 = vcvt.s32.f32 %v4238_v15  ;;  %v4374_v45 = vunpack.c.3.s8 %v3910_v19 }
 0x701   :  { %5566 = vmatpush.bf16.msra.mxu3 %v5182_v13  ;;  %v4758_v48 = vcvt.s32.f32 %v4246_v28  ;;  %v4878_v39 = vcvt.s32.f32 %v4366_v58  ;;  %v3966_v51 = vunpack.c.0.s8 %v3814_v26  ;;  %v3974_v40 = vunpack.c.1.s8 %v3814_v26 }
 0x702   :  { %5528 = vmatpush.bf16.msrb.mxu0 %v4982_v55  ;;  %v5046_v16 = vpack.c.bf16 %v4630_v22, %v4622_v17  ;;  %v4886_v53 = vcvt.s32.f32 %v4374_v45  ;;  %v4094_v0 = vunpack.c.0.s8 %v3846_v7  ;;  %v4102_v52 = vunpack.c.1.s8 %v3846_v7 }
 0x703   :  { %v5110_v1 = vpack.c.bf16 %v4758_v48, %v4750_v36  ;;  %v4478_v21 = vcvt.s32.f32 %v3966_v51  ;;  %v4486_v31 = vcvt.s32.f32 %v3974_v40  ;;  %v4222_v29 = vunpack.c.0.s8 %v3878_v32 }
 0x704   :  { %5541 = vmatpush.bf16.msrb.mxu1 %v5046_v16  ;;  %v5174_v56 = vpack.c.bf16 %v4886_v53, %v4878_v39  ;;  %v4606_v54 = vcvt.s32.f32 %v4094_v0  ;;  %v4614_v23 = vcvt.s32.f32 %v4102_v52  ;;  %v4230_v49 = vunpack.c.1.s8 %v3878_v32  ;;  %v5288_v32 = vpop.f32.mrf.mxu1 }
 0x705   :  { %5554 = vmatpush.bf16.msra.mxu2 %v5110_v1  ;;  %v4974_v47 = vpack.c.bf16 %v4486_v31, %v4478_v21  ;;  %v4734_v37 = vcvt.s32.f32 %v4222_v29  ;;  %v4350_v26 = vunpack.c.0.s8 %v3910_v19  ;;  %v4358_v59 = vunpack.c.1.s8 %v3910_v19  ;;  %v5301_v19 = vpop.f32.mrf.mxu2  ;;  %v3831_v1 = vld [vmem:[#allocation3 + $0xf8] sm:$0xff] }
 0x706   :  { %5567 = vmatpush.bf16.msra.mxu3 %v5174_v56  ;;  %v5038_v43 = vpack.c.bf16 %v4614_v23, %v4606_v54  ;;  %v4742_v38 = vcvt.s32.f32 %v4230_v49  ;;  %v3950_v7 = vunpack.c.2.s8 %v3806_v42  ;;  %v3958_v27 = vunpack.c.3.s8 %v3806_v42  ;;  %v3863_v54 = vld [vmem:[#allocation3 + $0x1f8] sm:$0xff] }
 0x707   :  { %5529 = vmatpush.bf16.msrb.mxu0 %v4974_v47  ;;  %v4862_v14 = vcvt.s32.f32 %v4350_v26  ;;  %v4870_v63 = vcvt.s32.f32 %v4358_v59  ;;  %v4078_v4 = vunpack.c.2.s8 %v3838_v5  ;;  %v4086_v61 = vunpack.c.3.s8 %v3838_v5 }
 0x708   :  { %5542 = vmatpush.bf16.msrb.mxu1 %v5038_v43  ;;  %v5102_v8 = vpack.c.bf16 %v4742_v38, %v4734_v37  ;;  %v4462_v9 = vcvt.s32.f32 %v3950_v7  ;;  %v4470_v25 = vcvt.s32.f32 %v3958_v27  ;;  %v4206_v3 = vunpack.c.2.s8 %v3870_v11  ;;  %v3895_v37 = vld [vmem:[#allocation3 + $0x2f8] sm:$0xff] }
 0x709   :  { %v5166_v34 = vpack.c.bf16 %v4870_v63, %v4862_v14  ;;  %v4590_v50 = vcvt.s32.f32 %v4078_v4  ;;  %v4598_v41 = vcvt.s32.f32 %v4086_v61  ;;  %v4214_v15 = vunpack.c.3.s8 %v3870_v11  ;;  %v3927_v63 = vld [vmem:[#allocation3 + $0x3f8] sm:$0xff] }
 0x70a   :  { %5555 = vmatpush.bf16.msra.mxu2 %v5102_v8  ;;  %v4966_v13 = vpack.c.bf16 %v4470_v25, %v4462_v9  ;;  %v4718_v17 = vcvt.s32.f32 %v4206_v3  ;;  %v4334_v28 = vunpack.c.2.s8 %v3902_v57  ;;  %v4342_v58 = vunpack.c.3.s8 %v3902_v57 }
 0x70b   :  { %5568 = vmatpush.bf16.msra.mxu3 %v5166_v34  ;;  %v5030_v55 = vpack.c.bf16 %v4598_v41, %v4590_v50  ;;  %v4726_v22 = vcvt.s32.f32 %v4214_v15  ;;  %v3934_v36 = vunpack.c.0.s8 %v3806_v42  ;;  %v3942_v45 = vunpack.c.1.s8 %v3806_v42 }
 0x70c   :  { %5530 = vmatpush.bf16.msrb.mxu0 %v4966_v13  ;;  %v4846_v48 = vcvt.s32.f32 %v4334_v28  ;;  %v4854_v39 = vcvt.s32.f32 %v4342_v58  ;;  %v4062_v51 = vunpack.c.0.s8 %v3838_v5  ;;  %v4070_v40 = vunpack.c.1.s8 %v3838_v5 }
 0x70d   :  { %5543 = vmatpush.bf16.msrb.mxu1 %v5030_v55  ;;  %v5094_v16 = vpack.c.bf16 %v4726_v22, %v4718_v17  ;;  %v4446_v53 = vcvt.s32.f32 %v3934_v36  ;;  %v4454_v0 = vcvt.s32.f32 %v3942_v45  ;;  %v4190_v52 = vunpack.c.0.s8 %v3870_v11 }
 0x70e   :  { %v5158_v21 = vpack.c.bf16 %v4854_v39, %v4846_v48  ;;  %v4574_v31 = vcvt.s32.f32 %v4062_v51  ;;  %v4582_v29 = vcvt.s32.f32 %v4070_v40  ;;  %v4198_v56 = vunpack.c.1.s8 %v3870_v11 }
 0x70f   :  { %5556 = vmatpush.bf16.msra.mxu2 %v5094_v16  ;;  %v4958_v23 = vpack.c.bf16 %v4454_v0, %v4446_v53  ;;  %v4702_v49 = vcvt.s32.f32 %v4190_v52  ;;  %v4318_v42 = vunpack.c.0.s8 %v3902_v57  ;;  %v4326_v47 = vunpack.c.1.s8 %v3902_v57  ;;  %v3823_v16 = vld [vmem:[#allocation3 + $0xb8] sm:$0xff] }
 0x710   :  { %5569 = vmatpush.bf16.msra.mxu3 %v5158_v21  ;;  %v5022_v26 = vpack.c.bf16 %v4582_v29, %v4574_v31  ;;  %v4710_v5 = vcvt.s32.f32 %v4198_v56  ;;  %v4047_v59 = vunpack.c.2.s8 %v3831_v1  ;;  %v4055_v43 = vunpack.c.3.s8 %v3831_v1  ;;  %v7150_v21 = vld [vmem:[#allocation3 + $0x1b8] sm:$0xff] }
 0x711   :  { %5531 = vmatpush.bf16.msrb.mxu0 %v4958_v23  ;;  %v4830_v38 = vcvt.s32.f32 %v4318_v42  ;;  %v4838_v7 = vcvt.s32.f32 %v4326_v47  ;;  %v4175_v27 = vunpack.c.2.s8 %v3863_v54  ;;  %v4183_v14 = vunpack.c.3.s8 %v3863_v54  ;;  %v3887_v23 = vld [vmem:[#allocation3 + $0x2b8] sm:$0xff] }
 0x712   :  { %5544 = vmatpush.bf16.msrb.mxu1 %v5022_v26  ;;  %v5086_v11 = vpack.c.bf16 %v4710_v5, %v4702_v49  ;;  %v4559_v4 = vcvt.s32.f32 %v4047_v59  ;;  %v4567_v61 = vcvt.s32.f32 %v4055_v43  ;;  %v4303_v24 = vunpack.c.2.s8 %v3895_v37 }
 0x713   :  { %v5150_v32 = vpack.c.bf16 %v4838_v7, %v4830_v38  ;;  %v4687_v8 = vcvt.s32.f32 %v4175_v27  ;;  %v4695_v57 = vcvt.s32.f32 %v4183_v14  ;;  %v4311_v9 = vunpack.c.3.s8 %v3895_v37  ;;  %v3919_v38 = vld [vmem:[#allocation3 + $0x3b8] sm:$0xff] }
 0x714   :  { %5557 = vmatpush.bf16.msra.mxu2 %v5086_v11  ;;  %v5015_v25 = vpack.c.bf16 %v4567_v61, %v4559_v4  ;;  %v4815_v3 = vcvt.s32.f32 %v4303_v24  ;;  %v4431_v19 = vunpack.c.2.s8 %v3927_v63  ;;  %v4439_v20 = vunpack.c.3.s8 %v3927_v63  ;;  %5532 = vmatmul.bf16.vlgmr.msrb.gmra.mxu0 %v7082_v10 }
 0x715   :  { %5570 = vmatpush.bf16.msra.mxu3 %v5150_v32  ;;  %v5079_v34 = vpack.c.bf16 %v4695_v57, %v4687_v8  ;;  %v4823_v50 = vcvt.s32.f32 %v4311_v9  ;;  %v4031_v41 = vunpack.c.0.s8 %v3831_v1  ;;  %v4039_v15 = vunpack.c.1.s8 %v3831_v1  ;;  %5545 = vmatmul.bf16.vlgmr.msrb.gmra.mxu1 %v7087_v60 }
 0x716   :  { %5576 = vmatpush.bf16.msra.mxu0 %v5015_v25  ;;  %v4943_v13 = vcvt.s32.f32 %v4431_v19  ;;  %v4951_v17 = vcvt.s32.f32 %v4439_v20  ;;  %v4159_v28 = vunpack.c.0.s8 %v3863_v54  ;;  %v4167_v58 = vunpack.c.1.s8 %v3863_v54 }
 0x717   :  { %5589 = vmatpush.bf16.msra.mxu1 %v5079_v34  ;;  %v5143_v55 = vpack.c.bf16 %v4823_v50, %v4815_v3  ;;  %v4543_v22 = vcvt.s32.f32 %v4031_v41  ;;  %v4551_v36 = vcvt.s32.f32 %v4039_v15  ;;  %v4287_v45 = vunpack.c.0.s8 %v3895_v37  ;;  %5558 = vmatmul.bf16.vlgmr.msra.gmra.mxu2 %v7070_v30 }
 0x718   :  { %v5207_v48 = vpack.c.bf16 %v4951_v17, %v4943_v13  ;;  %v4671_v39 = vcvt.s32.f32 %v4159_v28  ;;  %v4679_v51 = vcvt.s32.f32 %v4167_v58  ;;  %v4295_v40 = vunpack.c.1.s8 %v3895_v37  ;;  %5571 = vmatmul.bf16.vlgmr.msra.gmra.mxu3 %v7075_v33  ;;  %v7163_v13 = vpop.f32.mrf.mxu0  ;;  %v7165_v17 = vpop.f32.mrf.mxu1 }
 0x719   :  { %5602 = vmatpush.bf16.msrb.mxu2 %v5143_v55  ;;  %v5007_v53 = vpack.c.bf16 %v4551_v36, %v4543_v22  ;;  %v4799_v0 = vcvt.s32.f32 %v4287_v45  ;;  %v4415_v52 = vunpack.c.0.s8 %v3927_v63  ;;  %v4423_v1 = vunpack.c.1.s8 %v3927_v63  ;;  %v3815_v36 = vld [vmem:[#allocation3 + $0x78] sm:$0xff]  ;;  %v7168_v45 = vpop.f32.mrf.mxu2 }
 0x71a   :  { %5615 = vmatpush.bf16.msrb.mxu3 %v5207_v48  ;;  %v5071_v31 = vpack.c.bf16 %v4679_v51, %v4671_v39  ;;  %v4807_v29 = vcvt.s32.f32 %v4295_v40  ;;  %v5287_v56 = vadd.f32 %v7140_v18, %v7138_v46  ;;  %v5630_v54 = vperm.slane %v7126_v12, 1  ;;  %v7170_v48 = vpop.f32.mrf.mxu3 }
 0x71b   :  { %5577 = vmatpush.bf16.msra.mxu0 %v5007_v53  ;;  %v4927_v49 = vcvt.s32.f32 %v4415_v52  ;;  %v4935_v42 = vcvt.s32.f32 %v4423_v1  ;;  %v5655_v47 = vperm.slane %v7123_v35, 1  ;;  %v4015_v37 = vunpack.c.2.s8 %v3823_v16  ;;  %v3847_v53 = vld [vmem:[#allocation3 + $0x178] sm:$0xff] }
 0x71c   :  { %5590 = vmatpush.bf16.msra.mxu1 %v5071_v31  ;;  %v5135_v26 = vpack.c.bf16 %v4807_v29, %v4799_v0  ;;  %v5300_v5 = vadd.f32 %v7142_v6, %v5287_v56  ;;  %v4023_v59 = vunpack.c.3.s8 %v3823_v16  ;;  %v4143_v43 = vunpack.c.2.s8 %v7150_v21  ;;  %v3879_v29 = vld [vmem:[#allocation3 + $0x278] sm:$0xff] }
 0x71d   :  { %v5199_v7 = vpack.c.bf16 %v4935_v42, %v4927_v49  ;;  %v4527_v27 = vcvt.s32.f32 %v4015_v37  ;;  %v4151_v46 = vunpack.c.3.s8 %v7150_v21  ;;  %v4271_v18 = vunpack.c.2.s8 %v3887_v23 }
 0x71e   :  { %5603 = vmatpush.bf16.msrb.mxu2 %v5135_v26  ;;  %v5313_v14 = vadd.f32 %v7144_v62, %v5300_v5  ;;  %v4535_v63 = vcvt.s32.f32 %v4023_v59  ;;  %v4655_v11 = vcvt.s32.f32 %v4143_v43  ;;  %v4279_v4 = vunpack.c.3.s8 %v3887_v23  ;;  %v3911_v5 = vld [vmem:[#allocation3 + $0x378] sm:$0xff] }
 0x71f   :  { %5616 = vmatpush.bf16.msrb.mxu3 %v5199_v7  ;;  %v4663_v61 = vcvt.s32.f32 %v4151_v46  ;;  %v4783_v24 = vcvt.s32.f32 %v4271_v18  ;;  %v4399_v32 = vunpack.c.2.s8 %v3919_v38  ;;  %v4407_v6 = vunpack.c.3.s8 %v3919_v38 }
 0x720   :  { %v5646_v8 = vmul.f32 %v5630_v54, %v5313_v14  ;;  %v4999_v57 = vpack.c.bf16 %v4535_v63, %v4527_v27  ;;  %v4791_v9 = vcvt.s32.f32 %v4279_v4  ;;  %v3999_v25 = vunpack.c.0.s8 %v3823_v16 }
 0x721   :  { %v5063_v3 = vpack.c.bf16 %v4663_v61, %v4655_v11  ;;  %v4911_v19 = vcvt.s32.f32 %v4399_v32  ;;  %v4919_v20 = vcvt.s32.f32 %v4407_v6  ;;  %v4007_v34 = vunpack.c.1.s8 %v3823_v16  ;;  %v5327_v61 = vpop.f32.mrf.mxu0 }
 0x722   :  { %v7160_v50 = vadd.f32 %v5655_v47, %v5646_v8  ;;  %5578 = vmatpush.bf16.msra.mxu0 %v4999_v57  ;;  %v5127_v62 = vpack.c.bf16 %v4791_v9, %v4783_v24  ;;  %v4511_v41 = vcvt.s32.f32 %v3999_v25  ;;  %v4127_v15 = vunpack.c.0.s8 %v7150_v21  ;;  %v5340_v24 = vpop.f32.mrf.mxu1  ;;  %v5353_v9 = vpop.f32.mrf.mxu2 }
 0x723   :  { %5591 = vmatpush.bf16.msra.mxu1 %v5063_v3  ;;  %v5191_v28 = vpack.c.bf16 %v4919_v20, %v4911_v19  ;;  %v4519_v58 = vcvt.s32.f32 %v4007_v34  ;;  %v4135_v55 = vunpack.c.1.s8 %v7150_v21  ;;  %v4255_v22 = vunpack.c.0.s8 %v3887_v23  ;;  %v5366_v25 = vpop.f32.mrf.mxu3 }
 0x724   :  { %v5679_v39 = vmax.f32 %v7160_v50, 0.0  ;;  %5604 = vmatpush.bf16.msrb.mxu2 %v5127_v62  ;;  %v4639_v51 = vcvt.s32.f32 %v4127_v15  ;;  %v4263_v40 = vunpack.c.1.s8 %v3887_v23  ;;  %v4383_v16 = vunpack.c.0.s8 %v3919_v38 }
 0x725   :  { %5617 = vmatpush.bf16.msrb.mxu3 %v5191_v28  ;;  %v4991_v0 = vpack.c.bf16 %v4519_v58, %v4511_v41  ;;  %v4647_v52 = vcvt.s32.f32 %v4135_v55  ;;  %v4767_v1 = vcvt.s32.f32 %v4255_v22  ;;  %v4391_v31 = vunpack.c.1.s8 %v3919_v38  ;;  %v3807_v58 = vld [vmem:[#allocation3 + $0x38] sm:$0xff] }
 0x726   :  { %v4775_v21 = vcvt.s32.f32 %v4263_v40  ;;  %v4895_v56 = vcvt.s32.f32 %v4383_v16  ;;  %v3983_v54 = vunpack.c.2.s8 %v3815_v36  ;;  %v3991_v49 = vunpack.c.3.s8 %v3815_v36  ;;  %v3839_v16 = vld [vmem:[#allocation3 + $0x138] sm:$0xff] }
 0x727   :  { %5579 = vmatpush.bf16.msra.mxu0 %v4991_v0  ;;  %v5055_v42 = vpack.c.bf16 %v4647_v52, %v4639_v51  ;;  %v4903_v47 = vcvt.s32.f32 %v4391_v31  ;;  %v4111_v37 = vunpack.c.2.s8 %v3847_v53  ;;  %v4119_v26 = vunpack.c.3.s8 %v3847_v53  ;;  %v3871_v31 = vld [vmem:[#allocation3 + $0x238] sm:$0xff] }
 0x728   :  { %v5119_v59 = vpack.c.bf16 %v4775_v21, %v4767_v1  ;;  %v4495_v23 = vcvt.s32.f32 %v3983_v54  ;;  %v4503_v43 = vcvt.s32.f32 %v3991_v49  ;;  %v4239_v7 = vunpack.c.2.s8 %v3879_v29 }
 0x729   :  { %5592 = vmatpush.bf16.msra.mxu1 %v5055_v42  ;;  %v5183_v27 = vpack.c.bf16 %v4903_v47, %v4895_v56  ;;  %v4623_v46 = vcvt.s32.f32 %v4111_v37  ;;  %v4631_v18 = vcvt.s32.f32 %v4119_v26  ;;  %v4247_v38 = vunpack.c.3.s8 %v3879_v29  ;;  %v3903_v26 = vld [vmem:[#allocation3 + $0x338] sm:$0xff] }
 0x72a   :  { %5605 = vmatpush.bf16.msrb.mxu2 %v5119_v59  ;;  %v4983_v14 = vpack.c.bf16 %v4503_v43, %v4495_v23  ;;  %v4751_v63 = vcvt.s32.f32 %v4239_v7  ;;  %v4367_v11 = vunpack.c.2.s8 %v3911_v5  ;;  %v4375_v4 = vunpack.c.3.s8 %v3911_v5  ;;  %v5377_v7 = vpop.f32.mrf.mxu0 }
 0x72b   :  { %5618 = vmatpush.bf16.msrb.mxu3 %v5183_v27  ;;  %v5047_v32 = vpack.c.bf16 %v4631_v18, %v4623_v46  ;;  %v4759_v6 = vcvt.s32.f32 %v4247_v38  ;;  %v3967_v8 = vunpack.c.0.s8 %v3815_v36  ;;  %v3975_v57 = vunpack.c.1.s8 %v3815_v36  ;;  %v5390_v27 = vpop.f32.mrf.mxu1 }
 0x72c   :  { %5580 = vmatpush.bf16.msra.mxu0 %v4983_v14  ;;  %v4879_v3 = vcvt.s32.f32 %v4367_v11  ;;  %v4887_v19 = vcvt.s32.f32 %v4375_v4  ;;  %v4095_v20 = vunpack.c.0.s8 %v3847_v53  ;;  %v4103_v34 = vunpack.c.1.s8 %v3847_v53  ;;  %v5403_v14 = vpop.f32.mrf.mxu2 }
 0x72d   :  { %5593 = vmatpush.bf16.msra.mxu1 %v5047_v32  ;;  %v5111_v62 = vpack.c.bf16 %v4759_v6, %v4751_v63  ;;  %v4479_v41 = vcvt.s32.f32 %v3967_v8  ;;  %v4487_v15 = vcvt.s32.f32 %v3975_v57  ;;  %v4223_v28 = vunpack.c.0.s8 %v3879_v29  ;;  %v5416_v63 = vpop.f32.mrf.mxu3 }
 0x72e   :  { %v5175_v55 = vpack.c.bf16 %v4887_v19, %v4879_v3  ;;  %v4607_v22 = vcvt.s32.f32 %v4095_v20  ;;  %v4615_v51 = vcvt.s32.f32 %v4103_v34  ;;  %v4231_v40 = vunpack.c.1.s8 %v3879_v29 }
 0x72f   :  { %5606 = vmatpush.bf16.msrb.mxu2 %v5111_v62  ;;  %v4975_v36 = vpack.c.bf16 %v4487_v15, %v4479_v41  ;;  %v4735_v0 = vcvt.s32.f32 %v4223_v28  ;;  %v4351_v52 = vunpack.c.0.s8 %v3911_v5  ;;  %v4359_v1 = vunpack.c.1.s8 %v3911_v5 }
 0x730   :  { %5619 = vmatpush.bf16.msrb.mxu3 %v5175_v55  ;;  %v5039_v21 = vpack.c.bf16 %v4615_v51, %v4607_v22  ;;  %v4743_v53 = vcvt.s32.f32 %v4231_v40  ;;  %v3951_v56 = vunpack.c.2.s8 %v3807_v58  ;;  %v3959_v54 = vunpack.c.3.s8 %v3807_v58 }
 0x731   :  { %5581 = vmatpush.bf16.msra.mxu0 %v4975_v36  ;;  %v4863_v49 = vcvt.s32.f32 %v4351_v52  ;;  %v4871_v42 = vcvt.s32.f32 %v4359_v1  ;;  %v4079_v47 = vunpack.c.2.s8 %v3839_v16  ;;  %v4087_v37 = vunpack.c.3.s8 %v3839_v16 }
 0x732   :  { %5594 = vmatpush.bf16.msra.mxu1 %v5039_v21  ;;  %v5103_v29 = vpack.c.bf16 %v4743_v53, %v4735_v0  ;;  %v4463_v59 = vcvt.s32.f32 %v3951_v56  ;;  %v4471_v23 = vcvt.s32.f32 %v3959_v54  ;;  %v4207_v43 = vunpack.c.2.s8 %v3871_v31  ;;  %v5379_v1 = vpop.f32.mrf.mxu0 }
 0x733   :  { %v5167_v5 = vpack.c.bf16 %v4871_v42, %v4863_v49  ;;  %v4591_v46 = vcvt.s32.f32 %v4079_v47  ;;  %v4599_v18 = vcvt.s32.f32 %v4087_v37  ;;  %v4215_v38 = vunpack.c.3.s8 %v3871_v31  ;;  %v5392_v21 = vpop.f32.mrf.mxu1 }
 0x734   :  { %5607 = vmatpush.bf16.msrb.mxu2 %v5103_v29  ;;  %v4967_v11 = vpack.c.bf16 %v4471_v23, %v4463_v59  ;;  %v4719_v4 = vcvt.s32.f32 %v4207_v43  ;;  %v4335_v61 = vunpack.c.2.s8 %v3903_v26  ;;  %v4343_v24 = vunpack.c.3.s8 %v3903_v26  ;;  %v5405_v49 = vpop.f32.mrf.mxu2 }
 0x735   :  { %5620 = vmatpush.bf16.msrb.mxu3 %v5167_v5  ;;  %v5031_v32 = vpack.c.bf16 %v4599_v18, %v4591_v46  ;;  %v4727_v6 = vcvt.s32.f32 %v4215_v38  ;;  %v3935_v8 = vunpack.c.0.s8 %v3807_v58  ;;  %v3943_v57 = vunpack.c.1.s8 %v3807_v58  ;;  %v5418_v42 = vpop.f32.mrf.mxu3 }
 0x736   :  { %5582 = vmatpush.bf16.msra.mxu0 %v4967_v11  ;;  %v4847_v9 = vcvt.s32.f32 %v4335_v61  ;;  %v4855_v25 = vcvt.s32.f32 %v4343_v24  ;;  %v4063_v3 = vunpack.c.0.s8 %v3839_v16  ;;  %v4071_v19 = vunpack.c.1.s8 %v3839_v16 }
 0x737   :  { %5595 = vmatpush.bf16.msra.mxu1 %v5031_v32  ;;  %v5095_v20 = vpack.c.bf16 %v4727_v6, %v4719_v4  ;;  %v4447_v34 = vcvt.s32.f32 %v3935_v8  ;;  %v4455_v62 = vcvt.s32.f32 %v3943_v57  ;;  %v4191_v41 = vunpack.c.0.s8 %v3871_v31 }
 0x738   :  { %v5159_v15 = vpack.c.bf16 %v4855_v25, %v4847_v9  ;;  %v4575_v28 = vcvt.s32.f32 %v4063_v3  ;;  %v4583_v55 = vcvt.s32.f32 %v4071_v19  ;;  %v4199_v22 = vunpack.c.1.s8 %v3871_v31 }
 0x739   :  { %5608 = vmatpush.bf16.msrb.mxu2 %v5095_v20  ;;  %v4959_v51 = vpack.c.bf16 %v4455_v62, %v4447_v34  ;;  %v4703_v40 = vcvt.s32.f32 %v4191_v41  ;;  %v4319_v36 = vunpack.c.0.s8 %v3903_v26  ;;  %v4327_v0 = vunpack.c.1.s8 %v3903_v26 }
 0x73a   :  { %5621 = vmatpush.bf16.msrb.mxu3 %v5159_v15  ;;  %v5023_v58 = vpack.c.bf16 %v4583_v55, %v4575_v28  ;;  %v4711_v52 = vcvt.s32.f32 %v4199_v22  ;;  %v5339_v16 = vadd.f32 %v7165_v17, %v7163_v13  ;;  %v5391_v54 = vadd.f32 %v5390_v27, %v5377_v7 }
 0x73b   :  { %5583 = vmatpush.bf16.msra.mxu0 %v4959_v51  ;;  %v4831_v53 = vcvt.s32.f32 %v4319_v36  ;;  %v4839_v56 = vcvt.s32.f32 %v4327_v0  ;;  %v5631_v37 = vperm.slane %v7126_v12, 2  ;;  %v5632_v59 = vperm.slane %v7126_v12, 3 }
 0x73c   :  { %5596 = vmatpush.bf16.msra.mxu1 %v5023_v58  ;;  %v5087_v31 = vpack.c.bf16 %v4711_v52, %v4703_v40  ;;  %v5352_v47 = vadd.f32 %v7168_v45, %v5339_v16  ;;  %v5404_v29 = vadd.f32 %v5403_v14, %v5391_v54  ;;  %v5656_v17 = vperm.slane %v7123_v35, 2 }
 0x73d   :  { %v5151_v26 = vpack.c.bf16 %v4839_v56, %v4831_v53  ;;  %v5657_v43 = vperm.slane %v7123_v35, 3  ;;  %v5633_v11 = vperm.slane %v7126_v12, 4  ;;  %v5658_v4 = vperm.slane %v7123_v35, 4 }
 0x73e   :  { %5609 = vmatpush.bf16.msrb.mxu2 %v5087_v31  ;;  %5584 = vmatmul.bf16.vlgmr.msra.gmra.mxu0 %v7082_v10  ;;  %v5365_v13 = vadd.f32 %v7170_v48, %v5352_v47  ;;  %v5417_v23 = vadd.f32 %v5416_v63, %v5404_v29  ;;  %v5634_v41 = vperm.slane %v7126_v12, 5  ;;  %v5659_v55 = vperm.slane %v7123_v35, 5 }
 0x73f   :  { %5622 = vmatpush.bf16.msrb.mxu3 %v5151_v26  ;;  %5597 = vmatmul.bf16.vlgmr.msra.gmra.mxu1 %v7087_v60  ;;  %v5429_v5 = vpop.f32.mrf.mxu0  ;;  %v5635_v49 = vperm.slane %v7126_v12, 6  ;;  %v5660_v31 = vperm.slane %v7123_v35, 6 }
 0x740   :  { %v5647_v45 = vmul.f32 %v5631_v37, %v5365_v13  ;;  %v5648_v7 = vmul.f32 %v5632_v59, %v5417_v23  ;;  %v5442_v10 = vpop.f32.mrf.mxu1 }
 0x741   :  { %5610 = vmatmul.bf16.vlgmr.msrb.gmra.mxu2 %v7070_v30  ;;  %v5443_v48 = vadd.f32 %v5442_v10, %v5429_v5 }
 0x742   :  { %5623 = vmatmul.bf16.vlgmr.msrb.gmra.mxu3 %v7075_v33  ;;  %v7185_v27 = vadd.f32 %v5656_v17, %v5647_v45  ;;  %v7187_v46 = vadd.f32 %v5657_v43, %v5648_v7 }
 0x744   :  { %v5680_v18 = vmax.f32 %v7185_v27, 0.0  ;;  %v5681_v60 = vmax.f32 %v7187_v46, 0.0 }
 0x747   :  { %v5455_v38 = vpop.f32.mrf.mxu2  ;;  %v5431_v33 = vpop.f32.mrf.mxu0 }
 0x748   :  { %v5456_v14 = vadd.f32 %v5455_v38, %v5443_v48  ;;  %v5468_v63 = vpop.f32.mrf.mxu3  ;;  %v5444_v61 = vpop.f32.mrf.mxu1  ;;  %v5636_v48 = vperm.slane %v7126_v12, 7 }
 0x74a   :  { %v5469_v30 = vadd.f32 %v5468_v63, %v5456_v14  ;;  %v5661_v14 = vperm.slane %v7123_v35, 7 }
 0x74c   :  { %v5649_v24 = vmul.f32 %v5633_v11, %v5469_v30 }
 0x74e   :  { %v7193_v32 = vadd.f32 %v5658_v4, %v5649_v24 }
 0x74f   :  { %v5457_v6 = vpop.f32.mrf.mxu2 }
 0x750   :  { %v5682_v8 = vmax.f32 %v7193_v32, 0.0  ;;  %v5470_v57 = vpop.f32.mrf.mxu3 }
 0x767   :  { %v5481_v9 = vpop.f32.mrf.mxu0 }
 0x768   :  { %v5494_v25 = vpop.f32.mrf.mxu1 }
 0x769   :  { %v5495_v3 = vadd.f32 %v5494_v25, %v5481_v9 }
 0x76f   :  { %v5507_v19 = vpop.f32.mrf.mxu2  ;;  %v5483_v20 = vpop.f32.mrf.mxu0 }
 0x770   :  { %v5508_v34 = vadd.f32 %v5507_v19, %v5495_v3  ;;  %v5520_v62 = vpop.f32.mrf.mxu3  ;;  %v5496_v15 = vpop.f32.mrf.mxu1 }
 0x772   :  { %v5521_v28 = vadd.f32 %v5520_v62, %v5508_v34 }
 0x774   :  { %v5650_v22 = vmul.f32 %v5634_v41, %v5521_v28 }
 0x776   :  { %v7198_v51 = vadd.f32 %v5659_v55, %v5650_v22 }
 0x777   :  { %v5509_v40 = vpop.f32.mrf.mxu2 }
 0x778   :  { %v5683_v36 = vmax.f32 %v7198_v51, 0.0  ;;  %v5522_v0 = vpop.f32.mrf.mxu3 }
 0x791   :  { %v5533_v58 = vpop.f32.mrf.mxu0 }
 0x792   :  { %v5546_v52 = vpop.f32.mrf.mxu1 }
 0x793   :  { %v5547_v16 = vadd.f32 %v5546_v52, %v5533_v58 }
 0x799   :  { %v5535_v1 = vpop.f32.mrf.mxu0 }
 0x79a   :  { %v5559_v21 = vpop.f32.mrf.mxu2  ;;  %v5548_v53 = vpop.f32.mrf.mxu1 }
 0x79b   :  { %v5560_v56 = vadd.f32 %v5559_v21, %v5547_v16  ;;  %v5572_v54 = vpop.f32.mrf.mxu3 }
 0x79d   :  { %v5573_v42 = vadd.f32 %v5572_v54, %v5560_v56 }
 0x79f   :  { %v5651_v47 = vmul.f32 %v5635_v49, %v5573_v42 }
 0x7a1   :  { %v7203_v37 = vadd.f32 %v5660_v31, %v5651_v47 }
 0x7a2   :  { %v5561_v26 = vpop.f32.mrf.mxu2 }
 0x7a3   :  { %v5684_v29 = vmax.f32 %v7203_v37, 0.0  ;;  %v5574_v59 = vpop.f32.mrf.mxu3 }
 0x7bb   :  { %v5585_v13 = vpop.f32.mrf.mxu0 }
 0x7bc   :  { %v5598_v17 = vpop.f32.mrf.mxu1 }
 0x7bd   :  { %v5599_v23 = vadd.f32 %v5598_v17, %v5585_v13 }
 0x7c3   :  { %v5587_v43 = vpop.f32.mrf.mxu0 }
 0x7c4   :  { %v5611_v45 = vpop.f32.mrf.mxu2  ;;  %v5600_v7 = vpop.f32.mrf.mxu1 }
 0x7c5   :  { %v5612_v5 = vadd.f32 %v5611_v45, %v5599_v23  ;;  %v5624_v10 = vpop.f32.mrf.mxu3 }
 0x7c7   :  { %v5625_v38 = vadd.f32 %v5624_v10, %v5612_v5 }
 0x7c9   :  { %v5652_v63 = vmul.f32 %v5636_v48, %v5625_v38 }
 0x7cb   :  { %v7208_v11 = vadd.f32 %v5661_v14, %v5652_v63 }
 0x7cc   :  { %v5613_v30 = vpop.f32.mrf.mxu2 }
 0x7cd   :  { %v5685_v4 = vmax.f32 %v7208_v11, 0.0  ;;  %v5626_v33 = vpop.f32.mrf.mxu3 }
 0x7ce   :  { %6427 = dma.done.wait [#allocation5 + $0x2], 4096 }
 0x7cf   :  { %6428 = vsyncadd [#allocation5 + $0x2], 4294963200  ;;  %v5695_v61 = vld [vmem:[#allocation4 + $0x18] sm:$0xff]  ;;  %v5694_v49 = vld [vmem:[#allocation4 + $0x10] sm:$0xff]  ;;  %s6444_s9 = smov [#allocation14]   ;;  %s6166_s23 = sshll.u32 %s7256_s12, 4  ;;  %s6167_s23 = int_to_ptr.hbm [resolvable:$true] %s6166_s23 }
 0x7d0   :  { %v5699_v24 = vld [vmem:[#allocation4 + $0x38] sm:$0xff]  ;;  %v5738_v57 = vunpack.c.2.s8 %v5695_v61  ;;  %v5739_v9 = vunpack.c.3.s8 %v5695_v61  ;;  %v5736_v16 = vunpack.c.0.s8 %v5695_v61  ;;  %v5737_v1 = vunpack.c.1.s8 %v5695_v61  ;;  %v5698_v43 = vld [vmem:[#allocation4 + $0x30] sm:$0xff]  ;;  %s6164_s10 = sshll.u32 %s6444_s9, 4  ;;  %s6165_s10 = int_to_ptr.vmem [resolvable:$true] %s6164_s10 }
 0x7d1   :  { %v5703_v6 = vld [vmem:[#allocation4 + $0x58] sm:$0xff]  ;;  %v5754_v25 = vunpack.c.2.s8 %v5699_v24  ;;  %v5755_v3 = vunpack.c.3.s8 %v5699_v24  ;;  %v5752_v56 = vunpack.c.0.s8 %v5699_v24  ;;  %v5753_v54 = vunpack.c.1.s8 %v5699_v24  ;;  %v5702_v48 = vld [vmem:[#allocation4 + $0x50] sm:$0xff] }
 0x7d2   :  { %v5707_v12 = vld [vmem:[#allocation4 + $0x78] sm:$0xff]  ;;  %v5770_v19 = vunpack.c.2.s8 %v5703_v6  ;;  %v5771_v20 = vunpack.c.3.s8 %v5703_v6  ;;  %v5866_v62 = vcvt.s32.f32 %v5738_v57  ;;  %v5867_v41 = vcvt.s32.f32 %v5739_v9  ;;  %v5706_v33 = vld [vmem:[#allocation4 + $0x70] sm:$0xff] }
 0x7d3   :  { %v5786_v35 = vunpack.c.2.s8 %v5707_v12  ;;  %v5787_v34 = vunpack.c.3.s8 %v5707_v12  ;;  %v5882_v15 = vcvt.s32.f32 %v5754_v25  ;;  %v5883_v28 = vcvt.s32.f32 %v5755_v3 }
 0x7d4   :  { %v5898_v55 = vcvt.s32.f32 %v5770_v19  ;;  %v5899_v22 = vcvt.s32.f32 %v5771_v20  ;;  %v5987_v58 = vpack.c.bf16 %v5867_v41, %v5866_v62  ;;  %v5864_v42 = vcvt.s32.f32 %v5736_v16 }
 0x7d5   :  { %v5914_v40 = vcvt.s32.f32 %v5786_v35  ;;  %v5915_v0 = vcvt.s32.f32 %v5787_v34  ;;  %v5995_v52 = vpack.c.bf16 %v5883_v28, %v5882_v15  ;;  %v5865_v31 = vcvt.s32.f32 %v5737_v1 }
 0x7d6   :  { %v6003_v21 = vpack.c.bf16 %v5899_v22, %v5898_v55  ;;  %6052 = vmatpush.bf16.msrb.mxu0 %v5987_v58  ;;  %v5768_v47 = vunpack.c.0.s8 %v5703_v6  ;;  %v5769_v26 = vunpack.c.1.s8 %v5703_v6  ;;  %v5880_v59 = vcvt.s32.f32 %v5752_v56 }
 0x7d7   :  { %v6011_v53 = vpack.c.bf16 %v5915_v0, %v5914_v40  ;;  %6065 = vmatpush.bf16.msrb.mxu1 %v5995_v52  ;;  %v5881_v13 = vcvt.s32.f32 %v5753_v54  ;;  %v5784_v17 = vunpack.c.0.s8 %v5707_v12  ;;  %v5785_v23 = vunpack.c.1.s8 %v5707_v12 }
 0x7d8   :  { %6078 = vmatpush.bf16.msra.mxu2 %v6003_v21  ;;  %v5986_v45 = vpack.c.bf16 %v5865_v31, %v5864_v42  ;;  %v5896_v7 = vcvt.s32.f32 %v5768_v47  ;;  %v5897_v5 = vcvt.s32.f32 %v5769_v26  ;;  %v5734_v10 = vunpack.c.2.s8 %v5694_v49  ;;  %v5693_v21 = vld [vmem:[#allocation4 + $0x8] sm:$0xff] }
 0x7d9   :  { %6091 = vmatpush.bf16.msra.mxu3 %v6011_v53  ;;  %v5994_v38 = vpack.c.bf16 %v5881_v13, %v5880_v59  ;;  %v5912_v14 = vcvt.s32.f32 %v5784_v17  ;;  %v5913_v63 = vcvt.s32.f32 %v5785_v23  ;;  %v5735_v30 = vunpack.c.3.s8 %v5694_v49  ;;  %v5697_v13 = vld [vmem:[#allocation4 + $0x28] sm:$0xff] }
 0x7da   :  { %6053 = vmatpush.bf16.msrb.mxu0 %v5986_v45  ;;  %v6002_v61 = vpack.c.bf16 %v5897_v5, %v5896_v7  ;;  %v5862_v24 = vcvt.s32.f32 %v5734_v10  ;;  %v5750_v6 = vunpack.c.2.s8 %v5698_v43  ;;  %v5751_v57 = vunpack.c.3.s8 %v5698_v43  ;;  %v5701_v7 = vld [vmem:[#allocation4 + $0x48] sm:$0xff] }
 0x7db   :  { %6066 = vmatpush.bf16.msrb.mxu1 %v5994_v38  ;;  %v6010_v9 = vpack.c.bf16 %v5913_v63, %v5912_v14  ;;  %v5863_v25 = vcvt.s32.f32 %v5735_v30  ;;  %v5766_v3 = vunpack.c.2.s8 %v5702_v48  ;;  %v5767_v12 = vunpack.c.3.s8 %v5702_v48  ;;  %v5705_v14 = vld [vmem:[#allocation4 + $0x68] sm:$0xff] }
 0x7dc   :  { %6079 = vmatpush.bf16.msra.mxu2 %v6002_v61  ;;  %v5878_v19 = vcvt.s32.f32 %v5750_v6  ;;  %v5879_v20 = vcvt.s32.f32 %v5751_v57  ;;  %v5782_v35 = vunpack.c.2.s8 %v5706_v33  ;;  %v5783_v34 = vunpack.c.3.s8 %v5706_v33 }
 0x7dd   :  { %6092 = vmatpush.bf16.msra.mxu3 %v6010_v9  ;;  %v5985_v62 = vpack.c.bf16 %v5863_v25, %v5862_v24  ;;  %v5894_v41 = vcvt.s32.f32 %v5766_v3  ;;  %v5895_v15 = vcvt.s32.f32 %v5767_v12  ;;  %v5732_v28 = vunpack.c.0.s8 %v5694_v49 }
 0x7de   :  { %v5993_v55 = vpack.c.bf16 %v5879_v20, %v5878_v19  ;;  %v5910_v22 = vcvt.s32.f32 %v5782_v35  ;;  %v5911_v40 = vcvt.s32.f32 %v5783_v34  ;;  %v5733_v0 = vunpack.c.1.s8 %v5694_v49 }
 0x7df   :  { %6054 = vmatpush.bf16.msrb.mxu0 %v5985_v62  ;;  %v6001_v58 = vpack.c.bf16 %v5895_v15, %v5894_v41  ;;  %v5860_v52 = vcvt.s32.f32 %v5732_v28  ;;  %v5748_v16 = vunpack.c.0.s8 %v5698_v43  ;;  %v5749_v1 = vunpack.c.1.s8 %v5698_v43 }
 0x7e0   :  { %6067 = vmatpush.bf16.msrb.mxu1 %v5993_v55  ;;  %v6009_v53 = vpack.c.bf16 %v5911_v40, %v5910_v22  ;;  %v5861_v56 = vcvt.s32.f32 %v5733_v0  ;;  %v5764_v54 = vunpack.c.0.s8 %v5702_v48  ;;  %v5765_v42 = vunpack.c.1.s8 %v5702_v48 }
 0x7e1   :  { %6080 = vmatpush.bf16.msra.mxu2 %v6001_v58  ;;  %v5876_v31 = vcvt.s32.f32 %v5748_v16  ;;  %v5877_v47 = vcvt.s32.f32 %v5749_v1  ;;  %v5780_v26 = vunpack.c.0.s8 %v5706_v33  ;;  %v5781_v59 = vunpack.c.1.s8 %v5706_v33  ;;  %v5692_v58 = vld [vmem:[#allocation4] sm:$0xff] }
 0x7e2   :  { %6093 = vmatpush.bf16.msra.mxu3 %v6009_v53  ;;  %v5984_v17 = vpack.c.bf16 %v5861_v56, %v5860_v52  ;;  %v5892_v49 = vcvt.s32.f32 %v5764_v54  ;;  %v5893_v23 = vcvt.s32.f32 %v5765_v42  ;;  %v5730_v45 = vunpack.c.2.s8 %v5693_v21 }
 0x7e3   :  { %v5992_v5 = vpack.c.bf16 %v5877_v47, %v5876_v31  ;;  %v5908_v43 = vcvt.s32.f32 %v5780_v26  ;;  %v5909_v10 = vcvt.s32.f32 %v5781_v59  ;;  %v5731_v38 = vunpack.c.3.s8 %v5693_v21  ;;  %v5696_v47 = vld [vmem:[#allocation4 + $0x20] sm:$0xff] }
 0x7e4   :  { %6055 = vmatpush.bf16.msrb.mxu0 %v5984_v17  ;;  %v6000_v63 = vpack.c.bf16 %v5893_v23, %v5892_v49  ;;  %v5858_v48 = vcvt.s32.f32 %v5730_v45  ;;  %v5746_v30 = vunpack.c.2.s8 %v5697_v13  ;;  %v5747_v61 = vunpack.c.3.s8 %v5697_v13  ;;  %v5700_v49 = vld [vmem:[#allocation4 + $0x40] sm:$0xff] }
 0x7e5   :  { %6068 = vmatpush.bf16.msrb.mxu1 %v5992_v5  ;;  %v6008_v24 = vpack.c.bf16 %v5909_v10, %v5908_v43  ;;  %v5859_v33 = vcvt.s32.f32 %v5731_v38  ;;  %v5762_v6 = vunpack.c.2.s8 %v5701_v7  ;;  %v5763_v57 = vunpack.c.3.s8 %v5701_v7  ;;  %v5704_v43 = vld [vmem:[#allocation4 + $0x60] sm:$0xff] }
 0x7e6   :  { %6081 = vmatpush.bf16.msra.mxu2 %v6000_v63  ;;  %v5874_v9 = vcvt.s32.f32 %v5746_v30  ;;  %v5875_v25 = vcvt.s32.f32 %v5747_v61  ;;  %v5778_v3 = vunpack.c.2.s8 %v5705_v14  ;;  %v5779_v12 = vunpack.c.3.s8 %v5705_v14 }
 0x7e7   :  { %6094 = vmatpush.bf16.msra.mxu3 %v6008_v24  ;;  %v5983_v19 = vpack.c.bf16 %v5859_v33, %v5858_v48  ;;  %v5890_v20 = vcvt.s32.f32 %v5762_v6  ;;  %v5891_v35 = vcvt.s32.f32 %v5763_v57  ;;  %v5728_v34 = vunpack.c.0.s8 %v5693_v21 }
 0x7e8   :  { %v5991_v62 = vpack.c.bf16 %v5875_v25, %v5874_v9  ;;  %v5906_v41 = vcvt.s32.f32 %v5778_v3  ;;  %v5907_v15 = vcvt.s32.f32 %v5779_v12  ;;  %v5729_v28 = vunpack.c.1.s8 %v5693_v21 }
 0x7e9   :  { %6056 = vmatpush.bf16.msrb.mxu0 %v5983_v19  ;;  %v5999_v55 = vpack.c.bf16 %v5891_v35, %v5890_v20  ;;  %v5856_v22 = vcvt.s32.f32 %v5728_v34  ;;  %v5744_v40 = vunpack.c.0.s8 %v5697_v13  ;;  %v5745_v0 = vunpack.c.1.s8 %v5697_v13 }
 0x7ea   :  { %6069 = vmatpush.bf16.msrb.mxu1 %v5991_v62  ;;  %v6007_v52 = vpack.c.bf16 %v5907_v15, %v5906_v41  ;;  %v5857_v16 = vcvt.s32.f32 %v5729_v28  ;;  %v5760_v1 = vunpack.c.0.s8 %v5701_v7  ;;  %v5761_v53 = vunpack.c.1.s8 %v5701_v7 }
 0x7eb   :  { %6082 = vmatpush.bf16.msra.mxu2 %v5999_v55  ;;  %v5872_v56 = vcvt.s32.f32 %v5744_v40  ;;  %v5873_v54 = vcvt.s32.f32 %v5745_v0  ;;  %v5776_v42 = vunpack.c.0.s8 %v5705_v14  ;;  %v5777_v31 = vunpack.c.1.s8 %v5705_v14  ;;  %v5711_v55 = vld [vmem:[#allocation4 + $0x98] sm:$0xff] }
 0x7ec   :  { %6095 = vmatpush.bf16.msra.mxu3 %v6007_v52  ;;  %v5982_v26 = vpack.c.bf16 %v5857_v16, %v5856_v22  ;;  %v5888_v21 = vcvt.s32.f32 %v5760_v1  ;;  %v5889_v59 = vcvt.s32.f32 %v5761_v53  ;;  %v5726_v17 = vunpack.c.2.s8 %v5692_v58 }
 0x7ed   :  { %v5990_v23 = vpack.c.bf16 %v5873_v54, %v5872_v56  ;;  %v5904_v13 = vcvt.s32.f32 %v5776_v42  ;;  %v5905_v45 = vcvt.s32.f32 %v5777_v31  ;;  %v5727_v5 = vunpack.c.3.s8 %v5692_v58  ;;  %v5715_v54 = vld [vmem:[#allocation4 + $0xb8] sm:$0xff] }
 0x7ee   :  { %6057 = vmatpush.bf16.msrb.mxu0 %v5982_v26  ;;  %v5998_v10 = vpack.c.bf16 %v5889_v59, %v5888_v21  ;;  %v5854_v7 = vcvt.s32.f32 %v5726_v17  ;;  %v5742_v38 = vunpack.c.2.s8 %v5696_v47  ;;  %v5743_v63 = vunpack.c.3.s8 %v5696_v47  ;;  %v5719_v21 = vld [vmem:[#allocation4 + $0xd8] sm:$0xff] }
 0x7ef   :  { %6070 = vmatpush.bf16.msrb.mxu1 %v5990_v23  ;;  %v6006_v48 = vpack.c.bf16 %v5905_v45, %v5904_v13  ;;  %v5855_v14 = vcvt.s32.f32 %v5727_v5  ;;  %v5758_v30 = vunpack.c.2.s8 %v5700_v49  ;;  %v5759_v61 = vunpack.c.3.s8 %v5700_v49  ;;  %v5723_v13 = vld [vmem:[#allocation4 + $0xf8] sm:$0xff] }
 0x7f0   :  { %6083 = vmatpush.bf16.msra.mxu2 %v5998_v10  ;;  %v5870_v24 = vcvt.s32.f32 %v5742_v38  ;;  %v5871_v33 = vcvt.s32.f32 %v5743_v63  ;;  %v5774_v6 = vunpack.c.2.s8 %v5704_v43  ;;  %v5775_v57 = vunpack.c.3.s8 %v5704_v43 }
 0x7f1   :  { %6096 = vmatpush.bf16.msra.mxu3 %v6006_v48  ;;  %v5981_v9 = vpack.c.bf16 %v5855_v14, %v5854_v7  ;;  %v5886_v25 = vcvt.s32.f32 %v5758_v30  ;;  %v5887_v3 = vcvt.s32.f32 %v5759_v61  ;;  %v5724_v12 = vunpack.c.0.s8 %v5692_v58 }
 0x7f2   :  { %v5989_v19 = vpack.c.bf16 %v5871_v33, %v5870_v24  ;;  %v5902_v20 = vcvt.s32.f32 %v5774_v6  ;;  %v5903_v35 = vcvt.s32.f32 %v5775_v57  ;;  %v5725_v34 = vunpack.c.1.s8 %v5692_v58 }
 0x7f3   :  { %6058 = vmatpush.bf16.msrb.mxu0 %v5981_v9  ;;  %v5997_v62 = vpack.c.bf16 %v5887_v3, %v5886_v25  ;;  %v5852_v41 = vcvt.s32.f32 %v5724_v12  ;;  %v5740_v15 = vunpack.c.0.s8 %v5696_v47  ;;  %v5741_v28 = vunpack.c.1.s8 %v5696_v47 }
 0x7f4   :  { %6071 = vmatpush.bf16.msrb.mxu1 %v5989_v19  ;;  %v6005_v22 = vpack.c.bf16 %v5903_v35, %v5902_v20  ;;  %v5853_v40 = vcvt.s32.f32 %v5725_v34  ;;  %v5756_v0 = vunpack.c.0.s8 %v5700_v49  ;;  %v5757_v52 = vunpack.c.1.s8 %v5700_v49 }
 0x7f5   :  { %6084 = vmatpush.bf16.msra.mxu2 %v5997_v62  ;;  %v5868_v16 = vcvt.s32.f32 %v5740_v15  ;;  %v5869_v1 = vcvt.s32.f32 %v5741_v28  ;;  %v5772_v53 = vunpack.c.0.s8 %v5704_v43  ;;  %v5773_v56 = vunpack.c.1.s8 %v5704_v43 }
 0x7f6   :  { %6097 = vmatpush.bf16.msra.mxu3 %v6005_v22  ;;  %v5980_v42 = vpack.c.bf16 %v5853_v40, %v5852_v41  ;;  %v5884_v58 = vcvt.s32.f32 %v5756_v0  ;;  %v5885_v31 = vcvt.s32.f32 %v5757_v52  ;;  %v5802_v26 = vunpack.c.2.s8 %v5711_v55  ;;  %v7211_v22 = vld [vmem:[#allocation4 + $0x90] sm:$0xff] }
 0x7f7   :  { %v5988_v59 = vpack.c.bf16 %v5869_v1, %v5868_v16  ;;  %v5900_v47 = vcvt.s32.f32 %v5772_v53  ;;  %v5901_v17 = vcvt.s32.f32 %v5773_v56  ;;  %v5803_v23 = vunpack.c.3.s8 %v5711_v55  ;;  %v5714_v1 = vld [vmem:[#allocation4 + $0xb0] sm:$0xff] }
 0x7f8   :  { %6059 = vmatpush.bf16.msrb.mxu0 %v5980_v42  ;;  %v5996_v45 = vpack.c.bf16 %v5885_v31, %v5884_v58  ;;  %v5930_v49 = vcvt.s32.f32 %v5802_v26  ;;  %v5818_v5 = vunpack.c.2.s8 %v5715_v54  ;;  %v5819_v10 = vunpack.c.3.s8 %v5715_v54  ;;  %v5718_v42 = vld [vmem:[#allocation4 + $0xd0] sm:$0xff] }
 0x7f9   :  { %6072 = vmatpush.bf16.msrb.mxu1 %v5988_v59  ;;  %v6004_v7 = vpack.c.bf16 %v5901_v17, %v5900_v47  ;;  %v5931_v43 = vcvt.s32.f32 %v5803_v23  ;;  %v5834_v38 = vunpack.c.2.s8 %v5719_v21  ;;  %v5835_v63 = vunpack.c.3.s8 %v5719_v21  ;;  %v5722_v59 = vld [vmem:[#allocation4 + $0xf0] sm:$0xff] }
 0x7fa   :  { %6085 = vmatpush.bf16.msra.mxu2 %v5996_v45  ;;  %v5946_v48 = vcvt.s32.f32 %v5818_v5  ;;  %v5947_v14 = vcvt.s32.f32 %v5819_v10  ;;  %v5850_v30 = vunpack.c.2.s8 %v5723_v13  ;;  %v5851_v61 = vunpack.c.3.s8 %v5723_v13 }
 0x7fb   :  { %6098 = vmatpush.bf16.msra.mxu3 %v6004_v7  ;;  %v6019_v24 = vpack.c.bf16 %v5931_v43, %v5930_v49  ;;  %v5962_v33 = vcvt.s32.f32 %v5834_v38  ;;  %v5963_v6 = vcvt.s32.f32 %v5835_v63  ;;  %v5800_v57 = vunpack.c.0.s8 %v5711_v55 }
 0x7fc   :  { %v6027_v9 = vpack.c.bf16 %v5947_v14, %v5946_v48  ;;  %v5978_v25 = vcvt.s32.f32 %v5850_v30  ;;  %v5979_v3 = vcvt.s32.f32 %v5851_v61  ;;  %v5801_v12 = vunpack.c.1.s8 %v5711_v55 }
 0x7fd   :  { %6104 = vmatpush.bf16.msra.mxu0 %v6019_v24  ;;  %v6035_v19 = vpack.c.bf16 %v5963_v6, %v5962_v33  ;;  %v5928_v20 = vcvt.s32.f32 %v5800_v57  ;;  %v5816_v35 = vunpack.c.0.s8 %v5715_v54  ;;  %v5817_v34 = vunpack.c.1.s8 %v5715_v54 }
 0x7fe   :  { %6117 = vmatpush.bf16.msra.mxu1 %v6027_v9  ;;  %v6043_v62 = vpack.c.bf16 %v5979_v3, %v5978_v25  ;;  %v5929_v41 = vcvt.s32.f32 %v5801_v12  ;;  %v5832_v15 = vunpack.c.0.s8 %v5719_v21  ;;  %v5833_v28 = vunpack.c.1.s8 %v5719_v21 }
 0x7ff   :  { %6130 = vmatpush.bf16.msrb.mxu2 %v6035_v19  ;;  %v5944_v40 = vcvt.s32.f32 %v5816_v35  ;;  %v5945_v0 = vcvt.s32.f32 %v5817_v34  ;;  %v5848_v52 = vunpack.c.0.s8 %v5723_v13  ;;  %v5849_v16 = vunpack.c.1.s8 %v5723_v13  ;;  %v5709_v19 = vld [vmem:[#allocation4 + $0x88] sm:$0xff] }
 0x800   :  { %6143 = vmatpush.bf16.msrb.mxu3 %v6043_v62  ;;  %v6018_v55 = vpack.c.bf16 %v5929_v41, %v5928_v20  ;;  %v5960_v53 = vcvt.s32.f32 %v5832_v15  ;;  %v5961_v56 = vcvt.s32.f32 %v5833_v28  ;;  %v6046_v54 = vpack.c.bf16 %v5680_v18, %v5680_v18  ;;  %v5713_v34 = vld [vmem:[#allocation4 + $0xa8] sm:$0xff] }
 0x801   :  { %v6026_v58 = vpack.c.bf16 %v5945_v0, %v5944_v40  ;;  %v5976_v31 = vcvt.s32.f32 %v5848_v52  ;;  %v5977_v26 = vcvt.s32.f32 %v5849_v16  ;;  %v5798_v21 = vunpack.c.2.s8 %v7211_v22  ;;  %v5717_v0 = vld [vmem:[#allocation4 + $0xc8] sm:$0xff] }
 0x802   :  { %6105 = vmatpush.bf16.msra.mxu0 %v6018_v55  ;;  %v6034_v47 = vpack.c.bf16 %v5961_v56, %v5960_v53  ;;  %6086 = vmatmul.bf16.vlgmr.msra.gmra.mxu2 %v6046_v54  ;;  %v5799_v17 = vunpack.c.3.s8 %v7211_v22  ;;  %v5814_v23 = vunpack.c.2.s8 %v5714_v1  ;;  %v5815_v13 = vunpack.c.3.s8 %v5714_v1  ;;  %v5721_v53 = vld [vmem:[#allocation4 + $0xe8] sm:$0xff] }
 0x803   :  { %6118 = vmatpush.bf16.msra.mxu1 %v6026_v58  ;;  %v6042_v45 = vpack.c.bf16 %v5977_v26, %v5976_v31  ;;  %v5926_v49 = vcvt.s32.f32 %v5798_v21  ;;  %v5830_v27 = vunpack.c.2.s8 %v5718_v42  ;;  %v5831_v5 = vunpack.c.3.s8 %v5718_v42 }
 0x804   :  { %6131 = vmatpush.bf16.msrb.mxu2 %v6034_v47  ;;  %v5927_v18 = vcvt.s32.f32 %v5799_v17  ;;  %v5942_v10 = vcvt.s32.f32 %v5814_v23  ;;  %v5943_v7 = vcvt.s32.f32 %v5815_v13  ;;  %v5846_v43 = vunpack.c.2.s8 %v5722_v59 }
 0x805   :  { %6144 = vmatpush.bf16.msrb.mxu3 %v6042_v45  ;;  %v5958_v38 = vcvt.s32.f32 %v5830_v27  ;;  %v5959_v63 = vcvt.s32.f32 %v5831_v5  ;;  %v5847_v48 = vunpack.c.3.s8 %v5722_v59  ;;  %v6044_v14 = vpack.c.bf16 %v5678_v2, %v5678_v2 }
 0x806   :  { %v6017_v30 = vpack.c.bf16 %v5927_v18, %v5926_v49  ;;  %v6025_v61 = vpack.c.bf16 %v5943_v7, %v5942_v10  ;;  %v5974_v24 = vcvt.s32.f32 %v5846_v43  ;;  %v6047_v33 = vpack.c.bf16 %v5681_v60, %v5681_v60 }
 0x807   :  { %v6033_v6 = vpack.c.bf16 %v5959_v63, %v5958_v38  ;;  %v5975_v57 = vcvt.s32.f32 %v5847_v48  ;;  %6060 = vmatmul.bf16.vlgmr.msrb.gmra.mxu0 %v6044_v14  ;;  %v6045_v9 = vpack.c.bf16 %v5679_v39, %v5679_v39  ;;  %v5796_v25 = vunpack.c.0.s8 %v7211_v22 }
 0x808   :  { %6106 = vmatpush.bf16.msra.mxu0 %v6017_v30  ;;  %6119 = vmatpush.bf16.msra.mxu1 %v6025_v61  ;;  %v5797_v44 = vunpack.c.1.s8 %v7211_v22  ;;  %v5812_v2 = vunpack.c.0.s8 %v5714_v1  ;;  %v5813_v3 = vunpack.c.1.s8 %v5714_v1  ;;  %v5828_v12 = vunpack.c.0.s8 %v5718_v42  ;;  %v5708_v30 = vld [vmem:[#allocation4 + $0x80] sm:$0xff] }
 0x809   :  { %6132 = vmatpush.bf16.msrb.mxu2 %v6033_v6  ;;  %v6041_v46 = vpack.c.bf16 %v5975_v57, %v5974_v24  ;;  %6099 = vmatmul.bf16.vlgmr.msra.gmra.mxu3 %v6047_v33  ;;  %v5924_v60 = vcvt.s32.f32 %v5796_v25  ;;  %v5829_v20 = vunpack.c.1.s8 %v5718_v42  ;;  %v5844_v35 = vunpack.c.0.s8 %v5722_v59 }
 0x80a   :  { %6073 = vmatmul.bf16.vlgmr.msrb.gmra.mxu1 %v6045_v9  ;;  %v5925_v50 = vcvt.s32.f32 %v5797_v44  ;;  %v5940_v39 = vcvt.s32.f32 %v5812_v2  ;;  %v5941_v62 = vcvt.s32.f32 %v5813_v3  ;;  %v5956_v41 = vcvt.s32.f32 %v5828_v12  ;;  %v5712_v2 = vld [vmem:[#allocation4 + $0xa0] sm:$0xff] }
 0x80b   :  { %6145 = vmatpush.bf16.msrb.mxu3 %v6041_v46  ;;  %v5957_v15 = vcvt.s32.f32 %v5829_v20  ;;  %v5845_v28 = vunpack.c.1.s8 %v5722_v59  ;;  %v5972_v22 = vcvt.s32.f32 %v5844_v35  ;;  %v5794_v40 = vunpack.c.2.s8 %v5709_v19 }
 0x80c   :  { %v6016_v52 = vpack.c.bf16 %v5925_v50, %v5924_v60  ;;  %v6024_v16 = vpack.c.bf16 %v5941_v62, %v5940_v39  ;;  %v5795_v1 = vunpack.c.3.s8 %v5709_v19  ;;  %v5810_v55 = vunpack.c.2.s8 %v5713_v34  ;;  %v5716_v60 = vld [vmem:[#allocation4 + $0xc0] sm:$0xff] }
 0x80d   :  { %v6032_v56 = vpack.c.bf16 %v5957_v15, %v5956_v41  ;;  %v5973_v54 = vcvt.s32.f32 %v5845_v28  ;;  %v5922_v42 = vcvt.s32.f32 %v5794_v40  ;;  %v5811_v58 = vunpack.c.3.s8 %v5713_v34  ;;  %v5720_v39 = vld [vmem:[#allocation4 + $0xe0] sm:$0xff] }
 0x80e   :  { %6107 = vmatpush.bf16.msra.mxu0 %v6016_v52  ;;  %6120 = vmatpush.bf16.msra.mxu1 %v6024_v16  ;;  %v5923_v31 = vcvt.s32.f32 %v5795_v1  ;;  %v5938_v26 = vcvt.s32.f32 %v5810_v55  ;;  %v5826_v21 = vunpack.c.2.s8 %v5717_v0  ;;  %v5827_v47 = vunpack.c.3.s8 %v5717_v0 }
 0x80f   :  { %6133 = vmatpush.bf16.msrb.mxu2 %v6032_v56  ;;  %v6040_v59 = vpack.c.bf16 %v5973_v54, %v5972_v22  ;;  %v5939_v17 = vcvt.s32.f32 %v5811_v58  ;;  %v5842_v23 = vunpack.c.2.s8 %v5721_v53  ;;  %v5843_v13 = vunpack.c.3.s8 %v5721_v53 }
 0x810   :  { %v6015_v45 = vpack.c.bf16 %v5923_v31, %v5922_v42  ;;  %v5954_v49 = vcvt.s32.f32 %v5826_v21  ;;  %v5955_v27 = vcvt.s32.f32 %v5827_v47  ;;  %v5792_v5 = vunpack.c.0.s8 %v5709_v19 }
 0x811   :  { %6146 = vmatpush.bf16.msrb.mxu3 %v6040_v59  ;;  %v6023_v18 = vpack.c.bf16 %v5939_v17, %v5938_v26  ;;  %v5970_v10 = vcvt.s32.f32 %v5842_v23  ;;  %v5971_v7 = vcvt.s32.f32 %v5843_v13  ;;  %v5793_v43 = vunpack.c.1.s8 %v5709_v19 }
 0x812   :  { %6108 = vmatpush.bf16.msra.mxu0 %v6015_v45  ;;  %v6031_v38 = vpack.c.bf16 %v5955_v27, %v5954_v49  ;;  %v5920_v63 = vcvt.s32.f32 %v5792_v5  ;;  %v5808_v48 = vunpack.c.0.s8 %v5713_v34  ;;  %v5809_v14 = vunpack.c.1.s8 %v5713_v34 }
 0x813   :  { %6121 = vmatpush.bf16.msra.mxu1 %v6023_v18  ;;  %v6039_v61 = vpack.c.bf16 %v5971_v7, %v5970_v10  ;;  %v5921_v24 = vcvt.s32.f32 %v5793_v43  ;;  %v5824_v33 = vunpack.c.0.s8 %v5717_v0  ;;  %v5825_v6 = vunpack.c.1.s8 %v5717_v0 }
 0x814   :  { %6134 = vmatpush.bf16.msrb.mxu2 %v6031_v38  ;;  %v5936_v57 = vcvt.s32.f32 %v5808_v48  ;;  %v5937_v9 = vcvt.s32.f32 %v5809_v14  ;;  %v5840_v25 = vunpack.c.0.s8 %v5721_v53  ;;  %v5841_v44 = vunpack.c.1.s8 %v5721_v53 }
 0x815   :  { %6147 = vmatpush.bf16.msrb.mxu3 %v6039_v61  ;;  %v6014_v3 = vpack.c.bf16 %v5921_v24, %v5920_v63  ;;  %v5952_v12 = vcvt.s32.f32 %v5824_v33  ;;  %v5953_v19 = vcvt.s32.f32 %v5825_v6  ;;  %v5790_v46 = vunpack.c.2.s8 %v5708_v30 }
 0x816   :  { %v6022_v20 = vpack.c.bf16 %v5937_v9, %v5936_v57  ;;  %v5968_v35 = vcvt.s32.f32 %v5840_v25  ;;  %v5969_v34 = vcvt.s32.f32 %v5841_v44  ;;  %v5791_v50 = vunpack.c.3.s8 %v5708_v30 }
 0x817   :  { %6109 = vmatpush.bf16.msra.mxu0 %v6014_v3  ;;  %v6030_v62 = vpack.c.bf16 %v5953_v19, %v5952_v12  ;;  %v5918_v41 = vcvt.s32.f32 %v5790_v46  ;;  %v5806_v15 = vunpack.c.2.s8 %v5712_v2  ;;  %v5807_v28 = vunpack.c.3.s8 %v5712_v2 }
 0x818   :  { %6122 = vmatpush.bf16.msra.mxu1 %v6022_v20  ;;  %v6038_v22 = vpack.c.bf16 %v5969_v34, %v5968_v35  ;;  %v5919_v40 = vcvt.s32.f32 %v5791_v50  ;;  %v5822_v0 = vunpack.c.2.s8 %v5716_v60  ;;  %v5823_v52 = vunpack.c.3.s8 %v5716_v60 }
 0x819   :  { %6135 = vmatpush.bf16.msrb.mxu2 %v6030_v62  ;;  %v5934_v16 = vcvt.s32.f32 %v5806_v15  ;;  %v5935_v1 = vcvt.s32.f32 %v5807_v28  ;;  %v5838_v55 = vunpack.c.2.s8 %v5720_v39  ;;  %v5839_v53 = vunpack.c.3.s8 %v5720_v39  ;;  %v5691_v62 = vld [vmem:[#allocation12 + $0x83] ss:$0 sm:$0xff]  ;;  %v5690_v15 = vld [vmem:[#allocation12 + $0x41] ss:$0 sm:$0xff] }
 0x81a   :  { %6148 = vmatpush.bf16.msrb.mxu3 %v6038_v22  ;;  %v6013_v56 = vpack.c.bf16 %v5919_v40, %v5918_v41  ;;  %v5950_v54 = vcvt.s32.f32 %v5822_v0  ;;  %v5951_v42 = vcvt.s32.f32 %v5823_v52  ;;  %v5788_v58 = vunpack.c.0.s8 %v5708_v30 }
 0x81b   :  { %v6021_v31 = vpack.c.bf16 %v5935_v1, %v5934_v16  ;;  %v5966_v26 = vcvt.s32.f32 %v5838_v55  ;;  %v5967_v21 = vcvt.s32.f32 %v5839_v53  ;;  %v5789_v47 = vunpack.c.1.s8 %v5708_v30 }
 0x81c   :  { %6110 = vmatpush.bf16.msra.mxu0 %v6013_v56  ;;  %v6029_v59 = vpack.c.bf16 %v5951_v42, %v5950_v54  ;;  %v5916_v17 = vcvt.s32.f32 %v5788_v58  ;;  %v5804_v23 = vunpack.c.0.s8 %v5712_v2  ;;  %v5805_v13 = vunpack.c.1.s8 %v5712_v2 }
 0x81d   :  { %6123 = vmatpush.bf16.msra.mxu1 %v6021_v31  ;;  %v6037_v45 = vpack.c.bf16 %v5967_v21, %v5966_v26  ;;  %v5917_v49 = vcvt.s32.f32 %v5789_v47  ;;  %v5820_v27 = vunpack.c.0.s8 %v5716_v60  ;;  %v5821_v5 = vunpack.c.1.s8 %v5716_v60 }
 0x81e   :  { %6136 = vmatpush.bf16.msrb.mxu2 %v6029_v59  ;;  %v5932_v18 = vcvt.s32.f32 %v5804_v23  ;;  %v5933_v10 = vcvt.s32.f32 %v5805_v13  ;;  %v5836_v7 = vunpack.c.0.s8 %v5720_v39  ;;  %v5837_v43 = vunpack.c.1.s8 %v5720_v39 }
 0x81f   :  { %6149 = vmatpush.bf16.msrb.mxu3 %v6037_v45  ;;  %v6012_v38 = vpack.c.bf16 %v5917_v49, %v5916_v17  ;;  %v5948_v63 = vcvt.s32.f32 %v5820_v27  ;;  %v5949_v48 = vcvt.s32.f32 %v5821_v5  ;;  %v6048_v24 = vpack.c.bf16 %v5682_v8, %v5682_v8 }
 0x820   :  { %v6020_v14 = vpack.c.bf16 %v5933_v10, %v5932_v18  ;;  %v5964_v30 = vcvt.s32.f32 %v5836_v7  ;;  %v5965_v61 = vcvt.s32.f32 %v5837_v43  ;;  %v6049_v6 = vpack.c.bf16 %v5683_v36, %v5683_v36 }
 0x821   :  { %6111 = vmatpush.bf16.msra.mxu0 %v6012_v38  ;;  %v6028_v33 = vpack.c.bf16 %v5949_v48, %v5948_v63  ;;  %v6050_v9 = vpack.c.bf16 %v5684_v29, %v5684_v29  ;;  %v6051_v25 = vpack.c.bf16 %v5685_v4, %v5685_v4 }
 0x822   :  { %6124 = vmatpush.bf16.msra.mxu1 %v6020_v14  ;;  %v6036_v57 = vpack.c.bf16 %v5965_v61, %v5964_v30 }
 0x823   :  { %6137 = vmatpush.bf16.msrb.mxu2 %v6028_v33 }
 0x824   :  { %6150 = vmatpush.bf16.msrb.mxu3 %v6036_v57  ;;  %6112 = vmatmul.bf16.vlgmr.msra.gmra.mxu0 %v6048_v24 }
 0x825   :  { %6125 = vmatmul.bf16.vlgmr.msra.gmra.mxu1 %v6049_v6 }
 0x826   :  { %6138 = vmatmul.bf16.vlgmr.msrb.gmra.mxu2 %v6050_v9 }
 0x827   :  { %6151 = vmatmul.bf16.vlgmr.msrb.gmra.mxu3 %v6051_v25 }
 0x884   :  { %v6061_v32 = vpop.f32.mrf.mxu0 }
 0x885   :  { %v6087_v8 = vpop.f32.mrf.mxu2 }
 0x887   :  { %v6074_v51 = vpop.f32.mrf.mxu1 }
 0x888   :  { %v6075_v12 = vadd.f32 %v6074_v51, %v6061_v32 }
 0x88a   :  { %v6088_v29 = vadd.f32 %v6087_v8, %v6075_v12 }
 0x88c   :  { %v6100_v36 = vpop.f32.mrf.mxu3  ;;  %v6063_v44 = vpop.f32.mrf.mxu0 }
 0x88d   :  { %v6089_v2 = vpop.f32.mrf.mxu2  ;;  %v6101_v46 = vadd.f32 %v6100_v36, %v6088_v29 }
 0x88f   :  { %v6076_v3 = vpop.f32.mrf.mxu1 }
 0x894   :  { %v6102_v37 = vpop.f32.mrf.mxu3 }
 0x8a1   :  { %v6113_v19 = vpop.f32.mrf.mxu0 }
 0x8a2   :  { %v6126_v11 = vpop.f32.mrf.mxu1  ;;  %v6114_v60 = vadd.f32 %v6113_v19, %v6101_v46 }
 0x8a4   :  { %v6127_v4 = vadd.f32 %v6126_v11, %v6114_v60 }
 0x8a9   :  { %v6139_v20 = vpop.f32.mrf.mxu2  ;;  %v6115_v35 = vpop.f32.mrf.mxu0 }
 0x8aa   :  { %v6140_v34 = vadd.f32 %v6139_v20, %v6127_v4  ;;  %v6152_v50 = vpop.f32.mrf.mxu3  ;;  %v6128_v39 = vpop.f32.mrf.mxu1 }
 0x8ac   :  { %v6153_v41 = vadd.f32 %v6152_v50, %v6140_v34 }
 0x8ae   :  { %v6156_v28 = vmul.f32 %v6153_v41, %v5691_v62 }
 0x8b0   :  { %v6157_v22 = vadd.f32 %v6156_v28, %v5690_v15 }
 0x8b1   :  { %v6141_v40 = vpop.f32.mrf.mxu2 }
 0x8b2   :  { %6158 = vst [vmem:[#allocation14] sm:$0xff] %v6157_v22  ;;  %v6154_v0 = vpop.f32.mrf.mxu3 }
 0x8b3   :  { %6169 = dma.vmem_to_hbm [thread:$0]  %s6165_s10, 128, %s6167_s23, [#allocation8]  }
 0x8b4   :  { %6429 = dma.done.wait [#allocation8], 128  }
 0x8b5   :  { %6430 = vsyncadd [#allocation8], 4294967168 }
 0x8b6   :  { %6178 = vsyncpa [#allocation7], 1 }
 0x8b7   :  { %6179 = vsyncpa [#allocation10], 1 }
 0x8b8   :  { %6180 = vsyncpa [#allocation13], 1 }
 0x8b9   :  { %6181 = vsyncpa [#allocation8], 1 }
 0x8ba   :  { %6182 = vsyncmov [#allocation5] }
 0x8bd   :  { %s6183_s5 = vpop.sfrf %6182 }
 0x8be   :  { %p6207_p0 = scmp.ne.s32.totalorder %s6183_s5, 0 }
 0x8c0   :  { %6187 = shalt.err (%p6207_p0)  }
 0x8c1   :  { %6189 = vsyncmov [#allocation5 + $0x1] }
 0x8c4   :  { %s6190_s12 = vpop.sfrf %6189 }
 0x8c5   :  { %p6208_p1 = scmp.ne.s32.totalorder %s6190_s12, 0 }
 0x8c7   :  { %6194 = shalt.err (%p6208_p1)  }
 0x8c8   :  { %6196 = vsyncmov [#allocation5 + $0x2] }
 0x8cb   :  { %s6197_s24 = vpop.sfrf %6196 }
 0x8cc   :  { %p6209_p2 = scmp.ne.s32.totalorder %s6197_s24, 0 }
 0x8ce   :  { %6201 = shalt.err (%p6209_p2)  }

</bundles_post_ra>
